<compile_context>
chip_gen: v7x
topology: tpu7x:2x2x1
jax: 0.10.0
libtpu: 0.0.40
codegen_flags: <defaults>
</compile_context>

<pallas_src>
import jax
import jax.numpy as jnp
import numpy as np
from jax import lax
from jax.experimental import pallas as pl
from jax.experimental.pallas import tpu as pltpu

BN_EPS = 1e-5


def _pick_tile(n):
    # largest lane-aligned tile (multiple of 128) that divides n
    for cand in (1408, 1024, 512, 384, 256, 128):
        if n % cand == 0:
            return cand
    return n  # full axis fallback (always legal)


def _round_up(n, m=128):
    return ((n + m - 1) // m) * m


def _make_kernel(dims, offs, tn6, ntiles):
    """dims: per-layer output widths [512, 256, dim, 256, 512, 4224].
    offs: lane-aligned column offset of each layer's gamma/beta inside the
    packed (1, P) BN-parameter arrays."""

    def kernel(x_ref, w1_ref, w2_ref, w3_ref, w4_ref, w5_ref, w6_hbm,
               g_ref, b_ref, a_ref, enc_ref, dec_ref, w6_buf, sems):
        # ---- kick off the whole 512->4224 weight stream immediately --------
        copies = []
        for t in range(ntiles):
            cp = pltpu.make_async_copy(
                w6_hbm.at[:, pl.ds(t * tn6, tn6)], w6_buf.at[t], sems.at[t])
            cp.start()
            copies.append(cp)

        def bn(y, off, n):
            # Training-mode BatchNorm1d, two-pass batch statistics (f32).
            g = g_ref[:, off:off + n]
            b = b_ref[:, off:off + n]
            mean = jnp.mean(y, axis=0, keepdims=True)
            d = y - mean
            var = jnp.mean(d * d, axis=0, keepdims=True)
            return d * lax.rsqrt(var + BN_EPS) * g + b

        def mm(h_bf16, w_ref):
            # bf16 x bf16 MXU matmul with f32 accumulation.  Linear bias is
            # omitted: the BN mean subtraction above cancels it exactly.
            return jnp.dot(h_bf16, w_ref[...], preferred_element_type=jnp.float32)

        def prelu(y, a):
            return jnp.where(y > 0, y, a * y)

        # ---- encoder: 3 x (Linear -> BN -> Sigmoid) -------------------------
        h = jax.nn.sigmoid(bn(mm(x_ref[...], w1_ref), offs[0], dims[0])).astype(jnp.bfloat16)
        h = jax.nn.sigmoid(bn(mm(h, w2_ref), offs[1], dims[1])).astype(jnp.bfloat16)
        enc = jax.nn.sigmoid(bn(mm(h, w3_ref), offs[2], dims[2]))
        enc_ref[...] = enc.astype(enc_ref.dtype)

        # ---- decoder layers 4-5: (Linear -> BN -> PReLU) --------------------
        h = prelu(bn(mm(enc.astype(jnp.bfloat16), w4_ref), offs[3], dims[3]),
                  a_ref[0]).astype(jnp.bfloat16)
        h5 = prelu(bn(mm(h, w5_ref), offs[4], dims[4]),
                   a_ref[1]).astype(jnp.bfloat16)

        # ---- decoder layer 6 (512 -> 4224): tile-by-tile as weights land ----
        # Per-feature BN stats only need this tile's columns -> N-tiling exact.
        for t in range(ntiles):
            copies[t].wait()
            y = mm(h5, w6_buf.at[t])
            y = bn(y, offs[5] + t * tn6, tn6)
            dec_ref[:, t * tn6:(t + 1) * tn6] = prelu(y, a_ref[2]).astype(dec_ref.dtype)

    return kernel


def fused_autoencoder(x, weights, gammas, betas, alphas):
    """x: (B, 4224) f32.  weights: 6 bf16 (K_i, N_i) arrays (in x out layout).
    gammas/betas: 6 f32 (N_i,) or (1, N_i) BN params.  alphas: 3 PReLU scalars."""
    B = x.shape[0]
    dims = [int(w.shape[1]) for w in weights]      # [512, 256, dim, 256, 512, 4224]
    dim, n6 = dims[2], dims[5]
    k6 = int(weights[5].shape[0])
    tn6 = _pick_tile(n6)
    ntiles = n6 // tn6

    # Consolidate all BN params into two resident (1, P) arrays; each layer's
    # block starts at a lane-aligned (multiple-of-128) offset.
    offs, p = [], 0
    for n in dims:
        offs.append(p)
        p += _round_up(n)
    g_cols, b_cols = [], []
    for n, g, b in zip(dims, gammas, betas):
        pad = _round_up(n) - n
        g = jnp.asarray(g, jnp.float32).reshape(1, n)
        b = jnp.asarray(b, jnp.float32).reshape(1, n)
        if pad:
            g = jnp.pad(g, ((0, 0), (0, pad)))
            b = jnp.pad(b, ((0, 0), (0, pad)))
        g_cols.append(g)
        b_cols.append(b)
    gpack = jnp.concatenate(g_cols, axis=1)        # (1, P)
    bpack = jnp.concatenate(b_cols, axis=1)        # (1, P)

    x_bf16 = x.astype(jnp.bfloat16)
    a_sm = jnp.asarray(alphas, jnp.float32).reshape(3)

    kernel = _make_kernel(tuple(dims), tuple(offs), tn6, ntiles)

    vmem = pltpu.MemorySpace.VMEM
    smem = pltpu.MemorySpace.SMEM
    in_specs = (
        [pl.BlockSpec(memory_space=vmem)]            # x (resident, bf16)
        + [pl.BlockSpec(memory_space=vmem)] * 5      # w1..w5 resident
        + [pl.BlockSpec(memory_space=pl.ANY)]        # w6 stays in HBM (manual DMA)
        + [pl.BlockSpec(memory_space=vmem)]          # packed gammas
        + [pl.BlockSpec(memory_space=vmem)]          # packed betas
        + [pl.BlockSpec(memory_space=smem)]          # PReLU alphas
    )
    out_specs = (pl.BlockSpec(memory_space=vmem),    # encoded
                 pl.BlockSpec(memory_space=vmem))    # decoded

    return pl.pallas_call(
        kernel,
        out_shape=(jax.ShapeDtypeStruct((B, dim), jnp.float32),
                   jax.ShapeDtypeStruct((B, n6), jnp.float32)),
        in_specs=in_specs,
        out_specs=out_specs,
        scratch_shapes=[
            pltpu.VMEM((ntiles, k6, tn6), jnp.bfloat16),   # w6 triple buffer
            pltpu.SemaphoreType.DMA((ntiles,)),
        ],
        compiler_params=pltpu.CompilerParams(
            vmem_limit_bytes=20 * 1024 * 1024,
        ),
    )(x_bf16, *weights, gpack, bpack, a_sm)


def make_params(key, dimension):
    sizes = [
        (4224, 512), (512, 256), (256, dimension),    # encoder
        (dimension, 256), (256, 512), (512, 4224),    # decoder
    ]
    keys = jax.random.split(key, len(sizes))
    weights, gammas, betas = [], [], []
    for k, (fi, fo) in zip(keys, sizes):
        bound = 1.0 / np.sqrt(fi)  # PyTorch-style uniform(-1/sqrt(fan_in), +)
        w = jax.random.uniform(k, (fi, fo), jnp.float32, -bound, bound)
        # Weights stored/streamed as bf16 (matmuls accumulate in f32).
        # Linear bias omitted: BN's batch-mean subtraction cancels it exactly.
        weights.append(w.astype(jnp.bfloat16))
        gammas.append(jnp.ones((fo,), jnp.float32))    # BN weight init
        betas.append(jnp.zeros((fo,), jnp.float32))    # BN bias init
    alphas = jnp.full((3,), 0.25, jnp.float32)         # PyTorch PReLU default
    return weights, gammas, betas, alphas


def reference_forward(x, weights, gammas, betas, alphas):
    # Pure-JAX (XLA) reference with the same bf16-input / f32-accumulation
    # matmul numerics as the kernel and two-pass train-mode BN statistics.
    acts = ["sigmoid"] * 3 + ["prelu"] * 3
    h = x
    encoded = None
    for i, (w, g, b, act) in enumerate(zip(weights, gammas, betas, acts)):
        y = jnp.dot(h.astype(jnp.bfloat16), w, preferred_element_type=jnp.float32)
        mean = jnp.mean(y, axis=0, keepdims=True)
        var = jnp.mean((y - mean) ** 2, axis=0, keepdims=True)
        y = (y - mean) * lax.rsqrt(var + BN_EPS) * g.reshape(1, -1) + b.reshape(1, -1)
        if act == "sigmoid":
            h = jax.nn.sigmoid(y)
        else:
            a = alphas[i - 3]
            h = jnp.where(y > 0, y, a * y)
        if i == 2:
            encoded = h
    return encoded, h


if __name__ == "__main__":
    BATCH = 8
    DIMENSION = 128   # the `dimension` constructor argument

    key = jax.random.PRNGKey(0)
    kx, kp = jax.random.split(key)
    x = jax.random.normal(kx, (BATCH, 4224), jnp.float32)
    weights, gammas, betas, alphas = make_params(kp, DIMENSION)

    encoded, decoded = jax.block_until_ready(
        fused_autoencoder(x, weights, gammas, betas, alphas)
    )

    enc_ref, dec_ref = reference_forward(x, weights, gammas, betas, alphas)
    assert encoded.shape == (BATCH, DIMENSION)
    assert decoded.shape == (BATCH, 4224)
    np.testing.assert_allclose(np.asarray(encoded), np.asarray(enc_ref), rtol=2e-3, atol=2e-3)
    np.testing.assert_allclose(np.asarray(decoded), np.asarray(dec_ref), rtol=2e-3, atol=2e-3)

    print("KERNEL_OK")
</pallas_src>

<mosaic_0001>
module attributes {stable_mosaic.version = 11 : i64} {
  func.func @kernel(%arg0: memref<8x4224xbf16, #tpu.memory_space<vmem>>, %arg1: memref<4224x512xbf16, #tpu.memory_space<vmem>>, %arg2: memref<512x256xbf16, #tpu.memory_space<vmem>>, %arg3: memref<256x128xbf16, #tpu.memory_space<vmem>>, %arg4: memref<128x256xbf16, #tpu.memory_space<vmem>>, %arg5: memref<256x512xbf16, #tpu.memory_space<vmem>>, %arg6: memref<512x4224xbf16, #tpu.memory_space<any>>, %arg7: memref<1x5888xf32, #tpu.memory_space<vmem>>, %arg8: memref<1x5888xf32, #tpu.memory_space<vmem>>, %arg9: memref<3xf32, #tpu.memory_space<smem>>, %arg10: memref<8x128xf32, #tpu.memory_space<vmem>>, %arg11: memref<8x4224xf32, #tpu.memory_space<vmem>>, %arg12: memref<3x512x1408xbf16, #tpu.memory_space<vmem>>, %arg13: memref<3x!tpu.dma_semaphore, #tpu.memory_space<semaphore_mem>>) attributes {dimension_semantics = [], scalar_prefetch = 0 : i64, scratch_operands = 2 : i64, tpu.core_type = #tpu.core_type<tc>} {
    %c0_i32 = arith.constant 0 : i32
    %c0_i32_0 = arith.constant 0 : i32
    %c0_i32_1 = arith.constant 0 : i32
    %c0_i32_2 = arith.constant 0 : i32
    %0 = tpu.memref_slice %arg6[%c0_i32_1, %c0_i32_2] : memref<512x4224xbf16, #tpu.memory_space<any>> -> memref<512x1408xbf16, #tpu.memory_space<any>>
    %c0_i32_3 = arith.constant 0 : i32
    %c0_i32_4 = arith.constant 0 : i32
    %1 = tpu.memref_slice %arg12[%c0_i32, %c0_i32_3, %c0_i32_4] : memref<3x512x1408xbf16, #tpu.memory_space<vmem>> -> memref<1x512x1408xbf16, #tpu.memory_space<vmem>>
    %2 = tpu.memref_squeeze %1 : memref<1x512x1408xbf16, #tpu.memory_space<vmem>> -> memref<512x1408xbf16, #tpu.memory_space<vmem>>
    %3 = tpu.memref_slice %arg13[%c0_i32_0] : memref<3x!tpu.dma_semaphore, #tpu.memory_space<semaphore_mem>> -> memref<1x!tpu.dma_semaphore, #tpu.memory_space<semaphore_mem>>
    %4 = tpu.memref_squeeze %3 : memref<1x!tpu.dma_semaphore, #tpu.memory_space<semaphore_mem>> -> memref<!tpu.dma_semaphore, #tpu.memory_space<semaphore_mem>>
    tpu.enqueue_dma source(%0 : memref<512x1408xbf16, #tpu.memory_space<any>>) target(%2 : memref<512x1408xbf16, #tpu.memory_space<vmem>>) target_semaphore(%4 : memref<!tpu.dma_semaphore, #tpu.memory_space<semaphore_mem>>)
    %c1_i32 = arith.constant 1 : i32
    %c1_i32_5 = arith.constant 1 : i32
    %c0_i32_6 = arith.constant 0 : i32
    %c1408_i32 = arith.constant 1408 : i32
    %5 = tpu.memref_slice %arg6[%c0_i32_6, %c1408_i32] : memref<512x4224xbf16, #tpu.memory_space<any>> -> memref<512x1408xbf16, #tpu.memory_space<any>>
    %c0_i32_7 = arith.constant 0 : i32
    %c0_i32_8 = arith.constant 0 : i32
    %6 = tpu.memref_slice %arg12[%c1_i32, %c0_i32_7, %c0_i32_8] : memref<3x512x1408xbf16, #tpu.memory_space<vmem>> -> memref<1x512x1408xbf16, #tpu.memory_space<vmem>>
    %7 = tpu.memref_squeeze %6 : memref<1x512x1408xbf16, #tpu.memory_space<vmem>> -> memref<512x1408xbf16, #tpu.memory_space<vmem>>
    %8 = tpu.memref_slice %arg13[%c1_i32_5] : memref<3x!tpu.dma_semaphore, #tpu.memory_space<semaphore_mem>> -> memref<1x!tpu.dma_semaphore, #tpu.memory_space<semaphore_mem>>
    %9 = tpu.memref_squeeze %8 : memref<1x!tpu.dma_semaphore, #tpu.memory_space<semaphore_mem>> -> memref<!tpu.dma_semaphore, #tpu.memory_space<semaphore_mem>>
    tpu.enqueue_dma source(%5 : memref<512x1408xbf16, #tpu.memory_space<any>>) target(%7 : memref<512x1408xbf16, #tpu.memory_space<vmem>>) target_semaphore(%9 : memref<!tpu.dma_semaphore, #tpu.memory_space<semaphore_mem>>)
    %c2_i32 = arith.constant 2 : i32
    %c2_i32_9 = arith.constant 2 : i32
    %c0_i32_10 = arith.constant 0 : i32
    %c2816_i32 = arith.constant 2816 : i32
    %10 = tpu.memref_slice %arg6[%c0_i32_10, %c2816_i32] : memref<512x4224xbf16, #tpu.memory_space<any>> -> memref<512x1408xbf16, #tpu.memory_space<any>>
    %c0_i32_11 = arith.constant 0 : i32
    %c0_i32_12 = arith.constant 0 : i32
    %11 = tpu.memref_slice %arg12[%c2_i32, %c0_i32_11, %c0_i32_12] : memref<3x512x1408xbf16, #tpu.memory_space<vmem>> -> memref<1x512x1408xbf16, #tpu.memory_space<vmem>>
    %12 = tpu.memref_squeeze %11 : memref<1x512x1408xbf16, #tpu.memory_space<vmem>> -> memref<512x1408xbf16, #tpu.memory_space<vmem>>
    %13 = tpu.memref_slice %arg13[%c2_i32_9] : memref<3x!tpu.dma_semaphore, #tpu.memory_space<semaphore_mem>> -> memref<1x!tpu.dma_semaphore, #tpu.memory_space<semaphore_mem>>
    %14 = tpu.memref_squeeze %13 : memref<1x!tpu.dma_semaphore, #tpu.memory_space<semaphore_mem>> -> memref<!tpu.dma_semaphore, #tpu.memory_space<semaphore_mem>>
    tpu.enqueue_dma source(%10 : memref<512x1408xbf16, #tpu.memory_space<any>>) target(%12 : memref<512x1408xbf16, #tpu.memory_space<vmem>>) target_semaphore(%14 : memref<!tpu.dma_semaphore, #tpu.memory_space<semaphore_mem>>)
    %c0 = arith.constant 0 : index
    %c0_13 = arith.constant 0 : index
    %15 = vector.load %arg0[%c0, %c0_13] : memref<8x4224xbf16, #tpu.memory_space<vmem>>, vector<8x4224xbf16>
    %c0_14 = arith.constant 0 : index
    %c0_15 = arith.constant 0 : index
    %16 = vector.load %arg1[%c0_14, %c0_15] : memref<4224x512xbf16, #tpu.memory_space<vmem>>, vector<4224x512xbf16>
    %cst = arith.constant dense<0.000000e+00> : vector<8x512xf32>
    %17 = tpu.matmul %15, %16, %cst {dimension_numbers = #tpu.dot_dimension_numbers<[1], [0], [0], [1], [0, 0, 1, 1], [], []>} : vector<8x4224xbf16>, vector<4224x512xbf16>, vector<8x512xf32> -> vector<8x512xf32>
    %c0_16 = arith.constant 0 : index
    %c0_17 = arith.constant 0 : index
    %18 = vector.load %arg7[%c0_16, %c0_17] : memref<1x5888xf32, #tpu.memory_space<vmem>>, vector<1x512xf32>
    %c0_18 = arith.constant 0 : index
    %c0_19 = arith.constant 0 : index
    %19 = vector.load %arg8[%c0_18, %c0_19] : memref<1x5888xf32, #tpu.memory_space<vmem>>, vector<1x512xf32>
    %cst_20 = arith.constant dense<0.000000e+00> : vector<512xf32>
    %20 = vector.multi_reduction <add>, %17, %cst_20 [0] : vector<8x512xf32> to vector<512xf32>
    %21 = vector.shape_cast %20 : vector<512xf32> to vector<1x512xf32>
    %cst_21 = arith.constant 8.000000e+00 : f32
    %22 = vector.broadcast %cst_21 : f32 to vector<1x512xf32>
    %23 = arith.divf %21, %22 : vector<1x512xf32>
    %24 = vector.broadcast %23 : vector<1x512xf32> to vector<8x512xf32>
    %25 = arith.subf %17, %24 : vector<8x512xf32>
    %26 = arith.mulf %25, %25 : vector<8x512xf32>
    %cst_22 = arith.constant dense<0.000000e+00> : vector<512xf32>
    %27 = vector.multi_reduction <add>, %26, %cst_22 [0] : vector<8x512xf32> to vector<512xf32>
    %28 = vector.shape_cast %27 : vector<512xf32> to vector<1x512xf32>
    %cst_23 = arith.constant 8.000000e+00 : f32
    %29 = vector.broadcast %cst_23 : f32 to vector<1x512xf32>
    %30 = arith.divf %28, %29 : vector<1x512xf32>
    %cst_24 = arith.constant 9.99999974E-6 : f32
    %31 = vector.broadcast %cst_24 : f32 to vector<1x512xf32>
    %32 = arith.addf %30, %31 : vector<1x512xf32>
    %33 = math.rsqrt %32 : vector<1x512xf32>
    %34 = vector.broadcast %33 : vector<1x512xf32> to vector<8x512xf32>
    %35 = arith.mulf %25, %34 : vector<8x512xf32>
    %36 = vector.broadcast %18 : vector<1x512xf32> to vector<8x512xf32>
    %37 = arith.mulf %35, %36 : vector<8x512xf32>
    %38 = vector.broadcast %19 : vector<1x512xf32> to vector<8x512xf32>
    %39 = arith.addf %37, %38 : vector<8x512xf32>
    %40 = arith.negf %39 : vector<8x512xf32>
    %41 = math.exp %40 : vector<8x512xf32>
    %cst_25 = arith.constant 1.000000e+00 : f32
    %42 = vector.broadcast %cst_25 : f32 to vector<8x512xf32>
    %43 = arith.addf %42, %41 : vector<8x512xf32>
    %44 = arith.divf %42, %43 : vector<8x512xf32>
    %45 = arith.truncf %44 : vector<8x512xf32> to vector<8x512xbf16>
    %c0_26 = arith.constant 0 : index
    %c0_27 = arith.constant 0 : index
    %46 = vector.load %arg2[%c0_26, %c0_27] : memref<512x256xbf16, #tpu.memory_space<vmem>>, vector<512x256xbf16>
    %cst_28 = arith.constant dense<0.000000e+00> : vector<8x256xf32>
    %47 = tpu.matmul %45, %46, %cst_28 {dimension_numbers = #tpu.dot_dimension_numbers<[1], [0], [0], [1], [0, 0, 1, 1], [], []>} : vector<8x512xbf16>, vector<512x256xbf16>, vector<8x256xf32> -> vector<8x256xf32>
    %c0_29 = arith.constant 0 : index
    %c512 = arith.constant 512 : index
    %48 = vector.load %arg7[%c0_29, %c512] : memref<1x5888xf32, #tpu.memory_space<vmem>>, vector<1x256xf32>
    %c0_30 = arith.constant 0 : index
    %c512_31 = arith.constant 512 : index
    %49 = vector.load %arg8[%c0_30, %c512_31] : memref<1x5888xf32, #tpu.memory_space<vmem>>, vector<1x256xf32>
    %cst_32 = arith.constant dense<0.000000e+00> : vector<256xf32>
    %50 = vector.multi_reduction <add>, %47, %cst_32 [0] : vector<8x256xf32> to vector<256xf32>
    %51 = vector.shape_cast %50 : vector<256xf32> to vector<1x256xf32>
    %cst_33 = arith.constant 8.000000e+00 : f32
    %52 = vector.broadcast %cst_33 : f32 to vector<1x256xf32>
    %53 = arith.divf %51, %52 : vector<1x256xf32>
    %54 = vector.broadcast %53 : vector<1x256xf32> to vector<8x256xf32>
    %55 = arith.subf %47, %54 : vector<8x256xf32>
    %56 = arith.mulf %55, %55 : vector<8x256xf32>
    %cst_34 = arith.constant dense<0.000000e+00> : vector<256xf32>
    %57 = vector.multi_reduction <add>, %56, %cst_34 [0] : vector<8x256xf32> to vector<256xf32>
    %58 = vector.shape_cast %57 : vector<256xf32> to vector<1x256xf32>
    %cst_35 = arith.constant 8.000000e+00 : f32
    %59 = vector.broadcast %cst_35 : f32 to vector<1x256xf32>
    %60 = arith.divf %58, %59 : vector<1x256xf32>
    %cst_36 = arith.constant 9.99999974E-6 : f32
    %61 = vector.broadcast %cst_36 : f32 to vector<1x256xf32>
    %62 = arith.addf %60, %61 : vector<1x256xf32>
    %63 = math.rsqrt %62 : vector<1x256xf32>
    %64 = vector.broadcast %63 : vector<1x256xf32> to vector<8x256xf32>
    %65 = arith.mulf %55, %64 : vector<8x256xf32>
    %66 = vector.broadcast %48 : vector<1x256xf32> to vector<8x256xf32>
    %67 = arith.mulf %65, %66 : vector<8x256xf32>
    %68 = vector.broadcast %49 : vector<1x256xf32> to vector<8x256xf32>
    %69 = arith.addf %67, %68 : vector<8x256xf32>
    %70 = arith.negf %69 : vector<8x256xf32>
    %71 = math.exp %70 : vector<8x256xf32>
    %cst_37 = arith.constant 1.000000e+00 : f32
    %72 = vector.broadcast %cst_37 : f32 to vector<8x256xf32>
    %73 = arith.addf %72, %71 : vector<8x256xf32>
    %74 = arith.divf %72, %73 : vector<8x256xf32>
    %75 = arith.truncf %74 : vector<8x256xf32> to vector<8x256xbf16>
    %c0_38 = arith.constant 0 : index
    %c0_39 = arith.constant 0 : index
    %76 = vector.load %arg3[%c0_38, %c0_39] : memref<256x128xbf16, #tpu.memory_space<vmem>>, vector<256x128xbf16>
    %cst_40 = arith.constant dense<0.000000e+00> : vector<8x128xf32>
    %77 = tpu.matmul %75, %76, %cst_40 {dimension_numbers = #tpu.dot_dimension_numbers<[1], [0], [0], [1], [0, 0, 1, 1], [], []>} : vector<8x256xbf16>, vector<256x128xbf16>, vector<8x128xf32> -> vector<8x128xf32>
    %c0_41 = arith.constant 0 : index
    %c768 = arith.constant 768 : index
    %78 = vector.load %arg7[%c0_41, %c768] : memref<1x5888xf32, #tpu.memory_space<vmem>>, vector<1x128xf32>
    %c0_42 = arith.constant 0 : index
    %c768_43 = arith.constant 768 : index
    %79 = vector.load %arg8[%c0_42, %c768_43] : memref<1x5888xf32, #tpu.memory_space<vmem>>, vector<1x128xf32>
    %cst_44 = arith.constant dense<0.000000e+00> : vector<128xf32>
    %80 = vector.multi_reduction <add>, %77, %cst_44 [0] : vector<8x128xf32> to vector<128xf32>
    %81 = vector.shape_cast %80 : vector<128xf32> to vector<1x128xf32>
    %cst_45 = arith.constant 8.000000e+00 : f32
    %82 = vector.broadcast %cst_45 : f32 to vector<1x128xf32>
    %83 = arith.divf %81, %82 : vector<1x128xf32>
    %84 = vector.broadcast %83 : vector<1x128xf32> to vector<8x128xf32>
    %85 = arith.subf %77, %84 : vector<8x128xf32>
    %86 = arith.mulf %85, %85 : vector<8x128xf32>
    %cst_46 = arith.constant dense<0.000000e+00> : vector<128xf32>
    %87 = vector.multi_reduction <add>, %86, %cst_46 [0] : vector<8x128xf32> to vector<128xf32>
    %88 = vector.shape_cast %87 : vector<128xf32> to vector<1x128xf32>
    %cst_47 = arith.constant 8.000000e+00 : f32
    %89 = vector.broadcast %cst_47 : f32 to vector<1x128xf32>
    %90 = arith.divf %88, %89 : vector<1x128xf32>
    %cst_48 = arith.constant 9.99999974E-6 : f32
    %91 = vector.broadcast %cst_48 : f32 to vector<1x128xf32>
    %92 = arith.addf %90, %91 : vector<1x128xf32>
    %93 = math.rsqrt %92 : vector<1x128xf32>
    %94 = vector.broadcast %93 : vector<1x128xf32> to vector<8x128xf32>
    %95 = arith.mulf %85, %94 : vector<8x128xf32>
    %96 = vector.broadcast %78 : vector<1x128xf32> to vector<8x128xf32>
    %97 = arith.mulf %95, %96 : vector<8x128xf32>
    %98 = vector.broadcast %79 : vector<1x128xf32> to vector<8x128xf32>
    %99 = arith.addf %97, %98 : vector<8x128xf32>
    %100 = arith.negf %99 : vector<8x128xf32>
    %101 = math.exp %100 : vector<8x128xf32>
    %cst_49 = arith.constant 1.000000e+00 : f32
    %102 = vector.broadcast %cst_49 : f32 to vector<8x128xf32>
    %103 = arith.addf %102, %101 : vector<8x128xf32>
    %104 = arith.divf %102, %103 : vector<8x128xf32>
    %c0_50 = arith.constant 0 : index
    %c0_51 = arith.constant 0 : index
    %105 = vector.load %arg10[%c0_50, %c0_51] : memref<8x128xf32, #tpu.memory_space<vmem>>, vector<8x128xf32>
    tpu.vector_store %arg10[%c0_50, %c0_51], %104 {strides = array<i32>} : memref<8x128xf32, #tpu.memory_space<vmem>>, vector<8x128xf32>,
    %106 = arith.truncf %104 : vector<8x128xf32> to vector<8x128xbf16>
    %c0_52 = arith.constant 0 : index
    %c0_53 = arith.constant 0 : index
    %107 = vector.load %arg4[%c0_52, %c0_53] : memref<128x256xbf16, #tpu.memory_space<vmem>>, vector<128x256xbf16>
    %cst_54 = arith.constant dense<0.000000e+00> : vector<8x256xf32>
    %108 = tpu.matmul %106, %107, %cst_54 {dimension_numbers = #tpu.dot_dimension_numbers<[1], [0], [0], [1], [0, 0, 1, 1], [], []>} : vector<8x128xbf16>, vector<128x256xbf16>, vector<8x256xf32> -> vector<8x256xf32>
    %c0_55 = arith.constant 0 : index
    %c896 = arith.constant 896 : index
    %109 = vector.load %arg7[%c0_55, %c896] : memref<1x5888xf32, #tpu.memory_space<vmem>>, vector<1x256xf32>
    %c0_56 = arith.constant 0 : index
    %c896_57 = arith.constant 896 : index
    %110 = vector.load %arg8[%c0_56, %c896_57] : memref<1x5888xf32, #tpu.memory_space<vmem>>, vector<1x256xf32>
    %cst_58 = arith.constant dense<0.000000e+00> : vector<256xf32>
    %111 = vector.multi_reduction <add>, %108, %cst_58 [0] : vector<8x256xf32> to vector<256xf32>
    %112 = vector.shape_cast %111 : vector<256xf32> to vector<1x256xf32>
    %cst_59 = arith.constant 8.000000e+00 : f32
    %113 = vector.broadcast %cst_59 : f32 to vector<1x256xf32>
    %114 = arith.divf %112, %113 : vector<1x256xf32>
    %115 = vector.broadcast %114 : vector<1x256xf32> to vector<8x256xf32>
    %116 = arith.subf %108, %115 : vector<8x256xf32>
    %117 = arith.mulf %116, %116 : vector<8x256xf32>
    %cst_60 = arith.constant dense<0.000000e+00> : vector<256xf32>
    %118 = vector.multi_reduction <add>, %117, %cst_60 [0] : vector<8x256xf32> to vector<256xf32>
    %119 = vector.shape_cast %118 : vector<256xf32> to vector<1x256xf32>
    %cst_61 = arith.constant 8.000000e+00 : f32
    %120 = vector.broadcast %cst_61 : f32 to vector<1x256xf32>
    %121 = arith.divf %119, %120 : vector<1x256xf32>
    %cst_62 = arith.constant 9.99999974E-6 : f32
    %122 = vector.broadcast %cst_62 : f32 to vector<1x256xf32>
    %123 = arith.addf %121, %122 : vector<1x256xf32>
    %124 = math.rsqrt %123 : vector<1x256xf32>
    %125 = vector.broadcast %124 : vector<1x256xf32> to vector<8x256xf32>
    %126 = arith.mulf %116, %125 : vector<8x256xf32>
    %127 = vector.broadcast %109 : vector<1x256xf32> to vector<8x256xf32>
    %128 = arith.mulf %126, %127 : vector<8x256xf32>
    %129 = vector.broadcast %110 : vector<1x256xf32> to vector<8x256xf32>
    %130 = arith.addf %128, %129 : vector<8x256xf32>
    %c0_63 = arith.constant 0 : index
    %131 = memref.load %arg9[%c0_63] : memref<3xf32, #tpu.memory_space<smem>>
    %cst_64 = arith.constant 0.000000e+00 : f32
    %132 = vector.broadcast %cst_64 : f32 to vector<8x256xf32>
    %133 = arith.cmpf ogt, %130, %132 : vector<8x256xf32>
    %134 = vector.broadcast %131 : f32 to vector<8x256xf32>
    %135 = arith.mulf %134, %130 : vector<8x256xf32>
    %136 = arith.select %133, %130, %135 : vector<8x256xi1>, vector<8x256xf32>
    %137 = arith.truncf %136 : vector<8x256xf32> to vector<8x256xbf16>
    %c0_65 = arith.constant 0 : index
    %c0_66 = arith.constant 0 : index
    %138 = vector.load %arg5[%c0_65, %c0_66] : memref<256x512xbf16, #tpu.memory_space<vmem>>, vector<256x512xbf16>
    %cst_67 = arith.constant dense<0.000000e+00> : vector<8x512xf32>
    %139 = tpu.matmul %137, %138, %cst_67 {dimension_numbers = #tpu.dot_dimension_numbers<[1], [0], [0], [1], [0, 0, 1, 1], [], []>} : vector<8x256xbf16>, vector<256x512xbf16>, vector<8x512xf32> -> vector<8x512xf32>
    %c0_68 = arith.constant 0 : index
    %c1152 = arith.constant 1152 : index
    %140 = vector.load %arg7[%c0_68, %c1152] : memref<1x5888xf32, #tpu.memory_space<vmem>>, vector<1x512xf32>
    %c0_69 = arith.constant 0 : index
    %c1152_70 = arith.constant 1152 : index
    %141 = vector.load %arg8[%c0_69, %c1152_70] : memref<1x5888xf32, #tpu.memory_space<vmem>>, vector<1x512xf32>
    %cst_71 = arith.constant dense<0.000000e+00> : vector<512xf32>
    %142 = vector.multi_reduction <add>, %139, %cst_71 [0] : vector<8x512xf32> to vector<512xf32>
    %143 = vector.shape_cast %142 : vector<512xf32> to vector<1x512xf32>
    %cst_72 = arith.constant 8.000000e+00 : f32
    %144 = vector.broadcast %cst_72 : f32 to vector<1x512xf32>
    %145 = arith.divf %143, %144 : vector<1x512xf32>
    %146 = vector.broadcast %145 : vector<1x512xf32> to vector<8x512xf32>
    %147 = arith.subf %139, %146 : vector<8x512xf32>
    %148 = arith.mulf %147, %147 : vector<8x512xf32>
    %cst_73 = arith.constant dense<0.000000e+00> : vector<512xf32>
    %149 = vector.multi_reduction <add>, %148, %cst_73 [0] : vector<8x512xf32> to vector<512xf32>
    %150 = vector.shape_cast %149 : vector<512xf32> to vector<1x512xf32>
    %cst_74 = arith.constant 8.000000e+00 : f32
    %151 = vector.broadcast %cst_74 : f32 to vector<1x512xf32>
    %152 = arith.divf %150, %151 : vector<1x512xf32>
    %cst_75 = arith.constant 9.99999974E-6 : f32
    %153 = vector.broadcast %cst_75 : f32 to vector<1x512xf32>
    %154 = arith.addf %152, %153 : vector<1x512xf32>
    %155 = math.rsqrt %154 : vector<1x512xf32>
    %156 = vector.broadcast %155 : vector<1x512xf32> to vector<8x512xf32>
    %157 = arith.mulf %147, %156 : vector<8x512xf32>
    %158 = vector.broadcast %140 : vector<1x512xf32> to vector<8x512xf32>
    %159 = arith.mulf %157, %158 : vector<8x512xf32>
    %160 = vector.broadcast %141 : vector<1x512xf32> to vector<8x512xf32>
    %161 = arith.addf %159, %160 : vector<8x512xf32>
    %c1 = arith.constant 1 : index
    %162 = memref.load %arg9[%c1] : memref<3xf32, #tpu.memory_space<smem>>
    %cst_76 = arith.constant 0.000000e+00 : f32
    %163 = vector.broadcast %cst_76 : f32 to vector<8x512xf32>
    %164 = arith.cmpf ogt, %161, %163 : vector<8x512xf32>
    %165 = vector.broadcast %162 : f32 to vector<8x512xf32>
    %166 = arith.mulf %165, %161 : vector<8x512xf32>
    %167 = arith.select %164, %161, %166 : vector<8x512xi1>, vector<8x512xf32>
    %168 = arith.truncf %167 : vector<8x512xf32> to vector<8x512xbf16>
    %c0_i32_77 = arith.constant 0 : i32
    %c0_i32_78 = arith.constant 0 : i32
    %c0_i32_79 = arith.constant 0 : i32
    %c0_i32_80 = arith.constant 0 : i32
    %169 = tpu.memref_slice %arg6[%c0_i32_79, %c0_i32_80] : memref<512x4224xbf16, #tpu.memory_space<any>> -> memref<512x1408xbf16, #tpu.memory_space<any>>
    %c0_i32_81 = arith.constant 0 : i32
    %c0_i32_82 = arith.constant 0 : i32
    %170 = tpu.memref_slice %arg12[%c0_i32_77, %c0_i32_81, %c0_i32_82] : memref<3x512x1408xbf16, #tpu.memory_space<vmem>> -> memref<1x512x1408xbf16, #tpu.memory_space<vmem>>
    %171 = tpu.memref_squeeze %170 : memref<1x512x1408xbf16, #tpu.memory_space<vmem>> -> memref<512x1408xbf16, #tpu.memory_space<vmem>>
    %172 = tpu.memref_slice %arg13[%c0_i32_78] : memref<3x!tpu.dma_semaphore, #tpu.memory_space<semaphore_mem>> -> memref<1x!tpu.dma_semaphore, #tpu.memory_space<semaphore_mem>>
    %173 = tpu.memref_squeeze %172 : memref<1x!tpu.dma_semaphore, #tpu.memory_space<semaphore_mem>> -> memref<!tpu.dma_semaphore, #tpu.memory_space<semaphore_mem>>
    tpu.wait_dma2 semaphore(%173 : memref<!tpu.dma_semaphore, #tpu.memory_space<semaphore_mem>>) src(%169 : memref<512x1408xbf16, #tpu.memory_space<any>>) dst(%171 : memref<512x1408xbf16, #tpu.memory_space<vmem>>)
    %c0_83 = arith.constant 0 : index
    %c0_84 = arith.constant 0 : index
    %c0_85 = arith.constant 0 : index
    %174 = vector.load %arg12[%c0_83, %c0_84, %c0_85] : memref<3x512x1408xbf16, #tpu.memory_space<vmem>>, vector<1x512x1408xbf16>
    %175 = vector.shape_cast %174 : vector<1x512x1408xbf16> to vector<512x1408xbf16>
    %cst_86 = arith.constant dense<0.000000e+00> : vector<8x1408xf32>
    %176 = tpu.matmul %168, %175, %cst_86 {dimension_numbers = #tpu.dot_dimension_numbers<[1], [0], [0], [1], [0, 0, 1, 1], [], []>} : vector<8x512xbf16>, vector<512x1408xbf16>, vector<8x1408xf32> -> vector<8x1408xf32>
    %c0_87 = arith.constant 0 : index
    %c1664 = arith.constant 1664 : index
    %177 = vector.load %arg7[%c0_87, %c1664] : memref<1x5888xf32, #tpu.memory_space<vmem>>, vector<1x1408xf32>
    %c0_88 = arith.constant 0 : index
    %c1664_89 = arith.constant 1664 : index
    %178 = vector.load %arg8[%c0_88, %c1664_89] : memref<1x5888xf32, #tpu.memory_space<vmem>>, vector<1x1408xf32>
    %cst_90 = arith.constant dense<0.000000e+00> : vector<1408xf32>
    %179 = vector.multi_reduction <add>, %176, %cst_90 [0] : vector<8x1408xf32> to vector<1408xf32>
    %180 = vector.shape_cast %179 : vector<1408xf32> to vector<1x1408xf32>
    %cst_91 = arith.constant 8.000000e+00 : f32
    %181 = vector.broadcast %cst_91 : f32 to vector<1x1408xf32>
    %182 = arith.divf %180, %181 : vector<1x1408xf32>
    %183 = vector.broadcast %182 : vector<1x1408xf32> to vector<8x1408xf32>
    %184 = arith.subf %176, %183 : vector<8x1408xf32>
    %185 = arith.mulf %184, %184 : vector<8x1408xf32>
    %cst_92 = arith.constant dense<0.000000e+00> : vector<1408xf32>
    %186 = vector.multi_reduction <add>, %185, %cst_92 [0] : vector<8x1408xf32> to vector<1408xf32>
    %187 = vector.shape_cast %186 : vector<1408xf32> to vector<1x1408xf32>
    %cst_93 = arith.constant 8.000000e+00 : f32
    %188 = vector.broadcast %cst_93 : f32 to vector<1x1408xf32>
    %189 = arith.divf %187, %188 : vector<1x1408xf32>
    %cst_94 = arith.constant 9.99999974E-6 : f32
    %190 = vector.broadcast %cst_94 : f32 to vector<1x1408xf32>
    %191 = arith.addf %189, %190 : vector<1x1408xf32>
    %192 = math.rsqrt %191 : vector<1x1408xf32>
    %193 = vector.broadcast %192 : vector<1x1408xf32> to vector<8x1408xf32>
    %194 = arith.mulf %184, %193 : vector<8x1408xf32>
    %195 = vector.broadcast %177 : vector<1x1408xf32> to vector<8x1408xf32>
    %196 = arith.mulf %194, %195 : vector<8x1408xf32>
    %197 = vector.broadcast %178 : vector<1x1408xf32> to vector<8x1408xf32>
    %198 = arith.addf %196, %197 : vector<8x1408xf32>
    %c2 = arith.constant 2 : index
    %199 = memref.load %arg9[%c2] : memref<3xf32, #tpu.memory_space<smem>>
    %cst_95 = arith.constant 0.000000e+00 : f32
    %200 = vector.broadcast %cst_95 : f32 to vector<8x1408xf32>
    %201 = arith.cmpf ogt, %198, %200 : vector<8x1408xf32>
    %202 = vector.broadcast %199 : f32 to vector<8x1408xf32>
    %203 = arith.mulf %202, %198 : vector<8x1408xf32>
    %204 = arith.select %201, %198, %203 : vector<8x1408xi1>, vector<8x1408xf32>
    %c0_96 = arith.constant 0 : index
    %c0_97 = arith.constant 0 : index
    %205 = vector.load %arg11[%c0_96, %c0_97] : memref<8x4224xf32, #tpu.memory_space<vmem>>, vector<8x1408xf32>
    tpu.vector_store %arg11[%c0_96, %c0_97], %204 {strides = array<i32>} : memref<8x4224xf32, #tpu.memory_space<vmem>>, vector<8x1408xf32>,
    %c1_i32_98 = arith.constant 1 : i32
    %c1_i32_99 = arith.constant 1 : i32
    %c0_i32_100 = arith.constant 0 : i32
    %c1408_i32_101 = arith.constant 1408 : i32
    %206 = tpu.memref_slice %arg6[%c0_i32_100, %c1408_i32_101] : memref<512x4224xbf16, #tpu.memory_space<any>> -> memref<512x1408xbf16, #tpu.memory_space<any>>
    %c0_i32_102 = arith.constant 0 : i32
    %c0_i32_103 = arith.constant 0 : i32
    %207 = tpu.memref_slice %arg12[%c1_i32_98, %c0_i32_102, %c0_i32_103] : memref<3x512x1408xbf16, #tpu.memory_space<vmem>> -> memref<1x512x1408xbf16, #tpu.memory_space<vmem>>
    %208 = tpu.memref_squeeze %207 : memref<1x512x1408xbf16, #tpu.memory_space<vmem>> -> memref<512x1408xbf16, #tpu.memory_space<vmem>>
    %209 = tpu.memref_slice %arg13[%c1_i32_99] : memref<3x!tpu.dma_semaphore, #tpu.memory_space<semaphore_mem>> -> memref<1x!tpu.dma_semaphore, #tpu.memory_space<semaphore_mem>>
    %210 = tpu.memref_squeeze %209 : memref<1x!tpu.dma_semaphore, #tpu.memory_space<semaphore_mem>> -> memref<!tpu.dma_semaphore, #tpu.memory_space<semaphore_mem>>
    tpu.wait_dma2 semaphore(%210 : memref<!tpu.dma_semaphore, #tpu.memory_space<semaphore_mem>>) src(%206 : memref<512x1408xbf16, #tpu.memory_space<any>>) dst(%208 : memref<512x1408xbf16, #tpu.memory_space<vmem>>)
    %c1_104 = arith.constant 1 : index
    %c0_105 = arith.constant 0 : index
    %c0_106 = arith.constant 0 : index
    %211 = vector.load %arg12[%c1_104, %c0_105, %c0_106] : memref<3x512x1408xbf16, #tpu.memory_space<vmem>>, vector<1x512x1408xbf16>
    %212 = vector.shape_cast %211 : vector<1x512x1408xbf16> to vector<512x1408xbf16>
    %cst_107 = arith.constant dense<0.000000e+00> : vector<8x1408xf32>
    %213 = tpu.matmul %168, %212, %cst_107 {dimension_numbers = #tpu.dot_dimension_numbers<[1], [0], [0], [1], [0, 0, 1, 1], [], []>} : vector<8x512xbf16>, vector<512x1408xbf16>, vector<8x1408xf32> -> vector<8x1408xf32>
    %c0_108 = arith.constant 0 : index
    %c3072 = arith.constant 3072 : index
    %214 = vector.load %arg7[%c0_108, %c3072] : memref<1x5888xf32, #tpu.memory_space<vmem>>, vector<1x1408xf32>
    %c0_109 = arith.constant 0 : index
    %c3072_110 = arith.constant 3072 : index
    %215 = vector.load %arg8[%c0_109, %c3072_110] : memref<1x5888xf32, #tpu.memory_space<vmem>>, vector<1x1408xf32>
    %cst_111 = arith.constant dense<0.000000e+00> : vector<1408xf32>
    %216 = vector.multi_reduction <add>, %213, %cst_111 [0] : vector<8x1408xf32> to vector<1408xf32>
    %217 = vector.shape_cast %216 : vector<1408xf32> to vector<1x1408xf32>
    %cst_112 = arith.constant 8.000000e+00 : f32
    %218 = vector.broadcast %cst_112 : f32 to vector<1x1408xf32>
    %219 = arith.divf %217, %218 : vector<1x1408xf32>
    %220 = vector.broadcast %219 : vector<1x1408xf32> to vector<8x1408xf32>
    %221 = arith.subf %213, %220 : vector<8x1408xf32>
    %222 = arith.mulf %221, %221 : vector<8x1408xf32>
    %cst_113 = arith.constant dense<0.000000e+00> : vector<1408xf32>
    %223 = vector.multi_reduction <add>, %222, %cst_113 [0] : vector<8x1408xf32> to vector<1408xf32>
    %224 = vector.shape_cast %223 : vector<1408xf32> to vector<1x1408xf32>
    %cst_114 = arith.constant 8.000000e+00 : f32
    %225 = vector.broadcast %cst_114 : f32 to vector<1x1408xf32>
    %226 = arith.divf %224, %225 : vector<1x1408xf32>
    %cst_115 = arith.constant 9.99999974E-6 : f32
    %227 = vector.broadcast %cst_115 : f32 to vector<1x1408xf32>
    %228 = arith.addf %226, %227 : vector<1x1408xf32>
    %229 = math.rsqrt %228 : vector<1x1408xf32>
    %230 = vector.broadcast %229 : vector<1x1408xf32> to vector<8x1408xf32>
    %231 = arith.mulf %221, %230 : vector<8x1408xf32>
    %232 = vector.broadcast %214 : vector<1x1408xf32> to vector<8x1408xf32>
    %233 = arith.mulf %231, %232 : vector<8x1408xf32>
    %234 = vector.broadcast %215 : vector<1x1408xf32> to vector<8x1408xf32>
    %235 = arith.addf %233, %234 : vector<8x1408xf32>
    %c2_116 = arith.constant 2 : index
    %236 = memref.load %arg9[%c2_116] : memref<3xf32, #tpu.memory_space<smem>>
    %cst_117 = arith.constant 0.000000e+00 : f32
    %237 = vector.broadcast %cst_117 : f32 to vector<8x1408xf32>
    %238 = arith.cmpf ogt, %235, %237 : vector<8x1408xf32>
    %239 = vector.broadcast %236 : f32 to vector<8x1408xf32>
    %240 = arith.mulf %239, %235 : vector<8x1408xf32>
    %241 = arith.select %238, %235, %240 : vector<8x1408xi1>, vector<8x1408xf32>
    %c0_118 = arith.constant 0 : index
    %c1408 = arith.constant 1408 : index
    %242 = vector.load %arg11[%c0_118, %c1408] : memref<8x4224xf32, #tpu.memory_space<vmem>>, vector<8x1408xf32>
    tpu.vector_store %arg11[%c0_118, %c1408], %241 {strides = array<i32>} : memref<8x4224xf32, #tpu.memory_space<vmem>>, vector<8x1408xf32>,
    %c2_i32_119 = arith.constant 2 : i32
    %c2_i32_120 = arith.constant 2 : i32
    %c0_i32_121 = arith.constant 0 : i32
    %c2816_i32_122 = arith.constant 2816 : i32
    %243 = tpu.memref_slice %arg6[%c0_i32_121, %c2816_i32_122] : memref<512x4224xbf16, #tpu.memory_space<any>> -> memref<512x1408xbf16, #tpu.memory_space<any>>
    %c0_i32_123 = arith.constant 0 : i32
    %c0_i32_124 = arith.constant 0 : i32
    %244 = tpu.memref_slice %arg12[%c2_i32_119, %c0_i32_123, %c0_i32_124] : memref<3x512x1408xbf16, #tpu.memory_space<vmem>> -> memref<1x512x1408xbf16, #tpu.memory_space<vmem>>
    %245 = tpu.memref_squeeze %244 : memref<1x512x1408xbf16, #tpu.memory_space<vmem>> -> memref<512x1408xbf16, #tpu.memory_space<vmem>>
    %246 = tpu.memref_slice %arg13[%c2_i32_120] : memref<3x!tpu.dma_semaphore, #tpu.memory_space<semaphore_mem>> -> memref<1x!tpu.dma_semaphore, #tpu.memory_space<semaphore_mem>>
    %247 = tpu.memref_squeeze %246 : memref<1x!tpu.dma_semaphore, #tpu.memory_space<semaphore_mem>> -> memref<!tpu.dma_semaphore, #tpu.memory_space<semaphore_mem>>
    tpu.wait_dma2 semaphore(%247 : memref<!tpu.dma_semaphore, #tpu.memory_space<semaphore_mem>>) src(%243 : memref<512x1408xbf16, #tpu.memory_space<any>>) dst(%245 : memref<512x1408xbf16, #tpu.memory_space<vmem>>)
    %c2_125 = arith.constant 2 : index
    %c0_126 = arith.constant 0 : index
    %c0_127 = arith.constant 0 : index
    %248 = vector.load %arg12[%c2_125, %c0_126, %c0_127] : memref<3x512x1408xbf16, #tpu.memory_space<vmem>>, vector<1x512x1408xbf16>
    %249 = vector.shape_cast %248 : vector<1x512x1408xbf16> to vector<512x1408xbf16>
    %cst_128 = arith.constant dense<0.000000e+00> : vector<8x1408xf32>
    %250 = tpu.matmul %168, %249, %cst_128 {dimension_numbers = #tpu.dot_dimension_numbers<[1], [0], [0], [1], [0, 0, 1, 1], [], []>} : vector<8x512xbf16>, vector<512x1408xbf16>, vector<8x1408xf32> -> vector<8x1408xf32>
    %c0_129 = arith.constant 0 : index
    %c4480 = arith.constant 4480 : index
    %251 = vector.load %arg7[%c0_129, %c4480] : memref<1x5888xf32, #tpu.memory_space<vmem>>, vector<1x1408xf32>
    %c0_130 = arith.constant 0 : index
    %c4480_131 = arith.constant 4480 : index
    %252 = vector.load %arg8[%c0_130, %c4480_131] : memref<1x5888xf32, #tpu.memory_space<vmem>>, vector<1x1408xf32>
    %cst_132 = arith.constant dense<0.000000e+00> : vector<1408xf32>
    %253 = vector.multi_reduction <add>, %250, %cst_132 [0] : vector<8x1408xf32> to vector<1408xf32>
    %254 = vector.shape_cast %253 : vector<1408xf32> to vector<1x1408xf32>
    %cst_133 = arith.constant 8.000000e+00 : f32
    %255 = vector.broadcast %cst_133 : f32 to vector<1x1408xf32>
    %256 = arith.divf %254, %255 : vector<1x1408xf32>
    %257 = vector.broadcast %256 : vector<1x1408xf32> to vector<8x1408xf32>
    %258 = arith.subf %250, %257 : vector<8x1408xf32>
    %259 = arith.mulf %258, %258 : vector<8x1408xf32>
    %cst_134 = arith.constant dense<0.000000e+00> : vector<1408xf32>
    %260 = vector.multi_reduction <add>, %259, %cst_134 [0] : vector<8x1408xf32> to vector<1408xf32>
    %261 = vector.shape_cast %260 : vector<1408xf32> to vector<1x1408xf32>
    %cst_135 = arith.constant 8.000000e+00 : f32
    %262 = vector.broadcast %cst_135 : f32 to vector<1x1408xf32>
    %263 = arith.divf %261, %262 : vector<1x1408xf32>
    %cst_136 = arith.constant 9.99999974E-6 : f32
    %264 = vector.broadcast %cst_136 : f32 to vector<1x1408xf32>
    %265 = arith.addf %263, %264 : vector<1x1408xf32>
    %266 = math.rsqrt %265 : vector<1x1408xf32>
    %267 = vector.broadcast %266 : vector<1x1408xf32> to vector<8x1408xf32>
    %268 = arith.mulf %258, %267 : vector<8x1408xf32>
    %269 = vector.broadcast %251 : vector<1x1408xf32> to vector<8x1408xf32>
    %270 = arith.mulf %268, %269 : vector<8x1408xf32>
    %271 = vector.broadcast %252 : vector<1x1408xf32> to vector<8x1408xf32>
    %272 = arith.addf %270, %271 : vector<8x1408xf32>
    %c2_137 = arith.constant 2 : index
    %273 = memref.load %arg9[%c2_137] : memref<3xf32, #tpu.memory_space<smem>>
    %cst_138 = arith.constant 0.000000e+00 : f32
    %274 = vector.broadcast %cst_138 : f32 to vector<8x1408xf32>
    %275 = arith.cmpf ogt, %272, %274 : vector<8x1408xf32>
    %276 = vector.broadcast %273 : f32 to vector<8x1408xf32>
    %277 = arith.mulf %276, %272 : vector<8x1408xf32>
    %278 = arith.select %275, %272, %277 : vector<8x1408xi1>, vector<8x1408xf32>
    %c0_139 = arith.constant 0 : index
    %c2816 = arith.constant 2816 : index
    %279 = vector.load %arg11[%c0_139, %c2816] : memref<8x4224xf32, #tpu.memory_space<vmem>>, vector<8x1408xf32>
    tpu.vector_store %arg11[%c0_139, %c2816], %278 {strides = array<i32>} : memref<8x4224xf32, #tpu.memory_space<vmem>>, vector<8x1408xf32>,
    return
  }
}

</mosaic_0001>

<bundles_post_ra>
// kernel: tpu_custom_call.1
= control target key start
LH: loop header
LB: loop body
LE: loop exit
PB: predicated region body
PF: predicated region fallthrough
CT: control target
= control target key end

     0   :  { %17 = vsyncpa [#allocation5], 0  ;;  %s18270_s0 = inlined_call_operand.hbm [shape: bf16[8,4224], index: 0, kind: input, shape index: {}]   ;;  %s18271_s1 = inlined_call_operand.hbm [shape: bf16[4224,512], index: 1, kind: input, shape index: {}]   ;;  %s18272_s2 = inlined_call_operand.hbm [shape: bf16[512,256], index: 2, kind: input, shape index: {}]   ;;  %s18273_s3 = inlined_call_operand.hbm [shape: bf16[256,128], index: 3, kind: input, shape index: {}]   ;;  %s18274_s4 = inlined_call_operand.hbm [shape: bf16[128,256], index: 4, kind: input, shape index: {}]   ;;  %s18275_s5 = inlined_call_operand.hbm [shape: bf16[256,512], index: 5, kind: input, shape index: {}]   ;;  %s18276_s6 = inlined_call_operand.hbm [shape: bf16[512,4224], index: 6, kind: input, shape index: {}]   ;;  %s18277_s7 = inlined_call_operand.hbm [shape: f32[1,5888], index: 7, kind: input, shape index: {}]   ;;  %s18278_s8 = inlined_call_operand.hbm [shape: f32[1,5888], index: 8, kind: input, shape index: {}]   ;;  %s18279_s9 = inlined_call_operand.hbm [shape: f32[3], index: 9, kind: input, shape index: {}]   ;;  %s18280_s10 = inlined_call_operand.hbm [shape: f32[8,128], index: 10, kind: output, shape index: {0}]   ;;  %s18281_s11 = inlined_call_operand.hbm [shape: f32[8,4224], index: 11, kind: output, shape index: {1}]  }
   0x1   :  { %18 = vsyncpa [#allocation9], 0 }
   0x2   :  { %19 = vsyncpa [#allocation12], 0 }
   0x3   :  { %20 = vsyncpa [#allocation15], 0 }
   0x4   :  { %21 = vsyncpa [#allocation18], 0 }
   0x5   :  { %22 = vsyncpa [#allocation7], 0 }
   0x6   :  { %23 = vsyncpa [#allocation6], 0 }
   0x7   :  { %24 = vsyncpa [#allocation22], 0  ;;  %s17506_s17 = smov [#allocation8]   ;;  %s17254_s21 = scalar_lea.hbm %s18271_s1, 135168 }
   0x8   :  { %s40_s18 = sshll.u32 %s17506_s17, 4  ;;  %p17255_p0 = scmp.ne.s32.totalorder %s18271_s1, %s17254_s21  ;;  %s41_s18 = int_to_ptr.vmem [resolvable:$true] %s40_s18 }
   0x9   :  { %p17258_p1 = scmp.lt.u32.totalorder %s17254_s21, %s18271_s1 }
   0xb   :  { %p17260_p2 = pnand %p17258_p1, %p17255_p0 }
   0xd   :  { %17263 = shalt.err (!%p17260_p2)
}
   0xe   :  { %s17264_s26 = scalar_lea.vmem %s41_s18, 135168  ;;  %p17269_p4 = scmp.lt.s32.totalorder %s41_s18, %s41_s18 }
   0xf   :  { %p17265_p3 = scmp.ne.s32.totalorder %s41_s18, %s17264_s26  ;;  %p17270_p5 = scmp.lt.s32.totalorder %s17264_s26, %s17264_s26 }
  0x11   :  { %p17271_p6 = por %p17270_p5, %p17269_p4 }
  0x13   :  { %p17272_p7 = pnand %p17271_p6, %p17265_p3 }
  0x15   :  { %17275 = shalt.err (!%p17272_p7)
}
  0x16   :  { %s17507_s27 = smov 256   ;;  %s17508_s28 = smov 16  }
  0x17   :  { %46 = dma.hbm_to_vmem [thread:$0]  %s18271_s1, 135168, %s41_s18, [#allocation9], %s17507_s27, %s17507_s27, %s17508_s28  }
  0x18   :  { %s17509_s12 = smov [#allocation11]   ;;  %s17276_s16 = scalar_lea.hbm %s18273_s3, 2048 }
  0x19   :  { %s64_s13 = sshll.u32 %s17509_s12, 4  ;;  %p17277_p8 = scmp.ne.s32.totalorder %s18273_s3, %s17276_s16  ;;  %s65_s13 = int_to_ptr.vmem [resolvable:$true] %s64_s13 }
  0x1a   :  { %p17280_p9 = scmp.lt.u32.totalorder %s17276_s16, %s18273_s3 }
  0x1c   :  { %p17282_p10 = pnand %p17280_p9, %p17277_p8 }
  0x1e   :  { %17285 = shalt.err (!%p17282_p10)
}
  0x1f   :  { %s17286_s22 = scalar_lea.vmem %s65_s13, 2048  ;;  %p17291_p12 = scmp.lt.s32.totalorder %s65_s13, %s65_s13 }
  0x20   :  { %p17287_p11 = scmp.ne.s32.totalorder %s65_s13, %s17286_s22  ;;  %p17292_p13 = scmp.lt.s32.totalorder %s17286_s22, %s17286_s22 }
  0x22   :  { %p17293_p0 = por %p17292_p13, %p17291_p12 }
  0x24   :  { %p17294_p1 = pnand %p17293_p0, %p17287_p11 }
  0x26   :  { %17297 = shalt.err (!%p17294_p1)
}
  0x27   :  { %s17510_s1 = smov 64   ;;  %s17511_s18 = smov 4  }
  0x28   :  { %70 = dma.hbm_to_vmem [thread:$0]  %s18273_s3, 2048, %s65_s13, [#allocation12], %s17510_s1, %s17510_s1, %s17511_s18  }
  0x29   :  { %s17512_s25 = smov [#allocation14]   ;;  %s17513_s29 = smov [#allocation4]  }
  0x2a   :  { %s88_s26 = sshll.u32 %s17512_s25, 4  ;;  %s31_s30 = sshll.u32 %s17513_s29, 4  ;;  %s89_s26 = int_to_ptr.vmem [resolvable:$true] %s88_s26  ;;  %s32_s30 = int_to_ptr.vmem [resolvable:$true] %s31_s30 }
  0x2b   :  { %s17298_s15 = scalar_lea.hbm %s18275_s5, 8192 }
  0x2c   :  { %p17299_p2 = scmp.ne.s32.totalorder %s18275_s5, %s17298_s15  ;;  %p17302_p3 = scmp.lt.u32.totalorder %s17298_s15, %s18275_s5 }
  0x2e   :  { %p17304_p4 = pnand %p17302_p3, %p17299_p2 }
  0x30   :  { %17307 = shalt.err (!%p17304_p4)
}
  0x31   :  { %s17308_s3 = scalar_lea.vmem %s89_s26, 8192  ;;  %p17313_p6 = scmp.lt.s32.totalorder %s89_s26, %s89_s26 }
  0x32   :  { %p17309_p5 = scmp.ne.s32.totalorder %s89_s26, %s17308_s3  ;;  %p17314_p7 = scmp.lt.s32.totalorder %s17308_s3, %s17308_s3 }
  0x34   :  { %p17315_p8 = por %p17314_p7, %p17313_p6 }
  0x36   :  { %p17316_p9 = pnand %p17315_p8, %p17309_p5 }
  0x38   :  { %17319 = shalt.err (!%p17316_p9)
}
  0x39   :  { %94 = dma.hbm_to_vmem [thread:$0]  %s18275_s5, 8192, %s89_s26, [#allocation15], %s17507_s27, %s17507_s27, %s17508_s28  }
  0x3a   :  { %s17320_s24 = scalar_lea.hbm %s18270_s0, 2112 }
  0x3b   :  { %p17321_p10 = scmp.ne.s32.totalorder %s18270_s0, %s17320_s24  ;;  %p17324_p11 = scmp.lt.u32.totalorder %s17320_s24, %s18270_s0 }
  0x3d   :  { %p17326_p12 = pnand %p17324_p11, %p17321_p10 }
  0x3f   :  { %17329 = shalt.err (!%p17326_p12)
}
  0x40   :  { %s17330_s15 = scalar_lea.vmem %s32_s30, 2112  ;;  %p17335_p0 = scmp.lt.s32.totalorder %s32_s30, %s32_s30 }
  0x41   :  { %p17331_p13 = scmp.ne.s32.totalorder %s32_s30, %s17330_s15  ;;  %p17336_p1 = scmp.lt.s32.totalorder %s17330_s15, %s17330_s15 }
  0x43   :  { %p17337_p2 = por %p17336_p1, %p17335_p0 }
  0x45   :  { %p17338_p3 = pnand %p17337_p2, %p17331_p13 }
  0x47   :  { %17341 = shalt.err (!%p17338_p3)
}
  0x48   :  { %34 = dma.hbm_to_vmem [thread:$0]  %s18270_s0, 2112, %s32_s30, [#allocation5]  }
  0x49   :  { %s17514_s28 = smov [#allocation10]   ;;  %s17342_s19 = scalar_lea.hbm %s18272_s2, 8192 }
  0x4a   :  { %s52_s26 = sshll.u32 %s17514_s28, 4  ;;  %p17343_p4 = scmp.ne.s32.totalorder %s18272_s2, %s17342_s19  ;;  %s53_s26 = int_to_ptr.vmem [resolvable:$true] %s52_s26 }
  0x4b   :  { %p17346_p5 = scmp.lt.u32.totalorder %s17342_s19, %s18272_s2 }
  0x4d   :  { %p17348_p6 = pnand %p17346_p5, %p17343_p4 }
  0x4f   :  { %17351 = shalt.err (!%p17348_p6)
}
  0x50   :  { %s17352_s22 = scalar_lea.vmem %s53_s26, 8192  ;;  %p17357_p8 = scmp.lt.s32.totalorder %s53_s26, %s53_s26 }
  0x51   :  { %p17353_p7 = scmp.ne.s32.totalorder %s53_s26, %s17352_s22  ;;  %p17358_p9 = scmp.lt.s32.totalorder %s17352_s22, %s17352_s22 }
  0x53   :  { %p17359_p10 = por %p17358_p9, %p17357_p8 }
  0x55   :  { %p17360_p11 = pnand %p17359_p10, %p17353_p7 }
  0x57   :  { %17363 = shalt.err (!%p17360_p11)
}
  0x58   :  { %s17515_s0 = smov 128   ;;  %s17516_s30 = smov 8  }
  0x59   :  { %58 = dma.hbm_to_vmem [thread:$0]  %s18272_s2, 8192, %s53_s26, [#allocation9], %s17515_s0, %s17515_s0, %s17516_s30  }
  0x5a   :  { %s17517_s25 = smov [#allocation13]   ;;  %s17518_s12 = smov [#allocation16]  }
  0x5b   :  { %s76_s29 = sshll.u32 %s17517_s25, 4  ;;  %s101_s14 = sshll.u32 %s17518_s12, 4  ;;  %s77_s29 = int_to_ptr.vmem [resolvable:$true] %s76_s29  ;;  %s102_s14 = int_to_ptr.vmem [resolvable:$true] %s101_s14 }
  0x5c   :  { %s17364_s27 = scalar_lea.hbm %s18274_s4, 2048 }
  0x5d   :  { %p17365_p12 = scmp.ne.s32.totalorder %s18274_s4, %s17364_s27  ;;  %p17368_p13 = scmp.lt.u32.totalorder %s17364_s27, %s18274_s4 }
  0x5f   :  { %p17370_p0 = pnand %p17368_p13, %p17365_p12 }
  0x61   :  { %17373 = shalt.err (!%p17370_p0)
}
  0x62   :  { %s17374_s2 = scalar_lea.vmem %s77_s29, 2048  ;;  %p17379_p2 = scmp.lt.s32.totalorder %s77_s29, %s77_s29 }
  0x63   :  { %p17375_p1 = scmp.ne.s32.totalorder %s77_s29, %s17374_s2  ;;  %p17380_p3 = scmp.lt.s32.totalorder %s17374_s2, %s17374_s2 }
  0x65   :  { %p17381_p4 = por %p17380_p3, %p17379_p2 }
  0x67   :  { %p17382_p5 = pnand %p17381_p4, %p17375_p1 }
  0x69   :  { %17385 = shalt.err (!%p17382_p5)
}
  0x6a   :  { %82 = dma.hbm_to_vmem [thread:$0]  %s18274_s4, 2048, %s77_s29, [#allocation12], %s17515_s0, %s17515_s0, %s17516_s30  }
  0x6b   :  { %s17386_s21 = scalar_lea.hbm %s18277_s7, 736 }
  0x6c   :  { %p17387_p6 = scmp.ne.s32.totalorder %s18277_s7, %s17386_s21  ;;  %p17390_p7 = scmp.lt.u32.totalorder %s17386_s21, %s18277_s7 }
  0x6e   :  { %p17392_p8 = pnand %p17390_p7, %p17387_p6 }
  0x70   :  { %17395 = shalt.err (!%p17392_p8)
}
  0x71   :  { %s17396_s12 = scalar_lea.vmem %s102_s14, 736  ;;  %p17401_p10 = scmp.lt.s32.totalorder %s102_s14, %s102_s14 }
  0x72   :  { %p17397_p9 = scmp.ne.s32.totalorder %s102_s14, %s17396_s12  ;;  %p17402_p11 = scmp.lt.s32.totalorder %s17396_s12, %s17396_s12 }
  0x74   :  { %p17403_p12 = por %p17402_p11, %p17401_p10 }
  0x76   :  { %p17404_p13 = pnand %p17403_p12, %p17397_p9 }
  0x78   :  { %17407 = shalt.err (!%p17404_p13)
}
  0x79   :  { %104 = dma.hbm_to_vmem [thread:$0]  %s18277_s7, 736, %s102_s14, [#allocation15]  }
  0x7a   :  { %s17519_s29 = smov [#allocation17]   ;;  %s17408_s28 = scalar_lea.hbm %s18278_s8, 736 }
  0x7b   :  { %s111_s15 = sshll.u32 %s17519_s29, 4  ;;  %p17409_p0 = scmp.ne.s32.totalorder %s18278_s8, %s17408_s28  ;;  %s112_s15 = int_to_ptr.vmem [resolvable:$true] %s111_s15 }
  0x7c   :  { %p17412_p1 = scmp.lt.u32.totalorder %s17408_s28, %s18278_s8 }
  0x7e   :  { %p17414_p2 = pnand %p17412_p1, %p17409_p0 }
  0x80   :  { %17417 = shalt.err (!%p17414_p2)
}
  0x81   :  { %s17418_s26 = scalar_lea.vmem %s112_s15, 736  ;;  %p17423_p4 = scmp.lt.s32.totalorder %s112_s15, %s112_s15 }
  0x82   :  { %p17419_p3 = scmp.ne.s32.totalorder %s112_s15, %s17418_s26  ;;  %p17424_p5 = scmp.lt.s32.totalorder %s17418_s26, %s17418_s26 }
  0x84   :  { %p17425_p6 = por %p17424_p5, %p17423_p4 }
  0x86   :  { %p17426_p7 = pnand %p17425_p6, %p17419_p3 }
  0x88   :  { %17429 = shalt.err (!%p17426_p7)
}
  0x89   :  { %114 = dma.hbm_to_vmem [thread:$0]  %s18278_s8, 736, %s112_s15, [#allocation18]  }
  0x8a   :  { %s17430_s13 = scalar_lea.hbm %s18279_s9, 16 }
  0x8b   :  { %p17431_p8 = scmp.ne.s32.totalorder %s18279_s9, %s17430_s13  ;;  %p17434_p9 = scmp.lt.u32.totalorder %s17430_s13, %s18279_s9 }
  0x8d   :  { %p17436_p10 = pnand %p17434_p9, %p17431_p8 }
  0x8f   :  { %17439 = shalt.err (!%p17436_p10)
}
  0x90   :  { %s17520_s25 = smov [#allocation19]  }
  0x91   :  { %122 = dma.hbm_to_smem %s18279_s9, 16, %s17520_s25, [#allocation7]  }
  0x92   :  { %17484 = dma.done.wait [#allocation5], 2112  }
  0x93   :  { %17485 = vsyncadd [#allocation5], 4294965184 }
  0x94   :  { %17486 = dma.done.wait [#allocation9], 143360  }
  0x95   :  { %17487 = vsyncadd [#allocation9], 4294823936 }
  0x96   :  { %17488 = dma.done.wait [#allocation12], 4096  }
  0x97   :  { %17489 = vsyncadd [#allocation12], 4294963200 }
  0x98   :  { %17490 = dma.done.wait [#allocation15], 8928  }
  0x99   :  { %17491 = vsyncadd [#allocation15], 4294958368 }
  0x9a   :  { %17492 = dma.done.wait [#allocation18], 736  }
  0x9b   :  { %17493 = vsyncadd [#allocation18], 4294966560 }
  0x9c   :  { %17494 = dma.done.wait [#allocation7], 16  }
  0x9d   :  { %17495 = vsyncadd [#allocation7], 4294967280 }
  0x9e   :  { %150 = sfence }
  0x9f   :  { %s156_s8 = sld [smem:[#allocation0]]   ;;  %s17521_s30 = smov [#allocation2]  }
  0xa0   :  { %s164_s29 = sshll.u32 %s17521_s30, 4  ;;  %s17522_s15 = smov 4224   ;;  %s165_s29 = int_to_ptr.vmem [resolvable:$true] %s164_s29 }
  0xa1   :  { %168 = sst [smem:[#allocation24]] %s17522_s15  ;;  %s17523_s9 = smov 1408  }
  0xa2   :  { %170 = sst [smem:[#allocation24 + $0x1]] %s17523_s9  ;;  %s17524_s5 = smov 11  }
  0xa3   :  { %172 = sst [smem:[#allocation24 + $0x2]] %s17524_s5  ;;  %s17525_s16 = smov 2  }
  0xa4   :  { %174 = sst [smem:[#allocation24 + $0x3]] %s17510_s1  ;;  %s17526_s17 = smov 2112  }
  0xa5   :  { %s13636_s27 = sshll.u32 %s156_s8, 26  ;;  %176 = sst [smem:[#allocation24 + $0x4]] %s17515_s0 }
  0xa6   :  { %s17723_s28 = sadd.s32 134217728, %s13636_s27  ;;  %178 = sst [smem:[#allocation24 + $0x5]] %s17525_s16 }
  0xa7   :  { %180 = sst [smem:[#allocation24 + $0x6]] %s17526_s17  ;;  %s17527_s19 = smov [#allocation3]  }
  0xa8   :  { %182 = sst [smem:[#allocation24 + $0x7]] %s17510_s1  ;;  %s17528_s2 = smov [#allocation23]  }
  0xa9   :  { %184 = sst [smem:[#allocation24 + $0x8]] %s17511_s18  ;;  %s17529_s14 = smov [#allocation2 + $0xb00]  }
  0xaa   :  { %186 = dma.general %s18276_s6, 45056, %s165_s29, %s17527_s19, %s17528_s2, [#allocation24], %s17723_s28, 0  }
  0xab   :  { %205 = sst [smem:[#allocation26]] %s17522_s15  ;;  %s201_s20 = sshll.u32 %s17529_s14, 4  ;;  %s202_s20 = int_to_ptr.vmem [resolvable:$true] %s201_s20 }
  0xac   :  { %207 = sst [smem:[#allocation26 + $0x1]] %s17523_s9  ;;  %s187_s21 = scalar_lea.hbm %s18276_s6, 704 }
  0xad   :  { %209 = sst [smem:[#allocation26 + $0x2]] %s17524_s5  ;;  %s17530_s22 = smov [#allocation3 + $0x1]  }
  0xae   :  { %211 = sst [smem:[#allocation26 + $0x3]] %s17510_s1  ;;  %s17531_s23 = smov [#allocation25]  }
  0xaf   :  { %213 = sst [smem:[#allocation26 + $0x4]] %s17515_s0  ;;  %s17532_s24 = smov [#allocation2 + $0x1600]  }
  0xb0   :  { %215 = sst [smem:[#allocation26 + $0x5]] %s17525_s16  ;;  %s238_s25 = sshll.u32 %s17532_s24, 4  ;;  %s239_s25 = int_to_ptr.vmem [resolvable:$true] %s238_s25 }
  0xb1   :  { %217 = sst [smem:[#allocation26 + $0x6]] %s17526_s17  ;;  %s224_s8 = scalar_lea.hbm %s18276_s6, 1408 }
  0xb2   :  { %219 = sst [smem:[#allocation26 + $0x7]] %s17510_s1  ;;  %s17533_s30 = smov [#allocation3 + $0x2]  }
  0xb3   :  { %221 = sst [smem:[#allocation26 + $0x8]] %s17511_s18  ;;  %s17534_s29 = smov [#allocation27]  }
  0xb4   :  { %223 = dma.general %s187_s21, 45056, %s202_s20, %s17530_s22, %s17531_s23, [#allocation26], %s17723_s28, 0  }
  0xb5   :  { %242 = sst [smem:[#allocation28]] %s17522_s15 }
  0xb6   :  { %244 = sst [smem:[#allocation28 + $0x1]] %s17523_s9 }
  0xb7   :  { %246 = sst [smem:[#allocation28 + $0x2]] %s17524_s5 }
  0xb8   :  { %248 = sst [smem:[#allocation28 + $0x3]] %s17510_s1 }
  0xb9   :  { %250 = sst [smem:[#allocation28 + $0x4]] %s17515_s0 }
  0xba   :  { %252 = sst [smem:[#allocation28 + $0x5]] %s17525_s16 }
  0xbb   :  { %254 = sst [smem:[#allocation28 + $0x6]] %s17526_s17 }
  0xbc   :  { %256 = sst [smem:[#allocation28 + $0x7]] %s17510_s1 }
  0xbd   :  { %258 = sst [smem:[#allocation28 + $0x8]] %s17511_s18 }
  0xbe   :  { %260 = dma.general %s224_s8, 45056, %s239_s25, %s17533_s30, %s17534_s29, [#allocation28], %s17723_s28, 0  }
  0xbf   :  { %v15285_v0 = vld [vmem:[#allocation8 + $0x4] ss:$16 sps:$4 sm:$0xff]   ;;  %v15287_v1 = vld [vmem:[#allocation8 + $0xc] ss:$16 sps:$4 sm:$0xff]   ;;  %v15289_v2 = vld [vmem:[#allocation8] ss:$16 sps:$4 sm:$0xff]  }
  0xc0   :  { %6730 = vmatprep.subr.bf16.mxu0 %v15285_v0  ;;  %v15290_v3 = vld [vmem:[#allocation8 + $0x8] ss:$16 sps:$4 sm:$0xff]   ;;  %7427 = vmatprep.subr.bf16.mxu1 %v15287_v1  ;;  %v15291_v4 = vld [vmem:[#allocation8 + $0x24] ss:$16 sps:$4 sm:$0xff]   ;;  %v15293_v5 = vld [vmem:[#allocation8 + $0x2c] ss:$16 sps:$4 sm:$0xff]  }
  0xc1   :  { %6731 = vmatpush1.bf16.msra.mxu0 %v15289_v2  ;;  %7428 = vmatpush1.bf16.msra.mxu1 %v15290_v3  ;;  %v15295_v6 = vld [vmem:[#allocation8 + $0x20] ss:$16 sps:$4 sm:$0xff]   ;;  %v15296_v7 = vld [vmem:[#allocation8 + $0x28] ss:$16 sps:$4 sm:$0xff]   ;;  %v15297_v8 = vld [vmem:[#allocation8 + $0x44] ss:$16 sps:$4 sm:$0xff]  }
  0xc2   :  { %6732 = vmatprep.subr.bf16.mxu0 %v15291_v4  ;;  %7429 = vmatprep.subr.bf16.mxu1 %v15293_v5  ;;  %v15299_v9 = vld [vmem:[#allocation8 + $0x4c] ss:$16 sps:$4 sm:$0xff]   ;;  %v15301_v10 = vld [vmem:[#allocation8 + $0x40] ss:$16 sps:$4 sm:$0xff]   ;;  %v15302_v11 = vld [vmem:[#allocation8 + $0x48] ss:$16 sps:$4 sm:$0xff]  }
  0xc3   :  { %v15303_v12 = vld [vmem:[#allocation8 + $0x64] ss:$16 sps:$4 sm:$0xff]   ;;  %v15305_v13 = vld [vmem:[#allocation8 + $0x6c] ss:$16 sps:$4 sm:$0xff]   ;;  %v15307_v14 = vld [vmem:[#allocation8 + $0x60] ss:$16 sps:$4 sm:$0xff]  }
  0xc4   :  { %v15308_v15 = vld [vmem:[#allocation8 + $0x68] ss:$16 sps:$4 sm:$0xff]   ;;  %v15309_v16 = vld [vmem:[#allocation8 + $0x84] ss:$16 sps:$4 sm:$0xff]   ;;  %v15311_v17 = vld [vmem:[#allocation8 + $0x8c] ss:$16 sps:$4 sm:$0xff]  }
  0xc5   :  { %6733 = vmatpush1.bf16.msra.mxu0 %v15295_v6  ;;  %7430 = vmatpush1.bf16.msra.mxu1 %v15296_v7  ;;  %v15313_v18 = vld [vmem:[#allocation8 + $0x80] ss:$16 sps:$4 sm:$0xff]   ;;  %v15314_v19 = vld [vmem:[#allocation8 + $0x88] ss:$16 sps:$4 sm:$0xff]   ;;  %v15315_v20 = vld [vmem:[#allocation8 + $0xa4] ss:$16 sps:$4 sm:$0xff]  }
  0xc6   :  { %6734 = vmatprep.subr.bf16.mxu0 %v15297_v8  ;;  %7431 = vmatprep.subr.bf16.mxu1 %v15299_v9  ;;  %v15317_v21 = vld [vmem:[#allocation8 + $0xac] ss:$16 sps:$4 sm:$0xff]   ;;  %v15319_v22 = vld [vmem:[#allocation8 + $0xa0] ss:$16 sps:$4 sm:$0xff]   ;;  %v15320_v23 = vld [vmem:[#allocation8 + $0xa8] ss:$16 sps:$4 sm:$0xff]  }
  0xc7   :  { %v15321_v24 = vld [vmem:[#allocation8 + $0xc4] ss:$16 sps:$4 sm:$0xff]   ;;  %v15323_v25 = vld [vmem:[#allocation8 + $0xcc] ss:$16 sps:$4 sm:$0xff]   ;;  %v15325_v26 = vld [vmem:[#allocation8 + $0xc0] ss:$16 sps:$4 sm:$0xff]  }
  0xc8   :  { %v15326_v27 = vld [vmem:[#allocation8 + $0xc8] ss:$16 sps:$4 sm:$0xff]   ;;  %v15327_v28 = vld [vmem:[#allocation8 + $0xe4] ss:$16 sps:$4 sm:$0xff]   ;;  %v15329_v29 = vld [vmem:[#allocation8 + $0xec] ss:$16 sps:$4 sm:$0xff]  }
  0xc9   :  { %6735 = vmatpush1.bf16.msra.mxu0 %v15301_v10  ;;  %7432 = vmatpush1.bf16.msra.mxu1 %v15302_v11  ;;  %v15331_v30 = vld [vmem:[#allocation8 + $0xe0] ss:$16 sps:$4 sm:$0xff]   ;;  %v15332_v31 = vld [vmem:[#allocation8 + $0xe8] ss:$16 sps:$4 sm:$0xff]   ;;  %v15333_v32 = vld [vmem:[#allocation8 + $0x104] ss:$16 sps:$4 sm:$0xff]  }
  0xca   :  { %6736 = vmatprep.subr.bf16.mxu0 %v15303_v12  ;;  %7433 = vmatprep.subr.bf16.mxu1 %v15305_v13  ;;  %v15335_v33 = vld [vmem:[#allocation8 + $0x10c] ss:$16 sps:$4 sm:$0xff]   ;;  %v15337_v34 = vld [vmem:[#allocation8 + $0x100] ss:$16 sps:$4 sm:$0xff]   ;;  %v15338_v35 = vld [vmem:[#allocation8 + $0x108] ss:$16 sps:$4 sm:$0xff]  }
  0xcb   :  { %v15339_v36 = vld [vmem:[#allocation8 + $0x124] ss:$16 sps:$4 sm:$0xff]   ;;  %v15341_v37 = vld [vmem:[#allocation8 + $0x12c] ss:$16 sps:$4 sm:$0xff]   ;;  %v15343_v38 = vld [vmem:[#allocation8 + $0x120] ss:$16 sps:$4 sm:$0xff]  }
  0xcc   :  { %v15344_v39 = vld [vmem:[#allocation8 + $0x128] ss:$16 sps:$4 sm:$0xff]   ;;  %v15345_v40 = vld [vmem:[#allocation8 + $0x144] ss:$16 sps:$4 sm:$0xff]   ;;  %v15347_v41 = vld [vmem:[#allocation8 + $0x14c] ss:$16 sps:$4 sm:$0xff]  }
  0xcd   :  { %6737 = vmatpush1.bf16.msra.mxu0 %v15307_v14  ;;  %7434 = vmatpush1.bf16.msra.mxu1 %v15308_v15  ;;  %v15349_v42 = vld [vmem:[#allocation8 + $0x140] ss:$16 sps:$4 sm:$0xff]   ;;  %v15350_v43 = vld [vmem:[#allocation8 + $0x148] ss:$16 sps:$4 sm:$0xff]   ;;  %v15351_v44 = vld [vmem:[#allocation8 + $0x164] ss:$16 sps:$4 sm:$0xff]  }
  0xce   :  { %6738 = vmatprep.subr.bf16.mxu0 %v15309_v16  ;;  %7435 = vmatprep.subr.bf16.mxu1 %v15311_v17  ;;  %v15353_v45 = vld [vmem:[#allocation8 + $0x16c] ss:$16 sps:$4 sm:$0xff]   ;;  %v15355_v47 = vld [vmem:[#allocation8 + $0x160] ss:$16 sps:$4 sm:$0xff]   ;;  %v15356_v49 = vld [vmem:[#allocation8 + $0x168] ss:$16 sps:$4 sm:$0xff]  }
  0xcf   :  { %v261_v46 = vld [vmem:[#allocation4] sm:$0xff]  ;;  %v15357_v50 = vld [vmem:[#allocation8 + $0x184] ss:$16 sps:$4 sm:$0xff]   ;;  %v15362_v53 = vld [vmem:[#allocation8 + $0x188] ss:$16 sps:$4 sm:$0xff]   ;;  %s9241_s6 = sld [smem:[#allocation19]] }
  0xd0   :  { %v13643_v48 = vcombine.high %v261_v46, %v261_v46  ;;  %v15359_v51 = vld [vmem:[#allocation8 + $0x18c] ss:$16 sps:$4 sm:$0xff]   ;;  %v15361_v52 = vld [vmem:[#allocation8 + $0x180] ss:$16 sps:$4 sm:$0xff]   ;;  %v15363_v54 = vld [vmem:[#allocation8 + $0x1a4] ss:$16 sps:$4 sm:$0xff]   ;;  %v13642_v4 = vcombine.low %v261_v46, %v261_v46 }
  0xd1   :  { %6739 = vmatpush1.bf16.msra.mxu0 %v15313_v18  ;;  %7436 = vmatpush1.bf16.msra.mxu1 %v15314_v19  ;;  %v15365_v55 = vld [vmem:[#allocation8 + $0x1ac] ss:$16 sps:$4 sm:$0xff]   ;;  %v15367_v56 = vld [vmem:[#allocation8 + $0x1a0] ss:$16 sps:$4 sm:$0xff]   ;;  %v15368_v57 = vld [vmem:[#allocation8 + $0x1a8] ss:$16 sps:$4 sm:$0xff]  }
  0xd2   :  { %6740 = vmatprep.subr.bf16.mxu0 %v15315_v20  ;;  %7437 = vmatprep.subr.bf16.mxu1 %v15317_v21  ;;  %v15369_v58 = vld [vmem:[#allocation8 + $0x1c4] ss:$16 sps:$4 sm:$0xff]   ;;  %v15371_v59 = vld [vmem:[#allocation8 + $0x1cc] ss:$16 sps:$4 sm:$0xff]   ;;  %v15373_v60 = vld [vmem:[#allocation8 + $0x1c0] ss:$16 sps:$4 sm:$0xff]  }
  0xd3   :  { %6762 = vmatprep.mubr.bf16.mxu0 %v13643_v48  ;;  %7459 = vmatprep.mubr.bf16.mxu1 %v13643_v48  ;;  %v15374_v61 = vld [vmem:[#allocation8 + $0x1c8] ss:$16 sps:$4 sm:$0xff]   ;;  %v15375_v62 = vld [vmem:[#allocation8 + $0x1e4] ss:$16 sps:$4 sm:$0xff]   ;;  %v15377_v63 = vld [vmem:[#allocation8 + $0x1ec] ss:$16 sps:$4 sm:$0xff]  }
  0xd4   :  { %v15379_v0 = vld [vmem:[#allocation8 + $0x1e0] ss:$16 sps:$4 sm:$0xff]   ;;  %v15380_v1 = vld [vmem:[#allocation8 + $0x1e8] ss:$16 sps:$4 sm:$0xff]   ;;  %v15385_v2 = vld [vmem:[#allocation8 + $0x204] ss:$16 sps:$4 sm:$0xff]  }
  0xd5   :  { %6741 = vmatpush1.bf16.msra.mxu0 %v15319_v22  ;;  %7438 = vmatpush1.bf16.msra.mxu1 %v15320_v23  ;;  %v15388_v3 = vld [vmem:[#allocation8 + $0x20c] ss:$16 sps:$4 sm:$0xff]   ;;  %v15383_v5 = vld [vmem:[#allocation8 + $0x200] ss:$16 sps:$4 sm:$0xff]   ;;  %v15386_v6 = vld [vmem:[#allocation8 + $0x208] ss:$16 sps:$4 sm:$0xff]  }
  0xd6   :  { %6742 = vmatprep.subr.bf16.mxu0 %v15321_v24  ;;  %7439 = vmatprep.subr.bf16.mxu1 %v15323_v25  ;;  %v15391_v7 = vld [vmem:[#allocation8 + $0x224] ss:$16 sps:$4 sm:$0xff]   ;;  %v15394_v8 = vld [vmem:[#allocation8 + $0x22c] ss:$16 sps:$4 sm:$0xff]   ;;  %v15389_v9 = vld [vmem:[#allocation8 + $0x220] ss:$16 sps:$4 sm:$0xff]  }
  0xd7   :  { %v15392_v10 = vld [vmem:[#allocation8 + $0x228] ss:$16 sps:$4 sm:$0xff]   ;;  %v15397_v11 = vld [vmem:[#allocation8 + $0x244] ss:$16 sps:$4 sm:$0xff]   ;;  %v15400_v12 = vld [vmem:[#allocation8 + $0x24c] ss:$16 sps:$4 sm:$0xff]  }
  0xd8   :  { %v15395_v13 = vld [vmem:[#allocation8 + $0x240] ss:$16 sps:$4 sm:$0xff]   ;;  %v15398_v14 = vld [vmem:[#allocation8 + $0x248] ss:$16 sps:$4 sm:$0xff]   ;;  %v15403_v15 = vld [vmem:[#allocation8 + $0x264] ss:$16 sps:$4 sm:$0xff]  }
  0xd9   :  { %6743 = vmatpush1.bf16.msra.mxu0 %v15325_v26  ;;  %7440 = vmatpush1.bf16.msra.mxu1 %v15326_v27  ;;  %v15406_v16 = vld [vmem:[#allocation8 + $0x26c] ss:$16 sps:$4 sm:$0xff]   ;;  %v15401_v17 = vld [vmem:[#allocation8 + $0x260] ss:$16 sps:$4 sm:$0xff]   ;;  %v15404_v18 = vld [vmem:[#allocation8 + $0x268] ss:$16 sps:$4 sm:$0xff]  }
  0xda   :  { %6744 = vmatprep.subr.bf16.mxu0 %v15327_v28  ;;  %7441 = vmatprep.subr.bf16.mxu1 %v15329_v29  ;;  %v15409_v19 = vld [vmem:[#allocation8 + $0x284] ss:$16 sps:$4 sm:$0xff]   ;;  %v15412_v20 = vld [vmem:[#allocation8 + $0x28c] ss:$16 sps:$4 sm:$0xff]   ;;  %v15407_v21 = vld [vmem:[#allocation8 + $0x280] ss:$16 sps:$4 sm:$0xff]  }
  0xdb   :  { %v15410_v22 = vld [vmem:[#allocation8 + $0x288] ss:$16 sps:$4 sm:$0xff]   ;;  %v15415_v23 = vld [vmem:[#allocation8 + $0x2a4] ss:$16 sps:$4 sm:$0xff]   ;;  %v15418_v24 = vld [vmem:[#allocation8 + $0x2ac] ss:$16 sps:$4 sm:$0xff]  }
  0xdc   :  { %v15413_v25 = vld [vmem:[#allocation8 + $0x2a0] ss:$16 sps:$4 sm:$0xff]   ;;  %v15416_v26 = vld [vmem:[#allocation8 + $0x2a8] ss:$16 sps:$4 sm:$0xff]   ;;  %v15421_v27 = vld [vmem:[#allocation8 + $0x2c4] ss:$16 sps:$4 sm:$0xff]  }
  0xdd   :  { %6745 = vmatpush1.bf16.msra.mxu0 %v15331_v30  ;;  %7442 = vmatpush1.bf16.msra.mxu1 %v15332_v31  ;;  %v15424_v28 = vld [vmem:[#allocation8 + $0x2cc] ss:$16 sps:$4 sm:$0xff]   ;;  %v17760_v29 = vld [vmem:[#allocation4 + $0x8] sm:$0xff]  ;;  %v15419_v31 = vld [vmem:[#allocation8 + $0x2c0] ss:$16 sps:$4 sm:$0xff]   ;;  %s14900_s1 = sld [smem:[#allocation19 + $0x1]] }
  0xde   :  { %6746 = vmatprep.subr.bf16.mxu0 %v15333_v32  ;;  %7443 = vmatprep.subr.bf16.mxu1 %v15335_v33  ;;  %v13645_v30 = vcombine.high %v17760_v29, %v17760_v29  ;;  %v15422_v32 = vld [vmem:[#allocation8 + $0x2c8] ss:$16 sps:$4 sm:$0xff]   ;;  %v15427_v33 = vld [vmem:[#allocation8 + $0x2e4] ss:$16 sps:$4 sm:$0xff]   ;;  %v15448_v46 = vld [vmem:[#allocation8 + $0x34c] ss:$16 sps:$4 sm:$0xff]  }
  0xdf   :  { %v15446_v48 = vld [vmem:[#allocation8 + $0x348] ss:$16 sps:$4 sm:$0xff]  }
  0xe1   :  { %6747 = vmatpush1.bf16.msra.mxu0 %v15337_v34  ;;  %7444 = vmatpush1.bf16.msra.mxu1 %v15338_v35  ;;  %v15430_v34 = vld [vmem:[#allocation8 + $0x2ec] ss:$16 sps:$4 sm:$0xff]   ;;  %v15425_v35 = vld [vmem:[#allocation8 + $0x2e0] ss:$16 sps:$4 sm:$0xff]  }
  0xe2   :  { %6748 = vmatprep.subr.bf16.mxu0 %v15339_v36  ;;  %7445 = vmatprep.subr.bf16.mxu1 %v15341_v37  ;;  %v15428_v36 = vld [vmem:[#allocation8 + $0x2e8] ss:$16 sps:$4 sm:$0xff]   ;;  %v15433_v37 = vld [vmem:[#allocation8 + $0x304] ss:$16 sps:$4 sm:$0xff]  }
  0xe5   :  { %6749 = vmatpush1.bf16.msra.mxu0 %v15343_v38  ;;  %7446 = vmatpush1.bf16.msra.mxu1 %v15344_v39  ;;  %v15436_v38 = vld [vmem:[#allocation8 + $0x30c] ss:$16 sps:$4 sm:$0xff]   ;;  %v15431_v39 = vld [vmem:[#allocation8 + $0x300] ss:$16 sps:$4 sm:$0xff]  }
  0xe6   :  { %6750 = vmatprep.subr.bf16.mxu0 %v15345_v40  ;;  %7447 = vmatprep.subr.bf16.mxu1 %v15347_v41  ;;  %v15434_v40 = vld [vmem:[#allocation8 + $0x308] ss:$16 sps:$4 sm:$0xff]   ;;  %v15439_v41 = vld [vmem:[#allocation8 + $0x324] ss:$16 sps:$4 sm:$0xff]  }
  0xe9   :  { %6751 = vmatpush1.bf16.msra.mxu0 %v15349_v42  ;;  %7448 = vmatpush1.bf16.msra.mxu1 %v15350_v43  ;;  %v15442_v42 = vld [vmem:[#allocation8 + $0x32c] ss:$16 sps:$4 sm:$0xff]   ;;  %v15437_v43 = vld [vmem:[#allocation8 + $0x320] ss:$16 sps:$4 sm:$0xff]  }
  0xea   :  { %6752 = vmatprep.subr.bf16.mxu0 %v15351_v44  ;;  %7449 = vmatprep.subr.bf16.mxu1 %v15353_v45  ;;  %v15440_v44 = vld [vmem:[#allocation8 + $0x328] ss:$16 sps:$4 sm:$0xff]   ;;  %v15445_v45 = vld [vmem:[#allocation8 + $0x344] ss:$16 sps:$4 sm:$0xff]  }
  0xed   :  { %6753 = vmatpush1.bf16.msra.mxu0 %v15355_v47  ;;  %7450 = vmatpush1.bf16.msra.mxu1 %v15356_v49  ;;  %v15443_v47 = vld [vmem:[#allocation8 + $0x340] ss:$16 sps:$4 sm:$0xff]   ;;  %v15451_v49 = vld [vmem:[#allocation8 + $0x364] ss:$16 sps:$4 sm:$0xff]  }
  0xee   :  { %6754 = vmatprep.subr.bf16.mxu0 %v15357_v50  ;;  %7451 = vmatprep.subr.bf16.mxu1 %v15359_v51  ;;  %v15454_v50 = vld [vmem:[#allocation8 + $0x36c] ss:$16 sps:$4 sm:$0xff]   ;;  %v15449_v51 = vld [vmem:[#allocation8 + $0x360] ss:$16 sps:$4 sm:$0xff]  }
  0xf1   :  { %6755 = vmatpush1.bf16.msra.mxu0 %v15361_v52  ;;  %7452 = vmatpush1.bf16.msra.mxu1 %v15362_v53  ;;  %v15452_v52 = vld [vmem:[#allocation8 + $0x368] ss:$16 sps:$4 sm:$0xff]   ;;  %v15457_v53 = vld [vmem:[#allocation8 + $0x384] ss:$16 sps:$4 sm:$0xff]  }
  0xf2   :  { %6756 = vmatprep.subr.bf16.mxu0 %v15363_v54  ;;  %7453 = vmatprep.subr.bf16.mxu1 %v15365_v55  ;;  %v15460_v54 = vld [vmem:[#allocation8 + $0x38c] ss:$16 sps:$4 sm:$0xff]   ;;  %v15455_v55 = vld [vmem:[#allocation8 + $0x380] ss:$16 sps:$4 sm:$0xff]  }
  0xf5   :  { %6757 = vmatpush1.bf16.msra.mxu0 %v15367_v56  ;;  %7454 = vmatpush1.bf16.msra.mxu1 %v15368_v57  ;;  %v15458_v56 = vld [vmem:[#allocation8 + $0x388] ss:$16 sps:$4 sm:$0xff]   ;;  %v15463_v57 = vld [vmem:[#allocation8 + $0x3a4] ss:$16 sps:$4 sm:$0xff]  }
  0xf6   :  { %6758 = vmatprep.subr.bf16.mxu0 %v15369_v58  ;;  %7455 = vmatprep.subr.bf16.mxu1 %v15371_v59  ;;  %v15466_v58 = vld [vmem:[#allocation8 + $0x3ac] ss:$16 sps:$4 sm:$0xff]   ;;  %v15461_v59 = vld [vmem:[#allocation8 + $0x3a0] ss:$16 sps:$4 sm:$0xff]  }
  0xf9   :  { %6759 = vmatpush1.bf16.msra.mxu0 %v15373_v60  ;;  %7456 = vmatpush1.bf16.msra.mxu1 %v15374_v61  ;;  %v15464_v60 = vld [vmem:[#allocation8 + $0x3a8] ss:$16 sps:$4 sm:$0xff]   ;;  %v15469_v61 = vld [vmem:[#allocation8 + $0x3c4] ss:$16 sps:$4 sm:$0xff]  }
  0xfa   :  { %6760 = vmatprep.subr.bf16.mxu0 %v15375_v62  ;;  %7457 = vmatprep.subr.bf16.mxu1 %v15377_v63  ;;  %v15472_v62 = vld [vmem:[#allocation8 + $0x3cc] ss:$16 sps:$4 sm:$0xff]   ;;  %v15467_v63 = vld [vmem:[#allocation8 + $0x3c0] ss:$16 sps:$4 sm:$0xff]  }
  0xfd   :  { %6761 = vmatpush1.bf16.msra.mxu0 %v15379_v0  ;;  %7458 = vmatpush1.bf16.msra.mxu1 %v15380_v1  ;;  %v15470_v0 = vld [vmem:[#allocation8 + $0x3c8] ss:$16 sps:$4 sm:$0xff]   ;;  %v15475_v1 = vld [vmem:[#allocation8 + $0x3e4] ss:$16 sps:$4 sm:$0xff]  }
  0xfe   :  { %6771 = vmatprep.subr.bf16.mxu0 %v15385_v2  ;;  %7468 = vmatprep.subr.bf16.mxu1 %v15388_v3  ;;  %v15478_v2 = vld [vmem:[#allocation8 + $0x3ec] ss:$16 sps:$4 sm:$0xff]   ;;  %v15473_v3 = vld [vmem:[#allocation8 + $0x3e0] ss:$16 sps:$4 sm:$0xff]  }
 0x100   :  { %6763 = vmatmul.mubr.bf16.vlgmr.msra.gmra.mrb[0].mxu0 %v13642_v4  ;;  %7460 = vmatmul.mubr.bf16.vlgmr.msra.gmra.mrb[0].mxu1 %v13642_v4  ;;  %v15476_v4 = vld [vmem:[#allocation8 + $0x3e8] ss:$16 sps:$4 sm:$0xff]  }
 0x101   :  { %6772 = vmatpush1.bf16.msra.mxu0 %v15383_v5  ;;  %7469 = vmatpush1.bf16.msra.mxu1 %v15386_v6  ;;  %v15483_v5 = vld [vmem:[#allocation8 + $0x404] ss:$16 sps:$4 sm:$0xff]   ;;  %v15486_v6 = vld [vmem:[#allocation8 + $0x40c] ss:$16 sps:$4 sm:$0xff]  }
 0x102   :  { %6773 = vmatprep.subr.bf16.mxu0 %v15391_v7  ;;  %7470 = vmatprep.subr.bf16.mxu1 %v15394_v8  ;;  %v13644_v7 = vcombine.low %v17760_v29, %v17760_v29  ;;  %v15481_v8 = vld [vmem:[#allocation8 + $0x400] ss:$16 sps:$4 sm:$0xff]   ;;  %v15516_v29 = vld [vmem:[#allocation8 + $0x4ac] ss:$16 sps:$4 sm:$0xff]  }
 0x103   :  { %6803 = vmatprep.mubr.bf16.mxu0 %v13645_v30  ;;  %7500 = vmatprep.mubr.bf16.mxu1 %v13645_v30  ;;  %v15511_v30 = vld [vmem:[#allocation8 + $0x4a0] ss:$16 sps:$4 sm:$0xff]  }
 0x105   :  { %6774 = vmatpush1.bf16.msra.mxu0 %v15389_v9  ;;  %7471 = vmatpush1.bf16.msra.mxu1 %v15392_v10  ;;  %v15484_v9 = vld [vmem:[#allocation8 + $0x408] ss:$16 sps:$4 sm:$0xff]   ;;  %v15489_v10 = vld [vmem:[#allocation8 + $0x424] ss:$16 sps:$4 sm:$0xff]  }
 0x106   :  { %6775 = vmatprep.subr.bf16.mxu0 %v15397_v11  ;;  %7472 = vmatprep.subr.bf16.mxu1 %v15400_v12  ;;  %v17766_v11 = vld [vmem:[#allocation4 + $0x10] sm:$0xff] }
 0x107   :  { %v15492_v12 = vld [vmem:[#allocation8 + $0x42c] ss:$16 sps:$4 sm:$0xff]  }
 0x109   :  { %6776 = vmatpush1.bf16.msra.mxu0 %v15395_v13  ;;  %7473 = vmatpush1.bf16.msra.mxu1 %v15398_v14  ;;  %v13647_v13 = vcombine.high %v17766_v11, %v17766_v11  ;;  %v15487_v14 = vld [vmem:[#allocation8 + $0x420] ss:$16 sps:$4 sm:$0xff]  }
 0x10a   :  { %6777 = vmatprep.subr.bf16.mxu0 %v15403_v15  ;;  %7474 = vmatprep.subr.bf16.mxu1 %v15406_v16  ;;  %v15490_v15 = vld [vmem:[#allocation8 + $0x428] ss:$16 sps:$4 sm:$0xff]   ;;  %v15495_v16 = vld [vmem:[#allocation8 + $0x444] ss:$16 sps:$4 sm:$0xff]  }
 0x10d   :  { %6778 = vmatpush1.bf16.msra.mxu0 %v15401_v17  ;;  %7475 = vmatpush1.bf16.msra.mxu1 %v15404_v18  ;;  %v15498_v17 = vld [vmem:[#allocation8 + $0x44c] ss:$16 sps:$4 sm:$0xff]   ;;  %v15493_v18 = vld [vmem:[#allocation8 + $0x440] ss:$16 sps:$4 sm:$0xff]  }
 0x10e   :  { %6779 = vmatprep.subr.bf16.mxu0 %v15409_v19  ;;  %7476 = vmatprep.subr.bf16.mxu1 %v15412_v20  ;;  %v15496_v19 = vld [vmem:[#allocation8 + $0x448] ss:$16 sps:$4 sm:$0xff]   ;;  %v15501_v20 = vld [vmem:[#allocation8 + $0x464] ss:$16 sps:$4 sm:$0xff]  }
 0x111   :  { %6780 = vmatpush1.bf16.msra.mxu0 %v15407_v21  ;;  %7477 = vmatpush1.bf16.msra.mxu1 %v15410_v22  ;;  %v15504_v21 = vld [vmem:[#allocation8 + $0x46c] ss:$16 sps:$4 sm:$0xff]   ;;  %v15499_v22 = vld [vmem:[#allocation8 + $0x460] ss:$16 sps:$4 sm:$0xff]  }
 0x112   :  { %6781 = vmatprep.subr.bf16.mxu0 %v15415_v23  ;;  %7478 = vmatprep.subr.bf16.mxu1 %v15418_v24  ;;  %v15502_v23 = vld [vmem:[#allocation8 + $0x468] ss:$16 sps:$4 sm:$0xff]   ;;  %v15507_v24 = vld [vmem:[#allocation8 + $0x484] ss:$16 sps:$4 sm:$0xff]  }
 0x115   :  { %6782 = vmatpush1.bf16.msra.mxu0 %v15413_v25  ;;  %7479 = vmatpush1.bf16.msra.mxu1 %v15416_v26  ;;  %v15510_v25 = vld [vmem:[#allocation8 + $0x48c] ss:$16 sps:$4 sm:$0xff]   ;;  %v15505_v26 = vld [vmem:[#allocation8 + $0x480] ss:$16 sps:$4 sm:$0xff]  }
 0x116   :  { %6783 = vmatprep.subr.bf16.mxu0 %v15421_v27  ;;  %7480 = vmatprep.subr.bf16.mxu1 %v15424_v28  ;;  %v15508_v27 = vld [vmem:[#allocation8 + $0x488] ss:$16 sps:$4 sm:$0xff]   ;;  %v15513_v28 = vld [vmem:[#allocation8 + $0x4a4] ss:$16 sps:$4 sm:$0xff]  }
 0x119   :  { %6784 = vmatpush1.bf16.msra.mxu0 %v15419_v31  ;;  %7481 = vmatpush1.bf16.msra.mxu1 %v15422_v32  ;;  %v15514_v31 = vld [vmem:[#allocation8 + $0x4a8] ss:$16 sps:$4 sm:$0xff]   ;;  %v15519_v32 = vld [vmem:[#allocation8 + $0x4c4] ss:$16 sps:$4 sm:$0xff]  }
 0x11a   :  { %6785 = vmatprep.subr.bf16.mxu0 %v15427_v33  ;;  %7482 = vmatprep.subr.bf16.mxu1 %v15430_v34  ;;  %v15522_v33 = vld [vmem:[#allocation8 + $0x4cc] ss:$16 sps:$4 sm:$0xff]   ;;  %v15517_v34 = vld [vmem:[#allocation8 + $0x4c0] ss:$16 sps:$4 sm:$0xff]  }
 0x11d   :  { %6786 = vmatpush1.bf16.msra.mxu0 %v15425_v35  ;;  %7483 = vmatpush1.bf16.msra.mxu1 %v15428_v36  ;;  %v15520_v35 = vld [vmem:[#allocation8 + $0x4c8] ss:$16 sps:$4 sm:$0xff]   ;;  %v15525_v36 = vld [vmem:[#allocation8 + $0x4e4] ss:$16 sps:$4 sm:$0xff]  }
 0x11e   :  { %6787 = vmatprep.subr.bf16.mxu0 %v15433_v37  ;;  %7484 = vmatprep.subr.bf16.mxu1 %v15436_v38  ;;  %v15528_v37 = vld [vmem:[#allocation8 + $0x4ec] ss:$16 sps:$4 sm:$0xff]   ;;  %v15523_v38 = vld [vmem:[#allocation8 + $0x4e0] ss:$16 sps:$4 sm:$0xff]  }
 0x121   :  { %6788 = vmatpush1.bf16.msra.mxu0 %v15431_v39  ;;  %7485 = vmatpush1.bf16.msra.mxu1 %v15434_v40  ;;  %v15526_v39 = vld [vmem:[#allocation8 + $0x4e8] ss:$16 sps:$4 sm:$0xff]   ;;  %v15531_v40 = vld [vmem:[#allocation8 + $0x504] ss:$16 sps:$4 sm:$0xff]  }
 0x122   :  { %6789 = vmatprep.subr.bf16.mxu0 %v15439_v41  ;;  %7486 = vmatprep.subr.bf16.mxu1 %v15442_v42  ;;  %v15534_v41 = vld [vmem:[#allocation8 + $0x50c] ss:$16 sps:$4 sm:$0xff]   ;;  %v15529_v42 = vld [vmem:[#allocation8 + $0x500] ss:$16 sps:$4 sm:$0xff]  }
 0x125   :  { %6790 = vmatpush1.bf16.msra.mxu0 %v15437_v43  ;;  %7487 = vmatpush1.bf16.msra.mxu1 %v15440_v44  ;;  %v15532_v43 = vld [vmem:[#allocation8 + $0x508] ss:$16 sps:$4 sm:$0xff]   ;;  %v15537_v44 = vld [vmem:[#allocation8 + $0x524] ss:$16 sps:$4 sm:$0xff]  }
 0x126   :  { %6791 = vmatprep.subr.bf16.mxu0 %v15445_v45  ;;  %7488 = vmatprep.subr.bf16.mxu1 %v15448_v46  ;;  %v15540_v45 = vld [vmem:[#allocation8 + $0x52c] ss:$16 sps:$4 sm:$0xff]   ;;  %v15535_v46 = vld [vmem:[#allocation8 + $0x520] ss:$16 sps:$4 sm:$0xff]  }
 0x129   :  { %6792 = vmatpush1.bf16.msra.mxu0 %v15443_v47  ;;  %7489 = vmatpush1.bf16.msra.mxu1 %v15446_v48  ;;  %v15538_v47 = vld [vmem:[#allocation8 + $0x528] ss:$16 sps:$4 sm:$0xff]   ;;  %v15543_v48 = vld [vmem:[#allocation8 + $0x544] ss:$16 sps:$4 sm:$0xff]  }
 0x12a   :  { %6793 = vmatprep.subr.bf16.mxu0 %v15451_v49  ;;  %7490 = vmatprep.subr.bf16.mxu1 %v15454_v50  ;;  %v15546_v49 = vld [vmem:[#allocation8 + $0x54c] ss:$16 sps:$4 sm:$0xff]   ;;  %v15541_v50 = vld [vmem:[#allocation8 + $0x540] ss:$16 sps:$4 sm:$0xff]  }
 0x12d   :  { %6794 = vmatpush1.bf16.msra.mxu0 %v15449_v51  ;;  %7491 = vmatpush1.bf16.msra.mxu1 %v15452_v52  ;;  %v15544_v51 = vld [vmem:[#allocation8 + $0x548] ss:$16 sps:$4 sm:$0xff]   ;;  %v15549_v52 = vld [vmem:[#allocation8 + $0x564] ss:$16 sps:$4 sm:$0xff]  }
 0x12e   :  { %6795 = vmatprep.subr.bf16.mxu0 %v15457_v53  ;;  %7492 = vmatprep.subr.bf16.mxu1 %v15460_v54  ;;  %v15552_v53 = vld [vmem:[#allocation8 + $0x56c] ss:$16 sps:$4 sm:$0xff]   ;;  %v15547_v54 = vld [vmem:[#allocation8 + $0x560] ss:$16 sps:$4 sm:$0xff]  }
 0x131   :  { %6796 = vmatpush1.bf16.msra.mxu0 %v15455_v55  ;;  %7493 = vmatpush1.bf16.msra.mxu1 %v15458_v56  ;;  %v15550_v55 = vld [vmem:[#allocation8 + $0x568] ss:$16 sps:$4 sm:$0xff]   ;;  %v15555_v56 = vld [vmem:[#allocation8 + $0x584] ss:$16 sps:$4 sm:$0xff]  }
 0x132   :  { %6797 = vmatprep.subr.bf16.mxu0 %v15463_v57  ;;  %7494 = vmatprep.subr.bf16.mxu1 %v15466_v58  ;;  %v15558_v57 = vld [vmem:[#allocation8 + $0x58c] ss:$16 sps:$4 sm:$0xff]   ;;  %v15553_v58 = vld [vmem:[#allocation8 + $0x580] ss:$16 sps:$4 sm:$0xff]  }
 0x135   :  { %6798 = vmatpush1.bf16.msra.mxu0 %v15461_v59  ;;  %7495 = vmatpush1.bf16.msra.mxu1 %v15464_v60  ;;  %v15556_v59 = vld [vmem:[#allocation8 + $0x588] ss:$16 sps:$4 sm:$0xff]   ;;  %v15561_v60 = vld [vmem:[#allocation8 + $0x5a4] ss:$16 sps:$4 sm:$0xff]  }
 0x136   :  { %6799 = vmatprep.subr.bf16.mxu0 %v15469_v61  ;;  %7496 = vmatprep.subr.bf16.mxu1 %v15472_v62  ;;  %v15564_v61 = vld [vmem:[#allocation8 + $0x5ac] ss:$16 sps:$4 sm:$0xff]   ;;  %v15559_v62 = vld [vmem:[#allocation8 + $0x5a0] ss:$16 sps:$4 sm:$0xff]  }
 0x139   :  { %6800 = vmatpush1.bf16.msra.mxu0 %v15467_v63  ;;  %7497 = vmatpush1.bf16.msra.mxu1 %v15470_v0  ;;  %v15562_v63 = vld [vmem:[#allocation8 + $0x5a8] ss:$16 sps:$4 sm:$0xff]   ;;  %v15567_v0 = vld [vmem:[#allocation8 + $0x5c4] ss:$16 sps:$4 sm:$0xff]  }
 0x13a   :  { %6801 = vmatprep.subr.bf16.mxu0 %v15475_v1  ;;  %7498 = vmatprep.subr.bf16.mxu1 %v15478_v2  ;;  %v15570_v1 = vld [vmem:[#allocation8 + $0x5cc] ss:$16 sps:$4 sm:$0xff]   ;;  %v15565_v2 = vld [vmem:[#allocation8 + $0x5c0] ss:$16 sps:$4 sm:$0xff]  }
 0x13d   :  { %6802 = vmatpush1.bf16.msra.mxu0 %v15473_v3  ;;  %7499 = vmatpush1.bf16.msra.mxu1 %v15476_v4  ;;  %v15568_v3 = vld [vmem:[#allocation8 + $0x5c8] ss:$16 sps:$4 sm:$0xff]   ;;  %v15573_v4 = vld [vmem:[#allocation8 + $0x5e4] ss:$16 sps:$4 sm:$0xff]  }
 0x13e   :  { %6812 = vmatprep.subr.bf16.mxu0 %v15483_v5  ;;  %7509 = vmatprep.subr.bf16.mxu1 %v15486_v6  ;;  %v15576_v5 = vld [vmem:[#allocation8 + $0x5ec] ss:$16 sps:$4 sm:$0xff]   ;;  %v15571_v6 = vld [vmem:[#allocation8 + $0x5e0] ss:$16 sps:$4 sm:$0xff]  }
 0x140   :  { %6804 = vmatmul.mubr.bf16.vlgmr.msra.gmra.mrb[0].mxu0 %v13644_v7  ;;  %7501 = vmatmul.mubr.bf16.vlgmr.msra.gmra.mrb[0].mxu1 %v13644_v7  ;;  %v15574_v7 = vld [vmem:[#allocation8 + $0x5e8] ss:$16 sps:$4 sm:$0xff]  }
 0x141   :  { %6813 = vmatpush1.bf16.msra.mxu0 %v15481_v8  ;;  %7510 = vmatpush1.bf16.msra.mxu1 %v15484_v9  ;;  %v15581_v8 = vld [vmem:[#allocation8 + $0x604] ss:$16 sps:$4 sm:$0xff]   ;;  %v15584_v9 = vld [vmem:[#allocation8 + $0x60c] ss:$16 sps:$4 sm:$0xff]  }
 0x142   :  { %6814 = vmatprep.subr.bf16.mxu0 %v15489_v10  ;;  %7511 = vmatprep.subr.bf16.mxu1 %v15492_v12  ;;  %v15579_v10 = vld [vmem:[#allocation8 + $0x600] ss:$16 sps:$4 sm:$0xff]   ;;  %v13646_v12 = vcombine.low %v17766_v11, %v17766_v11  ;;  %v15596_v11 = vld [vmem:[#allocation8 + $0x64c] ss:$16 sps:$4 sm:$0xff]  }
 0x143   :  { %6844 = vmatprep.mubr.bf16.mxu0 %v13647_v13  ;;  %7541 = vmatprep.mubr.bf16.mxu1 %v13647_v13  ;;  %v15582_v13 = vld [vmem:[#allocation8 + $0x608] ss:$16 sps:$4 sm:$0xff]  }
 0x145   :  { %6815 = vmatpush1.bf16.msra.mxu0 %v15487_v14  ;;  %7512 = vmatpush1.bf16.msra.mxu1 %v15490_v15  ;;  %v17772_v14 = vld [vmem:[#allocation4 + $0x18] sm:$0xff] }
 0x146   :  { %6816 = vmatprep.subr.bf16.mxu0 %v15495_v16  ;;  %7513 = vmatprep.subr.bf16.mxu1 %v15498_v17  ;;  %v15587_v15 = vld [vmem:[#allocation8 + $0x624] ss:$16 sps:$4 sm:$0xff]   ;;  %v15590_v16 = vld [vmem:[#allocation8 + $0x62c] ss:$16 sps:$4 sm:$0xff]   ;;  %v13649_v17 = vcombine.high %v17772_v14, %v17772_v14 }
 0x149   :  { %6817 = vmatpush1.bf16.msra.mxu0 %v15493_v18  ;;  %7514 = vmatpush1.bf16.msra.mxu1 %v15496_v19  ;;  %v15585_v18 = vld [vmem:[#allocation8 + $0x620] ss:$16 sps:$4 sm:$0xff]   ;;  %v15588_v19 = vld [vmem:[#allocation8 + $0x628] ss:$16 sps:$4 sm:$0xff]  }
 0x14a   :  { %6818 = vmatprep.subr.bf16.mxu0 %v15501_v20  ;;  %7515 = vmatprep.subr.bf16.mxu1 %v15504_v21  ;;  %v15593_v20 = vld [vmem:[#allocation8 + $0x644] ss:$16 sps:$4 sm:$0xff]   ;;  %v15591_v21 = vld [vmem:[#allocation8 + $0x640] ss:$16 sps:$4 sm:$0xff]  }
 0x14d   :  { %6819 = vmatpush1.bf16.msra.mxu0 %v15499_v22  ;;  %7516 = vmatpush1.bf16.msra.mxu1 %v15502_v23  ;;  %v15594_v22 = vld [vmem:[#allocation8 + $0x648] ss:$16 sps:$4 sm:$0xff]   ;;  %v15599_v23 = vld [vmem:[#allocation8 + $0x664] ss:$16 sps:$4 sm:$0xff]  }
 0x14e   :  { %6820 = vmatprep.subr.bf16.mxu0 %v15507_v24  ;;  %7517 = vmatprep.subr.bf16.mxu1 %v15510_v25  ;;  %v15602_v24 = vld [vmem:[#allocation8 + $0x66c] ss:$16 sps:$4 sm:$0xff]   ;;  %v15597_v25 = vld [vmem:[#allocation8 + $0x660] ss:$16 sps:$4 sm:$0xff]  }
 0x151   :  { %6821 = vmatpush1.bf16.msra.mxu0 %v15505_v26  ;;  %7518 = vmatpush1.bf16.msra.mxu1 %v15508_v27  ;;  %v15600_v26 = vld [vmem:[#allocation8 + $0x668] ss:$16 sps:$4 sm:$0xff]   ;;  %v15605_v27 = vld [vmem:[#allocation8 + $0x684] ss:$16 sps:$4 sm:$0xff]  }
 0x152   :  { %6822 = vmatprep.subr.bf16.mxu0 %v15513_v28  ;;  %7519 = vmatprep.subr.bf16.mxu1 %v15516_v29  ;;  %v15608_v28 = vld [vmem:[#allocation8 + $0x68c] ss:$16 sps:$4 sm:$0xff]   ;;  %v15603_v29 = vld [vmem:[#allocation8 + $0x680] ss:$16 sps:$4 sm:$0xff]  }
 0x155   :  { %6823 = vmatpush1.bf16.msra.mxu0 %v15511_v30  ;;  %7520 = vmatpush1.bf16.msra.mxu1 %v15514_v31  ;;  %v15606_v30 = vld [vmem:[#allocation8 + $0x688] ss:$16 sps:$4 sm:$0xff]   ;;  %v15611_v31 = vld [vmem:[#allocation8 + $0x6a4] ss:$16 sps:$4 sm:$0xff]  }
 0x156   :  { %6824 = vmatprep.subr.bf16.mxu0 %v15519_v32  ;;  %7521 = vmatprep.subr.bf16.mxu1 %v15522_v33  ;;  %v15614_v32 = vld [vmem:[#allocation8 + $0x6ac] ss:$16 sps:$4 sm:$0xff]   ;;  %v15609_v33 = vld [vmem:[#allocation8 + $0x6a0] ss:$16 sps:$4 sm:$0xff]  }
 0x159   :  { %6825 = vmatpush1.bf16.msra.mxu0 %v15517_v34  ;;  %7522 = vmatpush1.bf16.msra.mxu1 %v15520_v35  ;;  %v15612_v34 = vld [vmem:[#allocation8 + $0x6a8] ss:$16 sps:$4 sm:$0xff]   ;;  %v15617_v35 = vld [vmem:[#allocation8 + $0x6c4] ss:$16 sps:$4 sm:$0xff]  }
 0x15a   :  { %6826 = vmatprep.subr.bf16.mxu0 %v15525_v36  ;;  %7523 = vmatprep.subr.bf16.mxu1 %v15528_v37  ;;  %v15620_v36 = vld [vmem:[#allocation8 + $0x6cc] ss:$16 sps:$4 sm:$0xff]   ;;  %v15615_v37 = vld [vmem:[#allocation8 + $0x6c0] ss:$16 sps:$4 sm:$0xff]  }
 0x15d   :  { %6827 = vmatpush1.bf16.msra.mxu0 %v15523_v38  ;;  %7524 = vmatpush1.bf16.msra.mxu1 %v15526_v39  ;;  %v15618_v38 = vld [vmem:[#allocation8 + $0x6c8] ss:$16 sps:$4 sm:$0xff]   ;;  %v15623_v39 = vld [vmem:[#allocation8 + $0x6e4] ss:$16 sps:$4 sm:$0xff]  }
 0x15e   :  { %6828 = vmatprep.subr.bf16.mxu0 %v15531_v40  ;;  %7525 = vmatprep.subr.bf16.mxu1 %v15534_v41  ;;  %v15626_v40 = vld [vmem:[#allocation8 + $0x6ec] ss:$16 sps:$4 sm:$0xff]   ;;  %v15621_v41 = vld [vmem:[#allocation8 + $0x6e0] ss:$16 sps:$4 sm:$0xff]  }
 0x161   :  { %6829 = vmatpush1.bf16.msra.mxu0 %v15529_v42  ;;  %7526 = vmatpush1.bf16.msra.mxu1 %v15532_v43  ;;  %v15624_v42 = vld [vmem:[#allocation8 + $0x6e8] ss:$16 sps:$4 sm:$0xff]   ;;  %v15629_v43 = vld [vmem:[#allocation8 + $0x704] ss:$16 sps:$4 sm:$0xff]  }
 0x162   :  { %6830 = vmatprep.subr.bf16.mxu0 %v15537_v44  ;;  %7527 = vmatprep.subr.bf16.mxu1 %v15540_v45  ;;  %v15632_v44 = vld [vmem:[#allocation8 + $0x70c] ss:$16 sps:$4 sm:$0xff]   ;;  %v15627_v45 = vld [vmem:[#allocation8 + $0x700] ss:$16 sps:$4 sm:$0xff]  }
 0x165   :  { %6831 = vmatpush1.bf16.msra.mxu0 %v15535_v46  ;;  %7528 = vmatpush1.bf16.msra.mxu1 %v15538_v47  ;;  %v15630_v46 = vld [vmem:[#allocation8 + $0x708] ss:$16 sps:$4 sm:$0xff]   ;;  %v15635_v47 = vld [vmem:[#allocation8 + $0x724] ss:$16 sps:$4 sm:$0xff]  }
 0x166   :  { %6832 = vmatprep.subr.bf16.mxu0 %v15543_v48  ;;  %7529 = vmatprep.subr.bf16.mxu1 %v15546_v49  ;;  %v15638_v48 = vld [vmem:[#allocation8 + $0x72c] ss:$16 sps:$4 sm:$0xff]   ;;  %v15633_v49 = vld [vmem:[#allocation8 + $0x720] ss:$16 sps:$4 sm:$0xff]  }
 0x169   :  { %6833 = vmatpush1.bf16.msra.mxu0 %v15541_v50  ;;  %7530 = vmatpush1.bf16.msra.mxu1 %v15544_v51  ;;  %v15636_v50 = vld [vmem:[#allocation8 + $0x728] ss:$16 sps:$4 sm:$0xff]   ;;  %v15641_v51 = vld [vmem:[#allocation8 + $0x744] ss:$16 sps:$4 sm:$0xff]  }
 0x16a   :  { %6834 = vmatprep.subr.bf16.mxu0 %v15549_v52  ;;  %7531 = vmatprep.subr.bf16.mxu1 %v15552_v53  ;;  %v15644_v52 = vld [vmem:[#allocation8 + $0x74c] ss:$16 sps:$4 sm:$0xff]   ;;  %v15639_v53 = vld [vmem:[#allocation8 + $0x740] ss:$16 sps:$4 sm:$0xff]  }
 0x16d   :  { %6835 = vmatpush1.bf16.msra.mxu0 %v15547_v54  ;;  %7532 = vmatpush1.bf16.msra.mxu1 %v15550_v55  ;;  %v15642_v54 = vld [vmem:[#allocation8 + $0x748] ss:$16 sps:$4 sm:$0xff]   ;;  %v15647_v55 = vld [vmem:[#allocation8 + $0x764] ss:$16 sps:$4 sm:$0xff]  }
 0x16e   :  { %6836 = vmatprep.subr.bf16.mxu0 %v15555_v56  ;;  %7533 = vmatprep.subr.bf16.mxu1 %v15558_v57  ;;  %v15650_v56 = vld [vmem:[#allocation8 + $0x76c] ss:$16 sps:$4 sm:$0xff]   ;;  %v15645_v57 = vld [vmem:[#allocation8 + $0x760] ss:$16 sps:$4 sm:$0xff]  }
 0x171   :  { %6837 = vmatpush1.bf16.msra.mxu0 %v15553_v58  ;;  %7534 = vmatpush1.bf16.msra.mxu1 %v15556_v59  ;;  %v15648_v58 = vld [vmem:[#allocation8 + $0x768] ss:$16 sps:$4 sm:$0xff]   ;;  %v15653_v59 = vld [vmem:[#allocation8 + $0x784] ss:$16 sps:$4 sm:$0xff]  }
 0x172   :  { %6838 = vmatprep.subr.bf16.mxu0 %v15561_v60  ;;  %7535 = vmatprep.subr.bf16.mxu1 %v15564_v61  ;;  %v15656_v60 = vld [vmem:[#allocation8 + $0x78c] ss:$16 sps:$4 sm:$0xff]   ;;  %v15651_v61 = vld [vmem:[#allocation8 + $0x780] ss:$16 sps:$4 sm:$0xff]  }
 0x175   :  { %6839 = vmatpush1.bf16.msra.mxu0 %v15559_v62  ;;  %7536 = vmatpush1.bf16.msra.mxu1 %v15562_v63  ;;  %v15654_v62 = vld [vmem:[#allocation8 + $0x788] ss:$16 sps:$4 sm:$0xff]   ;;  %v15659_v63 = vld [vmem:[#allocation8 + $0x7a4] ss:$16 sps:$4 sm:$0xff]  }
 0x176   :  { %6840 = vmatprep.subr.bf16.mxu0 %v15567_v0  ;;  %7537 = vmatprep.subr.bf16.mxu1 %v15570_v1  ;;  %v15662_v0 = vld [vmem:[#allocation8 + $0x7ac] ss:$16 sps:$4 sm:$0xff]   ;;  %v15657_v1 = vld [vmem:[#allocation8 + $0x7a0] ss:$16 sps:$4 sm:$0xff]  }
 0x179   :  { %6841 = vmatpush1.bf16.msra.mxu0 %v15565_v2  ;;  %7538 = vmatpush1.bf16.msra.mxu1 %v15568_v3  ;;  %v15660_v2 = vld [vmem:[#allocation8 + $0x7a8] ss:$16 sps:$4 sm:$0xff]   ;;  %v15665_v3 = vld [vmem:[#allocation8 + $0x7c4] ss:$16 sps:$4 sm:$0xff]  }
 0x17a   :  { %6842 = vmatprep.subr.bf16.mxu0 %v15573_v4  ;;  %7539 = vmatprep.subr.bf16.mxu1 %v15576_v5  ;;  %v15668_v4 = vld [vmem:[#allocation8 + $0x7cc] ss:$16 sps:$4 sm:$0xff]   ;;  %v15663_v5 = vld [vmem:[#allocation8 + $0x7c0] ss:$16 sps:$4 sm:$0xff]  }
 0x17d   :  { %6843 = vmatpush1.bf16.msra.mxu0 %v15571_v6  ;;  %7540 = vmatpush1.bf16.msra.mxu1 %v15574_v7  ;;  %v15666_v6 = vld [vmem:[#allocation8 + $0x7c8] ss:$16 sps:$4 sm:$0xff]   ;;  %v15671_v7 = vld [vmem:[#allocation8 + $0x7e4] ss:$16 sps:$4 sm:$0xff]  }
 0x17e   :  { %6853 = vmatprep.subr.bf16.mxu0 %v15581_v8  ;;  %7550 = vmatprep.subr.bf16.mxu1 %v15584_v9  ;;  %v15674_v8 = vld [vmem:[#allocation8 + $0x7ec] ss:$16 sps:$4 sm:$0xff]   ;;  %v15669_v9 = vld [vmem:[#allocation8 + $0x7e0] ss:$16 sps:$4 sm:$0xff]  }
 0x180   :  { %6845 = vmatmul.mubr.bf16.vlgmr.msra.gmra.mrb[0].mxu0 %v13646_v12  ;;  %7542 = vmatmul.mubr.bf16.vlgmr.msra.gmra.mrb[0].mxu1 %v13646_v12  ;;  %v15679_v12 = vld [vmem:[#allocation8 + $0x804] ss:$16 sps:$4 sm:$0xff]  }
 0x181   :  { %6854 = vmatpush1.bf16.msra.mxu0 %v15579_v10  ;;  %7551 = vmatpush1.bf16.msra.mxu1 %v15582_v13  ;;  %v15672_v10 = vld [vmem:[#allocation8 + $0x7e8] ss:$16 sps:$4 sm:$0xff]   ;;  %v15682_v13 = vld [vmem:[#allocation8 + $0x80c] ss:$16 sps:$4 sm:$0xff]  }
 0x182   :  { %6855 = vmatprep.subr.bf16.mxu0 %v15587_v15  ;;  %7552 = vmatprep.subr.bf16.mxu1 %v15590_v16  ;;  %v15677_v15 = vld [vmem:[#allocation8 + $0x800] ss:$16 sps:$4 sm:$0xff]   ;;  %v13648_v16 = vcombine.low %v17772_v14, %v17772_v14  ;;  %v15691_v14 = vld [vmem:[#allocation8 + $0x844] ss:$16 sps:$4 sm:$0xff]  }
 0x183   :  { %6885 = vmatprep.mubr.bf16.mxu0 %v13649_v17  ;;  %7582 = vmatprep.mubr.bf16.mxu1 %v13649_v17  ;;  %v17778_v17 = vld [vmem:[#allocation4 + $0x20] sm:$0xff] }
 0x185   :  { %6856 = vmatpush1.bf16.msra.mxu0 %v15585_v18  ;;  %7553 = vmatpush1.bf16.msra.mxu1 %v15588_v19  ;;  %v15680_v18 = vld [vmem:[#allocation8 + $0x808] ss:$16 sps:$4 sm:$0xff]   ;;  %v15685_v19 = vld [vmem:[#allocation8 + $0x824] ss:$16 sps:$4 sm:$0xff]  }
 0x186   :  { %6857 = vmatprep.subr.bf16.mxu0 %v15593_v20  ;;  %7554 = vmatprep.subr.bf16.mxu1 %v15596_v11  ;;  %v15688_v20 = vld [vmem:[#allocation8 + $0x82c] ss:$16 sps:$4 sm:$0xff]   ;;  %v13651_v11 = vcombine.high %v17778_v17, %v17778_v17 }
 0x189   :  { %6858 = vmatpush1.bf16.msra.mxu0 %v15591_v21  ;;  %7555 = vmatpush1.bf16.msra.mxu1 %v15594_v22  ;;  %v15683_v21 = vld [vmem:[#allocation8 + $0x820] ss:$16 sps:$4 sm:$0xff]   ;;  %v15686_v22 = vld [vmem:[#allocation8 + $0x828] ss:$16 sps:$4 sm:$0xff]  }
 0x18a   :  { %6859 = vmatprep.subr.bf16.mxu0 %v15599_v23  ;;  %7556 = vmatprep.subr.bf16.mxu1 %v15602_v24  ;;  %v15694_v23 = vld [vmem:[#allocation8 + $0x84c] ss:$16 sps:$4 sm:$0xff]   ;;  %v15689_v24 = vld [vmem:[#allocation8 + $0x840] ss:$16 sps:$4 sm:$0xff]  }
 0x18d   :  { %6860 = vmatpush1.bf16.msra.mxu0 %v15597_v25  ;;  %7557 = vmatpush1.bf16.msra.mxu1 %v15600_v26  ;;  %v15692_v25 = vld [vmem:[#allocation8 + $0x848] ss:$16 sps:$4 sm:$0xff]   ;;  %v15697_v26 = vld [vmem:[#allocation8 + $0x864] ss:$16 sps:$4 sm:$0xff]  }
 0x18e   :  { %6861 = vmatprep.subr.bf16.mxu0 %v15605_v27  ;;  %7558 = vmatprep.subr.bf16.mxu1 %v15608_v28  ;;  %v15700_v27 = vld [vmem:[#allocation8 + $0x86c] ss:$16 sps:$4 sm:$0xff]   ;;  %v15695_v28 = vld [vmem:[#allocation8 + $0x860] ss:$16 sps:$4 sm:$0xff]  }
 0x191   :  { %6862 = vmatpush1.bf16.msra.mxu0 %v15603_v29  ;;  %7559 = vmatpush1.bf16.msra.mxu1 %v15606_v30  ;;  %v15698_v29 = vld [vmem:[#allocation8 + $0x868] ss:$16 sps:$4 sm:$0xff]   ;;  %v15703_v30 = vld [vmem:[#allocation8 + $0x884] ss:$16 sps:$4 sm:$0xff]  }
 0x192   :  { %6863 = vmatprep.subr.bf16.mxu0 %v15611_v31  ;;  %7560 = vmatprep.subr.bf16.mxu1 %v15614_v32  ;;  %v15706_v31 = vld [vmem:[#allocation8 + $0x88c] ss:$16 sps:$4 sm:$0xff]   ;;  %v15701_v32 = vld [vmem:[#allocation8 + $0x880] ss:$16 sps:$4 sm:$0xff]  }
 0x195   :  { %6864 = vmatpush1.bf16.msra.mxu0 %v15609_v33  ;;  %7561 = vmatpush1.bf16.msra.mxu1 %v15612_v34  ;;  %v15704_v33 = vld [vmem:[#allocation8 + $0x888] ss:$16 sps:$4 sm:$0xff]   ;;  %v15709_v34 = vld [vmem:[#allocation8 + $0x8a4] ss:$16 sps:$4 sm:$0xff]  }
 0x196   :  { %6865 = vmatprep.subr.bf16.mxu0 %v15617_v35  ;;  %7562 = vmatprep.subr.bf16.mxu1 %v15620_v36  ;;  %v15712_v35 = vld [vmem:[#allocation8 + $0x8ac] ss:$16 sps:$4 sm:$0xff]   ;;  %v15707_v36 = vld [vmem:[#allocation8 + $0x8a0] ss:$16 sps:$4 sm:$0xff]  }
 0x199   :  { %6866 = vmatpush1.bf16.msra.mxu0 %v15615_v37  ;;  %7563 = vmatpush1.bf16.msra.mxu1 %v15618_v38  ;;  %v15710_v37 = vld [vmem:[#allocation8 + $0x8a8] ss:$16 sps:$4 sm:$0xff]   ;;  %v15715_v38 = vld [vmem:[#allocation8 + $0x8c4] ss:$16 sps:$4 sm:$0xff]  }
 0x19a   :  { %6867 = vmatprep.subr.bf16.mxu0 %v15623_v39  ;;  %7564 = vmatprep.subr.bf16.mxu1 %v15626_v40  ;;  %v15718_v39 = vld [vmem:[#allocation8 + $0x8cc] ss:$16 sps:$4 sm:$0xff]   ;;  %v15713_v40 = vld [vmem:[#allocation8 + $0x8c0] ss:$16 sps:$4 sm:$0xff]  }
 0x19d   :  { %6868 = vmatpush1.bf16.msra.mxu0 %v15621_v41  ;;  %7565 = vmatpush1.bf16.msra.mxu1 %v15624_v42  ;;  %v15716_v41 = vld [vmem:[#allocation8 + $0x8c8] ss:$16 sps:$4 sm:$0xff]   ;;  %v15721_v42 = vld [vmem:[#allocation8 + $0x8e4] ss:$16 sps:$4 sm:$0xff]  }
 0x19e   :  { %6869 = vmatprep.subr.bf16.mxu0 %v15629_v43  ;;  %7566 = vmatprep.subr.bf16.mxu1 %v15632_v44  ;;  %v15724_v43 = vld [vmem:[#allocation8 + $0x8ec] ss:$16 sps:$4 sm:$0xff]   ;;  %v15719_v44 = vld [vmem:[#allocation8 + $0x8e0] ss:$16 sps:$4 sm:$0xff]  }
 0x1a1   :  { %6870 = vmatpush1.bf16.msra.mxu0 %v15627_v45  ;;  %7567 = vmatpush1.bf16.msra.mxu1 %v15630_v46  ;;  %v15722_v45 = vld [vmem:[#allocation8 + $0x8e8] ss:$16 sps:$4 sm:$0xff]   ;;  %v15727_v46 = vld [vmem:[#allocation8 + $0x904] ss:$16 sps:$4 sm:$0xff]  }
 0x1a2   :  { %6871 = vmatprep.subr.bf16.mxu0 %v15635_v47  ;;  %7568 = vmatprep.subr.bf16.mxu1 %v15638_v48  ;;  %v15730_v47 = vld [vmem:[#allocation8 + $0x90c] ss:$16 sps:$4 sm:$0xff]   ;;  %v15725_v48 = vld [vmem:[#allocation8 + $0x900] ss:$16 sps:$4 sm:$0xff]  }
 0x1a5   :  { %6872 = vmatpush1.bf16.msra.mxu0 %v15633_v49  ;;  %7569 = vmatpush1.bf16.msra.mxu1 %v15636_v50  ;;  %v15728_v49 = vld [vmem:[#allocation8 + $0x908] ss:$16 sps:$4 sm:$0xff]   ;;  %v15733_v50 = vld [vmem:[#allocation8 + $0x924] ss:$16 sps:$4 sm:$0xff]  }
 0x1a6   :  { %6873 = vmatprep.subr.bf16.mxu0 %v15641_v51  ;;  %7570 = vmatprep.subr.bf16.mxu1 %v15644_v52  ;;  %v15736_v51 = vld [vmem:[#allocation8 + $0x92c] ss:$16 sps:$4 sm:$0xff]   ;;  %v15731_v52 = vld [vmem:[#allocation8 + $0x920] ss:$16 sps:$4 sm:$0xff]  }
 0x1a9   :  { %6874 = vmatpush1.bf16.msra.mxu0 %v15639_v53  ;;  %7571 = vmatpush1.bf16.msra.mxu1 %v15642_v54  ;;  %v15734_v53 = vld [vmem:[#allocation8 + $0x928] ss:$16 sps:$4 sm:$0xff]   ;;  %v15739_v54 = vld [vmem:[#allocation8 + $0x944] ss:$16 sps:$4 sm:$0xff]  }
 0x1aa   :  { %6875 = vmatprep.subr.bf16.mxu0 %v15647_v55  ;;  %7572 = vmatprep.subr.bf16.mxu1 %v15650_v56  ;;  %v15742_v55 = vld [vmem:[#allocation8 + $0x94c] ss:$16 sps:$4 sm:$0xff]   ;;  %v15737_v56 = vld [vmem:[#allocation8 + $0x940] ss:$16 sps:$4 sm:$0xff]  }
 0x1ad   :  { %6876 = vmatpush1.bf16.msra.mxu0 %v15645_v57  ;;  %7573 = vmatpush1.bf16.msra.mxu1 %v15648_v58  ;;  %v15740_v57 = vld [vmem:[#allocation8 + $0x948] ss:$16 sps:$4 sm:$0xff]   ;;  %v15745_v58 = vld [vmem:[#allocation8 + $0x964] ss:$16 sps:$4 sm:$0xff]  }
 0x1ae   :  { %6877 = vmatprep.subr.bf16.mxu0 %v15653_v59  ;;  %7574 = vmatprep.subr.bf16.mxu1 %v15656_v60  ;;  %v15748_v59 = vld [vmem:[#allocation8 + $0x96c] ss:$16 sps:$4 sm:$0xff]   ;;  %v15743_v60 = vld [vmem:[#allocation8 + $0x960] ss:$16 sps:$4 sm:$0xff]  }
 0x1b1   :  { %6878 = vmatpush1.bf16.msra.mxu0 %v15651_v61  ;;  %7575 = vmatpush1.bf16.msra.mxu1 %v15654_v62  ;;  %v15746_v61 = vld [vmem:[#allocation8 + $0x968] ss:$16 sps:$4 sm:$0xff]   ;;  %v15751_v62 = vld [vmem:[#allocation8 + $0x984] ss:$16 sps:$4 sm:$0xff]  }
 0x1b2   :  { %6879 = vmatprep.subr.bf16.mxu0 %v15659_v63  ;;  %7576 = vmatprep.subr.bf16.mxu1 %v15662_v0  ;;  %v15754_v63 = vld [vmem:[#allocation8 + $0x98c] ss:$16 sps:$4 sm:$0xff]   ;;  %v15749_v0 = vld [vmem:[#allocation8 + $0x980] ss:$16 sps:$4 sm:$0xff]  }
 0x1b5   :  { %6880 = vmatpush1.bf16.msra.mxu0 %v15657_v1  ;;  %7577 = vmatpush1.bf16.msra.mxu1 %v15660_v2  ;;  %v15752_v1 = vld [vmem:[#allocation8 + $0x988] ss:$16 sps:$4 sm:$0xff]   ;;  %v15757_v2 = vld [vmem:[#allocation8 + $0x9a4] ss:$16 sps:$4 sm:$0xff]  }
 0x1b6   :  { %6881 = vmatprep.subr.bf16.mxu0 %v15665_v3  ;;  %7578 = vmatprep.subr.bf16.mxu1 %v15668_v4  ;;  %v15760_v3 = vld [vmem:[#allocation8 + $0x9ac] ss:$16 sps:$4 sm:$0xff]   ;;  %v15755_v4 = vld [vmem:[#allocation8 + $0x9a0] ss:$16 sps:$4 sm:$0xff]  }
 0x1b9   :  { %6882 = vmatpush1.bf16.msra.mxu0 %v15663_v5  ;;  %7579 = vmatpush1.bf16.msra.mxu1 %v15666_v6  ;;  %v15758_v5 = vld [vmem:[#allocation8 + $0x9a8] ss:$16 sps:$4 sm:$0xff]   ;;  %v15763_v6 = vld [vmem:[#allocation8 + $0x9c4] ss:$16 sps:$4 sm:$0xff]  }
 0x1ba   :  { %6883 = vmatprep.subr.bf16.mxu0 %v15671_v7  ;;  %7580 = vmatprep.subr.bf16.mxu1 %v15674_v8  ;;  %v15766_v7 = vld [vmem:[#allocation8 + $0x9cc] ss:$16 sps:$4 sm:$0xff]   ;;  %v15761_v8 = vld [vmem:[#allocation8 + $0x9c0] ss:$16 sps:$4 sm:$0xff]  }
 0x1bd   :  { %6884 = vmatpush1.bf16.msra.mxu0 %v15669_v9  ;;  %7581 = vmatpush1.bf16.msra.mxu1 %v15672_v10  ;;  %v15764_v9 = vld [vmem:[#allocation8 + $0x9c8] ss:$16 sps:$4 sm:$0xff]   ;;  %v15769_v10 = vld [vmem:[#allocation8 + $0x9e4] ss:$16 sps:$4 sm:$0xff]  }
 0x1be   :  { %6894 = vmatprep.subr.bf16.mxu0 %v15679_v12  ;;  %7591 = vmatprep.subr.bf16.mxu1 %v15682_v13  ;;  %v15772_v12 = vld [vmem:[#allocation8 + $0x9ec] ss:$16 sps:$4 sm:$0xff]   ;;  %v15767_v13 = vld [vmem:[#allocation8 + $0x9e0] ss:$16 sps:$4 sm:$0xff]  }
 0x1c0   :  { %6886 = vmatmul.mubr.bf16.vlgmr.msra.gmra.mrb[0].mxu0 %v13648_v16  ;;  %7583 = vmatmul.mubr.bf16.vlgmr.msra.gmra.mrb[0].mxu1 %v13648_v16  ;;  %v15777_v16 = vld [vmem:[#allocation8 + $0xa04] ss:$16 sps:$4 sm:$0xff]  }
 0x1c1   :  { %6895 = vmatpush1.bf16.msra.mxu0 %v15677_v15  ;;  %7592 = vmatpush1.bf16.msra.mxu1 %v15680_v18  ;;  %v15770_v15 = vld [vmem:[#allocation8 + $0x9e8] ss:$16 sps:$4 sm:$0xff]   ;;  %v15780_v18 = vld [vmem:[#allocation8 + $0xa0c] ss:$16 sps:$4 sm:$0xff]  }
 0x1c2   :  { %6896 = vmatprep.subr.bf16.mxu0 %v15685_v19  ;;  %7593 = vmatprep.subr.bf16.mxu1 %v15688_v20  ;;  %v17782_v19 = vld [vmem:[#allocation4 + $0x28] sm:$0xff]  ;;  %v13650_v20 = vcombine.low %v17778_v17, %v17778_v17 }
 0x1c3   :  { %6926 = vmatprep.mubr.bf16.mxu0 %v13651_v11  ;;  %7623 = vmatprep.mubr.bf16.mxu1 %v13651_v11  ;;  %v15775_v11 = vld [vmem:[#allocation8 + $0xa00] ss:$16 sps:$4 sm:$0xff]   ;;  %v15789_v17 = vld [vmem:[#allocation8 + $0xa44] ss:$16 sps:$4 sm:$0xff]  }
 0x1c5   :  { %6897 = vmatpush1.bf16.msra.mxu0 %v15683_v21  ;;  %7594 = vmatpush1.bf16.msra.mxu1 %v15686_v22  ;;  %v15778_v21 = vld [vmem:[#allocation8 + $0xa08] ss:$16 sps:$4 sm:$0xff]   ;;  %v15783_v22 = vld [vmem:[#allocation8 + $0xa24] ss:$16 sps:$4 sm:$0xff]  }
 0x1c6   :  { %6898 = vmatprep.subr.bf16.mxu0 %v15691_v14  ;;  %7595 = vmatprep.subr.bf16.mxu1 %v15694_v23  ;;  %v15786_v14 = vld [vmem:[#allocation8 + $0xa2c] ss:$16 sps:$4 sm:$0xff]   ;;  %v13653_v23 = vcombine.high %v17782_v19, %v17782_v19 }
 0x1c9   :  { %6899 = vmatpush1.bf16.msra.mxu0 %v15689_v24  ;;  %7596 = vmatpush1.bf16.msra.mxu1 %v15692_v25  ;;  %v15781_v24 = vld [vmem:[#allocation8 + $0xa20] ss:$16 sps:$4 sm:$0xff]   ;;  %v15784_v25 = vld [vmem:[#allocation8 + $0xa28] ss:$16 sps:$4 sm:$0xff]  }
 0x1ca   :  { %6900 = vmatprep.subr.bf16.mxu0 %v15697_v26  ;;  %7597 = vmatprep.subr.bf16.mxu1 %v15700_v27  ;;  %v15792_v26 = vld [vmem:[#allocation8 + $0xa4c] ss:$16 sps:$4 sm:$0xff]   ;;  %v15787_v27 = vld [vmem:[#allocation8 + $0xa40] ss:$16 sps:$4 sm:$0xff]  }
 0x1cd   :  { %6901 = vmatpush1.bf16.msra.mxu0 %v15695_v28  ;;  %7598 = vmatpush1.bf16.msra.mxu1 %v15698_v29  ;;  %v15790_v28 = vld [vmem:[#allocation8 + $0xa48] ss:$16 sps:$4 sm:$0xff]   ;;  %v15795_v29 = vld [vmem:[#allocation8 + $0xa64] ss:$16 sps:$4 sm:$0xff]  }
 0x1ce   :  { %6902 = vmatprep.subr.bf16.mxu0 %v15703_v30  ;;  %7599 = vmatprep.subr.bf16.mxu1 %v15706_v31  ;;  %v15798_v30 = vld [vmem:[#allocation8 + $0xa6c] ss:$16 sps:$4 sm:$0xff]   ;;  %v15793_v31 = vld [vmem:[#allocation8 + $0xa60] ss:$16 sps:$4 sm:$0xff]  }
 0x1d1   :  { %6903 = vmatpush1.bf16.msra.mxu0 %v15701_v32  ;;  %7600 = vmatpush1.bf16.msra.mxu1 %v15704_v33  ;;  %v15796_v32 = vld [vmem:[#allocation8 + $0xa68] ss:$16 sps:$4 sm:$0xff]   ;;  %v15801_v33 = vld [vmem:[#allocation8 + $0xa84] ss:$16 sps:$4 sm:$0xff]  }
 0x1d2   :  { %6904 = vmatprep.subr.bf16.mxu0 %v15709_v34  ;;  %7601 = vmatprep.subr.bf16.mxu1 %v15712_v35  ;;  %v15804_v34 = vld [vmem:[#allocation8 + $0xa8c] ss:$16 sps:$4 sm:$0xff]   ;;  %v15799_v35 = vld [vmem:[#allocation8 + $0xa80] ss:$16 sps:$4 sm:$0xff]  }
 0x1d5   :  { %6905 = vmatpush1.bf16.msra.mxu0 %v15707_v36  ;;  %7602 = vmatpush1.bf16.msra.mxu1 %v15710_v37  ;;  %v15802_v36 = vld [vmem:[#allocation8 + $0xa88] ss:$16 sps:$4 sm:$0xff]   ;;  %v15807_v37 = vld [vmem:[#allocation8 + $0xaa4] ss:$16 sps:$4 sm:$0xff]  }
 0x1d6   :  { %6906 = vmatprep.subr.bf16.mxu0 %v15715_v38  ;;  %7603 = vmatprep.subr.bf16.mxu1 %v15718_v39  ;;  %v15810_v38 = vld [vmem:[#allocation8 + $0xaac] ss:$16 sps:$4 sm:$0xff]   ;;  %v15805_v39 = vld [vmem:[#allocation8 + $0xaa0] ss:$16 sps:$4 sm:$0xff]  }
 0x1d9   :  { %6907 = vmatpush1.bf16.msra.mxu0 %v15713_v40  ;;  %7604 = vmatpush1.bf16.msra.mxu1 %v15716_v41  ;;  %v15808_v40 = vld [vmem:[#allocation8 + $0xaa8] ss:$16 sps:$4 sm:$0xff]   ;;  %v15813_v41 = vld [vmem:[#allocation8 + $0xac4] ss:$16 sps:$4 sm:$0xff]  }
 0x1da   :  { %6908 = vmatprep.subr.bf16.mxu0 %v15721_v42  ;;  %7605 = vmatprep.subr.bf16.mxu1 %v15724_v43  ;;  %v15816_v42 = vld [vmem:[#allocation8 + $0xacc] ss:$16 sps:$4 sm:$0xff]   ;;  %v15811_v43 = vld [vmem:[#allocation8 + $0xac0] ss:$16 sps:$4 sm:$0xff]  }
 0x1dd   :  { %6909 = vmatpush1.bf16.msra.mxu0 %v15719_v44  ;;  %7606 = vmatpush1.bf16.msra.mxu1 %v15722_v45  ;;  %v15814_v44 = vld [vmem:[#allocation8 + $0xac8] ss:$16 sps:$4 sm:$0xff]   ;;  %v15819_v45 = vld [vmem:[#allocation8 + $0xae4] ss:$16 sps:$4 sm:$0xff]  }
 0x1de   :  { %6910 = vmatprep.subr.bf16.mxu0 %v15727_v46  ;;  %7607 = vmatprep.subr.bf16.mxu1 %v15730_v47  ;;  %v15822_v46 = vld [vmem:[#allocation8 + $0xaec] ss:$16 sps:$4 sm:$0xff]   ;;  %v15817_v47 = vld [vmem:[#allocation8 + $0xae0] ss:$16 sps:$4 sm:$0xff]  }
 0x1e1   :  { %6911 = vmatpush1.bf16.msra.mxu0 %v15725_v48  ;;  %7608 = vmatpush1.bf16.msra.mxu1 %v15728_v49  ;;  %v15820_v48 = vld [vmem:[#allocation8 + $0xae8] ss:$16 sps:$4 sm:$0xff]   ;;  %v15825_v49 = vld [vmem:[#allocation8 + $0xb04] ss:$16 sps:$4 sm:$0xff]  }
 0x1e2   :  { %6912 = vmatprep.subr.bf16.mxu0 %v15733_v50  ;;  %7609 = vmatprep.subr.bf16.mxu1 %v15736_v51  ;;  %v15828_v50 = vld [vmem:[#allocation8 + $0xb0c] ss:$16 sps:$4 sm:$0xff]   ;;  %v15823_v51 = vld [vmem:[#allocation8 + $0xb00] ss:$16 sps:$4 sm:$0xff]  }
 0x1e5   :  { %6913 = vmatpush1.bf16.msra.mxu0 %v15731_v52  ;;  %7610 = vmatpush1.bf16.msra.mxu1 %v15734_v53  ;;  %v15826_v52 = vld [vmem:[#allocation8 + $0xb08] ss:$16 sps:$4 sm:$0xff]   ;;  %v15831_v53 = vld [vmem:[#allocation8 + $0xb24] ss:$16 sps:$4 sm:$0xff]  }
 0x1e6   :  { %6914 = vmatprep.subr.bf16.mxu0 %v15739_v54  ;;  %7611 = vmatprep.subr.bf16.mxu1 %v15742_v55  ;;  %v15834_v54 = vld [vmem:[#allocation8 + $0xb2c] ss:$16 sps:$4 sm:$0xff]   ;;  %v15829_v55 = vld [vmem:[#allocation8 + $0xb20] ss:$16 sps:$4 sm:$0xff]  }
 0x1e9   :  { %6915 = vmatpush1.bf16.msra.mxu0 %v15737_v56  ;;  %7612 = vmatpush1.bf16.msra.mxu1 %v15740_v57  ;;  %v15832_v56 = vld [vmem:[#allocation8 + $0xb28] ss:$16 sps:$4 sm:$0xff]   ;;  %v15837_v57 = vld [vmem:[#allocation8 + $0xb44] ss:$16 sps:$4 sm:$0xff]  }
 0x1ea   :  { %6916 = vmatprep.subr.bf16.mxu0 %v15745_v58  ;;  %7613 = vmatprep.subr.bf16.mxu1 %v15748_v59  ;;  %v15840_v58 = vld [vmem:[#allocation8 + $0xb4c] ss:$16 sps:$4 sm:$0xff]   ;;  %v15835_v59 = vld [vmem:[#allocation8 + $0xb40] ss:$16 sps:$4 sm:$0xff]  }
 0x1ed   :  { %6917 = vmatpush1.bf16.msra.mxu0 %v15743_v60  ;;  %7614 = vmatpush1.bf16.msra.mxu1 %v15746_v61  ;;  %v15838_v60 = vld [vmem:[#allocation8 + $0xb48] ss:$16 sps:$4 sm:$0xff]   ;;  %v15843_v61 = vld [vmem:[#allocation8 + $0xb64] ss:$16 sps:$4 sm:$0xff]  }
 0x1ee   :  { %6918 = vmatprep.subr.bf16.mxu0 %v15751_v62  ;;  %7615 = vmatprep.subr.bf16.mxu1 %v15754_v63  ;;  %v15846_v62 = vld [vmem:[#allocation8 + $0xb6c] ss:$16 sps:$4 sm:$0xff]   ;;  %v15841_v63 = vld [vmem:[#allocation8 + $0xb60] ss:$16 sps:$4 sm:$0xff]  }
 0x1f1   :  { %6919 = vmatpush1.bf16.msra.mxu0 %v15749_v0  ;;  %7616 = vmatpush1.bf16.msra.mxu1 %v15752_v1  ;;  %v15844_v0 = vld [vmem:[#allocation8 + $0xb68] ss:$16 sps:$4 sm:$0xff]   ;;  %v15849_v1 = vld [vmem:[#allocation8 + $0xb84] ss:$16 sps:$4 sm:$0xff]  }
 0x1f2   :  { %6920 = vmatprep.subr.bf16.mxu0 %v15757_v2  ;;  %7617 = vmatprep.subr.bf16.mxu1 %v15760_v3  ;;  %v15852_v2 = vld [vmem:[#allocation8 + $0xb8c] ss:$16 sps:$4 sm:$0xff]   ;;  %v15847_v3 = vld [vmem:[#allocation8 + $0xb80] ss:$16 sps:$4 sm:$0xff]  }
 0x1f5   :  { %6921 = vmatpush1.bf16.msra.mxu0 %v15755_v4  ;;  %7618 = vmatpush1.bf16.msra.mxu1 %v15758_v5  ;;  %v15850_v4 = vld [vmem:[#allocation8 + $0xb88] ss:$16 sps:$4 sm:$0xff]   ;;  %v15855_v5 = vld [vmem:[#allocation8 + $0xba4] ss:$16 sps:$4 sm:$0xff]  }
 0x1f6   :  { %6922 = vmatprep.subr.bf16.mxu0 %v15763_v6  ;;  %7619 = vmatprep.subr.bf16.mxu1 %v15766_v7  ;;  %v15858_v6 = vld [vmem:[#allocation8 + $0xbac] ss:$16 sps:$4 sm:$0xff]   ;;  %v15853_v7 = vld [vmem:[#allocation8 + $0xba0] ss:$16 sps:$4 sm:$0xff]  }
 0x1f9   :  { %6923 = vmatpush1.bf16.msra.mxu0 %v15761_v8  ;;  %7620 = vmatpush1.bf16.msra.mxu1 %v15764_v9  ;;  %v15856_v8 = vld [vmem:[#allocation8 + $0xba8] ss:$16 sps:$4 sm:$0xff]   ;;  %v15861_v9 = vld [vmem:[#allocation8 + $0xbc4] ss:$16 sps:$4 sm:$0xff]  }
 0x1fa   :  { %6924 = vmatprep.subr.bf16.mxu0 %v15769_v10  ;;  %7621 = vmatprep.subr.bf16.mxu1 %v15772_v12  ;;  %v15864_v10 = vld [vmem:[#allocation8 + $0xbcc] ss:$16 sps:$4 sm:$0xff]   ;;  %v15859_v12 = vld [vmem:[#allocation8 + $0xbc0] ss:$16 sps:$4 sm:$0xff]  }
 0x1fd   :  { %6925 = vmatpush1.bf16.msra.mxu0 %v15767_v13  ;;  %7622 = vmatpush1.bf16.msra.mxu1 %v15770_v15  ;;  %v15862_v13 = vld [vmem:[#allocation8 + $0xbc8] ss:$16 sps:$4 sm:$0xff]   ;;  %v15867_v15 = vld [vmem:[#allocation8 + $0xbe4] ss:$16 sps:$4 sm:$0xff]  }
 0x1fe   :  { %6935 = vmatprep.subr.bf16.mxu0 %v15777_v16  ;;  %7632 = vmatprep.subr.bf16.mxu1 %v15780_v18  ;;  %v15870_v16 = vld [vmem:[#allocation8 + $0xbec] ss:$16 sps:$4 sm:$0xff]   ;;  %v15865_v18 = vld [vmem:[#allocation8 + $0xbe0] ss:$16 sps:$4 sm:$0xff]  }
 0x200   :  { %6927 = vmatmul.mubr.bf16.vlgmr.msra.gmra.mrb[0].mxu0 %v13650_v20  ;;  %7624 = vmatmul.mubr.bf16.vlgmr.msra.gmra.mrb[0].mxu1 %v13650_v20  ;;  %v15868_v20 = vld [vmem:[#allocation8 + $0xbe8] ss:$16 sps:$4 sm:$0xff]  }
 0x201   :  { %6936 = vmatpush1.bf16.msra.mxu0 %v15775_v11  ;;  %7633 = vmatpush1.bf16.msra.mxu1 %v15778_v21  ;;  %v15875_v11 = vld [vmem:[#allocation8 + $0xc04] ss:$16 sps:$4 sm:$0xff]   ;;  %v15878_v21 = vld [vmem:[#allocation8 + $0xc0c] ss:$16 sps:$4 sm:$0xff]  }
 0x202   :  { %6937 = vmatprep.subr.bf16.mxu0 %v15783_v22  ;;  %7634 = vmatprep.subr.bf16.mxu1 %v15786_v14  ;;  %v17788_v22 = vld [vmem:[#allocation4 + $0x30] sm:$0xff]  ;;  %v13652_v14 = vcombine.low %v17782_v19, %v17782_v19  ;;  %v15887_v19 = vld [vmem:[#allocation8 + $0xc44] ss:$16 sps:$4 sm:$0xff]  }
 0x203   :  { %6967 = vmatprep.mubr.bf16.mxu0 %v13653_v23  ;;  %7664 = vmatprep.mubr.bf16.mxu1 %v13653_v23  ;;  %v15873_v23 = vld [vmem:[#allocation8 + $0xc00] ss:$16 sps:$4 sm:$0xff]  }
 0x205   :  { %6938 = vmatpush1.bf16.msra.mxu0 %v15781_v24  ;;  %7635 = vmatpush1.bf16.msra.mxu1 %v15784_v25  ;;  %v15876_v24 = vld [vmem:[#allocation8 + $0xc08] ss:$16 sps:$4 sm:$0xff]   ;;  %v15881_v25 = vld [vmem:[#allocation8 + $0xc24] ss:$16 sps:$4 sm:$0xff]  }
 0x206   :  { %6939 = vmatprep.subr.bf16.mxu0 %v15789_v17  ;;  %7636 = vmatprep.subr.bf16.mxu1 %v15792_v26  ;;  %v15884_v17 = vld [vmem:[#allocation8 + $0xc2c] ss:$16 sps:$4 sm:$0xff]   ;;  %v13655_v26 = vcombine.high %v17788_v22, %v17788_v22 }
 0x209   :  { %6940 = vmatpush1.bf16.msra.mxu0 %v15787_v27  ;;  %7637 = vmatpush1.bf16.msra.mxu1 %v15790_v28  ;;  %v15879_v27 = vld [vmem:[#allocation8 + $0xc20] ss:$16 sps:$4 sm:$0xff]   ;;  %v15882_v28 = vld [vmem:[#allocation8 + $0xc28] ss:$16 sps:$4 sm:$0xff]  }
 0x20a   :  { %6941 = vmatprep.subr.bf16.mxu0 %v15795_v29  ;;  %7638 = vmatprep.subr.bf16.mxu1 %v15798_v30  ;;  %v15890_v29 = vld [vmem:[#allocation8 + $0xc4c] ss:$16 sps:$4 sm:$0xff]   ;;  %v15885_v30 = vld [vmem:[#allocation8 + $0xc40] ss:$16 sps:$4 sm:$0xff]  }
 0x20d   :  { %6942 = vmatpush1.bf16.msra.mxu0 %v15793_v31  ;;  %7639 = vmatpush1.bf16.msra.mxu1 %v15796_v32  ;;  %v15888_v31 = vld [vmem:[#allocation8 + $0xc48] ss:$16 sps:$4 sm:$0xff]   ;;  %v15893_v32 = vld [vmem:[#allocation8 + $0xc64] ss:$16 sps:$4 sm:$0xff]  }
 0x20e   :  { %6943 = vmatprep.subr.bf16.mxu0 %v15801_v33  ;;  %7640 = vmatprep.subr.bf16.mxu1 %v15804_v34  ;;  %v15896_v33 = vld [vmem:[#allocation8 + $0xc6c] ss:$16 sps:$4 sm:$0xff]   ;;  %v15891_v34 = vld [vmem:[#allocation8 + $0xc60] ss:$16 sps:$4 sm:$0xff]  }
 0x211   :  { %6944 = vmatpush1.bf16.msra.mxu0 %v15799_v35  ;;  %7641 = vmatpush1.bf16.msra.mxu1 %v15802_v36  ;;  %v15894_v35 = vld [vmem:[#allocation8 + $0xc68] ss:$16 sps:$4 sm:$0xff]   ;;  %v15899_v36 = vld [vmem:[#allocation8 + $0xc84] ss:$16 sps:$4 sm:$0xff]  }
 0x212   :  { %6945 = vmatprep.subr.bf16.mxu0 %v15807_v37  ;;  %7642 = vmatprep.subr.bf16.mxu1 %v15810_v38  ;;  %v15902_v37 = vld [vmem:[#allocation8 + $0xc8c] ss:$16 sps:$4 sm:$0xff]   ;;  %v15897_v38 = vld [vmem:[#allocation8 + $0xc80] ss:$16 sps:$4 sm:$0xff]  }
 0x215   :  { %6946 = vmatpush1.bf16.msra.mxu0 %v15805_v39  ;;  %7643 = vmatpush1.bf16.msra.mxu1 %v15808_v40  ;;  %v15900_v39 = vld [vmem:[#allocation8 + $0xc88] ss:$16 sps:$4 sm:$0xff]   ;;  %v15905_v40 = vld [vmem:[#allocation8 + $0xca4] ss:$16 sps:$4 sm:$0xff]  }
 0x216   :  { %6947 = vmatprep.subr.bf16.mxu0 %v15813_v41  ;;  %7644 = vmatprep.subr.bf16.mxu1 %v15816_v42  ;;  %v15908_v41 = vld [vmem:[#allocation8 + $0xcac] ss:$16 sps:$4 sm:$0xff]   ;;  %v15903_v42 = vld [vmem:[#allocation8 + $0xca0] ss:$16 sps:$4 sm:$0xff]  }
 0x219   :  { %6948 = vmatpush1.bf16.msra.mxu0 %v15811_v43  ;;  %7645 = vmatpush1.bf16.msra.mxu1 %v15814_v44  ;;  %v15906_v43 = vld [vmem:[#allocation8 + $0xca8] ss:$16 sps:$4 sm:$0xff]   ;;  %v15911_v44 = vld [vmem:[#allocation8 + $0xcc4] ss:$16 sps:$4 sm:$0xff]  }
 0x21a   :  { %6949 = vmatprep.subr.bf16.mxu0 %v15819_v45  ;;  %7646 = vmatprep.subr.bf16.mxu1 %v15822_v46  ;;  %v15914_v45 = vld [vmem:[#allocation8 + $0xccc] ss:$16 sps:$4 sm:$0xff]   ;;  %v15909_v46 = vld [vmem:[#allocation8 + $0xcc0] ss:$16 sps:$4 sm:$0xff]  }
 0x21d   :  { %6950 = vmatpush1.bf16.msra.mxu0 %v15817_v47  ;;  %7647 = vmatpush1.bf16.msra.mxu1 %v15820_v48  ;;  %v15912_v47 = vld [vmem:[#allocation8 + $0xcc8] ss:$16 sps:$4 sm:$0xff]   ;;  %v15917_v48 = vld [vmem:[#allocation8 + $0xce4] ss:$16 sps:$4 sm:$0xff]  }
 0x21e   :  { %6951 = vmatprep.subr.bf16.mxu0 %v15825_v49  ;;  %7648 = vmatprep.subr.bf16.mxu1 %v15828_v50  ;;  %v15920_v49 = vld [vmem:[#allocation8 + $0xcec] ss:$16 sps:$4 sm:$0xff]   ;;  %v15915_v50 = vld [vmem:[#allocation8 + $0xce0] ss:$16 sps:$4 sm:$0xff]  }
 0x221   :  { %6952 = vmatpush1.bf16.msra.mxu0 %v15823_v51  ;;  %7649 = vmatpush1.bf16.msra.mxu1 %v15826_v52  ;;  %v15918_v51 = vld [vmem:[#allocation8 + $0xce8] ss:$16 sps:$4 sm:$0xff]   ;;  %v15923_v52 = vld [vmem:[#allocation8 + $0xd04] ss:$16 sps:$4 sm:$0xff]  }
 0x222   :  { %6953 = vmatprep.subr.bf16.mxu0 %v15831_v53  ;;  %7650 = vmatprep.subr.bf16.mxu1 %v15834_v54  ;;  %v15926_v53 = vld [vmem:[#allocation8 + $0xd0c] ss:$16 sps:$4 sm:$0xff]   ;;  %v15921_v54 = vld [vmem:[#allocation8 + $0xd00] ss:$16 sps:$4 sm:$0xff]  }
 0x225   :  { %6954 = vmatpush1.bf16.msra.mxu0 %v15829_v55  ;;  %7651 = vmatpush1.bf16.msra.mxu1 %v15832_v56  ;;  %v15924_v55 = vld [vmem:[#allocation8 + $0xd08] ss:$16 sps:$4 sm:$0xff]   ;;  %v15929_v56 = vld [vmem:[#allocation8 + $0xd24] ss:$16 sps:$4 sm:$0xff]  }
 0x226   :  { %6955 = vmatprep.subr.bf16.mxu0 %v15837_v57  ;;  %7652 = vmatprep.subr.bf16.mxu1 %v15840_v58  ;;  %v15932_v57 = vld [vmem:[#allocation8 + $0xd2c] ss:$16 sps:$4 sm:$0xff]   ;;  %v15927_v58 = vld [vmem:[#allocation8 + $0xd20] ss:$16 sps:$4 sm:$0xff]  }
 0x229   :  { %6956 = vmatpush1.bf16.msra.mxu0 %v15835_v59  ;;  %7653 = vmatpush1.bf16.msra.mxu1 %v15838_v60  ;;  %v15930_v59 = vld [vmem:[#allocation8 + $0xd28] ss:$16 sps:$4 sm:$0xff]   ;;  %v15935_v60 = vld [vmem:[#allocation8 + $0xd44] ss:$16 sps:$4 sm:$0xff]  }
 0x22a   :  { %6957 = vmatprep.subr.bf16.mxu0 %v15843_v61  ;;  %7654 = vmatprep.subr.bf16.mxu1 %v15846_v62  ;;  %v15938_v61 = vld [vmem:[#allocation8 + $0xd4c] ss:$16 sps:$4 sm:$0xff]   ;;  %v15933_v62 = vld [vmem:[#allocation8 + $0xd40] ss:$16 sps:$4 sm:$0xff]  }
 0x22d   :  { %6958 = vmatpush1.bf16.msra.mxu0 %v15841_v63  ;;  %7655 = vmatpush1.bf16.msra.mxu1 %v15844_v0  ;;  %v15936_v63 = vld [vmem:[#allocation8 + $0xd48] ss:$16 sps:$4 sm:$0xff]   ;;  %v15941_v0 = vld [vmem:[#allocation8 + $0xd64] ss:$16 sps:$4 sm:$0xff]  }
 0x22e   :  { %6959 = vmatprep.subr.bf16.mxu0 %v15849_v1  ;;  %7656 = vmatprep.subr.bf16.mxu1 %v15852_v2  ;;  %v15944_v1 = vld [vmem:[#allocation8 + $0xd6c] ss:$16 sps:$4 sm:$0xff]   ;;  %v15939_v2 = vld [vmem:[#allocation8 + $0xd60] ss:$16 sps:$4 sm:$0xff]  }
 0x231   :  { %6960 = vmatpush1.bf16.msra.mxu0 %v15847_v3  ;;  %7657 = vmatpush1.bf16.msra.mxu1 %v15850_v4  ;;  %v15942_v3 = vld [vmem:[#allocation8 + $0xd68] ss:$16 sps:$4 sm:$0xff]   ;;  %v15947_v4 = vld [vmem:[#allocation8 + $0xd84] ss:$16 sps:$4 sm:$0xff]  }
 0x232   :  { %6961 = vmatprep.subr.bf16.mxu0 %v15855_v5  ;;  %7658 = vmatprep.subr.bf16.mxu1 %v15858_v6  ;;  %v15950_v5 = vld [vmem:[#allocation8 + $0xd8c] ss:$16 sps:$4 sm:$0xff]   ;;  %v15945_v6 = vld [vmem:[#allocation8 + $0xd80] ss:$16 sps:$4 sm:$0xff]  }
 0x235   :  { %6962 = vmatpush1.bf16.msra.mxu0 %v15853_v7  ;;  %7659 = vmatpush1.bf16.msra.mxu1 %v15856_v8  ;;  %v15948_v7 = vld [vmem:[#allocation8 + $0xd88] ss:$16 sps:$4 sm:$0xff]   ;;  %v15953_v8 = vld [vmem:[#allocation8 + $0xda4] ss:$16 sps:$4 sm:$0xff]  }
 0x236   :  { %6963 = vmatprep.subr.bf16.mxu0 %v15861_v9  ;;  %7660 = vmatprep.subr.bf16.mxu1 %v15864_v10  ;;  %v15956_v9 = vld [vmem:[#allocation8 + $0xdac] ss:$16 sps:$4 sm:$0xff]   ;;  %v15951_v10 = vld [vmem:[#allocation8 + $0xda0] ss:$16 sps:$4 sm:$0xff]  }
 0x239   :  { %6964 = vmatpush1.bf16.msra.mxu0 %v15859_v12  ;;  %7661 = vmatpush1.bf16.msra.mxu1 %v15862_v13  ;;  %v15954_v12 = vld [vmem:[#allocation8 + $0xda8] ss:$16 sps:$4 sm:$0xff]   ;;  %v15959_v13 = vld [vmem:[#allocation8 + $0xdc4] ss:$16 sps:$4 sm:$0xff]  }
 0x23a   :  { %6965 = vmatprep.subr.bf16.mxu0 %v15867_v15  ;;  %7662 = vmatprep.subr.bf16.mxu1 %v15870_v16  ;;  %v15962_v15 = vld [vmem:[#allocation8 + $0xdcc] ss:$16 sps:$4 sm:$0xff]   ;;  %v15957_v16 = vld [vmem:[#allocation8 + $0xdc0] ss:$16 sps:$4 sm:$0xff]  }
 0x23d   :  { %6966 = vmatpush1.bf16.msra.mxu0 %v15865_v18  ;;  %7663 = vmatpush1.bf16.msra.mxu1 %v15868_v20  ;;  %v15960_v18 = vld [vmem:[#allocation8 + $0xdc8] ss:$16 sps:$4 sm:$0xff]   ;;  %v15965_v20 = vld [vmem:[#allocation8 + $0xde4] ss:$16 sps:$4 sm:$0xff]  }
 0x23e   :  { %6976 = vmatprep.subr.bf16.mxu0 %v15875_v11  ;;  %7673 = vmatprep.subr.bf16.mxu1 %v15878_v21  ;;  %v15968_v11 = vld [vmem:[#allocation8 + $0xdec] ss:$16 sps:$4 sm:$0xff]   ;;  %v15963_v21 = vld [vmem:[#allocation8 + $0xde0] ss:$16 sps:$4 sm:$0xff]  }
 0x240   :  { %6968 = vmatmul.mubr.bf16.vlgmr.msra.gmra.mrb[0].mxu0 %v13652_v14  ;;  %7665 = vmatmul.mubr.bf16.vlgmr.msra.gmra.mrb[0].mxu1 %v13652_v14  ;;  %v15966_v14 = vld [vmem:[#allocation8 + $0xde8] ss:$16 sps:$4 sm:$0xff]  }
 0x241   :  { %6977 = vmatpush1.bf16.msra.mxu0 %v15873_v23  ;;  %7674 = vmatpush1.bf16.msra.mxu1 %v15876_v24  ;;  %v15973_v23 = vld [vmem:[#allocation8 + $0xe04] ss:$16 sps:$4 sm:$0xff]   ;;  %v15976_v24 = vld [vmem:[#allocation8 + $0xe0c] ss:$16 sps:$4 sm:$0xff]  }
 0x242   :  { %6978 = vmatprep.subr.bf16.mxu0 %v15881_v25  ;;  %7675 = vmatprep.subr.bf16.mxu1 %v15884_v17  ;;  %v17794_v25 = vld [vmem:[#allocation4 + $0x38] sm:$0xff]  ;;  %v13654_v17 = vcombine.low %v17788_v22, %v17788_v22 }
 0x243   :  { %7008 = vmatprep.mubr.bf16.mxu0 %v13655_v26  ;;  %7705 = vmatprep.mubr.bf16.mxu1 %v13655_v26  ;;  %v15971_v26 = vld [vmem:[#allocation8 + $0xe00] ss:$16 sps:$4 sm:$0xff]   ;;  %v15985_v22 = vld [vmem:[#allocation8 + $0xe44] ss:$16 sps:$4 sm:$0xff]  }
 0x245   :  { %6979 = vmatpush1.bf16.msra.mxu0 %v15879_v27  ;;  %7676 = vmatpush1.bf16.msra.mxu1 %v15882_v28  ;;  %v15974_v27 = vld [vmem:[#allocation8 + $0xe08] ss:$16 sps:$4 sm:$0xff]   ;;  %v15979_v28 = vld [vmem:[#allocation8 + $0xe24] ss:$16 sps:$4 sm:$0xff]  }
 0x246   :  { %6980 = vmatprep.subr.bf16.mxu0 %v15887_v19  ;;  %7677 = vmatprep.subr.bf16.mxu1 %v15890_v29  ;;  %v15982_v19 = vld [vmem:[#allocation8 + $0xe2c] ss:$16 sps:$4 sm:$0xff]   ;;  %v13657_v29 = vcombine.high %v17794_v25, %v17794_v25 }
 0x249   :  { %6981 = vmatpush1.bf16.msra.mxu0 %v15885_v30  ;;  %7678 = vmatpush1.bf16.msra.mxu1 %v15888_v31  ;;  %v15977_v30 = vld [vmem:[#allocation8 + $0xe20] ss:$16 sps:$4 sm:$0xff]   ;;  %v15980_v31 = vld [vmem:[#allocation8 + $0xe28] ss:$16 sps:$4 sm:$0xff]  }
 0x24a   :  { %6982 = vmatprep.subr.bf16.mxu0 %v15893_v32  ;;  %7679 = vmatprep.subr.bf16.mxu1 %v15896_v33  ;;  %v15988_v32 = vld [vmem:[#allocation8 + $0xe4c] ss:$16 sps:$4 sm:$0xff]   ;;  %v15983_v33 = vld [vmem:[#allocation8 + $0xe40] ss:$16 sps:$4 sm:$0xff]  }
 0x24d   :  { %6983 = vmatpush1.bf16.msra.mxu0 %v15891_v34  ;;  %7680 = vmatpush1.bf16.msra.mxu1 %v15894_v35  ;;  %v15986_v34 = vld [vmem:[#allocation8 + $0xe48] ss:$16 sps:$4 sm:$0xff]   ;;  %v15991_v35 = vld [vmem:[#allocation8 + $0xe64] ss:$16 sps:$4 sm:$0xff]  }
 0x24e   :  { %6984 = vmatprep.subr.bf16.mxu0 %v15899_v36  ;;  %7681 = vmatprep.subr.bf16.mxu1 %v15902_v37  ;;  %v15994_v36 = vld [vmem:[#allocation8 + $0xe6c] ss:$16 sps:$4 sm:$0xff]   ;;  %v15989_v37 = vld [vmem:[#allocation8 + $0xe60] ss:$16 sps:$4 sm:$0xff]  }
 0x251   :  { %6985 = vmatpush1.bf16.msra.mxu0 %v15897_v38  ;;  %7682 = vmatpush1.bf16.msra.mxu1 %v15900_v39  ;;  %v15992_v38 = vld [vmem:[#allocation8 + $0xe68] ss:$16 sps:$4 sm:$0xff]   ;;  %v15997_v39 = vld [vmem:[#allocation8 + $0xe84] ss:$16 sps:$4 sm:$0xff]  }
 0x252   :  { %6986 = vmatprep.subr.bf16.mxu0 %v15905_v40  ;;  %7683 = vmatprep.subr.bf16.mxu1 %v15908_v41  ;;  %v16000_v40 = vld [vmem:[#allocation8 + $0xe8c] ss:$16 sps:$4 sm:$0xff]   ;;  %v15995_v41 = vld [vmem:[#allocation8 + $0xe80] ss:$16 sps:$4 sm:$0xff]  }
 0x255   :  { %6987 = vmatpush1.bf16.msra.mxu0 %v15903_v42  ;;  %7684 = vmatpush1.bf16.msra.mxu1 %v15906_v43  ;;  %v15998_v42 = vld [vmem:[#allocation8 + $0xe88] ss:$16 sps:$4 sm:$0xff]   ;;  %v16003_v43 = vld [vmem:[#allocation8 + $0xea4] ss:$16 sps:$4 sm:$0xff]  }
 0x256   :  { %6988 = vmatprep.subr.bf16.mxu0 %v15911_v44  ;;  %7685 = vmatprep.subr.bf16.mxu1 %v15914_v45  ;;  %v16006_v44 = vld [vmem:[#allocation8 + $0xeac] ss:$16 sps:$4 sm:$0xff]   ;;  %v16001_v45 = vld [vmem:[#allocation8 + $0xea0] ss:$16 sps:$4 sm:$0xff]  }
 0x259   :  { %6989 = vmatpush1.bf16.msra.mxu0 %v15909_v46  ;;  %7686 = vmatpush1.bf16.msra.mxu1 %v15912_v47  ;;  %v16004_v46 = vld [vmem:[#allocation8 + $0xea8] ss:$16 sps:$4 sm:$0xff]   ;;  %v16009_v47 = vld [vmem:[#allocation8 + $0xec4] ss:$16 sps:$4 sm:$0xff]  }
 0x25a   :  { %6990 = vmatprep.subr.bf16.mxu0 %v15917_v48  ;;  %7687 = vmatprep.subr.bf16.mxu1 %v15920_v49  ;;  %v16012_v48 = vld [vmem:[#allocation8 + $0xecc] ss:$16 sps:$4 sm:$0xff]   ;;  %v16007_v49 = vld [vmem:[#allocation8 + $0xec0] ss:$16 sps:$4 sm:$0xff]  }
 0x25d   :  { %6991 = vmatpush1.bf16.msra.mxu0 %v15915_v50  ;;  %7688 = vmatpush1.bf16.msra.mxu1 %v15918_v51  ;;  %v16010_v50 = vld [vmem:[#allocation8 + $0xec8] ss:$16 sps:$4 sm:$0xff]   ;;  %v16015_v51 = vld [vmem:[#allocation8 + $0xee4] ss:$16 sps:$4 sm:$0xff]  }
 0x25e   :  { %6992 = vmatprep.subr.bf16.mxu0 %v15923_v52  ;;  %7689 = vmatprep.subr.bf16.mxu1 %v15926_v53  ;;  %v16018_v52 = vld [vmem:[#allocation8 + $0xeec] ss:$16 sps:$4 sm:$0xff]   ;;  %v16013_v53 = vld [vmem:[#allocation8 + $0xee0] ss:$16 sps:$4 sm:$0xff]  }
 0x261   :  { %6993 = vmatpush1.bf16.msra.mxu0 %v15921_v54  ;;  %7690 = vmatpush1.bf16.msra.mxu1 %v15924_v55  ;;  %v16016_v54 = vld [vmem:[#allocation8 + $0xee8] ss:$16 sps:$4 sm:$0xff]   ;;  %v16021_v55 = vld [vmem:[#allocation8 + $0xf04] ss:$16 sps:$4 sm:$0xff]  }
 0x262   :  { %6994 = vmatprep.subr.bf16.mxu0 %v15929_v56  ;;  %7691 = vmatprep.subr.bf16.mxu1 %v15932_v57  ;;  %v16024_v56 = vld [vmem:[#allocation8 + $0xf0c] ss:$16 sps:$4 sm:$0xff]   ;;  %v16019_v57 = vld [vmem:[#allocation8 + $0xf00] ss:$16 sps:$4 sm:$0xff]  }
 0x265   :  { %6995 = vmatpush1.bf16.msra.mxu0 %v15927_v58  ;;  %7692 = vmatpush1.bf16.msra.mxu1 %v15930_v59  ;;  %v16022_v58 = vld [vmem:[#allocation8 + $0xf08] ss:$16 sps:$4 sm:$0xff]   ;;  %v16027_v59 = vld [vmem:[#allocation8 + $0xf24] ss:$16 sps:$4 sm:$0xff]  }
 0x266   :  { %6996 = vmatprep.subr.bf16.mxu0 %v15935_v60  ;;  %7693 = vmatprep.subr.bf16.mxu1 %v15938_v61  ;;  %v16030_v60 = vld [vmem:[#allocation8 + $0xf2c] ss:$16 sps:$4 sm:$0xff]   ;;  %v16025_v61 = vld [vmem:[#allocation8 + $0xf20] ss:$16 sps:$4 sm:$0xff]  }
 0x269   :  { %6997 = vmatpush1.bf16.msra.mxu0 %v15933_v62  ;;  %7694 = vmatpush1.bf16.msra.mxu1 %v15936_v63  ;;  %v16028_v62 = vld [vmem:[#allocation8 + $0xf28] ss:$16 sps:$4 sm:$0xff]   ;;  %v16033_v63 = vld [vmem:[#allocation8 + $0xf44] ss:$16 sps:$4 sm:$0xff]  }
 0x26a   :  { %6998 = vmatprep.subr.bf16.mxu0 %v15941_v0  ;;  %7695 = vmatprep.subr.bf16.mxu1 %v15944_v1  ;;  %v16036_v0 = vld [vmem:[#allocation8 + $0xf4c] ss:$16 sps:$4 sm:$0xff]   ;;  %v16031_v1 = vld [vmem:[#allocation8 + $0xf40] ss:$16 sps:$4 sm:$0xff]  }
 0x26d   :  { %6999 = vmatpush1.bf16.msra.mxu0 %v15939_v2  ;;  %7696 = vmatpush1.bf16.msra.mxu1 %v15942_v3  ;;  %v16034_v2 = vld [vmem:[#allocation8 + $0xf48] ss:$16 sps:$4 sm:$0xff]   ;;  %v16039_v3 = vld [vmem:[#allocation8 + $0xf64] ss:$16 sps:$4 sm:$0xff]  }
 0x26e   :  { %7000 = vmatprep.subr.bf16.mxu0 %v15947_v4  ;;  %7697 = vmatprep.subr.bf16.mxu1 %v15950_v5  ;;  %v16042_v4 = vld [vmem:[#allocation8 + $0xf6c] ss:$16 sps:$4 sm:$0xff]   ;;  %v16037_v5 = vld [vmem:[#allocation8 + $0xf60] ss:$16 sps:$4 sm:$0xff]  }
 0x271   :  { %7001 = vmatpush1.bf16.msra.mxu0 %v15945_v6  ;;  %7698 = vmatpush1.bf16.msra.mxu1 %v15948_v7  ;;  %v16040_v6 = vld [vmem:[#allocation8 + $0xf68] ss:$16 sps:$4 sm:$0xff]   ;;  %v16045_v7 = vld [vmem:[#allocation8 + $0xf84] ss:$16 sps:$4 sm:$0xff]  }
 0x272   :  { %7002 = vmatprep.subr.bf16.mxu0 %v15953_v8  ;;  %7699 = vmatprep.subr.bf16.mxu1 %v15956_v9  ;;  %v16048_v8 = vld [vmem:[#allocation8 + $0xf8c] ss:$16 sps:$4 sm:$0xff]   ;;  %v16043_v9 = vld [vmem:[#allocation8 + $0xf80] ss:$16 sps:$4 sm:$0xff]  }
 0x275   :  { %7003 = vmatpush1.bf16.msra.mxu0 %v15951_v10  ;;  %7700 = vmatpush1.bf16.msra.mxu1 %v15954_v12  ;;  %v16046_v10 = vld [vmem:[#allocation8 + $0xf88] ss:$16 sps:$4 sm:$0xff]   ;;  %v16051_v12 = vld [vmem:[#allocation8 + $0xfa4] ss:$16 sps:$4 sm:$0xff]  }
 0x276   :  { %7004 = vmatprep.subr.bf16.mxu0 %v15959_v13  ;;  %7701 = vmatprep.subr.bf16.mxu1 %v15962_v15  ;;  %v16054_v13 = vld [vmem:[#allocation8 + $0xfac] ss:$16 sps:$4 sm:$0xff]   ;;  %v16049_v15 = vld [vmem:[#allocation8 + $0xfa0] ss:$16 sps:$4 sm:$0xff]  }
 0x279   :  { %7005 = vmatpush1.bf16.msra.mxu0 %v15957_v16  ;;  %7702 = vmatpush1.bf16.msra.mxu1 %v15960_v18  ;;  %v16052_v16 = vld [vmem:[#allocation8 + $0xfa8] ss:$16 sps:$4 sm:$0xff]   ;;  %v16057_v18 = vld [vmem:[#allocation8 + $0xfc4] ss:$16 sps:$4 sm:$0xff]  }
 0x27a   :  { %7006 = vmatprep.subr.bf16.mxu0 %v15965_v20  ;;  %7703 = vmatprep.subr.bf16.mxu1 %v15968_v11  ;;  %v16060_v20 = vld [vmem:[#allocation8 + $0xfcc] ss:$16 sps:$4 sm:$0xff]   ;;  %v16055_v11 = vld [vmem:[#allocation8 + $0xfc0] ss:$16 sps:$4 sm:$0xff]  }
 0x27d   :  { %7007 = vmatpush1.bf16.msra.mxu0 %v15963_v21  ;;  %7704 = vmatpush1.bf16.msra.mxu1 %v15966_v14  ;;  %v16058_v21 = vld [vmem:[#allocation8 + $0xfc8] ss:$16 sps:$4 sm:$0xff]   ;;  %v16063_v14 = vld [vmem:[#allocation8 + $0xfe4] ss:$16 sps:$4 sm:$0xff]  }
 0x27e   :  { %7017 = vmatprep.subr.bf16.mxu0 %v15973_v23  ;;  %7714 = vmatprep.subr.bf16.mxu1 %v15976_v24  ;;  %v16066_v23 = vld [vmem:[#allocation8 + $0xfec] ss:$16 sps:$4 sm:$0xff]   ;;  %v16061_v24 = vld [vmem:[#allocation8 + $0xfe0] ss:$16 sps:$4 sm:$0xff]  }
 0x280   :  { %7009 = vmatmul.mubr.bf16.vlgmr.msra.gmra.mrb[0].mxu0 %v13654_v17  ;;  %7706 = vmatmul.mubr.bf16.vlgmr.msra.gmra.mrb[0].mxu1 %v13654_v17  ;;  %v16064_v17 = vld [vmem:[#allocation8 + $0xfe8] ss:$16 sps:$4 sm:$0xff]  }
 0x281   :  { %7018 = vmatpush1.bf16.msra.mxu0 %v15971_v26  ;;  %7715 = vmatpush1.bf16.msra.mxu1 %v15974_v27  ;;  %v16071_v26 = vld [vmem:[#allocation8 + $0x1004] ss:$16 sps:$4 sm:$0xff]   ;;  %v16074_v27 = vld [vmem:[#allocation8 + $0x100c] ss:$16 sps:$4 sm:$0xff]  }
 0x282   :  { %7019 = vmatprep.subr.bf16.mxu0 %v15979_v28  ;;  %7716 = vmatprep.subr.bf16.mxu1 %v15982_v19  ;;  %v17800_v28 = vld [vmem:[#allocation4 + $0x40] sm:$0xff]  ;;  %v13656_v19 = vcombine.low %v17794_v25, %v17794_v25  ;;  %v16083_v25 = vld [vmem:[#allocation8 + $0x1044] ss:$16 sps:$4 sm:$0xff]  }
 0x283   :  { %7049 = vmatprep.mubr.bf16.mxu0 %v13657_v29  ;;  %7746 = vmatprep.mubr.bf16.mxu1 %v13657_v29  ;;  %v16069_v29 = vld [vmem:[#allocation8 + $0x1000] ss:$16 sps:$4 sm:$0xff]  }
 0x285   :  { %7020 = vmatpush1.bf16.msra.mxu0 %v15977_v30  ;;  %7717 = vmatpush1.bf16.msra.mxu1 %v15980_v31  ;;  %v16072_v30 = vld [vmem:[#allocation8 + $0x1008] ss:$16 sps:$4 sm:$0xff]   ;;  %v16077_v31 = vld [vmem:[#allocation8 + $0x1024] ss:$16 sps:$4 sm:$0xff]  }
 0x286   :  { %7021 = vmatprep.subr.bf16.mxu0 %v15985_v22  ;;  %7718 = vmatprep.subr.bf16.mxu1 %v15988_v32  ;;  %v16080_v22 = vld [vmem:[#allocation8 + $0x102c] ss:$16 sps:$4 sm:$0xff]   ;;  %v13659_v32 = vcombine.high %v17800_v28, %v17800_v28 }
 0x289   :  { %7022 = vmatpush1.bf16.msra.mxu0 %v15983_v33  ;;  %7719 = vmatpush1.bf16.msra.mxu1 %v15986_v34  ;;  %v16075_v33 = vld [vmem:[#allocation8 + $0x1020] ss:$16 sps:$4 sm:$0xff]   ;;  %v16078_v34 = vld [vmem:[#allocation8 + $0x1028] ss:$16 sps:$4 sm:$0xff]  }
 0x28a   :  { %7023 = vmatprep.subr.bf16.mxu0 %v15991_v35  ;;  %7720 = vmatprep.subr.bf16.mxu1 %v15994_v36  ;;  %v16086_v35 = vld [vmem:[#allocation8 + $0x104c] ss:$16 sps:$4 sm:$0xff]   ;;  %v16081_v36 = vld [vmem:[#allocation8 + $0x1040] ss:$16 sps:$4 sm:$0xff]  }
 0x28d   :  { %7024 = vmatpush1.bf16.msra.mxu0 %v15989_v37  ;;  %7721 = vmatpush1.bf16.msra.mxu1 %v15992_v38  ;;  %v16084_v37 = vld [vmem:[#allocation8 + $0x1048] ss:$16 sps:$4 sm:$0xff]   ;;  %v16089_v38 = vld [vmem:[#allocation8 + $0x1064] ss:$16 sps:$4 sm:$0xff]  }
 0x28e   :  { %7025 = vmatprep.subr.bf16.mxu0 %v15997_v39  ;;  %7722 = vmatprep.subr.bf16.mxu1 %v16000_v40  ;;  %v16092_v39 = vld [vmem:[#allocation8 + $0x106c] ss:$16 sps:$4 sm:$0xff]   ;;  %v16087_v40 = vld [vmem:[#allocation8 + $0x1060] ss:$16 sps:$4 sm:$0xff]  }
 0x291   :  { %7026 = vmatpush1.bf16.msra.mxu0 %v15995_v41  ;;  %7723 = vmatpush1.bf16.msra.mxu1 %v15998_v42  ;;  %v16090_v41 = vld [vmem:[#allocation8 + $0x1068] ss:$16 sps:$4 sm:$0xff]   ;;  %v16095_v42 = vld [vmem:[#allocation8 + $0x1084] ss:$16 sps:$4 sm:$0xff]  }
 0x292   :  { %7027 = vmatprep.subr.bf16.mxu0 %v16003_v43  ;;  %7724 = vmatprep.subr.bf16.mxu1 %v16006_v44  ;;  %v16098_v43 = vld [vmem:[#allocation8 + $0x108c] ss:$16 sps:$4 sm:$0xff]   ;;  %v16093_v44 = vld [vmem:[#allocation8 + $0x1080] ss:$16 sps:$4 sm:$0xff]  }
 0x295   :  { %7028 = vmatpush1.bf16.msra.mxu0 %v16001_v45  ;;  %7725 = vmatpush1.bf16.msra.mxu1 %v16004_v46  ;;  %v16096_v45 = vld [vmem:[#allocation8 + $0x1088] ss:$16 sps:$4 sm:$0xff]   ;;  %v16101_v46 = vld [vmem:[#allocation8 + $0x10a4] ss:$16 sps:$4 sm:$0xff]  }
 0x296   :  { %7029 = vmatprep.subr.bf16.mxu0 %v16009_v47  ;;  %7726 = vmatprep.subr.bf16.mxu1 %v16012_v48  ;;  %v16104_v47 = vld [vmem:[#allocation8 + $0x10ac] ss:$16 sps:$4 sm:$0xff]   ;;  %v16099_v48 = vld [vmem:[#allocation8 + $0x10a0] ss:$16 sps:$4 sm:$0xff]  }
 0x299   :  { %7030 = vmatpush1.bf16.msra.mxu0 %v16007_v49  ;;  %7727 = vmatpush1.bf16.msra.mxu1 %v16010_v50  ;;  %v16102_v49 = vld [vmem:[#allocation8 + $0x10a8] ss:$16 sps:$4 sm:$0xff]   ;;  %v16107_v50 = vld [vmem:[#allocation8 + $0x10c4] ss:$16 sps:$4 sm:$0xff]  }
 0x29a   :  { %7031 = vmatprep.subr.bf16.mxu0 %v16015_v51  ;;  %7728 = vmatprep.subr.bf16.mxu1 %v16018_v52  ;;  %v16110_v51 = vld [vmem:[#allocation8 + $0x10cc] ss:$16 sps:$4 sm:$0xff]   ;;  %v16105_v52 = vld [vmem:[#allocation8 + $0x10c0] ss:$16 sps:$4 sm:$0xff]  }
 0x29d   :  { %7032 = vmatpush1.bf16.msra.mxu0 %v16013_v53  ;;  %7729 = vmatpush1.bf16.msra.mxu1 %v16016_v54  ;;  %v16108_v53 = vld [vmem:[#allocation8 + $0x10c8] ss:$16 sps:$4 sm:$0xff]   ;;  %v16113_v54 = vld [vmem:[#allocation8 + $0x10e4] ss:$16 sps:$4 sm:$0xff]  }
 0x29e   :  { %7033 = vmatprep.subr.bf16.mxu0 %v16021_v55  ;;  %7730 = vmatprep.subr.bf16.mxu1 %v16024_v56  ;;  %v16116_v55 = vld [vmem:[#allocation8 + $0x10ec] ss:$16 sps:$4 sm:$0xff]   ;;  %v16111_v56 = vld [vmem:[#allocation8 + $0x10e0] ss:$16 sps:$4 sm:$0xff]  }
 0x2a1   :  { %7034 = vmatpush1.bf16.msra.mxu0 %v16019_v57  ;;  %7731 = vmatpush1.bf16.msra.mxu1 %v16022_v58  ;;  %v16114_v57 = vld [vmem:[#allocation8 + $0x10e8] ss:$16 sps:$4 sm:$0xff]   ;;  %v16119_v58 = vld [vmem:[#allocation8 + $0x1104] ss:$16 sps:$4 sm:$0xff]  }
 0x2a2   :  { %7035 = vmatprep.subr.bf16.mxu0 %v16027_v59  ;;  %7732 = vmatprep.subr.bf16.mxu1 %v16030_v60  ;;  %v16122_v59 = vld [vmem:[#allocation8 + $0x110c] ss:$16 sps:$4 sm:$0xff]   ;;  %v16117_v60 = vld [vmem:[#allocation8 + $0x1100] ss:$16 sps:$4 sm:$0xff]  }
 0x2a5   :  { %7036 = vmatpush1.bf16.msra.mxu0 %v16025_v61  ;;  %7733 = vmatpush1.bf16.msra.mxu1 %v16028_v62  ;;  %v16120_v61 = vld [vmem:[#allocation8 + $0x1108] ss:$16 sps:$4 sm:$0xff]   ;;  %v16125_v62 = vld [vmem:[#allocation8 + $0x1124] ss:$16 sps:$4 sm:$0xff]  }
 0x2a6   :  { %7037 = vmatprep.subr.bf16.mxu0 %v16033_v63  ;;  %7734 = vmatprep.subr.bf16.mxu1 %v16036_v0  ;;  %v16128_v63 = vld [vmem:[#allocation8 + $0x112c] ss:$16 sps:$4 sm:$0xff]   ;;  %v16123_v0 = vld [vmem:[#allocation8 + $0x1120] ss:$16 sps:$4 sm:$0xff]  }
 0x2a9   :  { %7038 = vmatpush1.bf16.msra.mxu0 %v16031_v1  ;;  %7735 = vmatpush1.bf16.msra.mxu1 %v16034_v2  ;;  %v16126_v1 = vld [vmem:[#allocation8 + $0x1128] ss:$16 sps:$4 sm:$0xff]   ;;  %v16131_v2 = vld [vmem:[#allocation8 + $0x1144] ss:$16 sps:$4 sm:$0xff]  }
 0x2aa   :  { %7039 = vmatprep.subr.bf16.mxu0 %v16039_v3  ;;  %7736 = vmatprep.subr.bf16.mxu1 %v16042_v4  ;;  %v16134_v3 = vld [vmem:[#allocation8 + $0x114c] ss:$16 sps:$4 sm:$0xff]   ;;  %v16129_v4 = vld [vmem:[#allocation8 + $0x1140] ss:$16 sps:$4 sm:$0xff]  }
 0x2ad   :  { %7040 = vmatpush1.bf16.msra.mxu0 %v16037_v5  ;;  %7737 = vmatpush1.bf16.msra.mxu1 %v16040_v6  ;;  %v16132_v5 = vld [vmem:[#allocation8 + $0x1148] ss:$16 sps:$4 sm:$0xff]   ;;  %v16137_v6 = vld [vmem:[#allocation8 + $0x1164] ss:$16 sps:$4 sm:$0xff]  }
 0x2ae   :  { %7041 = vmatprep.subr.bf16.mxu0 %v16045_v7  ;;  %7738 = vmatprep.subr.bf16.mxu1 %v16048_v8  ;;  %v16140_v7 = vld [vmem:[#allocation8 + $0x116c] ss:$16 sps:$4 sm:$0xff]   ;;  %v16135_v8 = vld [vmem:[#allocation8 + $0x1160] ss:$16 sps:$4 sm:$0xff]  }
 0x2b1   :  { %7042 = vmatpush1.bf16.msra.mxu0 %v16043_v9  ;;  %7739 = vmatpush1.bf16.msra.mxu1 %v16046_v10  ;;  %v16138_v9 = vld [vmem:[#allocation8 + $0x1168] ss:$16 sps:$4 sm:$0xff]   ;;  %v16143_v10 = vld [vmem:[#allocation8 + $0x1184] ss:$16 sps:$4 sm:$0xff]  }
 0x2b2   :  { %7043 = vmatprep.subr.bf16.mxu0 %v16051_v12  ;;  %7740 = vmatprep.subr.bf16.mxu1 %v16054_v13  ;;  %v16146_v12 = vld [vmem:[#allocation8 + $0x118c] ss:$16 sps:$4 sm:$0xff]   ;;  %v16141_v13 = vld [vmem:[#allocation8 + $0x1180] ss:$16 sps:$4 sm:$0xff]  }
 0x2b5   :  { %7044 = vmatpush1.bf16.msra.mxu0 %v16049_v15  ;;  %7741 = vmatpush1.bf16.msra.mxu1 %v16052_v16  ;;  %v16144_v15 = vld [vmem:[#allocation8 + $0x1188] ss:$16 sps:$4 sm:$0xff]   ;;  %v16149_v16 = vld [vmem:[#allocation8 + $0x11a4] ss:$16 sps:$4 sm:$0xff]  }
 0x2b6   :  { %7045 = vmatprep.subr.bf16.mxu0 %v16057_v18  ;;  %7742 = vmatprep.subr.bf16.mxu1 %v16060_v20  ;;  %v16152_v18 = vld [vmem:[#allocation8 + $0x11ac] ss:$16 sps:$4 sm:$0xff]   ;;  %v16147_v20 = vld [vmem:[#allocation8 + $0x11a0] ss:$16 sps:$4 sm:$0xff]  }
 0x2b9   :  { %7046 = vmatpush1.bf16.msra.mxu0 %v16055_v11  ;;  %7743 = vmatpush1.bf16.msra.mxu1 %v16058_v21  ;;  %v16150_v11 = vld [vmem:[#allocation8 + $0x11a8] ss:$16 sps:$4 sm:$0xff]   ;;  %v16155_v21 = vld [vmem:[#allocation8 + $0x11c4] ss:$16 sps:$4 sm:$0xff]  }
 0x2ba   :  { %7047 = vmatprep.subr.bf16.mxu0 %v16063_v14  ;;  %7744 = vmatprep.subr.bf16.mxu1 %v16066_v23  ;;  %v16158_v14 = vld [vmem:[#allocation8 + $0x11cc] ss:$16 sps:$4 sm:$0xff]   ;;  %v16153_v23 = vld [vmem:[#allocation8 + $0x11c0] ss:$16 sps:$4 sm:$0xff]  }
 0x2bd   :  { %7048 = vmatpush1.bf16.msra.mxu0 %v16061_v24  ;;  %7745 = vmatpush1.bf16.msra.mxu1 %v16064_v17  ;;  %v16156_v24 = vld [vmem:[#allocation8 + $0x11c8] ss:$16 sps:$4 sm:$0xff]   ;;  %v16161_v17 = vld [vmem:[#allocation8 + $0x11e4] ss:$16 sps:$4 sm:$0xff]  }
 0x2be   :  { %7058 = vmatprep.subr.bf16.mxu0 %v16071_v26  ;;  %7755 = vmatprep.subr.bf16.mxu1 %v16074_v27  ;;  %v16164_v26 = vld [vmem:[#allocation8 + $0x11ec] ss:$16 sps:$4 sm:$0xff]   ;;  %v16159_v27 = vld [vmem:[#allocation8 + $0x11e0] ss:$16 sps:$4 sm:$0xff]  }
 0x2c0   :  { %7050 = vmatmul.mubr.bf16.vlgmr.msra.gmra.mrb[0].mxu0 %v13656_v19  ;;  %7747 = vmatmul.mubr.bf16.vlgmr.msra.gmra.mrb[0].mxu1 %v13656_v19  ;;  %v16162_v19 = vld [vmem:[#allocation8 + $0x11e8] ss:$16 sps:$4 sm:$0xff]  }
 0x2c1   :  { %7059 = vmatpush1.bf16.msra.mxu0 %v16069_v29  ;;  %7756 = vmatpush1.bf16.msra.mxu1 %v16072_v30  ;;  %v16169_v29 = vld [vmem:[#allocation8 + $0x1204] ss:$16 sps:$4 sm:$0xff]   ;;  %v16172_v30 = vld [vmem:[#allocation8 + $0x120c] ss:$16 sps:$4 sm:$0xff]  }
 0x2c2   :  { %7060 = vmatprep.subr.bf16.mxu0 %v16077_v31  ;;  %7757 = vmatprep.subr.bf16.mxu1 %v16080_v22  ;;  %v17806_v31 = vld [vmem:[#allocation4 + $0x48] sm:$0xff]  ;;  %v13658_v22 = vcombine.low %v17800_v28, %v17800_v28 }
 0x2c3   :  { %7090 = vmatprep.mubr.bf16.mxu0 %v13659_v32  ;;  %7787 = vmatprep.mubr.bf16.mxu1 %v13659_v32  ;;  %v16167_v32 = vld [vmem:[#allocation8 + $0x1200] ss:$16 sps:$4 sm:$0xff]   ;;  %v16181_v28 = vld [vmem:[#allocation8 + $0x1244] ss:$16 sps:$4 sm:$0xff]  }
 0x2c5   :  { %7061 = vmatpush1.bf16.msra.mxu0 %v16075_v33  ;;  %7758 = vmatpush1.bf16.msra.mxu1 %v16078_v34  ;;  %v16170_v33 = vld [vmem:[#allocation8 + $0x1208] ss:$16 sps:$4 sm:$0xff]   ;;  %v16175_v34 = vld [vmem:[#allocation8 + $0x1224] ss:$16 sps:$4 sm:$0xff]  }
 0x2c6   :  { %7062 = vmatprep.subr.bf16.mxu0 %v16083_v25  ;;  %7759 = vmatprep.subr.bf16.mxu1 %v16086_v35  ;;  %v16178_v25 = vld [vmem:[#allocation8 + $0x122c] ss:$16 sps:$4 sm:$0xff]   ;;  %v13661_v35 = vcombine.high %v17806_v31, %v17806_v31 }
 0x2c9   :  { %7063 = vmatpush1.bf16.msra.mxu0 %v16081_v36  ;;  %7760 = vmatpush1.bf16.msra.mxu1 %v16084_v37  ;;  %v16173_v36 = vld [vmem:[#allocation8 + $0x1220] ss:$16 sps:$4 sm:$0xff]   ;;  %v16176_v37 = vld [vmem:[#allocation8 + $0x1228] ss:$16 sps:$4 sm:$0xff]  }
 0x2ca   :  { %7064 = vmatprep.subr.bf16.mxu0 %v16089_v38  ;;  %7761 = vmatprep.subr.bf16.mxu1 %v16092_v39  ;;  %v16184_v38 = vld [vmem:[#allocation8 + $0x124c] ss:$16 sps:$4 sm:$0xff]   ;;  %v16179_v39 = vld [vmem:[#allocation8 + $0x1240] ss:$16 sps:$4 sm:$0xff]  }
 0x2cd   :  { %7065 = vmatpush1.bf16.msra.mxu0 %v16087_v40  ;;  %7762 = vmatpush1.bf16.msra.mxu1 %v16090_v41  ;;  %v16182_v40 = vld [vmem:[#allocation8 + $0x1248] ss:$16 sps:$4 sm:$0xff]   ;;  %v16187_v41 = vld [vmem:[#allocation8 + $0x1264] ss:$16 sps:$4 sm:$0xff]  }
 0x2ce   :  { %7066 = vmatprep.subr.bf16.mxu0 %v16095_v42  ;;  %7763 = vmatprep.subr.bf16.mxu1 %v16098_v43  ;;  %v16190_v42 = vld [vmem:[#allocation8 + $0x126c] ss:$16 sps:$4 sm:$0xff]   ;;  %v16185_v43 = vld [vmem:[#allocation8 + $0x1260] ss:$16 sps:$4 sm:$0xff]  }
 0x2d1   :  { %7067 = vmatpush1.bf16.msra.mxu0 %v16093_v44  ;;  %7764 = vmatpush1.bf16.msra.mxu1 %v16096_v45  ;;  %v16188_v44 = vld [vmem:[#allocation8 + $0x1268] ss:$16 sps:$4 sm:$0xff]   ;;  %v16193_v45 = vld [vmem:[#allocation8 + $0x1284] ss:$16 sps:$4 sm:$0xff]  }
 0x2d2   :  { %7068 = vmatprep.subr.bf16.mxu0 %v16101_v46  ;;  %7765 = vmatprep.subr.bf16.mxu1 %v16104_v47  ;;  %v16196_v46 = vld [vmem:[#allocation8 + $0x128c] ss:$16 sps:$4 sm:$0xff]   ;;  %v16191_v47 = vld [vmem:[#allocation8 + $0x1280] ss:$16 sps:$4 sm:$0xff]  }
 0x2d5   :  { %7069 = vmatpush1.bf16.msra.mxu0 %v16099_v48  ;;  %7766 = vmatpush1.bf16.msra.mxu1 %v16102_v49  ;;  %v16194_v48 = vld [vmem:[#allocation8 + $0x1288] ss:$16 sps:$4 sm:$0xff]   ;;  %v16199_v49 = vld [vmem:[#allocation8 + $0x12a4] ss:$16 sps:$4 sm:$0xff]  }
 0x2d6   :  { %7070 = vmatprep.subr.bf16.mxu0 %v16107_v50  ;;  %7767 = vmatprep.subr.bf16.mxu1 %v16110_v51  ;;  %v16202_v50 = vld [vmem:[#allocation8 + $0x12ac] ss:$16 sps:$4 sm:$0xff]   ;;  %v16197_v51 = vld [vmem:[#allocation8 + $0x12a0] ss:$16 sps:$4 sm:$0xff]  }
 0x2d9   :  { %7071 = vmatpush1.bf16.msra.mxu0 %v16105_v52  ;;  %7768 = vmatpush1.bf16.msra.mxu1 %v16108_v53  ;;  %v16200_v52 = vld [vmem:[#allocation8 + $0x12a8] ss:$16 sps:$4 sm:$0xff]   ;;  %v16205_v53 = vld [vmem:[#allocation8 + $0x12c4] ss:$16 sps:$4 sm:$0xff]  }
 0x2da   :  { %7072 = vmatprep.subr.bf16.mxu0 %v16113_v54  ;;  %7769 = vmatprep.subr.bf16.mxu1 %v16116_v55  ;;  %v16208_v54 = vld [vmem:[#allocation8 + $0x12cc] ss:$16 sps:$4 sm:$0xff]   ;;  %v16203_v55 = vld [vmem:[#allocation8 + $0x12c0] ss:$16 sps:$4 sm:$0xff]  }
 0x2dd   :  { %7073 = vmatpush1.bf16.msra.mxu0 %v16111_v56  ;;  %7770 = vmatpush1.bf16.msra.mxu1 %v16114_v57  ;;  %v16206_v56 = vld [vmem:[#allocation8 + $0x12c8] ss:$16 sps:$4 sm:$0xff]   ;;  %v16211_v57 = vld [vmem:[#allocation8 + $0x12e4] ss:$16 sps:$4 sm:$0xff]  }
 0x2de   :  { %7074 = vmatprep.subr.bf16.mxu0 %v16119_v58  ;;  %7771 = vmatprep.subr.bf16.mxu1 %v16122_v59  ;;  %v16214_v58 = vld [vmem:[#allocation8 + $0x12ec] ss:$16 sps:$4 sm:$0xff]   ;;  %v16209_v59 = vld [vmem:[#allocation8 + $0x12e0] ss:$16 sps:$4 sm:$0xff]  }
 0x2e1   :  { %7075 = vmatpush1.bf16.msra.mxu0 %v16117_v60  ;;  %7772 = vmatpush1.bf16.msra.mxu1 %v16120_v61  ;;  %v16212_v60 = vld [vmem:[#allocation8 + $0x12e8] ss:$16 sps:$4 sm:$0xff]   ;;  %v16217_v61 = vld [vmem:[#allocation8 + $0x1304] ss:$16 sps:$4 sm:$0xff]  }
 0x2e2   :  { %7076 = vmatprep.subr.bf16.mxu0 %v16125_v62  ;;  %7773 = vmatprep.subr.bf16.mxu1 %v16128_v63  ;;  %v16220_v62 = vld [vmem:[#allocation8 + $0x130c] ss:$16 sps:$4 sm:$0xff]   ;;  %v16215_v63 = vld [vmem:[#allocation8 + $0x1300] ss:$16 sps:$4 sm:$0xff]  }
 0x2e5   :  { %7077 = vmatpush1.bf16.msra.mxu0 %v16123_v0  ;;  %7774 = vmatpush1.bf16.msra.mxu1 %v16126_v1  ;;  %v16218_v0 = vld [vmem:[#allocation8 + $0x1308] ss:$16 sps:$4 sm:$0xff]   ;;  %v16223_v1 = vld [vmem:[#allocation8 + $0x1324] ss:$16 sps:$4 sm:$0xff]  }
 0x2e6   :  { %7078 = vmatprep.subr.bf16.mxu0 %v16131_v2  ;;  %7775 = vmatprep.subr.bf16.mxu1 %v16134_v3  ;;  %v16226_v2 = vld [vmem:[#allocation8 + $0x132c] ss:$16 sps:$4 sm:$0xff]   ;;  %v16221_v3 = vld [vmem:[#allocation8 + $0x1320] ss:$16 sps:$4 sm:$0xff]  }
 0x2e9   :  { %7079 = vmatpush1.bf16.msra.mxu0 %v16129_v4  ;;  %7776 = vmatpush1.bf16.msra.mxu1 %v16132_v5  ;;  %v16224_v4 = vld [vmem:[#allocation8 + $0x1328] ss:$16 sps:$4 sm:$0xff]   ;;  %v16229_v5 = vld [vmem:[#allocation8 + $0x1344] ss:$16 sps:$4 sm:$0xff]  }
 0x2ea   :  { %7080 = vmatprep.subr.bf16.mxu0 %v16137_v6  ;;  %7777 = vmatprep.subr.bf16.mxu1 %v16140_v7  ;;  %v16232_v6 = vld [vmem:[#allocation8 + $0x134c] ss:$16 sps:$4 sm:$0xff]   ;;  %v16227_v7 = vld [vmem:[#allocation8 + $0x1340] ss:$16 sps:$4 sm:$0xff]  }
 0x2ed   :  { %7081 = vmatpush1.bf16.msra.mxu0 %v16135_v8  ;;  %7778 = vmatpush1.bf16.msra.mxu1 %v16138_v9  ;;  %v16230_v8 = vld [vmem:[#allocation8 + $0x1348] ss:$16 sps:$4 sm:$0xff]   ;;  %v16235_v9 = vld [vmem:[#allocation8 + $0x1364] ss:$16 sps:$4 sm:$0xff]  }
 0x2ee   :  { %7082 = vmatprep.subr.bf16.mxu0 %v16143_v10  ;;  %7779 = vmatprep.subr.bf16.mxu1 %v16146_v12  ;;  %v16238_v10 = vld [vmem:[#allocation8 + $0x136c] ss:$16 sps:$4 sm:$0xff]   ;;  %v16233_v12 = vld [vmem:[#allocation8 + $0x1360] ss:$16 sps:$4 sm:$0xff]  }
 0x2f1   :  { %7083 = vmatpush1.bf16.msra.mxu0 %v16141_v13  ;;  %7780 = vmatpush1.bf16.msra.mxu1 %v16144_v15  ;;  %v16236_v13 = vld [vmem:[#allocation8 + $0x1368] ss:$16 sps:$4 sm:$0xff]   ;;  %v16241_v15 = vld [vmem:[#allocation8 + $0x1384] ss:$16 sps:$4 sm:$0xff]  }
 0x2f2   :  { %7084 = vmatprep.subr.bf16.mxu0 %v16149_v16  ;;  %7781 = vmatprep.subr.bf16.mxu1 %v16152_v18  ;;  %v16244_v16 = vld [vmem:[#allocation8 + $0x138c] ss:$16 sps:$4 sm:$0xff]   ;;  %v16239_v18 = vld [vmem:[#allocation8 + $0x1380] ss:$16 sps:$4 sm:$0xff]  }
 0x2f5   :  { %7085 = vmatpush1.bf16.msra.mxu0 %v16147_v20  ;;  %7782 = vmatpush1.bf16.msra.mxu1 %v16150_v11  ;;  %v16242_v20 = vld [vmem:[#allocation8 + $0x1388] ss:$16 sps:$4 sm:$0xff]   ;;  %v16247_v11 = vld [vmem:[#allocation8 + $0x13a4] ss:$16 sps:$4 sm:$0xff]  }
 0x2f6   :  { %7086 = vmatprep.subr.bf16.mxu0 %v16155_v21  ;;  %7783 = vmatprep.subr.bf16.mxu1 %v16158_v14  ;;  %v16250_v21 = vld [vmem:[#allocation8 + $0x13ac] ss:$16 sps:$4 sm:$0xff]   ;;  %v16245_v14 = vld [vmem:[#allocation8 + $0x13a0] ss:$16 sps:$4 sm:$0xff]  }
 0x2f9   :  { %7087 = vmatpush1.bf16.msra.mxu0 %v16153_v23  ;;  %7784 = vmatpush1.bf16.msra.mxu1 %v16156_v24  ;;  %v16248_v23 = vld [vmem:[#allocation8 + $0x13a8] ss:$16 sps:$4 sm:$0xff]   ;;  %v16253_v24 = vld [vmem:[#allocation8 + $0x13c4] ss:$16 sps:$4 sm:$0xff]  }
 0x2fa   :  { %7088 = vmatprep.subr.bf16.mxu0 %v16161_v17  ;;  %7785 = vmatprep.subr.bf16.mxu1 %v16164_v26  ;;  %v16256_v17 = vld [vmem:[#allocation8 + $0x13cc] ss:$16 sps:$4 sm:$0xff]   ;;  %v16251_v26 = vld [vmem:[#allocation8 + $0x13c0] ss:$16 sps:$4 sm:$0xff]  }
 0x2fd   :  { %7089 = vmatpush1.bf16.msra.mxu0 %v16159_v27  ;;  %7786 = vmatpush1.bf16.msra.mxu1 %v16162_v19  ;;  %v16254_v27 = vld [vmem:[#allocation8 + $0x13c8] ss:$16 sps:$4 sm:$0xff]   ;;  %v16259_v19 = vld [vmem:[#allocation8 + $0x13e4] ss:$16 sps:$4 sm:$0xff]  }
 0x2fe   :  { %7099 = vmatprep.subr.bf16.mxu0 %v16169_v29  ;;  %7796 = vmatprep.subr.bf16.mxu1 %v16172_v30  ;;  %v16262_v29 = vld [vmem:[#allocation8 + $0x13ec] ss:$16 sps:$4 sm:$0xff]   ;;  %v16257_v30 = vld [vmem:[#allocation8 + $0x13e0] ss:$16 sps:$4 sm:$0xff]  }
 0x300   :  { %7091 = vmatmul.mubr.bf16.vlgmr.msra.gmra.mrb[0].mxu0 %v13658_v22  ;;  %7788 = vmatmul.mubr.bf16.vlgmr.msra.gmra.mrb[0].mxu1 %v13658_v22  ;;  %v16260_v22 = vld [vmem:[#allocation8 + $0x13e8] ss:$16 sps:$4 sm:$0xff]  }
 0x301   :  { %7100 = vmatpush1.bf16.msra.mxu0 %v16167_v32  ;;  %7797 = vmatpush1.bf16.msra.mxu1 %v16170_v33  ;;  %v16267_v32 = vld [vmem:[#allocation8 + $0x1404] ss:$16 sps:$4 sm:$0xff]   ;;  %v16270_v33 = vld [vmem:[#allocation8 + $0x140c] ss:$16 sps:$4 sm:$0xff]  }
 0x302   :  { %7101 = vmatprep.subr.bf16.mxu0 %v16175_v34  ;;  %7798 = vmatprep.subr.bf16.mxu1 %v16178_v25  ;;  %v17812_v34 = vld [vmem:[#allocation4 + $0x50] sm:$0xff]  ;;  %v13660_v25 = vcombine.low %v17806_v31, %v17806_v31  ;;  %v16279_v31 = vld [vmem:[#allocation8 + $0x1444] ss:$16 sps:$4 sm:$0xff]  }
 0x303   :  { %7131 = vmatprep.mubr.bf16.mxu0 %v13661_v35  ;;  %7828 = vmatprep.mubr.bf16.mxu1 %v13661_v35  ;;  %v16265_v35 = vld [vmem:[#allocation8 + $0x1400] ss:$16 sps:$4 sm:$0xff]  }
 0x305   :  { %7102 = vmatpush1.bf16.msra.mxu0 %v16173_v36  ;;  %7799 = vmatpush1.bf16.msra.mxu1 %v16176_v37  ;;  %v16268_v36 = vld [vmem:[#allocation8 + $0x1408] ss:$16 sps:$4 sm:$0xff]   ;;  %v16273_v37 = vld [vmem:[#allocation8 + $0x1424] ss:$16 sps:$4 sm:$0xff]  }
 0x306   :  { %7103 = vmatprep.subr.bf16.mxu0 %v16181_v28  ;;  %7800 = vmatprep.subr.bf16.mxu1 %v16184_v38  ;;  %v16276_v28 = vld [vmem:[#allocation8 + $0x142c] ss:$16 sps:$4 sm:$0xff]   ;;  %v13663_v38 = vcombine.high %v17812_v34, %v17812_v34 }
 0x309   :  { %7104 = vmatpush1.bf16.msra.mxu0 %v16179_v39  ;;  %7801 = vmatpush1.bf16.msra.mxu1 %v16182_v40  ;;  %v16271_v39 = vld [vmem:[#allocation8 + $0x1420] ss:$16 sps:$4 sm:$0xff]   ;;  %v16274_v40 = vld [vmem:[#allocation8 + $0x1428] ss:$16 sps:$4 sm:$0xff]  }
 0x30a   :  { %7105 = vmatprep.subr.bf16.mxu0 %v16187_v41  ;;  %7802 = vmatprep.subr.bf16.mxu1 %v16190_v42  ;;  %v16282_v41 = vld [vmem:[#allocation8 + $0x144c] ss:$16 sps:$4 sm:$0xff]   ;;  %v16277_v42 = vld [vmem:[#allocation8 + $0x1440] ss:$16 sps:$4 sm:$0xff]  }
 0x30d   :  { %7106 = vmatpush1.bf16.msra.mxu0 %v16185_v43  ;;  %7803 = vmatpush1.bf16.msra.mxu1 %v16188_v44  ;;  %v16280_v43 = vld [vmem:[#allocation8 + $0x1448] ss:$16 sps:$4 sm:$0xff]   ;;  %v16285_v44 = vld [vmem:[#allocation8 + $0x1464] ss:$16 sps:$4 sm:$0xff]  }
 0x30e   :  { %7107 = vmatprep.subr.bf16.mxu0 %v16193_v45  ;;  %7804 = vmatprep.subr.bf16.mxu1 %v16196_v46  ;;  %v16288_v45 = vld [vmem:[#allocation8 + $0x146c] ss:$16 sps:$4 sm:$0xff]   ;;  %v16283_v46 = vld [vmem:[#allocation8 + $0x1460] ss:$16 sps:$4 sm:$0xff]  }
 0x311   :  { %7108 = vmatpush1.bf16.msra.mxu0 %v16191_v47  ;;  %7805 = vmatpush1.bf16.msra.mxu1 %v16194_v48  ;;  %v16286_v47 = vld [vmem:[#allocation8 + $0x1468] ss:$16 sps:$4 sm:$0xff]   ;;  %v16291_v48 = vld [vmem:[#allocation8 + $0x1484] ss:$16 sps:$4 sm:$0xff]  }
 0x312   :  { %7109 = vmatprep.subr.bf16.mxu0 %v16199_v49  ;;  %7806 = vmatprep.subr.bf16.mxu1 %v16202_v50  ;;  %v16294_v49 = vld [vmem:[#allocation8 + $0x148c] ss:$16 sps:$4 sm:$0xff]   ;;  %v16289_v50 = vld [vmem:[#allocation8 + $0x1480] ss:$16 sps:$4 sm:$0xff]  }
 0x315   :  { %7110 = vmatpush1.bf16.msra.mxu0 %v16197_v51  ;;  %7807 = vmatpush1.bf16.msra.mxu1 %v16200_v52  ;;  %v16292_v51 = vld [vmem:[#allocation8 + $0x1488] ss:$16 sps:$4 sm:$0xff]   ;;  %v16297_v52 = vld [vmem:[#allocation8 + $0x14a4] ss:$16 sps:$4 sm:$0xff]  }
 0x316   :  { %7111 = vmatprep.subr.bf16.mxu0 %v16205_v53  ;;  %7808 = vmatprep.subr.bf16.mxu1 %v16208_v54  ;;  %v16300_v53 = vld [vmem:[#allocation8 + $0x14ac] ss:$16 sps:$4 sm:$0xff]   ;;  %v16295_v54 = vld [vmem:[#allocation8 + $0x14a0] ss:$16 sps:$4 sm:$0xff]  }
 0x319   :  { %7112 = vmatpush1.bf16.msra.mxu0 %v16203_v55  ;;  %7809 = vmatpush1.bf16.msra.mxu1 %v16206_v56  ;;  %v16298_v55 = vld [vmem:[#allocation8 + $0x14a8] ss:$16 sps:$4 sm:$0xff]   ;;  %v16303_v56 = vld [vmem:[#allocation8 + $0x14c4] ss:$16 sps:$4 sm:$0xff]  }
 0x31a   :  { %7113 = vmatprep.subr.bf16.mxu0 %v16211_v57  ;;  %7810 = vmatprep.subr.bf16.mxu1 %v16214_v58  ;;  %v16306_v57 = vld [vmem:[#allocation8 + $0x14cc] ss:$16 sps:$4 sm:$0xff]   ;;  %v16301_v58 = vld [vmem:[#allocation8 + $0x14c0] ss:$16 sps:$4 sm:$0xff]  }
 0x31d   :  { %7114 = vmatpush1.bf16.msra.mxu0 %v16209_v59  ;;  %7811 = vmatpush1.bf16.msra.mxu1 %v16212_v60  ;;  %v16304_v59 = vld [vmem:[#allocation8 + $0x14c8] ss:$16 sps:$4 sm:$0xff]   ;;  %v16309_v60 = vld [vmem:[#allocation8 + $0x14e4] ss:$16 sps:$4 sm:$0xff]  }
 0x31e   :  { %7115 = vmatprep.subr.bf16.mxu0 %v16217_v61  ;;  %7812 = vmatprep.subr.bf16.mxu1 %v16220_v62  ;;  %v16312_v61 = vld [vmem:[#allocation8 + $0x14ec] ss:$16 sps:$4 sm:$0xff]   ;;  %v16307_v62 = vld [vmem:[#allocation8 + $0x14e0] ss:$16 sps:$4 sm:$0xff]  }
 0x321   :  { %7116 = vmatpush1.bf16.msra.mxu0 %v16215_v63  ;;  %7813 = vmatpush1.bf16.msra.mxu1 %v16218_v0  ;;  %v16310_v63 = vld [vmem:[#allocation8 + $0x14e8] ss:$16 sps:$4 sm:$0xff]   ;;  %v16315_v0 = vld [vmem:[#allocation8 + $0x1504] ss:$16 sps:$4 sm:$0xff]  }
 0x322   :  { %7117 = vmatprep.subr.bf16.mxu0 %v16223_v1  ;;  %7814 = vmatprep.subr.bf16.mxu1 %v16226_v2  ;;  %v16318_v1 = vld [vmem:[#allocation8 + $0x150c] ss:$16 sps:$4 sm:$0xff]   ;;  %v16313_v2 = vld [vmem:[#allocation8 + $0x1500] ss:$16 sps:$4 sm:$0xff]  }
 0x325   :  { %7118 = vmatpush1.bf16.msra.mxu0 %v16221_v3  ;;  %7815 = vmatpush1.bf16.msra.mxu1 %v16224_v4  ;;  %v16316_v3 = vld [vmem:[#allocation8 + $0x1508] ss:$16 sps:$4 sm:$0xff]   ;;  %v16321_v4 = vld [vmem:[#allocation8 + $0x1524] ss:$16 sps:$4 sm:$0xff]  }
 0x326   :  { %7119 = vmatprep.subr.bf16.mxu0 %v16229_v5  ;;  %7816 = vmatprep.subr.bf16.mxu1 %v16232_v6  ;;  %v16324_v5 = vld [vmem:[#allocation8 + $0x152c] ss:$16 sps:$4 sm:$0xff]   ;;  %v16319_v6 = vld [vmem:[#allocation8 + $0x1520] ss:$16 sps:$4 sm:$0xff]  }
 0x329   :  { %7120 = vmatpush1.bf16.msra.mxu0 %v16227_v7  ;;  %7817 = vmatpush1.bf16.msra.mxu1 %v16230_v8  ;;  %v16322_v7 = vld [vmem:[#allocation8 + $0x1528] ss:$16 sps:$4 sm:$0xff]   ;;  %v16327_v8 = vld [vmem:[#allocation8 + $0x1544] ss:$16 sps:$4 sm:$0xff]  }
 0x32a   :  { %7121 = vmatprep.subr.bf16.mxu0 %v16235_v9  ;;  %7818 = vmatprep.subr.bf16.mxu1 %v16238_v10  ;;  %v16330_v9 = vld [vmem:[#allocation8 + $0x154c] ss:$16 sps:$4 sm:$0xff]   ;;  %v16325_v10 = vld [vmem:[#allocation8 + $0x1540] ss:$16 sps:$4 sm:$0xff]  }
 0x32d   :  { %7122 = vmatpush1.bf16.msra.mxu0 %v16233_v12  ;;  %7819 = vmatpush1.bf16.msra.mxu1 %v16236_v13  ;;  %v16328_v12 = vld [vmem:[#allocation8 + $0x1548] ss:$16 sps:$4 sm:$0xff]   ;;  %v16333_v13 = vld [vmem:[#allocation8 + $0x1564] ss:$16 sps:$4 sm:$0xff]  }
 0x32e   :  { %7123 = vmatprep.subr.bf16.mxu0 %v16241_v15  ;;  %7820 = vmatprep.subr.bf16.mxu1 %v16244_v16  ;;  %v16336_v15 = vld [vmem:[#allocation8 + $0x156c] ss:$16 sps:$4 sm:$0xff]   ;;  %v16331_v16 = vld [vmem:[#allocation8 + $0x1560] ss:$16 sps:$4 sm:$0xff]  }
 0x331   :  { %7124 = vmatpush1.bf16.msra.mxu0 %v16239_v18  ;;  %7821 = vmatpush1.bf16.msra.mxu1 %v16242_v20  ;;  %v16334_v18 = vld [vmem:[#allocation8 + $0x1568] ss:$16 sps:$4 sm:$0xff]   ;;  %v16339_v20 = vld [vmem:[#allocation8 + $0x1584] ss:$16 sps:$4 sm:$0xff]  }
 0x332   :  { %7125 = vmatprep.subr.bf16.mxu0 %v16247_v11  ;;  %7822 = vmatprep.subr.bf16.mxu1 %v16250_v21  ;;  %v16342_v11 = vld [vmem:[#allocation8 + $0x158c] ss:$16 sps:$4 sm:$0xff]   ;;  %v16337_v21 = vld [vmem:[#allocation8 + $0x1580] ss:$16 sps:$4 sm:$0xff]  }
 0x335   :  { %7126 = vmatpush1.bf16.msra.mxu0 %v16245_v14  ;;  %7823 = vmatpush1.bf16.msra.mxu1 %v16248_v23  ;;  %v16340_v14 = vld [vmem:[#allocation8 + $0x1588] ss:$16 sps:$4 sm:$0xff]   ;;  %v16345_v23 = vld [vmem:[#allocation8 + $0x15a4] ss:$16 sps:$4 sm:$0xff]  }
 0x336   :  { %7127 = vmatprep.subr.bf16.mxu0 %v16253_v24  ;;  %7824 = vmatprep.subr.bf16.mxu1 %v16256_v17  ;;  %v16348_v24 = vld [vmem:[#allocation8 + $0x15ac] ss:$16 sps:$4 sm:$0xff]   ;;  %v16343_v17 = vld [vmem:[#allocation8 + $0x15a0] ss:$16 sps:$4 sm:$0xff]  }
 0x339   :  { %7128 = vmatpush1.bf16.msra.mxu0 %v16251_v26  ;;  %7825 = vmatpush1.bf16.msra.mxu1 %v16254_v27  ;;  %v16346_v26 = vld [vmem:[#allocation8 + $0x15a8] ss:$16 sps:$4 sm:$0xff]   ;;  %v16351_v27 = vld [vmem:[#allocation8 + $0x15c4] ss:$16 sps:$4 sm:$0xff]  }
 0x33a   :  { %7129 = vmatprep.subr.bf16.mxu0 %v16259_v19  ;;  %7826 = vmatprep.subr.bf16.mxu1 %v16262_v29  ;;  %v16354_v19 = vld [vmem:[#allocation8 + $0x15cc] ss:$16 sps:$4 sm:$0xff]   ;;  %v16349_v29 = vld [vmem:[#allocation8 + $0x15c0] ss:$16 sps:$4 sm:$0xff]  }
 0x33d   :  { %7130 = vmatpush1.bf16.msra.mxu0 %v16257_v30  ;;  %7827 = vmatpush1.bf16.msra.mxu1 %v16260_v22  ;;  %v16352_v30 = vld [vmem:[#allocation8 + $0x15c8] ss:$16 sps:$4 sm:$0xff]   ;;  %v16357_v22 = vld [vmem:[#allocation8 + $0x15e4] ss:$16 sps:$4 sm:$0xff]  }
 0x33e   :  { %7140 = vmatprep.subr.bf16.mxu0 %v16267_v32  ;;  %7837 = vmatprep.subr.bf16.mxu1 %v16270_v33  ;;  %v16360_v32 = vld [vmem:[#allocation8 + $0x15ec] ss:$16 sps:$4 sm:$0xff]   ;;  %v16355_v33 = vld [vmem:[#allocation8 + $0x15e0] ss:$16 sps:$4 sm:$0xff]  }
 0x340   :  { %7132 = vmatmul.mubr.bf16.vlgmr.msra.gmra.mrb[0].mxu0 %v13660_v25  ;;  %7829 = vmatmul.mubr.bf16.vlgmr.msra.gmra.mrb[0].mxu1 %v13660_v25  ;;  %v16358_v25 = vld [vmem:[#allocation8 + $0x15e8] ss:$16 sps:$4 sm:$0xff]  }
 0x341   :  { %7141 = vmatpush1.bf16.msra.mxu0 %v16265_v35  ;;  %7838 = vmatpush1.bf16.msra.mxu1 %v16268_v36  ;;  %v16365_v35 = vld [vmem:[#allocation8 + $0x1604] ss:$16 sps:$4 sm:$0xff]   ;;  %v16368_v36 = vld [vmem:[#allocation8 + $0x160c] ss:$16 sps:$4 sm:$0xff]  }
 0x342   :  { %7142 = vmatprep.subr.bf16.mxu0 %v16273_v37  ;;  %7839 = vmatprep.subr.bf16.mxu1 %v16276_v28  ;;  %v13662_v37 = vcombine.low %v17812_v34, %v17812_v34  ;;  %v17820_v28 = vld [vmem:[#allocation4 + $0x58] sm:$0xff] }
 0x343   :  { %7172 = vmatprep.mubr.bf16.mxu0 %v13663_v38  ;;  %7869 = vmatprep.mubr.bf16.mxu1 %v13663_v38  ;;  %v16363_v38 = vld [vmem:[#allocation8 + $0x1600] ss:$16 sps:$4 sm:$0xff]   ;;  %v16377_v34 = vld [vmem:[#allocation8 + $0x1644] ss:$16 sps:$4 sm:$0xff]  }
 0x345   :  { %7143 = vmatpush1.bf16.msra.mxu0 %v16271_v39  ;;  %7840 = vmatpush1.bf16.msra.mxu1 %v16274_v40  ;;  %v16366_v39 = vld [vmem:[#allocation8 + $0x1608] ss:$16 sps:$4 sm:$0xff]   ;;  %v16371_v40 = vld [vmem:[#allocation8 + $0x1624] ss:$16 sps:$4 sm:$0xff]  }
 0x346   :  { %7144 = vmatprep.subr.bf16.mxu0 %v16279_v31  ;;  %7841 = vmatprep.subr.bf16.mxu1 %v16282_v41  ;;  %v16374_v31 = vld [vmem:[#allocation8 + $0x162c] ss:$16 sps:$4 sm:$0xff]   ;;  %v13665_v41 = vcombine.high %v17820_v28, %v17820_v28 }
 0x349   :  { %7145 = vmatpush1.bf16.msra.mxu0 %v16277_v42  ;;  %7842 = vmatpush1.bf16.msra.mxu1 %v16280_v43  ;;  %v16369_v42 = vld [vmem:[#allocation8 + $0x1620] ss:$16 sps:$4 sm:$0xff]   ;;  %v16372_v43 = vld [vmem:[#allocation8 + $0x1628] ss:$16 sps:$4 sm:$0xff]  }
 0x34a   :  { %7146 = vmatprep.subr.bf16.mxu0 %v16285_v44  ;;  %7843 = vmatprep.subr.bf16.mxu1 %v16288_v45  ;;  %v16380_v44 = vld [vmem:[#allocation8 + $0x164c] ss:$16 sps:$4 sm:$0xff]   ;;  %v16375_v45 = vld [vmem:[#allocation8 + $0x1640] ss:$16 sps:$4 sm:$0xff]  }
 0x34d   :  { %7147 = vmatpush1.bf16.msra.mxu0 %v16283_v46  ;;  %7844 = vmatpush1.bf16.msra.mxu1 %v16286_v47  ;;  %v16378_v46 = vld [vmem:[#allocation8 + $0x1648] ss:$16 sps:$4 sm:$0xff]   ;;  %v16383_v47 = vld [vmem:[#allocation8 + $0x1664] ss:$16 sps:$4 sm:$0xff]  }
 0x34e   :  { %7148 = vmatprep.subr.bf16.mxu0 %v16291_v48  ;;  %7845 = vmatprep.subr.bf16.mxu1 %v16294_v49  ;;  %v16386_v48 = vld [vmem:[#allocation8 + $0x166c] ss:$16 sps:$4 sm:$0xff]   ;;  %v16381_v49 = vld [vmem:[#allocation8 + $0x1660] ss:$16 sps:$4 sm:$0xff]  }
 0x351   :  { %7149 = vmatpush1.bf16.msra.mxu0 %v16289_v50  ;;  %7846 = vmatpush1.bf16.msra.mxu1 %v16292_v51  ;;  %v16384_v50 = vld [vmem:[#allocation8 + $0x1668] ss:$16 sps:$4 sm:$0xff]   ;;  %v16389_v51 = vld [vmem:[#allocation8 + $0x1684] ss:$16 sps:$4 sm:$0xff]  }
 0x352   :  { %7150 = vmatprep.subr.bf16.mxu0 %v16297_v52  ;;  %7847 = vmatprep.subr.bf16.mxu1 %v16300_v53  ;;  %v16392_v52 = vld [vmem:[#allocation8 + $0x168c] ss:$16 sps:$4 sm:$0xff]   ;;  %v16387_v53 = vld [vmem:[#allocation8 + $0x1680] ss:$16 sps:$4 sm:$0xff]  }
 0x355   :  { %7151 = vmatpush1.bf16.msra.mxu0 %v16295_v54  ;;  %7848 = vmatpush1.bf16.msra.mxu1 %v16298_v55  ;;  %v16390_v54 = vld [vmem:[#allocation8 + $0x1688] ss:$16 sps:$4 sm:$0xff]   ;;  %v16395_v55 = vld [vmem:[#allocation8 + $0x16a4] ss:$16 sps:$4 sm:$0xff]  }
 0x356   :  { %7152 = vmatprep.subr.bf16.mxu0 %v16303_v56  ;;  %7849 = vmatprep.subr.bf16.mxu1 %v16306_v57  ;;  %v16398_v56 = vld [vmem:[#allocation8 + $0x16ac] ss:$16 sps:$4 sm:$0xff]   ;;  %v16393_v57 = vld [vmem:[#allocation8 + $0x16a0] ss:$16 sps:$4 sm:$0xff]  }
 0x359   :  { %7153 = vmatpush1.bf16.msra.mxu0 %v16301_v58  ;;  %7850 = vmatpush1.bf16.msra.mxu1 %v16304_v59  ;;  %v16396_v58 = vld [vmem:[#allocation8 + $0x16a8] ss:$16 sps:$4 sm:$0xff]   ;;  %v16401_v59 = vld [vmem:[#allocation8 + $0x16c4] ss:$16 sps:$4 sm:$0xff]  }
 0x35a   :  { %7154 = vmatprep.subr.bf16.mxu0 %v16309_v60  ;;  %7851 = vmatprep.subr.bf16.mxu1 %v16312_v61  ;;  %v16404_v60 = vld [vmem:[#allocation8 + $0x16cc] ss:$16 sps:$4 sm:$0xff]   ;;  %v16399_v61 = vld [vmem:[#allocation8 + $0x16c0] ss:$16 sps:$4 sm:$0xff]  }
 0x35d   :  { %7155 = vmatpush1.bf16.msra.mxu0 %v16307_v62  ;;  %7852 = vmatpush1.bf16.msra.mxu1 %v16310_v63  ;;  %v16402_v62 = vld [vmem:[#allocation8 + $0x16c8] ss:$16 sps:$4 sm:$0xff]   ;;  %v16407_v63 = vld [vmem:[#allocation8 + $0x16e4] ss:$16 sps:$4 sm:$0xff]  }
 0x35e   :  { %7156 = vmatprep.subr.bf16.mxu0 %v16315_v0  ;;  %7853 = vmatprep.subr.bf16.mxu1 %v16318_v1  ;;  %v16410_v0 = vld [vmem:[#allocation8 + $0x16ec] ss:$16 sps:$4 sm:$0xff]   ;;  %v16405_v1 = vld [vmem:[#allocation8 + $0x16e0] ss:$16 sps:$4 sm:$0xff]  }
 0x361   :  { %7157 = vmatpush1.bf16.msra.mxu0 %v16313_v2  ;;  %7854 = vmatpush1.bf16.msra.mxu1 %v16316_v3  ;;  %v16408_v2 = vld [vmem:[#allocation8 + $0x16e8] ss:$16 sps:$4 sm:$0xff]   ;;  %v16413_v3 = vld [vmem:[#allocation8 + $0x1704] ss:$16 sps:$4 sm:$0xff]  }
 0x362   :  { %7158 = vmatprep.subr.bf16.mxu0 %v16321_v4  ;;  %7855 = vmatprep.subr.bf16.mxu1 %v16324_v5  ;;  %v16416_v4 = vld [vmem:[#allocation8 + $0x170c] ss:$16 sps:$4 sm:$0xff]   ;;  %v16411_v5 = vld [vmem:[#allocation8 + $0x1700] ss:$16 sps:$4 sm:$0xff]  }
 0x365   :  { %7159 = vmatpush1.bf16.msra.mxu0 %v16319_v6  ;;  %7856 = vmatpush1.bf16.msra.mxu1 %v16322_v7  ;;  %v16414_v6 = vld [vmem:[#allocation8 + $0x1708] ss:$16 sps:$4 sm:$0xff]   ;;  %v16419_v7 = vld [vmem:[#allocation8 + $0x1724] ss:$16 sps:$4 sm:$0xff]  }
 0x366   :  { %7160 = vmatprep.subr.bf16.mxu0 %v16327_v8  ;;  %7857 = vmatprep.subr.bf16.mxu1 %v16330_v9  ;;  %v16422_v8 = vld [vmem:[#allocation8 + $0x172c] ss:$16 sps:$4 sm:$0xff]   ;;  %v16417_v9 = vld [vmem:[#allocation8 + $0x1720] ss:$16 sps:$4 sm:$0xff]  }
 0x369   :  { %7161 = vmatpush1.bf16.msra.mxu0 %v16325_v10  ;;  %7858 = vmatpush1.bf16.msra.mxu1 %v16328_v12  ;;  %v16420_v10 = vld [vmem:[#allocation8 + $0x1728] ss:$16 sps:$4 sm:$0xff]   ;;  %v16425_v12 = vld [vmem:[#allocation8 + $0x1744] ss:$16 sps:$4 sm:$0xff]  }
 0x36a   :  { %7162 = vmatprep.subr.bf16.mxu0 %v16333_v13  ;;  %7859 = vmatprep.subr.bf16.mxu1 %v16336_v15  ;;  %v16428_v13 = vld [vmem:[#allocation8 + $0x174c] ss:$16 sps:$4 sm:$0xff]   ;;  %v16423_v15 = vld [vmem:[#allocation8 + $0x1740] ss:$16 sps:$4 sm:$0xff]  }
 0x36d   :  { %7163 = vmatpush1.bf16.msra.mxu0 %v16331_v16  ;;  %7860 = vmatpush1.bf16.msra.mxu1 %v16334_v18  ;;  %v16426_v16 = vld [vmem:[#allocation8 + $0x1748] ss:$16 sps:$4 sm:$0xff]   ;;  %v16431_v18 = vld [vmem:[#allocation8 + $0x1764] ss:$16 sps:$4 sm:$0xff]  }
 0x36e   :  { %7164 = vmatprep.subr.bf16.mxu0 %v16339_v20  ;;  %7861 = vmatprep.subr.bf16.mxu1 %v16342_v11  ;;  %v16434_v20 = vld [vmem:[#allocation8 + $0x176c] ss:$16 sps:$4 sm:$0xff]   ;;  %v16429_v11 = vld [vmem:[#allocation8 + $0x1760] ss:$16 sps:$4 sm:$0xff]  }
 0x371   :  { %7165 = vmatpush1.bf16.msra.mxu0 %v16337_v21  ;;  %7862 = vmatpush1.bf16.msra.mxu1 %v16340_v14  ;;  %v16432_v21 = vld [vmem:[#allocation8 + $0x1768] ss:$16 sps:$4 sm:$0xff]   ;;  %v16437_v14 = vld [vmem:[#allocation8 + $0x1784] ss:$16 sps:$4 sm:$0xff]  }
 0x372   :  { %7166 = vmatprep.subr.bf16.mxu0 %v16345_v23  ;;  %7863 = vmatprep.subr.bf16.mxu1 %v16348_v24  ;;  %v16440_v23 = vld [vmem:[#allocation8 + $0x178c] ss:$16 sps:$4 sm:$0xff]   ;;  %v16435_v24 = vld [vmem:[#allocation8 + $0x1780] ss:$16 sps:$4 sm:$0xff]  }
 0x375   :  { %7167 = vmatpush1.bf16.msra.mxu0 %v16343_v17  ;;  %7864 = vmatpush1.bf16.msra.mxu1 %v16346_v26  ;;  %v16438_v17 = vld [vmem:[#allocation8 + $0x1788] ss:$16 sps:$4 sm:$0xff]   ;;  %v16443_v26 = vld [vmem:[#allocation8 + $0x17a4] ss:$16 sps:$4 sm:$0xff]  }
 0x376   :  { %7168 = vmatprep.subr.bf16.mxu0 %v16351_v27  ;;  %7865 = vmatprep.subr.bf16.mxu1 %v16354_v19  ;;  %v16446_v27 = vld [vmem:[#allocation8 + $0x17ac] ss:$16 sps:$4 sm:$0xff]   ;;  %v16441_v19 = vld [vmem:[#allocation8 + $0x17a0] ss:$16 sps:$4 sm:$0xff]  }
 0x379   :  { %7169 = vmatpush1.bf16.msra.mxu0 %v16349_v29  ;;  %7866 = vmatpush1.bf16.msra.mxu1 %v16352_v30  ;;  %v16444_v29 = vld [vmem:[#allocation8 + $0x17a8] ss:$16 sps:$4 sm:$0xff]   ;;  %v16449_v30 = vld [vmem:[#allocation8 + $0x17c4] ss:$16 sps:$4 sm:$0xff]  }
 0x37a   :  { %7170 = vmatprep.subr.bf16.mxu0 %v16357_v22  ;;  %7867 = vmatprep.subr.bf16.mxu1 %v16360_v32  ;;  %v16452_v22 = vld [vmem:[#allocation8 + $0x17cc] ss:$16 sps:$4 sm:$0xff]   ;;  %v16447_v32 = vld [vmem:[#allocation8 + $0x17c0] ss:$16 sps:$4 sm:$0xff]  }
 0x37d   :  { %7171 = vmatpush1.bf16.msra.mxu0 %v16355_v33  ;;  %7868 = vmatpush1.bf16.msra.mxu1 %v16358_v25  ;;  %v16450_v33 = vld [vmem:[#allocation8 + $0x17c8] ss:$16 sps:$4 sm:$0xff]   ;;  %v16455_v25 = vld [vmem:[#allocation8 + $0x17e4] ss:$16 sps:$4 sm:$0xff]  }
 0x37e   :  { %7181 = vmatprep.subr.bf16.mxu0 %v16365_v35  ;;  %7878 = vmatprep.subr.bf16.mxu1 %v16368_v36  ;;  %v16458_v35 = vld [vmem:[#allocation8 + $0x17ec] ss:$16 sps:$4 sm:$0xff]   ;;  %v16453_v36 = vld [vmem:[#allocation8 + $0x17e0] ss:$16 sps:$4 sm:$0xff]  }
 0x380   :  { %7173 = vmatmul.mubr.bf16.vlgmr.msra.gmra.mrb[0].mxu0 %v13662_v37  ;;  %7870 = vmatmul.mubr.bf16.vlgmr.msra.gmra.mrb[0].mxu1 %v13662_v37  ;;  %v16456_v37 = vld [vmem:[#allocation8 + $0x17e8] ss:$16 sps:$4 sm:$0xff]  }
 0x381   :  { %7182 = vmatpush1.bf16.msra.mxu0 %v16363_v38  ;;  %7879 = vmatpush1.bf16.msra.mxu1 %v16366_v39  ;;  %v16463_v38 = vld [vmem:[#allocation8 + $0x1804] ss:$16 sps:$4 sm:$0xff]   ;;  %v16466_v39 = vld [vmem:[#allocation8 + $0x180c] ss:$16 sps:$4 sm:$0xff]  }
 0x382   :  { %7183 = vmatprep.subr.bf16.mxu0 %v16371_v40  ;;  %7880 = vmatprep.subr.bf16.mxu1 %v16374_v31  ;;  %v13664_v40 = vcombine.low %v17820_v28, %v17820_v28  ;;  %v17826_v31 = vld [vmem:[#allocation4 + $0x60] sm:$0xff]  ;;  %v16475_v28 = vld [vmem:[#allocation8 + $0x1844] ss:$16 sps:$4 sm:$0xff]  }
 0x383   :  { %7213 = vmatprep.mubr.bf16.mxu0 %v13665_v41  ;;  %7910 = vmatprep.mubr.bf16.mxu1 %v13665_v41  ;;  %v16461_v41 = vld [vmem:[#allocation8 + $0x1800] ss:$16 sps:$4 sm:$0xff]  }
 0x385   :  { %7184 = vmatpush1.bf16.msra.mxu0 %v16369_v42  ;;  %7881 = vmatpush1.bf16.msra.mxu1 %v16372_v43  ;;  %v16464_v42 = vld [vmem:[#allocation8 + $0x1808] ss:$16 sps:$4 sm:$0xff]   ;;  %v16469_v43 = vld [vmem:[#allocation8 + $0x1824] ss:$16 sps:$4 sm:$0xff]  }
 0x386   :  { %7185 = vmatprep.subr.bf16.mxu0 %v16377_v34  ;;  %7882 = vmatprep.subr.bf16.mxu1 %v16380_v44  ;;  %v16472_v34 = vld [vmem:[#allocation8 + $0x182c] ss:$16 sps:$4 sm:$0xff]   ;;  %v13667_v44 = vcombine.high %v17826_v31, %v17826_v31 }
 0x389   :  { %7186 = vmatpush1.bf16.msra.mxu0 %v16375_v45  ;;  %7883 = vmatpush1.bf16.msra.mxu1 %v16378_v46  ;;  %v16467_v45 = vld [vmem:[#allocation8 + $0x1820] ss:$16 sps:$4 sm:$0xff]   ;;  %v16470_v46 = vld [vmem:[#allocation8 + $0x1828] ss:$16 sps:$4 sm:$0xff]  }
 0x38a   :  { %7187 = vmatprep.subr.bf16.mxu0 %v16383_v47  ;;  %7884 = vmatprep.subr.bf16.mxu1 %v16386_v48  ;;  %v16478_v47 = vld [vmem:[#allocation8 + $0x184c] ss:$16 sps:$4 sm:$0xff]   ;;  %v16473_v48 = vld [vmem:[#allocation8 + $0x1840] ss:$16 sps:$4 sm:$0xff]  }
 0x38d   :  { %7188 = vmatpush1.bf16.msra.mxu0 %v16381_v49  ;;  %7885 = vmatpush1.bf16.msra.mxu1 %v16384_v50  ;;  %v16476_v49 = vld [vmem:[#allocation8 + $0x1848] ss:$16 sps:$4 sm:$0xff]   ;;  %v16481_v50 = vld [vmem:[#allocation8 + $0x1864] ss:$16 sps:$4 sm:$0xff]  }
 0x38e   :  { %7189 = vmatprep.subr.bf16.mxu0 %v16389_v51  ;;  %7886 = vmatprep.subr.bf16.mxu1 %v16392_v52  ;;  %v16484_v51 = vld [vmem:[#allocation8 + $0x186c] ss:$16 sps:$4 sm:$0xff]   ;;  %v16479_v52 = vld [vmem:[#allocation8 + $0x1860] ss:$16 sps:$4 sm:$0xff]  }
 0x391   :  { %7190 = vmatpush1.bf16.msra.mxu0 %v16387_v53  ;;  %7887 = vmatpush1.bf16.msra.mxu1 %v16390_v54  ;;  %v16482_v53 = vld [vmem:[#allocation8 + $0x1868] ss:$16 sps:$4 sm:$0xff]   ;;  %v16487_v54 = vld [vmem:[#allocation8 + $0x1884] ss:$16 sps:$4 sm:$0xff]  }
 0x392   :  { %7191 = vmatprep.subr.bf16.mxu0 %v16395_v55  ;;  %7888 = vmatprep.subr.bf16.mxu1 %v16398_v56  ;;  %v16490_v55 = vld [vmem:[#allocation8 + $0x188c] ss:$16 sps:$4 sm:$0xff]   ;;  %v16485_v56 = vld [vmem:[#allocation8 + $0x1880] ss:$16 sps:$4 sm:$0xff]  }
 0x395   :  { %7192 = vmatpush1.bf16.msra.mxu0 %v16393_v57  ;;  %7889 = vmatpush1.bf16.msra.mxu1 %v16396_v58  ;;  %v16488_v57 = vld [vmem:[#allocation8 + $0x1888] ss:$16 sps:$4 sm:$0xff]   ;;  %v16493_v58 = vld [vmem:[#allocation8 + $0x18a4] ss:$16 sps:$4 sm:$0xff]  }
 0x396   :  { %7193 = vmatprep.subr.bf16.mxu0 %v16401_v59  ;;  %7890 = vmatprep.subr.bf16.mxu1 %v16404_v60  ;;  %v16496_v59 = vld [vmem:[#allocation8 + $0x18ac] ss:$16 sps:$4 sm:$0xff]   ;;  %v16491_v60 = vld [vmem:[#allocation8 + $0x18a0] ss:$16 sps:$4 sm:$0xff]  }
 0x399   :  { %7194 = vmatpush1.bf16.msra.mxu0 %v16399_v61  ;;  %7891 = vmatpush1.bf16.msra.mxu1 %v16402_v62  ;;  %v16494_v61 = vld [vmem:[#allocation8 + $0x18a8] ss:$16 sps:$4 sm:$0xff]   ;;  %v16499_v62 = vld [vmem:[#allocation8 + $0x18c4] ss:$16 sps:$4 sm:$0xff]  }
 0x39a   :  { %7195 = vmatprep.subr.bf16.mxu0 %v16407_v63  ;;  %7892 = vmatprep.subr.bf16.mxu1 %v16410_v0  ;;  %v16502_v63 = vld [vmem:[#allocation8 + $0x18cc] ss:$16 sps:$4 sm:$0xff]   ;;  %v16497_v0 = vld [vmem:[#allocation8 + $0x18c0] ss:$16 sps:$4 sm:$0xff]  }
 0x39d   :  { %7196 = vmatpush1.bf16.msra.mxu0 %v16405_v1  ;;  %7893 = vmatpush1.bf16.msra.mxu1 %v16408_v2  ;;  %v16500_v1 = vld [vmem:[#allocation8 + $0x18c8] ss:$16 sps:$4 sm:$0xff]   ;;  %v16505_v2 = vld [vmem:[#allocation8 + $0x18e4] ss:$16 sps:$4 sm:$0xff]  }
 0x39e   :  { %7197 = vmatprep.subr.bf16.mxu0 %v16413_v3  ;;  %7894 = vmatprep.subr.bf16.mxu1 %v16416_v4  ;;  %v16508_v3 = vld [vmem:[#allocation8 + $0x18ec] ss:$16 sps:$4 sm:$0xff]   ;;  %v16503_v4 = vld [vmem:[#allocation8 + $0x18e0] ss:$16 sps:$4 sm:$0xff]  }
 0x3a1   :  { %7198 = vmatpush1.bf16.msra.mxu0 %v16411_v5  ;;  %7895 = vmatpush1.bf16.msra.mxu1 %v16414_v6  ;;  %v16506_v5 = vld [vmem:[#allocation8 + $0x18e8] ss:$16 sps:$4 sm:$0xff]   ;;  %v16511_v6 = vld [vmem:[#allocation8 + $0x1904] ss:$16 sps:$4 sm:$0xff]  }
 0x3a2   :  { %7199 = vmatprep.subr.bf16.mxu0 %v16419_v7  ;;  %7896 = vmatprep.subr.bf16.mxu1 %v16422_v8  ;;  %v16514_v7 = vld [vmem:[#allocation8 + $0x190c] ss:$16 sps:$4 sm:$0xff]   ;;  %v16509_v8 = vld [vmem:[#allocation8 + $0x1900] ss:$16 sps:$4 sm:$0xff]  }
 0x3a5   :  { %7200 = vmatpush1.bf16.msra.mxu0 %v16417_v9  ;;  %7897 = vmatpush1.bf16.msra.mxu1 %v16420_v10  ;;  %v16512_v9 = vld [vmem:[#allocation8 + $0x1908] ss:$16 sps:$4 sm:$0xff]   ;;  %v16517_v10 = vld [vmem:[#allocation8 + $0x1924] ss:$16 sps:$4 sm:$0xff]  }
 0x3a6   :  { %7201 = vmatprep.subr.bf16.mxu0 %v16425_v12  ;;  %7898 = vmatprep.subr.bf16.mxu1 %v16428_v13  ;;  %v16520_v12 = vld [vmem:[#allocation8 + $0x192c] ss:$16 sps:$4 sm:$0xff]   ;;  %v16515_v13 = vld [vmem:[#allocation8 + $0x1920] ss:$16 sps:$4 sm:$0xff]  }
 0x3a9   :  { %7202 = vmatpush1.bf16.msra.mxu0 %v16423_v15  ;;  %7899 = vmatpush1.bf16.msra.mxu1 %v16426_v16  ;;  %v16518_v15 = vld [vmem:[#allocation8 + $0x1928] ss:$16 sps:$4 sm:$0xff]   ;;  %v16523_v16 = vld [vmem:[#allocation8 + $0x1944] ss:$16 sps:$4 sm:$0xff]  }
 0x3aa   :  { %7203 = vmatprep.subr.bf16.mxu0 %v16431_v18  ;;  %7900 = vmatprep.subr.bf16.mxu1 %v16434_v20  ;;  %v16526_v18 = vld [vmem:[#allocation8 + $0x194c] ss:$16 sps:$4 sm:$0xff]   ;;  %v16521_v20 = vld [vmem:[#allocation8 + $0x1940] ss:$16 sps:$4 sm:$0xff]  }
 0x3ad   :  { %7204 = vmatpush1.bf16.msra.mxu0 %v16429_v11  ;;  %7901 = vmatpush1.bf16.msra.mxu1 %v16432_v21  ;;  %v16524_v11 = vld [vmem:[#allocation8 + $0x1948] ss:$16 sps:$4 sm:$0xff]   ;;  %v16529_v21 = vld [vmem:[#allocation8 + $0x1964] ss:$16 sps:$4 sm:$0xff]  }
 0x3ae   :  { %7205 = vmatprep.subr.bf16.mxu0 %v16437_v14  ;;  %7902 = vmatprep.subr.bf16.mxu1 %v16440_v23  ;;  %v16532_v14 = vld [vmem:[#allocation8 + $0x196c] ss:$16 sps:$4 sm:$0xff]   ;;  %v16527_v23 = vld [vmem:[#allocation8 + $0x1960] ss:$16 sps:$4 sm:$0xff]  }
 0x3b1   :  { %7206 = vmatpush1.bf16.msra.mxu0 %v16435_v24  ;;  %7903 = vmatpush1.bf16.msra.mxu1 %v16438_v17  ;;  %v16530_v24 = vld [vmem:[#allocation8 + $0x1968] ss:$16 sps:$4 sm:$0xff]   ;;  %v16535_v17 = vld [vmem:[#allocation8 + $0x1984] ss:$16 sps:$4 sm:$0xff]  }
 0x3b2   :  { %7207 = vmatprep.subr.bf16.mxu0 %v16443_v26  ;;  %7904 = vmatprep.subr.bf16.mxu1 %v16446_v27  ;;  %v16538_v26 = vld [vmem:[#allocation8 + $0x198c] ss:$16 sps:$4 sm:$0xff]   ;;  %v16533_v27 = vld [vmem:[#allocation8 + $0x1980] ss:$16 sps:$4 sm:$0xff]  }
 0x3b5   :  { %7208 = vmatpush1.bf16.msra.mxu0 %v16441_v19  ;;  %7905 = vmatpush1.bf16.msra.mxu1 %v16444_v29  ;;  %v16536_v19 = vld [vmem:[#allocation8 + $0x1988] ss:$16 sps:$4 sm:$0xff]   ;;  %v16541_v29 = vld [vmem:[#allocation8 + $0x19a4] ss:$16 sps:$4 sm:$0xff]  }
 0x3b6   :  { %7209 = vmatprep.subr.bf16.mxu0 %v16449_v30  ;;  %7906 = vmatprep.subr.bf16.mxu1 %v16452_v22  ;;  %v16544_v30 = vld [vmem:[#allocation8 + $0x19ac] ss:$16 sps:$4 sm:$0xff]   ;;  %v16539_v22 = vld [vmem:[#allocation8 + $0x19a0] ss:$16 sps:$4 sm:$0xff]  }
 0x3b9   :  { %7210 = vmatpush1.bf16.msra.mxu0 %v16447_v32  ;;  %7907 = vmatpush1.bf16.msra.mxu1 %v16450_v33  ;;  %v16542_v32 = vld [vmem:[#allocation8 + $0x19a8] ss:$16 sps:$4 sm:$0xff]   ;;  %v16547_v33 = vld [vmem:[#allocation8 + $0x19c4] ss:$16 sps:$4 sm:$0xff]  }
 0x3ba   :  { %7211 = vmatprep.subr.bf16.mxu0 %v16455_v25  ;;  %7908 = vmatprep.subr.bf16.mxu1 %v16458_v35  ;;  %v16550_v25 = vld [vmem:[#allocation8 + $0x19cc] ss:$16 sps:$4 sm:$0xff]   ;;  %v16545_v35 = vld [vmem:[#allocation8 + $0x19c0] ss:$16 sps:$4 sm:$0xff]  }
 0x3bd   :  { %7212 = vmatpush1.bf16.msra.mxu0 %v16453_v36  ;;  %7909 = vmatpush1.bf16.msra.mxu1 %v16456_v37  ;;  %v16548_v36 = vld [vmem:[#allocation8 + $0x19c8] ss:$16 sps:$4 sm:$0xff]   ;;  %v16553_v37 = vld [vmem:[#allocation8 + $0x19e4] ss:$16 sps:$4 sm:$0xff]  }
 0x3be   :  { %7222 = vmatprep.subr.bf16.mxu0 %v16463_v38  ;;  %7919 = vmatprep.subr.bf16.mxu1 %v16466_v39  ;;  %v16556_v38 = vld [vmem:[#allocation8 + $0x19ec] ss:$16 sps:$4 sm:$0xff]   ;;  %v16551_v39 = vld [vmem:[#allocation8 + $0x19e0] ss:$16 sps:$4 sm:$0xff]  }
 0x3c0   :  { %7214 = vmatmul.mubr.bf16.vlgmr.msra.gmra.mrb[0].mxu0 %v13664_v40  ;;  %7911 = vmatmul.mubr.bf16.vlgmr.msra.gmra.mrb[0].mxu1 %v13664_v40  ;;  %v16554_v40 = vld [vmem:[#allocation8 + $0x19e8] ss:$16 sps:$4 sm:$0xff]  }
 0x3c1   :  { %7223 = vmatpush1.bf16.msra.mxu0 %v16461_v41  ;;  %7920 = vmatpush1.bf16.msra.mxu1 %v16464_v42  ;;  %v16561_v41 = vld [vmem:[#allocation8 + $0x1a04] ss:$16 sps:$4 sm:$0xff]   ;;  %v16564_v42 = vld [vmem:[#allocation8 + $0x1a0c] ss:$16 sps:$4 sm:$0xff]  }
 0x3c2   :  { %7224 = vmatprep.subr.bf16.mxu0 %v16469_v43  ;;  %7921 = vmatprep.subr.bf16.mxu1 %v16472_v34  ;;  %v13666_v43 = vcombine.low %v17826_v31, %v17826_v31  ;;  %v17832_v34 = vld [vmem:[#allocation4 + $0x68] sm:$0xff] }
 0x3c3   :  { %7254 = vmatprep.mubr.bf16.mxu0 %v13667_v44  ;;  %7951 = vmatprep.mubr.bf16.mxu1 %v13667_v44  ;;  %v16559_v44 = vld [vmem:[#allocation8 + $0x1a00] ss:$16 sps:$4 sm:$0xff]   ;;  %v16573_v31 = vld [vmem:[#allocation8 + $0x1a44] ss:$16 sps:$4 sm:$0xff]  }
 0x3c5   :  { %7225 = vmatpush1.bf16.msra.mxu0 %v16467_v45  ;;  %7922 = vmatpush1.bf16.msra.mxu1 %v16470_v46  ;;  %v16562_v45 = vld [vmem:[#allocation8 + $0x1a08] ss:$16 sps:$4 sm:$0xff]   ;;  %v16567_v46 = vld [vmem:[#allocation8 + $0x1a24] ss:$16 sps:$4 sm:$0xff]  }
 0x3c6   :  { %7226 = vmatprep.subr.bf16.mxu0 %v16475_v28  ;;  %7923 = vmatprep.subr.bf16.mxu1 %v16478_v47  ;;  %v16570_v28 = vld [vmem:[#allocation8 + $0x1a2c] ss:$16 sps:$4 sm:$0xff]   ;;  %v13669_v47 = vcombine.high %v17832_v34, %v17832_v34 }
 0x3c9   :  { %7227 = vmatpush1.bf16.msra.mxu0 %v16473_v48  ;;  %7924 = vmatpush1.bf16.msra.mxu1 %v16476_v49  ;;  %v16565_v48 = vld [vmem:[#allocation8 + $0x1a20] ss:$16 sps:$4 sm:$0xff]   ;;  %v16568_v49 = vld [vmem:[#allocation8 + $0x1a28] ss:$16 sps:$4 sm:$0xff]  }
 0x3ca   :  { %7228 = vmatprep.subr.bf16.mxu0 %v16481_v50  ;;  %7925 = vmatprep.subr.bf16.mxu1 %v16484_v51  ;;  %v16576_v50 = vld [vmem:[#allocation8 + $0x1a4c] ss:$16 sps:$4 sm:$0xff]   ;;  %v16571_v51 = vld [vmem:[#allocation8 + $0x1a40] ss:$16 sps:$4 sm:$0xff]  }
 0x3cd   :  { %7229 = vmatpush1.bf16.msra.mxu0 %v16479_v52  ;;  %7926 = vmatpush1.bf16.msra.mxu1 %v16482_v53  ;;  %v16574_v52 = vld [vmem:[#allocation8 + $0x1a48] ss:$16 sps:$4 sm:$0xff]   ;;  %v16579_v53 = vld [vmem:[#allocation8 + $0x1a64] ss:$16 sps:$4 sm:$0xff]  }
 0x3ce   :  { %7230 = vmatprep.subr.bf16.mxu0 %v16487_v54  ;;  %7927 = vmatprep.subr.bf16.mxu1 %v16490_v55  ;;  %v16582_v54 = vld [vmem:[#allocation8 + $0x1a6c] ss:$16 sps:$4 sm:$0xff]   ;;  %v16577_v55 = vld [vmem:[#allocation8 + $0x1a60] ss:$16 sps:$4 sm:$0xff]  }
 0x3d1   :  { %7231 = vmatpush1.bf16.msra.mxu0 %v16485_v56  ;;  %7928 = vmatpush1.bf16.msra.mxu1 %v16488_v57  ;;  %v16580_v56 = vld [vmem:[#allocation8 + $0x1a68] ss:$16 sps:$4 sm:$0xff]   ;;  %v16585_v57 = vld [vmem:[#allocation8 + $0x1a84] ss:$16 sps:$4 sm:$0xff]  }
 0x3d2   :  { %7232 = vmatprep.subr.bf16.mxu0 %v16493_v58  ;;  %7929 = vmatprep.subr.bf16.mxu1 %v16496_v59  ;;  %v16588_v58 = vld [vmem:[#allocation8 + $0x1a8c] ss:$16 sps:$4 sm:$0xff]   ;;  %v16583_v59 = vld [vmem:[#allocation8 + $0x1a80] ss:$16 sps:$4 sm:$0xff]  }
 0x3d5   :  { %7233 = vmatpush1.bf16.msra.mxu0 %v16491_v60  ;;  %7930 = vmatpush1.bf16.msra.mxu1 %v16494_v61  ;;  %v16586_v60 = vld [vmem:[#allocation8 + $0x1a88] ss:$16 sps:$4 sm:$0xff]   ;;  %v16591_v61 = vld [vmem:[#allocation8 + $0x1aa4] ss:$16 sps:$4 sm:$0xff]  }
 0x3d6   :  { %7234 = vmatprep.subr.bf16.mxu0 %v16499_v62  ;;  %7931 = vmatprep.subr.bf16.mxu1 %v16502_v63  ;;  %v16594_v62 = vld [vmem:[#allocation8 + $0x1aac] ss:$16 sps:$4 sm:$0xff]   ;;  %v16589_v63 = vld [vmem:[#allocation8 + $0x1aa0] ss:$16 sps:$4 sm:$0xff]  }
 0x3d9   :  { %7235 = vmatpush1.bf16.msra.mxu0 %v16497_v0  ;;  %7932 = vmatpush1.bf16.msra.mxu1 %v16500_v1  ;;  %v16592_v0 = vld [vmem:[#allocation8 + $0x1aa8] ss:$16 sps:$4 sm:$0xff]   ;;  %v16597_v1 = vld [vmem:[#allocation8 + $0x1ac4] ss:$16 sps:$4 sm:$0xff]  }
 0x3da   :  { %7236 = vmatprep.subr.bf16.mxu0 %v16505_v2  ;;  %7933 = vmatprep.subr.bf16.mxu1 %v16508_v3  ;;  %v16600_v2 = vld [vmem:[#allocation8 + $0x1acc] ss:$16 sps:$4 sm:$0xff]   ;;  %v16595_v3 = vld [vmem:[#allocation8 + $0x1ac0] ss:$16 sps:$4 sm:$0xff]  }
 0x3dd   :  { %7237 = vmatpush1.bf16.msra.mxu0 %v16503_v4  ;;  %7934 = vmatpush1.bf16.msra.mxu1 %v16506_v5  ;;  %v16598_v4 = vld [vmem:[#allocation8 + $0x1ac8] ss:$16 sps:$4 sm:$0xff]   ;;  %v16603_v5 = vld [vmem:[#allocation8 + $0x1ae4] ss:$16 sps:$4 sm:$0xff]  }
 0x3de   :  { %7238 = vmatprep.subr.bf16.mxu0 %v16511_v6  ;;  %7935 = vmatprep.subr.bf16.mxu1 %v16514_v7  ;;  %v16606_v6 = vld [vmem:[#allocation8 + $0x1aec] ss:$16 sps:$4 sm:$0xff]   ;;  %v16601_v7 = vld [vmem:[#allocation8 + $0x1ae0] ss:$16 sps:$4 sm:$0xff]  }
 0x3e1   :  { %7239 = vmatpush1.bf16.msra.mxu0 %v16509_v8  ;;  %7936 = vmatpush1.bf16.msra.mxu1 %v16512_v9  ;;  %v16604_v8 = vld [vmem:[#allocation8 + $0x1ae8] ss:$16 sps:$4 sm:$0xff]   ;;  %v16609_v9 = vld [vmem:[#allocation8 + $0x1b04] ss:$16 sps:$4 sm:$0xff]  }
 0x3e2   :  { %7240 = vmatprep.subr.bf16.mxu0 %v16517_v10  ;;  %7937 = vmatprep.subr.bf16.mxu1 %v16520_v12  ;;  %v16612_v10 = vld [vmem:[#allocation8 + $0x1b0c] ss:$16 sps:$4 sm:$0xff]   ;;  %v16607_v12 = vld [vmem:[#allocation8 + $0x1b00] ss:$16 sps:$4 sm:$0xff]  }
 0x3e5   :  { %7241 = vmatpush1.bf16.msra.mxu0 %v16515_v13  ;;  %7938 = vmatpush1.bf16.msra.mxu1 %v16518_v15  ;;  %v16610_v13 = vld [vmem:[#allocation8 + $0x1b08] ss:$16 sps:$4 sm:$0xff]   ;;  %v16615_v15 = vld [vmem:[#allocation8 + $0x1b24] ss:$16 sps:$4 sm:$0xff]  }
 0x3e6   :  { %7242 = vmatprep.subr.bf16.mxu0 %v16523_v16  ;;  %7939 = vmatprep.subr.bf16.mxu1 %v16526_v18  ;;  %v16618_v16 = vld [vmem:[#allocation8 + $0x1b2c] ss:$16 sps:$4 sm:$0xff]   ;;  %v16613_v18 = vld [vmem:[#allocation8 + $0x1b20] ss:$16 sps:$4 sm:$0xff]  }
 0x3e9   :  { %7243 = vmatpush1.bf16.msra.mxu0 %v16521_v20  ;;  %7940 = vmatpush1.bf16.msra.mxu1 %v16524_v11  ;;  %v16616_v20 = vld [vmem:[#allocation8 + $0x1b28] ss:$16 sps:$4 sm:$0xff]   ;;  %v16621_v11 = vld [vmem:[#allocation8 + $0x1b44] ss:$16 sps:$4 sm:$0xff]  }
 0x3ea   :  { %7244 = vmatprep.subr.bf16.mxu0 %v16529_v21  ;;  %7941 = vmatprep.subr.bf16.mxu1 %v16532_v14  ;;  %v16624_v21 = vld [vmem:[#allocation8 + $0x1b4c] ss:$16 sps:$4 sm:$0xff]   ;;  %v16619_v14 = vld [vmem:[#allocation8 + $0x1b40] ss:$16 sps:$4 sm:$0xff]  }
 0x3ed   :  { %7245 = vmatpush1.bf16.msra.mxu0 %v16527_v23  ;;  %7942 = vmatpush1.bf16.msra.mxu1 %v16530_v24  ;;  %v16622_v23 = vld [vmem:[#allocation8 + $0x1b48] ss:$16 sps:$4 sm:$0xff]   ;;  %v16627_v24 = vld [vmem:[#allocation8 + $0x1b64] ss:$16 sps:$4 sm:$0xff]  }
 0x3ee   :  { %7246 = vmatprep.subr.bf16.mxu0 %v16535_v17  ;;  %7943 = vmatprep.subr.bf16.mxu1 %v16538_v26  ;;  %v16630_v17 = vld [vmem:[#allocation8 + $0x1b6c] ss:$16 sps:$4 sm:$0xff]   ;;  %v16625_v26 = vld [vmem:[#allocation8 + $0x1b60] ss:$16 sps:$4 sm:$0xff]  }
 0x3f1   :  { %7247 = vmatpush1.bf16.msra.mxu0 %v16533_v27  ;;  %7944 = vmatpush1.bf16.msra.mxu1 %v16536_v19  ;;  %v16628_v27 = vld [vmem:[#allocation8 + $0x1b68] ss:$16 sps:$4 sm:$0xff]   ;;  %v16633_v19 = vld [vmem:[#allocation8 + $0x1b84] ss:$16 sps:$4 sm:$0xff]  }
 0x3f2   :  { %7248 = vmatprep.subr.bf16.mxu0 %v16541_v29  ;;  %7945 = vmatprep.subr.bf16.mxu1 %v16544_v30  ;;  %v16636_v29 = vld [vmem:[#allocation8 + $0x1b8c] ss:$16 sps:$4 sm:$0xff]   ;;  %v16631_v30 = vld [vmem:[#allocation8 + $0x1b80] ss:$16 sps:$4 sm:$0xff]  }
 0x3f5   :  { %7249 = vmatpush1.bf16.msra.mxu0 %v16539_v22  ;;  %7946 = vmatpush1.bf16.msra.mxu1 %v16542_v32  ;;  %v16634_v22 = vld [vmem:[#allocation8 + $0x1b88] ss:$16 sps:$4 sm:$0xff]   ;;  %v16639_v32 = vld [vmem:[#allocation8 + $0x1ba4] ss:$16 sps:$4 sm:$0xff]  }
 0x3f6   :  { %7250 = vmatprep.subr.bf16.mxu0 %v16547_v33  ;;  %7947 = vmatprep.subr.bf16.mxu1 %v16550_v25  ;;  %v16642_v33 = vld [vmem:[#allocation8 + $0x1bac] ss:$16 sps:$4 sm:$0xff]   ;;  %v16637_v25 = vld [vmem:[#allocation8 + $0x1ba0] ss:$16 sps:$4 sm:$0xff]  }
 0x3f9   :  { %7251 = vmatpush1.bf16.msra.mxu0 %v16545_v35  ;;  %7948 = vmatpush1.bf16.msra.mxu1 %v16548_v36  ;;  %v16640_v35 = vld [vmem:[#allocation8 + $0x1ba8] ss:$16 sps:$4 sm:$0xff]   ;;  %v16645_v36 = vld [vmem:[#allocation8 + $0x1bc4] ss:$16 sps:$4 sm:$0xff]  }
 0x3fa   :  { %7252 = vmatprep.subr.bf16.mxu0 %v16553_v37  ;;  %7949 = vmatprep.subr.bf16.mxu1 %v16556_v38  ;;  %v16648_v37 = vld [vmem:[#allocation8 + $0x1bcc] ss:$16 sps:$4 sm:$0xff]   ;;  %v16643_v38 = vld [vmem:[#allocation8 + $0x1bc0] ss:$16 sps:$4 sm:$0xff]  }
 0x3fd   :  { %7253 = vmatpush1.bf16.msra.mxu0 %v16551_v39  ;;  %7950 = vmatpush1.bf16.msra.mxu1 %v16554_v40  ;;  %v16646_v39 = vld [vmem:[#allocation8 + $0x1bc8] ss:$16 sps:$4 sm:$0xff]   ;;  %v16651_v40 = vld [vmem:[#allocation8 + $0x1be4] ss:$16 sps:$4 sm:$0xff]  }
 0x3fe   :  { %7263 = vmatprep.subr.bf16.mxu0 %v16561_v41  ;;  %7960 = vmatprep.subr.bf16.mxu1 %v16564_v42  ;;  %v16654_v41 = vld [vmem:[#allocation8 + $0x1bec] ss:$16 sps:$4 sm:$0xff]   ;;  %v16649_v42 = vld [vmem:[#allocation8 + $0x1be0] ss:$16 sps:$4 sm:$0xff]  }
 0x400   :  { %7255 = vmatmul.mubr.bf16.vlgmr.msra.gmra.mrb[0].mxu0 %v13666_v43  ;;  %7952 = vmatmul.mubr.bf16.vlgmr.msra.gmra.mrb[0].mxu1 %v13666_v43  ;;  %v16652_v43 = vld [vmem:[#allocation8 + $0x1be8] ss:$16 sps:$4 sm:$0xff]  }
 0x401   :  { %7264 = vmatpush1.bf16.msra.mxu0 %v16559_v44  ;;  %7961 = vmatpush1.bf16.msra.mxu1 %v16562_v45  ;;  %v16659_v44 = vld [vmem:[#allocation8 + $0x1c04] ss:$16 sps:$4 sm:$0xff]   ;;  %v16662_v45 = vld [vmem:[#allocation8 + $0x1c0c] ss:$16 sps:$4 sm:$0xff]  }
 0x402   :  { %7265 = vmatprep.subr.bf16.mxu0 %v16567_v46  ;;  %7962 = vmatprep.subr.bf16.mxu1 %v16570_v28  ;;  %v13668_v46 = vcombine.low %v17832_v34, %v17832_v34  ;;  %v17838_v28 = vld [vmem:[#allocation4 + $0x70] sm:$0xff]  ;;  %v16671_v34 = vld [vmem:[#allocation8 + $0x1c44] ss:$16 sps:$4 sm:$0xff]  }
 0x403   :  { %7295 = vmatprep.mubr.bf16.mxu0 %v13669_v47  ;;  %7992 = vmatprep.mubr.bf16.mxu1 %v13669_v47  ;;  %v16657_v47 = vld [vmem:[#allocation8 + $0x1c00] ss:$16 sps:$4 sm:$0xff]  }
 0x405   :  { %7266 = vmatpush1.bf16.msra.mxu0 %v16565_v48  ;;  %7963 = vmatpush1.bf16.msra.mxu1 %v16568_v49  ;;  %v16660_v48 = vld [vmem:[#allocation8 + $0x1c08] ss:$16 sps:$4 sm:$0xff]   ;;  %v16665_v49 = vld [vmem:[#allocation8 + $0x1c24] ss:$16 sps:$4 sm:$0xff]  }
 0x406   :  { %7267 = vmatprep.subr.bf16.mxu0 %v16573_v31  ;;  %7964 = vmatprep.subr.bf16.mxu1 %v16576_v50  ;;  %v16668_v31 = vld [vmem:[#allocation8 + $0x1c2c] ss:$16 sps:$4 sm:$0xff]   ;;  %v13671_v50 = vcombine.high %v17838_v28, %v17838_v28 }
 0x409   :  { %7268 = vmatpush1.bf16.msra.mxu0 %v16571_v51  ;;  %7965 = vmatpush1.bf16.msra.mxu1 %v16574_v52  ;;  %v16663_v51 = vld [vmem:[#allocation8 + $0x1c20] ss:$16 sps:$4 sm:$0xff]   ;;  %v16666_v52 = vld [vmem:[#allocation8 + $0x1c28] ss:$16 sps:$4 sm:$0xff]  }
 0x40a   :  { %7269 = vmatprep.subr.bf16.mxu0 %v16579_v53  ;;  %7966 = vmatprep.subr.bf16.mxu1 %v16582_v54  ;;  %v16674_v53 = vld [vmem:[#allocation8 + $0x1c4c] ss:$16 sps:$4 sm:$0xff]   ;;  %v16669_v54 = vld [vmem:[#allocation8 + $0x1c40] ss:$16 sps:$4 sm:$0xff]  }
 0x40d   :  { %7270 = vmatpush1.bf16.msra.mxu0 %v16577_v55  ;;  %7967 = vmatpush1.bf16.msra.mxu1 %v16580_v56  ;;  %v16672_v55 = vld [vmem:[#allocation8 + $0x1c48] ss:$16 sps:$4 sm:$0xff]   ;;  %v16677_v56 = vld [vmem:[#allocation8 + $0x1c64] ss:$16 sps:$4 sm:$0xff]  }
 0x40e   :  { %7271 = vmatprep.subr.bf16.mxu0 %v16585_v57  ;;  %7968 = vmatprep.subr.bf16.mxu1 %v16588_v58  ;;  %v16680_v57 = vld [vmem:[#allocation8 + $0x1c6c] ss:$16 sps:$4 sm:$0xff]   ;;  %v16675_v58 = vld [vmem:[#allocation8 + $0x1c60] ss:$16 sps:$4 sm:$0xff]  }
 0x411   :  { %7272 = vmatpush1.bf16.msra.mxu0 %v16583_v59  ;;  %7969 = vmatpush1.bf16.msra.mxu1 %v16586_v60  ;;  %v16678_v59 = vld [vmem:[#allocation8 + $0x1c68] ss:$16 sps:$4 sm:$0xff]   ;;  %v16683_v60 = vld [vmem:[#allocation8 + $0x1c84] ss:$16 sps:$4 sm:$0xff]  }
 0x412   :  { %7273 = vmatprep.subr.bf16.mxu0 %v16591_v61  ;;  %7970 = vmatprep.subr.bf16.mxu1 %v16594_v62  ;;  %v16686_v61 = vld [vmem:[#allocation8 + $0x1c8c] ss:$16 sps:$4 sm:$0xff]   ;;  %v16681_v62 = vld [vmem:[#allocation8 + $0x1c80] ss:$16 sps:$4 sm:$0xff]  }
 0x415   :  { %7274 = vmatpush1.bf16.msra.mxu0 %v16589_v63  ;;  %7971 = vmatpush1.bf16.msra.mxu1 %v16592_v0  ;;  %v16684_v63 = vld [vmem:[#allocation8 + $0x1c88] ss:$16 sps:$4 sm:$0xff]   ;;  %v16689_v0 = vld [vmem:[#allocation8 + $0x1ca4] ss:$16 sps:$4 sm:$0xff]  }
 0x416   :  { %7275 = vmatprep.subr.bf16.mxu0 %v16597_v1  ;;  %7972 = vmatprep.subr.bf16.mxu1 %v16600_v2  ;;  %v16692_v1 = vld [vmem:[#allocation8 + $0x1cac] ss:$16 sps:$4 sm:$0xff]   ;;  %v16687_v2 = vld [vmem:[#allocation8 + $0x1ca0] ss:$16 sps:$4 sm:$0xff]  }
 0x419   :  { %7276 = vmatpush1.bf16.msra.mxu0 %v16595_v3  ;;  %7973 = vmatpush1.bf16.msra.mxu1 %v16598_v4  ;;  %v16690_v3 = vld [vmem:[#allocation8 + $0x1ca8] ss:$16 sps:$4 sm:$0xff]   ;;  %v16695_v4 = vld [vmem:[#allocation8 + $0x1cc4] ss:$16 sps:$4 sm:$0xff]  }
 0x41a   :  { %7277 = vmatprep.subr.bf16.mxu0 %v16603_v5  ;;  %7974 = vmatprep.subr.bf16.mxu1 %v16606_v6  ;;  %v16698_v5 = vld [vmem:[#allocation8 + $0x1ccc] ss:$16 sps:$4 sm:$0xff]   ;;  %v16693_v6 = vld [vmem:[#allocation8 + $0x1cc0] ss:$16 sps:$4 sm:$0xff]  }
 0x41d   :  { %7278 = vmatpush1.bf16.msra.mxu0 %v16601_v7  ;;  %7975 = vmatpush1.bf16.msra.mxu1 %v16604_v8  ;;  %v16696_v7 = vld [vmem:[#allocation8 + $0x1cc8] ss:$16 sps:$4 sm:$0xff]   ;;  %v16701_v8 = vld [vmem:[#allocation8 + $0x1ce4] ss:$16 sps:$4 sm:$0xff]  }
 0x41e   :  { %7279 = vmatprep.subr.bf16.mxu0 %v16609_v9  ;;  %7976 = vmatprep.subr.bf16.mxu1 %v16612_v10  ;;  %v16704_v9 = vld [vmem:[#allocation8 + $0x1cec] ss:$16 sps:$4 sm:$0xff]   ;;  %v16699_v10 = vld [vmem:[#allocation8 + $0x1ce0] ss:$16 sps:$4 sm:$0xff]  }
 0x421   :  { %7280 = vmatpush1.bf16.msra.mxu0 %v16607_v12  ;;  %7977 = vmatpush1.bf16.msra.mxu1 %v16610_v13  ;;  %v16702_v12 = vld [vmem:[#allocation8 + $0x1ce8] ss:$16 sps:$4 sm:$0xff]   ;;  %v16707_v13 = vld [vmem:[#allocation8 + $0x1d04] ss:$16 sps:$4 sm:$0xff]  }
 0x422   :  { %7281 = vmatprep.subr.bf16.mxu0 %v16615_v15  ;;  %7978 = vmatprep.subr.bf16.mxu1 %v16618_v16  ;;  %v16710_v15 = vld [vmem:[#allocation8 + $0x1d0c] ss:$16 sps:$4 sm:$0xff]   ;;  %v16705_v16 = vld [vmem:[#allocation8 + $0x1d00] ss:$16 sps:$4 sm:$0xff]  }
 0x425   :  { %7282 = vmatpush1.bf16.msra.mxu0 %v16613_v18  ;;  %7979 = vmatpush1.bf16.msra.mxu1 %v16616_v20  ;;  %v16708_v18 = vld [vmem:[#allocation8 + $0x1d08] ss:$16 sps:$4 sm:$0xff]   ;;  %v16713_v20 = vld [vmem:[#allocation8 + $0x1d24] ss:$16 sps:$4 sm:$0xff]  }
 0x426   :  { %7283 = vmatprep.subr.bf16.mxu0 %v16621_v11  ;;  %7980 = vmatprep.subr.bf16.mxu1 %v16624_v21  ;;  %v16716_v11 = vld [vmem:[#allocation8 + $0x1d2c] ss:$16 sps:$4 sm:$0xff]   ;;  %v16711_v21 = vld [vmem:[#allocation8 + $0x1d20] ss:$16 sps:$4 sm:$0xff]  }
 0x429   :  { %7284 = vmatpush1.bf16.msra.mxu0 %v16619_v14  ;;  %7981 = vmatpush1.bf16.msra.mxu1 %v16622_v23  ;;  %v16714_v14 = vld [vmem:[#allocation8 + $0x1d28] ss:$16 sps:$4 sm:$0xff]   ;;  %v16719_v23 = vld [vmem:[#allocation8 + $0x1d44] ss:$16 sps:$4 sm:$0xff]  }
 0x42a   :  { %7285 = vmatprep.subr.bf16.mxu0 %v16627_v24  ;;  %7982 = vmatprep.subr.bf16.mxu1 %v16630_v17  ;;  %v16722_v24 = vld [vmem:[#allocation8 + $0x1d4c] ss:$16 sps:$4 sm:$0xff]   ;;  %v16717_v17 = vld [vmem:[#allocation8 + $0x1d40] ss:$16 sps:$4 sm:$0xff]  }
 0x42d   :  { %7286 = vmatpush1.bf16.msra.mxu0 %v16625_v26  ;;  %7983 = vmatpush1.bf16.msra.mxu1 %v16628_v27  ;;  %v16720_v26 = vld [vmem:[#allocation8 + $0x1d48] ss:$16 sps:$4 sm:$0xff]   ;;  %v16725_v27 = vld [vmem:[#allocation8 + $0x1d64] ss:$16 sps:$4 sm:$0xff]  }
 0x42e   :  { %7287 = vmatprep.subr.bf16.mxu0 %v16633_v19  ;;  %7984 = vmatprep.subr.bf16.mxu1 %v16636_v29  ;;  %v16728_v19 = vld [vmem:[#allocation8 + $0x1d6c] ss:$16 sps:$4 sm:$0xff]   ;;  %v16723_v29 = vld [vmem:[#allocation8 + $0x1d60] ss:$16 sps:$4 sm:$0xff]  }
 0x431   :  { %7288 = vmatpush1.bf16.msra.mxu0 %v16631_v30  ;;  %7985 = vmatpush1.bf16.msra.mxu1 %v16634_v22  ;;  %v16726_v30 = vld [vmem:[#allocation8 + $0x1d68] ss:$16 sps:$4 sm:$0xff]   ;;  %v16731_v22 = vld [vmem:[#allocation8 + $0x1d84] ss:$16 sps:$4 sm:$0xff]  }
 0x432   :  { %7289 = vmatprep.subr.bf16.mxu0 %v16639_v32  ;;  %7986 = vmatprep.subr.bf16.mxu1 %v16642_v33  ;;  %v16734_v32 = vld [vmem:[#allocation8 + $0x1d8c] ss:$16 sps:$4 sm:$0xff]   ;;  %v16729_v33 = vld [vmem:[#allocation8 + $0x1d80] ss:$16 sps:$4 sm:$0xff]  }
 0x435   :  { %7290 = vmatpush1.bf16.msra.mxu0 %v16637_v25  ;;  %7987 = vmatpush1.bf16.msra.mxu1 %v16640_v35  ;;  %v16732_v25 = vld [vmem:[#allocation8 + $0x1d88] ss:$16 sps:$4 sm:$0xff]   ;;  %v16737_v35 = vld [vmem:[#allocation8 + $0x1da4] ss:$16 sps:$4 sm:$0xff]  }
 0x436   :  { %7291 = vmatprep.subr.bf16.mxu0 %v16645_v36  ;;  %7988 = vmatprep.subr.bf16.mxu1 %v16648_v37  ;;  %v16740_v36 = vld [vmem:[#allocation8 + $0x1dac] ss:$16 sps:$4 sm:$0xff]   ;;  %v16735_v37 = vld [vmem:[#allocation8 + $0x1da0] ss:$16 sps:$4 sm:$0xff]  }
 0x439   :  { %7292 = vmatpush1.bf16.msra.mxu0 %v16643_v38  ;;  %7989 = vmatpush1.bf16.msra.mxu1 %v16646_v39  ;;  %v16738_v38 = vld [vmem:[#allocation8 + $0x1da8] ss:$16 sps:$4 sm:$0xff]   ;;  %v16743_v39 = vld [vmem:[#allocation8 + $0x1dc4] ss:$16 sps:$4 sm:$0xff]  }
 0x43a   :  { %7293 = vmatprep.subr.bf16.mxu0 %v16651_v40  ;;  %7990 = vmatprep.subr.bf16.mxu1 %v16654_v41  ;;  %v16746_v40 = vld [vmem:[#allocation8 + $0x1dcc] ss:$16 sps:$4 sm:$0xff]   ;;  %v16741_v41 = vld [vmem:[#allocation8 + $0x1dc0] ss:$16 sps:$4 sm:$0xff]  }
 0x43d   :  { %7294 = vmatpush1.bf16.msra.mxu0 %v16649_v42  ;;  %7991 = vmatpush1.bf16.msra.mxu1 %v16652_v43  ;;  %v16744_v42 = vld [vmem:[#allocation8 + $0x1dc8] ss:$16 sps:$4 sm:$0xff]   ;;  %v16749_v43 = vld [vmem:[#allocation8 + $0x1de4] ss:$16 sps:$4 sm:$0xff]  }
 0x43e   :  { %7304 = vmatprep.subr.bf16.mxu0 %v16659_v44  ;;  %8001 = vmatprep.subr.bf16.mxu1 %v16662_v45  ;;  %v16752_v44 = vld [vmem:[#allocation8 + $0x1dec] ss:$16 sps:$4 sm:$0xff]   ;;  %v16747_v45 = vld [vmem:[#allocation8 + $0x1de0] ss:$16 sps:$4 sm:$0xff]  }
 0x440   :  { %7296 = vmatmul.mubr.bf16.vlgmr.msra.gmra.mrb[0].mxu0 %v13668_v46  ;;  %7993 = vmatmul.mubr.bf16.vlgmr.msra.gmra.mrb[0].mxu1 %v13668_v46  ;;  %v16750_v46 = vld [vmem:[#allocation8 + $0x1de8] ss:$16 sps:$4 sm:$0xff]  }
 0x441   :  { %7305 = vmatpush1.bf16.msra.mxu0 %v16657_v47  ;;  %8002 = vmatpush1.bf16.msra.mxu1 %v16660_v48  ;;  %v16757_v47 = vld [vmem:[#allocation8 + $0x1e04] ss:$16 sps:$4 sm:$0xff]   ;;  %v16760_v48 = vld [vmem:[#allocation8 + $0x1e0c] ss:$16 sps:$4 sm:$0xff]  }
 0x442   :  { %7306 = vmatprep.subr.bf16.mxu0 %v16665_v49  ;;  %8003 = vmatprep.subr.bf16.mxu1 %v16668_v31  ;;  %v13670_v49 = vcombine.low %v17838_v28, %v17838_v28  ;;  %v17844_v31 = vld [vmem:[#allocation4 + $0x78] sm:$0xff] }
 0x443   :  { %7336 = vmatprep.mubr.bf16.mxu0 %v13671_v50  ;;  %8033 = vmatprep.mubr.bf16.mxu1 %v13671_v50  ;;  %v16755_v50 = vld [vmem:[#allocation8 + $0x1e00] ss:$16 sps:$4 sm:$0xff]   ;;  %v16769_v28 = vld [vmem:[#allocation8 + $0x1e44] ss:$16 sps:$4 sm:$0xff]  }
 0x445   :  { %7307 = vmatpush1.bf16.msra.mxu0 %v16663_v51  ;;  %8004 = vmatpush1.bf16.msra.mxu1 %v16666_v52  ;;  %v16758_v51 = vld [vmem:[#allocation8 + $0x1e08] ss:$16 sps:$4 sm:$0xff]   ;;  %v16763_v52 = vld [vmem:[#allocation8 + $0x1e24] ss:$16 sps:$4 sm:$0xff]  }
 0x446   :  { %7308 = vmatprep.subr.bf16.mxu0 %v16671_v34  ;;  %8005 = vmatprep.subr.bf16.mxu1 %v16674_v53  ;;  %v16766_v34 = vld [vmem:[#allocation8 + $0x1e2c] ss:$16 sps:$4 sm:$0xff]   ;;  %v13673_v53 = vcombine.high %v17844_v31, %v17844_v31 }
 0x449   :  { %7309 = vmatpush1.bf16.msra.mxu0 %v16669_v54  ;;  %8006 = vmatpush1.bf16.msra.mxu1 %v16672_v55  ;;  %v16761_v54 = vld [vmem:[#allocation8 + $0x1e20] ss:$16 sps:$4 sm:$0xff]   ;;  %v16764_v55 = vld [vmem:[#allocation8 + $0x1e28] ss:$16 sps:$4 sm:$0xff]  }
 0x44a   :  { %7310 = vmatprep.subr.bf16.mxu0 %v16677_v56  ;;  %8007 = vmatprep.subr.bf16.mxu1 %v16680_v57  ;;  %v16772_v56 = vld [vmem:[#allocation8 + $0x1e4c] ss:$16 sps:$4 sm:$0xff]   ;;  %v16767_v57 = vld [vmem:[#allocation8 + $0x1e40] ss:$16 sps:$4 sm:$0xff]  }
 0x44d   :  { %7311 = vmatpush1.bf16.msra.mxu0 %v16675_v58  ;;  %8008 = vmatpush1.bf16.msra.mxu1 %v16678_v59  ;;  %v16770_v58 = vld [vmem:[#allocation8 + $0x1e48] ss:$16 sps:$4 sm:$0xff]   ;;  %v16775_v59 = vld [vmem:[#allocation8 + $0x1e64] ss:$16 sps:$4 sm:$0xff]  }
 0x44e   :  { %7312 = vmatprep.subr.bf16.mxu0 %v16683_v60  ;;  %8009 = vmatprep.subr.bf16.mxu1 %v16686_v61  ;;  %v16778_v60 = vld [vmem:[#allocation8 + $0x1e6c] ss:$16 sps:$4 sm:$0xff]   ;;  %v16773_v61 = vld [vmem:[#allocation8 + $0x1e60] ss:$16 sps:$4 sm:$0xff]  }
 0x451   :  { %7313 = vmatpush1.bf16.msra.mxu0 %v16681_v62  ;;  %8010 = vmatpush1.bf16.msra.mxu1 %v16684_v63  ;;  %v16776_v62 = vld [vmem:[#allocation8 + $0x1e68] ss:$16 sps:$4 sm:$0xff]   ;;  %v16781_v63 = vld [vmem:[#allocation8 + $0x1e84] ss:$16 sps:$4 sm:$0xff]  }
 0x452   :  { %7314 = vmatprep.subr.bf16.mxu0 %v16689_v0  ;;  %8011 = vmatprep.subr.bf16.mxu1 %v16692_v1  ;;  %v16784_v0 = vld [vmem:[#allocation8 + $0x1e8c] ss:$16 sps:$4 sm:$0xff]   ;;  %v16779_v1 = vld [vmem:[#allocation8 + $0x1e80] ss:$16 sps:$4 sm:$0xff]  }
 0x455   :  { %7315 = vmatpush1.bf16.msra.mxu0 %v16687_v2  ;;  %8012 = vmatpush1.bf16.msra.mxu1 %v16690_v3  ;;  %v16782_v2 = vld [vmem:[#allocation8 + $0x1e88] ss:$16 sps:$4 sm:$0xff]   ;;  %v16787_v3 = vld [vmem:[#allocation8 + $0x1ea4] ss:$16 sps:$4 sm:$0xff]  }
 0x456   :  { %7316 = vmatprep.subr.bf16.mxu0 %v16695_v4  ;;  %8013 = vmatprep.subr.bf16.mxu1 %v16698_v5  ;;  %v16790_v4 = vld [vmem:[#allocation8 + $0x1eac] ss:$16 sps:$4 sm:$0xff]   ;;  %v16785_v5 = vld [vmem:[#allocation8 + $0x1ea0] ss:$16 sps:$4 sm:$0xff]  }
 0x459   :  { %7317 = vmatpush1.bf16.msra.mxu0 %v16693_v6  ;;  %8014 = vmatpush1.bf16.msra.mxu1 %v16696_v7  ;;  %v16788_v6 = vld [vmem:[#allocation8 + $0x1ea8] ss:$16 sps:$4 sm:$0xff]   ;;  %v16793_v7 = vld [vmem:[#allocation8 + $0x1ec4] ss:$16 sps:$4 sm:$0xff]  }
 0x45a   :  { %7318 = vmatprep.subr.bf16.mxu0 %v16701_v8  ;;  %8015 = vmatprep.subr.bf16.mxu1 %v16704_v9  ;;  %v16796_v8 = vld [vmem:[#allocation8 + $0x1ecc] ss:$16 sps:$4 sm:$0xff]   ;;  %v16791_v9 = vld [vmem:[#allocation8 + $0x1ec0] ss:$16 sps:$4 sm:$0xff]  }
 0x45d   :  { %7319 = vmatpush1.bf16.msra.mxu0 %v16699_v10  ;;  %8016 = vmatpush1.bf16.msra.mxu1 %v16702_v12  ;;  %v16794_v10 = vld [vmem:[#allocation8 + $0x1ec8] ss:$16 sps:$4 sm:$0xff]   ;;  %v16799_v12 = vld [vmem:[#allocation8 + $0x1ee4] ss:$16 sps:$4 sm:$0xff]  }
 0x45e   :  { %7320 = vmatprep.subr.bf16.mxu0 %v16707_v13  ;;  %8017 = vmatprep.subr.bf16.mxu1 %v16710_v15  ;;  %v16802_v13 = vld [vmem:[#allocation8 + $0x1eec] ss:$16 sps:$4 sm:$0xff]   ;;  %v16797_v15 = vld [vmem:[#allocation8 + $0x1ee0] ss:$16 sps:$4 sm:$0xff]  }
 0x461   :  { %7321 = vmatpush1.bf16.msra.mxu0 %v16705_v16  ;;  %8018 = vmatpush1.bf16.msra.mxu1 %v16708_v18  ;;  %v16800_v16 = vld [vmem:[#allocation8 + $0x1ee8] ss:$16 sps:$4 sm:$0xff]   ;;  %v16805_v18 = vld [vmem:[#allocation8 + $0x1f04] ss:$16 sps:$4 sm:$0xff]  }
 0x462   :  { %7322 = vmatprep.subr.bf16.mxu0 %v16713_v20  ;;  %8019 = vmatprep.subr.bf16.mxu1 %v16716_v11  ;;  %v16808_v20 = vld [vmem:[#allocation8 + $0x1f0c] ss:$16 sps:$4 sm:$0xff]   ;;  %v16803_v11 = vld [vmem:[#allocation8 + $0x1f00] ss:$16 sps:$4 sm:$0xff]  }
 0x465   :  { %7323 = vmatpush1.bf16.msra.mxu0 %v16711_v21  ;;  %8020 = vmatpush1.bf16.msra.mxu1 %v16714_v14  ;;  %v16806_v21 = vld [vmem:[#allocation8 + $0x1f08] ss:$16 sps:$4 sm:$0xff]   ;;  %v16811_v14 = vld [vmem:[#allocation8 + $0x1f24] ss:$16 sps:$4 sm:$0xff]  }
 0x466   :  { %7324 = vmatprep.subr.bf16.mxu0 %v16719_v23  ;;  %8021 = vmatprep.subr.bf16.mxu1 %v16722_v24  ;;  %v16814_v23 = vld [vmem:[#allocation8 + $0x1f2c] ss:$16 sps:$4 sm:$0xff]   ;;  %v16809_v24 = vld [vmem:[#allocation8 + $0x1f20] ss:$16 sps:$4 sm:$0xff]  }
 0x469   :  { %7325 = vmatpush1.bf16.msra.mxu0 %v16717_v17  ;;  %8022 = vmatpush1.bf16.msra.mxu1 %v16720_v26  ;;  %v16812_v17 = vld [vmem:[#allocation8 + $0x1f28] ss:$16 sps:$4 sm:$0xff]   ;;  %v16817_v26 = vld [vmem:[#allocation8 + $0x1f44] ss:$16 sps:$4 sm:$0xff]  }
 0x46a   :  { %7326 = vmatprep.subr.bf16.mxu0 %v16725_v27  ;;  %8023 = vmatprep.subr.bf16.mxu1 %v16728_v19  ;;  %v16820_v27 = vld [vmem:[#allocation8 + $0x1f4c] ss:$16 sps:$4 sm:$0xff]   ;;  %v16815_v19 = vld [vmem:[#allocation8 + $0x1f40] ss:$16 sps:$4 sm:$0xff]  }
 0x46d   :  { %7327 = vmatpush1.bf16.msra.mxu0 %v16723_v29  ;;  %8024 = vmatpush1.bf16.msra.mxu1 %v16726_v30  ;;  %v16818_v29 = vld [vmem:[#allocation8 + $0x1f48] ss:$16 sps:$4 sm:$0xff]   ;;  %v16823_v30 = vld [vmem:[#allocation8 + $0x1f64] ss:$16 sps:$4 sm:$0xff]  }
 0x46e   :  { %7328 = vmatprep.subr.bf16.mxu0 %v16731_v22  ;;  %8025 = vmatprep.subr.bf16.mxu1 %v16734_v32  ;;  %v16826_v22 = vld [vmem:[#allocation8 + $0x1f6c] ss:$16 sps:$4 sm:$0xff]   ;;  %v16821_v32 = vld [vmem:[#allocation8 + $0x1f60] ss:$16 sps:$4 sm:$0xff]  }
 0x471   :  { %7329 = vmatpush1.bf16.msra.mxu0 %v16729_v33  ;;  %8026 = vmatpush1.bf16.msra.mxu1 %v16732_v25  ;;  %v16824_v33 = vld [vmem:[#allocation8 + $0x1f68] ss:$16 sps:$4 sm:$0xff]   ;;  %v16829_v25 = vld [vmem:[#allocation8 + $0x1f84] ss:$16 sps:$4 sm:$0xff]  }
 0x472   :  { %7330 = vmatprep.subr.bf16.mxu0 %v16737_v35  ;;  %8027 = vmatprep.subr.bf16.mxu1 %v16740_v36  ;;  %v16832_v35 = vld [vmem:[#allocation8 + $0x1f8c] ss:$16 sps:$4 sm:$0xff]   ;;  %v16827_v36 = vld [vmem:[#allocation8 + $0x1f80] ss:$16 sps:$4 sm:$0xff]  }
 0x475   :  { %7331 = vmatpush1.bf16.msra.mxu0 %v16735_v37  ;;  %8028 = vmatpush1.bf16.msra.mxu1 %v16738_v38  ;;  %v16830_v37 = vld [vmem:[#allocation8 + $0x1f88] ss:$16 sps:$4 sm:$0xff]   ;;  %v16835_v38 = vld [vmem:[#allocation8 + $0x1fa4] ss:$16 sps:$4 sm:$0xff]  }
 0x476   :  { %7332 = vmatprep.subr.bf16.mxu0 %v16743_v39  ;;  %8029 = vmatprep.subr.bf16.mxu1 %v16746_v40  ;;  %v16838_v39 = vld [vmem:[#allocation8 + $0x1fac] ss:$16 sps:$4 sm:$0xff]   ;;  %v16833_v40 = vld [vmem:[#allocation8 + $0x1fa0] ss:$16 sps:$4 sm:$0xff]  }
 0x479   :  { %7333 = vmatpush1.bf16.msra.mxu0 %v16741_v41  ;;  %8030 = vmatpush1.bf16.msra.mxu1 %v16744_v42  ;;  %v16836_v41 = vld [vmem:[#allocation8 + $0x1fa8] ss:$16 sps:$4 sm:$0xff]   ;;  %v16841_v42 = vld [vmem:[#allocation8 + $0x1fc4] ss:$16 sps:$4 sm:$0xff]  }
 0x47a   :  { %7334 = vmatprep.subr.bf16.mxu0 %v16749_v43  ;;  %8031 = vmatprep.subr.bf16.mxu1 %v16752_v44  ;;  %v16844_v43 = vld [vmem:[#allocation8 + $0x1fcc] ss:$16 sps:$4 sm:$0xff]   ;;  %v16839_v44 = vld [vmem:[#allocation8 + $0x1fc0] ss:$16 sps:$4 sm:$0xff]  }
 0x47d   :  { %7335 = vmatpush1.bf16.msra.mxu0 %v16747_v45  ;;  %8032 = vmatpush1.bf16.msra.mxu1 %v16750_v46  ;;  %v16842_v45 = vld [vmem:[#allocation8 + $0x1fc8] ss:$16 sps:$4 sm:$0xff]   ;;  %v16847_v46 = vld [vmem:[#allocation8 + $0x1fe4] ss:$16 sps:$4 sm:$0xff]  }
 0x47e   :  { %7345 = vmatprep.subr.bf16.mxu0 %v16757_v47  ;;  %8042 = vmatprep.subr.bf16.mxu1 %v16760_v48  ;;  %v16850_v47 = vld [vmem:[#allocation8 + $0x1fec] ss:$16 sps:$4 sm:$0xff]   ;;  %v16845_v48 = vld [vmem:[#allocation8 + $0x1fe0] ss:$16 sps:$4 sm:$0xff]  }
 0x480   :  { %7337 = vmatmul.mubr.bf16.vlgmr.msra.gmra.mrb[0].mxu0 %v13670_v49  ;;  %8034 = vmatmul.mubr.bf16.vlgmr.msra.gmra.mrb[0].mxu1 %v13670_v49  ;;  %v16848_v49 = vld [vmem:[#allocation8 + $0x1fe8] ss:$16 sps:$4 sm:$0xff]  }
 0x481   :  { %7346 = vmatpush1.bf16.msra.mxu0 %v16755_v50  ;;  %8043 = vmatpush1.bf16.msra.mxu1 %v16758_v51  ;;  %v16855_v50 = vld [vmem:[#allocation8 + $0x2004] ss:$16 sps:$4 sm:$0xff]   ;;  %v16858_v51 = vld [vmem:[#allocation8 + $0x200c] ss:$16 sps:$4 sm:$0xff]  }
 0x482   :  { %7347 = vmatprep.subr.bf16.mxu0 %v16763_v52  ;;  %8044 = vmatprep.subr.bf16.mxu1 %v16766_v34  ;;  %v13672_v52 = vcombine.low %v17844_v31, %v17844_v31  ;;  %v16853_v34 = vld [vmem:[#allocation8 + $0x2000] ss:$16 sps:$4 sm:$0xff]  }
 0x483   :  { %7377 = vmatprep.mubr.bf16.mxu0 %v13673_v53  ;;  %8074 = vmatprep.mubr.bf16.mxu1 %v13673_v53  ;;  %v16856_v53 = vld [vmem:[#allocation8 + $0x2008] ss:$16 sps:$4 sm:$0xff]   ;;  %v16865_v31 = vld [vmem:[#allocation8 + $0x2040] ss:$16 sps:$4 sm:$0xff]  }
 0x485   :  { %7348 = vmatpush1.bf16.msra.mxu0 %v16761_v54  ;;  %8045 = vmatpush1.bf16.msra.mxu1 %v16764_v55  ;;  %v16861_v54 = vld [vmem:[#allocation8 + $0x2024] ss:$16 sps:$4 sm:$0xff]   ;;  %v16864_v55 = vld [vmem:[#allocation8 + $0x202c] ss:$16 sps:$4 sm:$0xff]  }
 0x486   :  { %7349 = vmatprep.subr.bf16.mxu0 %v16769_v28  ;;  %8046 = vmatprep.subr.bf16.mxu1 %v16772_v56  ;;  %v16859_v28 = vld [vmem:[#allocation8 + $0x2020] ss:$16 sps:$4 sm:$0xff]   ;;  %v16862_v56 = vld [vmem:[#allocation8 + $0x2028] ss:$16 sps:$4 sm:$0xff]  }
 0x489   :  { %7350 = vmatpush1.bf16.msra.mxu0 %v16767_v57  ;;  %8047 = vmatpush1.bf16.msra.mxu1 %v16770_v58  ;;  %v16867_v57 = vld [vmem:[#allocation8 + $0x2044] ss:$16 sps:$4 sm:$0xff]   ;;  %v16870_v58 = vld [vmem:[#allocation8 + $0x204c] ss:$16 sps:$4 sm:$0xff]  }
 0x48a   :  { %7351 = vmatprep.subr.bf16.mxu0 %v16775_v59  ;;  %8048 = vmatprep.subr.bf16.mxu1 %v16778_v60  ;;  %v17535_v59 = vmov 0   ;;  %v16868_v60 = vld [vmem:[#allocation8 + $0x2048] ss:$16 sps:$4 sm:$0xff]  }
 0x48d   :  { %7352 = vmatpush1.bf16.msra.mxu0 %v16773_v61  ;;  %8049 = vmatpush1.bf16.msra.mxu1 %v16776_v62  ;;  %v16873_v61 = vld [vmem:[#allocation8 + $0x2064] ss:$16 sps:$4 sm:$0xff]   ;;  %v16876_v62 = vld [vmem:[#allocation8 + $0x206c] ss:$16 sps:$4 sm:$0xff]  }
 0x48e   :  { %7353 = vmatprep.subr.bf16.mxu0 %v16781_v63  ;;  %8050 = vmatprep.subr.bf16.mxu1 %v16784_v0  ;;  %v16871_v63 = vld [vmem:[#allocation8 + $0x2060] ss:$16 sps:$4 sm:$0xff]   ;;  %v16874_v0 = vld [vmem:[#allocation8 + $0x2068] ss:$16 sps:$4 sm:$0xff]  }
 0x491   :  { %7354 = vmatpush1.bf16.msra.mxu0 %v16779_v1  ;;  %8051 = vmatpush1.bf16.msra.mxu1 %v16782_v2  ;;  %v16879_v1 = vld [vmem:[#allocation8 + $0x2084] ss:$16 sps:$4 sm:$0xff]   ;;  %v16882_v2 = vld [vmem:[#allocation8 + $0x208c] ss:$16 sps:$4 sm:$0xff]  }
 0x492   :  { %7355 = vmatprep.subr.bf16.mxu0 %v16787_v3  ;;  %8052 = vmatprep.subr.bf16.mxu1 %v16790_v4  ;;  %v16877_v3 = vld [vmem:[#allocation8 + $0x2080] ss:$16 sps:$4 sm:$0xff]   ;;  %v16880_v4 = vld [vmem:[#allocation8 + $0x2088] ss:$16 sps:$4 sm:$0xff]  }
 0x495   :  { %7356 = vmatpush1.bf16.msra.mxu0 %v16785_v5  ;;  %8053 = vmatpush1.bf16.msra.mxu1 %v16788_v6  ;;  %v16885_v5 = vld [vmem:[#allocation8 + $0x20a4] ss:$16 sps:$4 sm:$0xff]   ;;  %v16888_v6 = vld [vmem:[#allocation8 + $0x20ac] ss:$16 sps:$4 sm:$0xff]  }
 0x496   :  { %7357 = vmatprep.subr.bf16.mxu0 %v16793_v7  ;;  %8054 = vmatprep.subr.bf16.mxu1 %v16796_v8  ;;  %v16883_v7 = vld [vmem:[#allocation8 + $0x20a0] ss:$16 sps:$4 sm:$0xff]   ;;  %v16886_v8 = vld [vmem:[#allocation8 + $0x20a8] ss:$16 sps:$4 sm:$0xff]  }
 0x499   :  { %7358 = vmatpush1.bf16.msra.mxu0 %v16791_v9  ;;  %8055 = vmatpush1.bf16.msra.mxu1 %v16794_v10  ;;  %v16891_v9 = vld [vmem:[#allocation8 + $0x20c4] ss:$16 sps:$4 sm:$0xff]   ;;  %v16894_v10 = vld [vmem:[#allocation8 + $0x20cc] ss:$16 sps:$4 sm:$0xff]  }
 0x49a   :  { %7359 = vmatprep.subr.bf16.mxu0 %v16799_v12  ;;  %8056 = vmatprep.subr.bf16.mxu1 %v16802_v13  ;;  %v16889_v12 = vld [vmem:[#allocation8 + $0x20c0] ss:$16 sps:$4 sm:$0xff]   ;;  %v16892_v13 = vld [vmem:[#allocation8 + $0x20c8] ss:$16 sps:$4 sm:$0xff]  }
 0x49d   :  { %7360 = vmatpush1.bf16.msra.mxu0 %v16797_v15  ;;  %8057 = vmatpush1.bf16.msra.mxu1 %v16800_v16  ;;  %v16897_v15 = vld [vmem:[#allocation8 + $0x20e4] ss:$16 sps:$4 sm:$0xff]   ;;  %v16900_v16 = vld [vmem:[#allocation8 + $0x20ec] ss:$16 sps:$4 sm:$0xff]  }
 0x49e   :  { %7361 = vmatprep.subr.bf16.mxu0 %v16805_v18  ;;  %8058 = vmatprep.subr.bf16.mxu1 %v16808_v20  ;;  %v16895_v18 = vld [vmem:[#allocation8 + $0x20e0] ss:$16 sps:$4 sm:$0xff]   ;;  %v16898_v20 = vld [vmem:[#allocation8 + $0x20e8] ss:$16 sps:$4 sm:$0xff]  }
 0x4a1   :  { %7362 = vmatpush1.bf16.msra.mxu0 %v16803_v11  ;;  %8059 = vmatpush1.bf16.msra.mxu1 %v16806_v21  ;;  %v16901_v11 = vld [vmem:[#allocation4 + $0x80] ss:$0 sps:$4 sm:$0xff]   ;;  %v16904_v21 = vld [vmem:[#allocation10 + $0x4] ss:$8 sps:$4 sm:$0xff]  }
 0x4a2   :  { %7363 = vmatprep.subr.bf16.mxu0 %v16811_v14  ;;  %8060 = vmatprep.subr.bf16.mxu1 %v16814_v23  ;;  %v16902_v14 = vld [vmem:[#allocation10] ss:$8 sps:$4 sm:$0xff]   ;;  %v16907_v23 = vld [vmem:[#allocation10 + $0x14] ss:$8 sps:$4 sm:$0xff]  }
 0x4a5   :  { %7364 = vmatpush1.bf16.msra.mxu0 %v16809_v24  ;;  %8061 = vmatpush1.bf16.msra.mxu1 %v16812_v17  ;;  %v16905_v24 = vld [vmem:[#allocation10 + $0x10] ss:$8 sps:$4 sm:$0xff]   ;;  %v16910_v17 = vld [vmem:[#allocation10 + $0x24] ss:$8 sps:$4 sm:$0xff]  }
 0x4a6   :  { %7365 = vmatprep.subr.bf16.mxu0 %v16817_v26  ;;  %8062 = vmatprep.subr.bf16.mxu1 %v16820_v27  ;;  %v16908_v26 = vld [vmem:[#allocation10 + $0x20] ss:$8 sps:$4 sm:$0xff]   ;;  %v16913_v27 = vld [vmem:[#allocation10 + $0x34] ss:$8 sps:$4 sm:$0xff]  }
 0x4a9   :  { %7366 = vmatpush1.bf16.msra.mxu0 %v16815_v19  ;;  %8063 = vmatpush1.bf16.msra.mxu1 %v16818_v29  ;;  %v16911_v19 = vld [vmem:[#allocation10 + $0x30] ss:$8 sps:$4 sm:$0xff]   ;;  %v16916_v29 = vld [vmem:[#allocation10 + $0x44] ss:$8 sps:$4 sm:$0xff]  }
 0x4aa   :  { %7367 = vmatprep.subr.bf16.mxu0 %v16823_v30  ;;  %8064 = vmatprep.subr.bf16.mxu1 %v16826_v22  ;;  %v16914_v30 = vld [vmem:[#allocation10 + $0x40] ss:$8 sps:$4 sm:$0xff]   ;;  %v16919_v22 = vld [vmem:[#allocation10 + $0x54] ss:$8 sps:$4 sm:$0xff]  }
 0x4ad   :  { %7368 = vmatpush1.bf16.msra.mxu0 %v16821_v32  ;;  %8065 = vmatpush1.bf16.msra.mxu1 %v16824_v33  ;;  %v16917_v32 = vld [vmem:[#allocation10 + $0x50] ss:$8 sps:$4 sm:$0xff]   ;;  %v16922_v33 = vld [vmem:[#allocation10 + $0x64] ss:$8 sps:$4 sm:$0xff]  }
 0x4ae   :  { %7369 = vmatprep.subr.bf16.mxu0 %v16829_v25  ;;  %8066 = vmatprep.subr.bf16.mxu1 %v16832_v35  ;;  %v16920_v25 = vld [vmem:[#allocation10 + $0x60] ss:$8 sps:$4 sm:$0xff]   ;;  %v16925_v35 = vld [vmem:[#allocation10 + $0x74] ss:$8 sps:$4 sm:$0xff]  }
 0x4b1   :  { %7370 = vmatpush1.bf16.msra.mxu0 %v16827_v36  ;;  %8067 = vmatpush1.bf16.msra.mxu1 %v16830_v37  ;;  %v16923_v36 = vld [vmem:[#allocation10 + $0x70] ss:$8 sps:$4 sm:$0xff]   ;;  %v16928_v37 = vld [vmem:[#allocation10 + $0x84] ss:$8 sps:$4 sm:$0xff]  }
 0x4b2   :  { %7371 = vmatprep.subr.bf16.mxu0 %v16835_v38  ;;  %8068 = vmatprep.subr.bf16.mxu1 %v16838_v39  ;;  %v16926_v38 = vld [vmem:[#allocation10 + $0x80] ss:$8 sps:$4 sm:$0xff]   ;;  %v16931_v39 = vld [vmem:[#allocation10 + $0x94] ss:$8 sps:$4 sm:$0xff]  }
 0x4b5   :  { %7372 = vmatpush1.bf16.msra.mxu0 %v16833_v40  ;;  %8069 = vmatpush1.bf16.msra.mxu1 %v16836_v41  ;;  %v16929_v40 = vld [vmem:[#allocation10 + $0x90] ss:$8 sps:$4 sm:$0xff]   ;;  %v16934_v41 = vld [vmem:[#allocation10 + $0xa4] ss:$8 sps:$4 sm:$0xff]  }
 0x4b6   :  { %7373 = vmatprep.subr.bf16.mxu0 %v16841_v42  ;;  %8070 = vmatprep.subr.bf16.mxu1 %v16844_v43  ;;  %v16932_v42 = vld [vmem:[#allocation10 + $0xa0] ss:$8 sps:$4 sm:$0xff]   ;;  %v16937_v43 = vld [vmem:[#allocation10 + $0xb4] ss:$8 sps:$4 sm:$0xff]  }
 0x4b9   :  { %7374 = vmatpush1.bf16.msra.mxu0 %v16839_v44  ;;  %8071 = vmatpush1.bf16.msra.mxu1 %v16842_v45  ;;  %v16935_v44 = vld [vmem:[#allocation10 + $0xb0] ss:$8 sps:$4 sm:$0xff]   ;;  %v16940_v45 = vld [vmem:[#allocation10 + $0xc4] ss:$8 sps:$4 sm:$0xff]  }
 0x4ba   :  { %7375 = vmatprep.subr.bf16.mxu0 %v16847_v46  ;;  %8072 = vmatprep.subr.bf16.mxu1 %v16850_v47  ;;  %v16938_v46 = vld [vmem:[#allocation10 + $0xc0] ss:$8 sps:$4 sm:$0xff]   ;;  %v16943_v47 = vld [vmem:[#allocation10 + $0xd4] ss:$8 sps:$4 sm:$0xff]  }
 0x4bd   :  { %7376 = vmatpush1.bf16.msra.mxu0 %v16845_v48  ;;  %8073 = vmatpush1.bf16.msra.mxu1 %v16848_v49  ;;  %v16941_v48 = vld [vmem:[#allocation10 + $0xd0] ss:$8 sps:$4 sm:$0xff]   ;;  %v16946_v49 = vld [vmem:[#allocation10 + $0xe4] ss:$8 sps:$4 sm:$0xff]  }
 0x4be   :  { %7386 = vmatprep.subr.bf16.mxu0 %v16855_v50  ;;  %8083 = vmatprep.subr.bf16.mxu1 %v16858_v51  ;;  %v16944_v50 = vld [vmem:[#allocation10 + $0xe0] ss:$8 sps:$4 sm:$0xff]   ;;  %v16949_v51 = vld [vmem:[#allocation10 + $0xf4] ss:$8 sps:$4 sm:$0xff]  }
 0x4c0   :  { %7378 = vmatmul.mubr.bf16.vlgmr.msra.gmra.mrb[0].mxu0 %v13672_v52  ;;  %8075 = vmatmul.mubr.bf16.vlgmr.msra.gmra.mrb[0].mxu1 %v13672_v52  ;;  %v16947_v52 = vld [vmem:[#allocation10 + $0xf0] ss:$8 sps:$4 sm:$0xff]  }
 0x4c1   :  { %7387 = vmatpush1.bf16.msra.mxu0 %v16853_v34  ;;  %8084 = vmatpush1.bf16.msra.mxu1 %v16856_v53  ;;  %v16952_v34 = vld [vmem:[#allocation10 + $0x104] ss:$8 sps:$4 sm:$0xff]  }
 0x4c2   :  { %7388 = vmatprep.subr.bf16.mxu0 %v16861_v54  ;;  %8085 = vmatprep.subr.bf16.mxu1 %v16864_v55 }
 0x4c3   :  { %7418 = vmatprep.mubr.bf16.mxu0 %v17535_v59  ;;  %8115 = vmatprep.mubr.bf16.mxu1 %v17535_v59 }
 0x4c5   :  { %7389 = vmatpush1.bf16.msra.mxu0 %v16859_v28  ;;  %8086 = vmatpush1.bf16.msra.mxu1 %v16862_v56 }
 0x4c6   :  { %7390 = vmatprep.subr.bf16.mxu0 %v16867_v57  ;;  %8087 = vmatprep.subr.bf16.mxu1 %v16870_v58 }
 0x4c9   :  { %7391 = vmatpush1.bf16.msra.mxu0 %v16865_v31  ;;  %8088 = vmatpush1.bf16.msra.mxu1 %v16868_v60 }
 0x4ca   :  { %7392 = vmatprep.subr.bf16.mxu0 %v16873_v61  ;;  %8089 = vmatprep.subr.bf16.mxu1 %v16876_v62 }
 0x4cd   :  { %7393 = vmatpush1.bf16.msra.mxu0 %v16871_v63  ;;  %8090 = vmatpush1.bf16.msra.mxu1 %v16874_v0 }
 0x4ce   :  { %7394 = vmatprep.subr.bf16.mxu0 %v16879_v1  ;;  %8091 = vmatprep.subr.bf16.mxu1 %v16882_v2 }
 0x4d1   :  { %7395 = vmatpush1.bf16.msra.mxu0 %v16877_v3  ;;  %8092 = vmatpush1.bf16.msra.mxu1 %v16880_v4 }
 0x4d2   :  { %7396 = vmatprep.subr.bf16.mxu0 %v16885_v5  ;;  %8093 = vmatprep.subr.bf16.mxu1 %v16888_v6 }
 0x4d5   :  { %7397 = vmatpush1.bf16.msra.mxu0 %v16883_v7  ;;  %8094 = vmatpush1.bf16.msra.mxu1 %v16886_v8 }
 0x4d6   :  { %7398 = vmatprep.subr.bf16.mxu0 %v16891_v9  ;;  %8095 = vmatprep.subr.bf16.mxu1 %v16894_v10 }
 0x4d9   :  { %7399 = vmatpush1.bf16.msra.mxu0 %v16889_v12  ;;  %8096 = vmatpush1.bf16.msra.mxu1 %v16892_v13 }
 0x4da   :  { %7400 = vmatprep.subr.bf16.mxu0 %v16897_v15  ;;  %8097 = vmatprep.subr.bf16.mxu1 %v16900_v16 }
 0x4dd   :  { %7401 = vmatpush1.bf16.msra.mxu0 %v16895_v18  ;;  %8098 = vmatpush1.bf16.msra.mxu1 %v16898_v20 }
 0x4de   :  { %8665 = vmatprep.subr.bf16.mxu0 %v16904_v21 }
 0x4e0   :  { %7419 = vmatmul.mubr.bf16.vlgmr.msra.gmra.mrb[0].mxu0 %v16901_v11  ;;  %8116 = vmatmul.mubr.bf16.vlgmr.msra.gmra.mrb[0].mxu1 %v16901_v11 }
 0x4e1   :  { %8666 = vmatpush1.bf16.msra.mxu0 %v16902_v14 }
 0x4e2   :  { %8667 = vmatprep.subr.bf16.mxu0 %v16907_v23 }
 0x4e5   :  { %8668 = vmatpush1.bf16.msra.mxu0 %v16905_v24 }
 0x4e6   :  { %8669 = vmatprep.subr.bf16.mxu0 %v16910_v17 }
 0x4e9   :  { %8670 = vmatpush1.bf16.msra.mxu0 %v16908_v26 }
 0x4ea   :  { %8671 = vmatprep.subr.bf16.mxu0 %v16913_v27 }
 0x4ed   :  { %8672 = vmatpush1.bf16.msra.mxu0 %v16911_v19 }
 0x4ee   :  { %8673 = vmatprep.subr.bf16.mxu0 %v16916_v29 }
 0x4f1   :  { %8674 = vmatpush1.bf16.msra.mxu0 %v16914_v30 }
 0x4f2   :  { %8675 = vmatprep.subr.bf16.mxu0 %v16919_v22 }
 0x4f5   :  { %8676 = vmatpush1.bf16.msra.mxu0 %v16917_v32 }
 0x4f6   :  { %8677 = vmatprep.subr.bf16.mxu0 %v16922_v33 }
 0x4f9   :  { %8678 = vmatpush1.bf16.msra.mxu0 %v16920_v25 }
 0x4fa   :  { %8679 = vmatprep.subr.bf16.mxu0 %v16925_v35 }
 0x4fd   :  { %8680 = vmatpush1.bf16.msra.mxu0 %v16923_v36 }
 0x4fe   :  { %8681 = vmatprep.subr.bf16.mxu0 %v16928_v37 }
 0x501   :  { %8682 = vmatpush1.bf16.msra.mxu0 %v16926_v38 }
 0x502   :  { %8683 = vmatprep.subr.bf16.mxu0 %v16931_v39 }
 0x505   :  { %8684 = vmatpush1.bf16.msra.mxu0 %v16929_v40 }
 0x506   :  { %8685 = vmatprep.subr.bf16.mxu0 %v16934_v41 }
 0x509   :  { %8686 = vmatpush1.bf16.msra.mxu0 %v16932_v42 }
 0x50a   :  { %8687 = vmatprep.subr.bf16.mxu0 %v16937_v43 }
 0x50d   :  { %8688 = vmatpush1.bf16.msra.mxu0 %v16935_v44 }
 0x50e   :  { %8689 = vmatprep.subr.bf16.mxu0 %v16940_v45 }
 0x511   :  { %8690 = vmatpush1.bf16.msra.mxu0 %v16938_v46 }
 0x512   :  { %8691 = vmatprep.subr.bf16.mxu0 %v16943_v47 }
 0x515   :  { %8692 = vmatpush1.bf16.msra.mxu0 %v16941_v48 }
 0x516   :  { %8693 = vmatprep.subr.bf16.mxu0 %v16946_v49 }
 0x519   :  { %8694 = vmatpush1.bf16.msra.mxu0 %v16944_v50 }
 0x51a   :  { %8695 = vmatprep.subr.bf16.mxu0 %v16949_v51 }
 0x51d   :  { %8696 = vmatpush1.bf16.msra.mxu0 %v16947_v52 }
 0x51e   :  { %8706 = vmatprep.subr.bf16.mxu0 %v16952_v34 }
 0x5b3   :  { %v7420_v53 = vpop.f32.mrb[0].mxu0  ;;  %v8117_v54 = vpop.f32.mrb[0].mxu1 }
 0x5b4   :  { %v8126_v55 = vrot.slane %v7420_v53, 4  ;;  %v8138_v28 = vrot.slane %v8117_v54, 4  ;;  %v7422_v56 = vpop.f32.mrb[1].mxu0  ;;  %v8119_v57 = vpop.f32.mrb[1].mxu1 }
 0x5b5   :  { %v8132_v58 = vrot.slane %v7422_v56, 4  ;;  %v8144_v31 = vrot.slane %v8119_v57, 4  ;;  %v7424_v60 = vpop.f32.mrb[2].mxu0  ;;  %v8121_v61 = vpop.f32.mrb[2].mxu1 }
 0x5b6   :  { %v8127_v62 = vadd.f32 %v8126_v55, %v7420_v53  ;;  %v8139_v63 = vadd.f32 %v8138_v28, %v8117_v54  ;;  %v7425_v0 = vpop.f32.mrb[3].mxu0  ;;  %v8122_v1 = vpop.f32.mrb[3].mxu1 }
 0x5b7   :  { %v8133_v2 = vadd.f32 %v8132_v58, %v7422_v56  ;;  %v8145_v3 = vadd.f32 %v8144_v31, %v8119_v57  ;;  %v8204_v31 = vlaneseq }
 0x5b8   :  { %v8128_v4 = vrot.slane %v8127_v62, 2  ;;  %v8140_v5 = vrot.slane %v8139_v63, 2 }
 0x5b9   :  { %v8134_v6 = vrot.slane %v8133_v2, 2  ;;  %v8146_v7 = vrot.slane %v8145_v3, 2 }
 0x5ba   :  { %v8129_v8 = vadd.f32 %v8128_v4, %v8127_v62  ;;  %v8141_v9 = vadd.f32 %v8140_v5, %v8139_v63  ;;  %v8124_v4 = vld [vmem:[#allocation16] sm:$0xf] }
 0x5bb   :  { %v8135_v10 = vadd.f32 %v8134_v6, %v8133_v2  ;;  %v8147_v12 = vadd.f32 %v8146_v7, %v8145_v3  ;;  %v17860_v2 = vshrl.u32 %v8204_v31, 7  ;;  %v8125_v7 = vld [vmem:[#allocation17] sm:$0xf] }
 0x5bc   :  { %v8130_v13 = vrot.slane %v8129_v8, 1  ;;  %v8142_v15 = vrot.slane %v8141_v9, 1  ;;  %v16965_v31 = vld [vmem:[#allocation10 + $0x150] ss:$8 sps:$4 sm:$0xff]  }
 0x5bd   :  { %v8136_v16 = vrot.slane %v8135_v10, 1  ;;  %v8148_v18 = vrot.slane %v8147_v12, 1  ;;  %v17863_v3 = vsub.s32 0, %v17860_v2  ;;  %v17866_v5 = vsub.s32 2, %v17860_v2 }
 0x5be   :  { %v8131_v20 = vadd.f32 %v8130_v13, %v8129_v8  ;;  %v8143_v11 = vadd.f32 %v8142_v15, %v8141_v9  ;;  %v17869_v6 = vsub.s32 1, %v17860_v2  ;;  %v17872_v8 = vsub.s32 3, %v17860_v2 }
 0x5bf   :  { %v8137_v21 = vadd.f32 %v8136_v16, %v8135_v10  ;;  %v8149_v14 = vadd.f32 %v8148_v18, %v8147_v12  ;;  %v8207_v9 = vrot.slane %v8124_v4, %v17863_v3  ;;  %v8215_v12 = vrot.slane %v8124_v4, %v17866_v5 }
 0x5c0   :  { %v8151_v23 = vmul.f32 0.125, %v8131_v20  ;;  %v8153_v24 = vmul.f32 0.125, %v8143_v11  ;;  %v8232_v16 = vrot.slane %v8125_v7, %v17863_v3  ;;  %v8211_v18 = vrot.slane %v8124_v4, %v17869_v6 }
 0x5c1   :  { %v8152_v17 = vmul.f32 0.125, %v8137_v21  ;;  %v8154_v26 = vmul.f32 0.125, %v8149_v14  ;;  %v8240_v21 = vrot.slane %v8125_v7, %v17866_v5  ;;  %v8219_v14 = vrot.slane %v8124_v4, %v17872_v8  ;;  %v16974_v4 = vld [vmem:[#allocation10 + $0x180] ss:$8 sps:$4 sm:$0xff]  }
 0x5c2   :  { %v8155_v27 = vsub.f32 %v7420_v53, %v8151_v23  ;;  %v8157_v19 = vsub.f32 %v8117_v54, %v8153_v24 }
 0x5c3   :  { %v17852_v29 = vsub.f32 %v7422_v56, %v8152_v17  ;;  %v17854_v30 = vsub.f32 %v8119_v57, %v8154_v26  ;;  %v8236_v26 = vrot.slane %v8125_v7, %v17869_v6 }
 0x5c4   :  { %v8159_v22 = vmul.f32 %v8155_v27, %v8155_v27  ;;  %v8161_v32 = vmul.f32 %v8157_v19, %v8157_v19 }
 0x5c5   :  { %v8160_v33 = vmul.f32 %v17852_v29, %v17852_v29  ;;  %v8162_v25 = vmul.f32 %v17854_v30, %v17854_v30 }
 0x5c6   :  { %v8163_v35 = vrot.slane %v8159_v22, 4  ;;  %v8175_v36 = vrot.slane %v8161_v32, 4 }
 0x5c7   :  { %v8169_v37 = vrot.slane %v8160_v33, 4  ;;  %v8181_v38 = vrot.slane %v8162_v25, 4 }
 0x5c8   :  { %v8164_v39 = vadd.f32 %v8163_v35, %v8159_v22  ;;  %v8176_v40 = vadd.f32 %v8175_v36, %v8161_v32 }
 0x5c9   :  { %v8170_v41 = vadd.f32 %v8169_v37, %v8160_v33  ;;  %v8182_v42 = vadd.f32 %v8181_v38, %v8162_v25 }
 0x5ca   :  { %v8165_v43 = vrot.slane %v8164_v39, 2  ;;  %v8177_v44 = vrot.slane %v8176_v40, 2 }
 0x5cb   :  { %v8171_v45 = vrot.slane %v8170_v41, 2  ;;  %v8183_v46 = vrot.slane %v8182_v42, 2 }
 0x5cc   :  { %v8166_v47 = vadd.f32 %v8165_v43, %v8164_v39  ;;  %v8178_v48 = vadd.f32 %v8177_v44, %v8176_v40 }
 0x5cd   :  { %v8172_v49 = vadd.f32 %v8171_v45, %v8170_v41  ;;  %v8184_v50 = vadd.f32 %v8183_v46, %v8182_v42 }
 0x5ce   :  { %v8167_v51 = vrot.slane %v8166_v47, 1  ;;  %v8179_v52 = vrot.slane %v8178_v48, 1 }
 0x5cf   :  { %v8173_v34 = vrot.slane %v8172_v49, 1  ;;  %v8185_v53 = vrot.slane %v8184_v50, 1 }
 0x5d0   :  { %v8168_v54 = vadd.f32 %v8167_v51, %v8166_v47  ;;  %v8180_v55 = vadd.f32 %v8179_v52, %v8178_v48  ;;  %v16955_v51 = vld [vmem:[#allocation10 + $0x114] ss:$8 sps:$4 sm:$0xff]  }
 0x5d1   :  { %v8174_v28 = vadd.f32 %v8173_v34, %v8172_v49  ;;  %v8186_v56 = vadd.f32 %v8185_v53, %v8184_v50  ;;  %v16950_v49 = vld [vmem:[#allocation10 + $0x100] ss:$8 sps:$4 sm:$0xff]   ;;  %v16953_v34 = vld [vmem:[#allocation10 + $0x110] ss:$8 sps:$4 sm:$0xff]   ;;  %v16958_v53 = vld [vmem:[#allocation10 + $0x124] ss:$8 sps:$4 sm:$0xff]  }
 0x5d2   :  { %v8187_v57 = vmul.f32 0.125, %v8168_v54  ;;  %v8189_v58 = vmul.f32 0.125, %v8180_v55  ;;  %v16956_v54 = vld [vmem:[#allocation10 + $0x120] ss:$8 sps:$4 sm:$0xff]   ;;  %v16961_v55 = vld [vmem:[#allocation10 + $0x134] ss:$8 sps:$4 sm:$0xff]  }
 0x5d3   :  { %v8188_v60 = vmul.f32 0.125, %v8174_v28  ;;  %v8190_v61 = vmul.f32 0.125, %v8186_v56  ;;  %v16959_v28 = vld [vmem:[#allocation10 + $0x130] ss:$8 sps:$4 sm:$0xff]   ;;  %v16964_v56 = vld [vmem:[#allocation10 + $0x144] ss:$8 sps:$4 sm:$0xff]  }
 0x5d4   :  { %v8191_v62 = vadd.f32 1e-05, %v8187_v57  ;;  %v8193_v63 = vadd.f32 1e-05, %v8189_v58  ;;  %v16962_v57 = vld [vmem:[#allocation10 + $0x140] ss:$8 sps:$4 sm:$0xff]  }
 0x5d5   :  { %v8192_v0 = vadd.f32 1e-05, %v8188_v60  ;;  %v8194_v1 = vadd.f32 1e-05, %v8190_v61  ;;  %v16967_v58 = vld [vmem:[#allocation10 + $0x154] ss:$8 sps:$4 sm:$0xff]  }
 0x5d6   :  { %17134 = vrsqrt.f32 %v8191_v62  ;;  %v16970_v60 = vld [vmem:[#allocation10 + $0x164] ss:$8 sps:$4 sm:$0xff]   ;;  %v16968_v61 = vld [vmem:[#allocation10 + $0x160] ss:$8 sps:$4 sm:$0xff]   ;;  %v16973_v62 = vld [vmem:[#allocation10 + $0x174] ss:$8 sps:$4 sm:$0xff]  }
 0x5d7   :  { %17136 = vrsqrt.f32 %v8193_v63  ;;  %v16971_v63 = vld [vmem:[#allocation10 + $0x170] ss:$8 sps:$4 sm:$0xff]  }
 0x5d8   :  { %17138 = vrsqrt.f32 %v8192_v0  ;;  %v16976_v0 = vld [vmem:[#allocation10 + $0x184] ss:$8 sps:$4 sm:$0xff]  }
 0x5d9   :  { %17140 = vrsqrt.f32 %v8194_v1 }
 0x5e0   :  { %v17135_v10 = vpop.eup %17134 }
 0x5e1   :  { %v17137_v13 = vpop.eup %17136  ;;  %v8199_v15 = vmul.f32 %v17135_v10, %v8155_v27  ;;  %v8244_v27 = vrot.slane %v8125_v7, %v17872_v8  ;;  %v16979_v7 = vld [vmem:[#allocation10 + $0x194] ss:$8 sps:$4 sm:$0xff]   ;;  %v16982_v10 = vld [vmem:[#allocation10 + $0x1a4] ss:$8 sps:$4 sm:$0xff]  }
 0x5e2   :  { %v17139_v20 = vpop.eup %17138  ;;  %v8201_v11 = vmul.f32 %v17137_v13, %v8157_v19  ;;  %v16985_v13 = vld [vmem:[#allocation10 + $0x1b4] ss:$8 sps:$4 sm:$0xff]  }
 0x5e3   :  { %v17141_v23 = vpop.eup %17140  ;;  %v8224_v24 = vmul.f32 %v8207_v9, %v8199_v15  ;;  %v8200_v17 = vmul.f32 %v17139_v20, %v17852_v29  ;;  %v16977_v9 = vld [vmem:[#allocation10 + $0x190] ss:$8 sps:$4 sm:$0xff]   ;;  %v16986_v20 = vld [vmem:[#allocation10 + $0x1c0] ss:$8 sps:$4 sm:$0xff]  }
 0x5e4   :  { %v8226_v22 = vmul.f32 %v8215_v12, %v8201_v11  ;;  %v8202_v32 = vmul.f32 %v17141_v23, %v17854_v30  ;;  %v16980_v12 = vld [vmem:[#allocation10 + $0x1a0] ss:$8 sps:$4 sm:$0xff]   ;;  %v16983_v15 = vld [vmem:[#allocation10 + $0x1b0] ss:$8 sps:$4 sm:$0xff]   ;;  %v16994_v23 = vld [vmem:[#allocation10 + $0x1e4] ss:$8 sps:$4 sm:$0xff]  }
 0x5e5   :  { %v8249_v33 = vadd.f32 %v8232_v16, %v8224_v24  ;;  %v8225_v25 = vmul.f32 %v8211_v18, %v8200_v17  ;;  %v16988_v18 = vld [vmem:[#allocation10 + $0x1c4] ss:$8 sps:$4 sm:$0xff]   ;;  %v16992_v24 = vld [vmem:[#allocation10 + $0x1e0] ss:$8 sps:$4 sm:$0xff]   ;;  %v16997_v17 = vld [vmem:[#allocation10 + $0x1f4] ss:$8 sps:$4 sm:$0xff]  }
 0x5e6   :  { %v8251_v35 = vadd.f32 %v8240_v21, %v8226_v22  ;;  %v8227_v36 = vmul.f32 %v8219_v14, %v8202_v32  ;;  %v16991_v21 = vld [vmem:[#allocation10 + $0x1d4] ss:$8 sps:$4 sm:$0xff]   ;;  %v16989_v14 = vld [vmem:[#allocation10 + $0x1d0] ss:$8 sps:$4 sm:$0xff]  }
 0x5e7   :  { %v14731_v19 = vmul.f32 -1.442695, %v8249_v33  ;;  %v8250_v37 = vadd.f32 %v8236_v26, %v8225_v25  ;;  %v16995_v26 = vld [vmem:[#allocation10 + $0x1f0] ss:$8 sps:$4 sm:$0xff]   ;;  %v16999_v33 = vld [vmem:[#allocation11] sm:$0xff]   ;;  %v17000_v25 = vld [vmem:[#allocation11 + $0x48] sm:$0xff]  }
 0x5e8   :  { %v8252_v38 = vadd.f32 %v8244_v27, %v8227_v36  ;;  %v14733_v1 = vmul.f32 -1.442695, %v8251_v35  ;;  %v16998_v27 = vld [vmem:[#allocation11 + $0x40] sm:$0xff]   ;;  %v17001_v35 = vld [vmem:[#allocation11 + $0x8] sm:$0xff]   ;;  %v17002_v36 = vld [vmem:[#allocation11 + $0x50] sm:$0xff]  }
 0x5e9   :  { %17142 = vpow2.f32 %v14731_v19  ;;  %v14732_v39 = vmul.f32 -1.442695, %v8250_v37  ;;  %14907 = vmatprep.subr.bf16.mxu1 %v16998_v27  ;;  %v17003_v19 = vld [vmem:[#allocation11 + $0x10] sm:$0xff]   ;;  %v17004_v37 = vld [vmem:[#allocation11 + $0x58] sm:$0xff]  }
 0x5ea   :  { %v14734_v40 = vmul.f32 -1.442695, %v8252_v38  ;;  %14908 = vmatpush3.bf16.msra.mxu1 %v16999_v33  ;;  %v17005_v38 = vld [vmem:[#allocation11 + $0x18] sm:$0xff]  }
 0x5eb   :  { %17144 = vpow2.f32 %v14732_v39  ;;  %14909 = vmatprep.subr.bf16.mxu1 %v17000_v25  ;;  %v17006_v39 = vld [vmem:[#allocation11 + $0x60] sm:$0xff]  }
 0x5ec   :  { %17146 = vpow2.f32 %v14734_v40  ;;  %v17007_v40 = vld [vmem:[#allocation11 + $0x20] sm:$0xff]  }
 0x5ee   :  { %14910 = vmatpush3.bf16.msra.mxu1 %v17001_v35 }
 0x5ef   :  { %14911 = vmatprep.subr.bf16.mxu1 %v17002_v36 }
 0x5f2   :  { %14912 = vmatpush3.bf16.msra.mxu1 %v17003_v19 }
 0x5f3   :  { %v17143_v29 = vpop.eup %17142  ;;  %14913 = vmatprep.subr.bf16.mxu1 %v17004_v37 }
 0x5f4   :  { %v8265_v41 = vadd.f32 1.0, %v17143_v29  ;;  %v17008_v29 = vld [vmem:[#allocation11 + $0x68] sm:$0xff]  }
 0x5f5   :  { %v17145_v42 = vpop.eup %17144 }
 0x5f6   :  { %v17147_v43 = vpop.eup %17146  ;;  %v8266_v44 = vadd.f32 1.0, %v17145_v42  ;;  %17148 = vrcp.f32 %v8265_v41  ;;  %14914 = vmatpush3.bf16.msra.mxu1 %v17005_v38  ;;  %v17009_v41 = vld [vmem:[#allocation11 + $0x28] sm:$0xff]   ;;  %v17010_v42 = vld [vmem:[#allocation11 + $0x70] sm:$0xff]  }
 0x5f7   :  { %v8268_v30 = vadd.f32 1.0, %v17147_v43  ;;  %14915 = vmatprep.subr.bf16.mxu1 %v17006_v39  ;;  %v17011_v43 = vld [vmem:[#allocation11 + $0x30] sm:$0xff]  }
 0x5f8   :  { %17150 = vrcp.f32 %v8266_v44  ;;  %v17012_v44 = vld [vmem:[#allocation11 + $0x78] sm:$0xff]  }
 0x5f9   :  { %17152 = vrcp.f32 %v8268_v30  ;;  %v17013_v30 = vld [vmem:[#allocation11 + $0x38] sm:$0xff]  }
 0x5fa   :  { %17154 = vpow2.f32 %v14733_v1  ;;  %14916 = vmatpush3.bf16.msra.mxu1 %v17007_v40 }
 0x5fb   :  { %14917 = vmatprep.subr.bf16.mxu1 %v17008_v29 }
 0x5fe   :  { %14918 = vmatpush3.bf16.msra.mxu1 %v17009_v41 }
 0x5ff   :  { %14919 = vmatprep.subr.bf16.mxu1 %v17010_v42 }
 0x600   :  { %v17149_v45 = vpop.eup %17148 }
 0x601   :  { %v8277_v50 = vpack.c.bf16 %v17149_v45, %v17149_v45 }
 0x602   :  { %v17151_v46 = vpop.eup %17150  ;;  %14920 = vmatpush3.bf16.msra.mxu1 %v17011_v43 }
 0x603   :  { %v17153_v47 = vpop.eup %17152  ;;  %v8278_v48 = vpack.c.bf16 %v17151_v46, %v17151_v46  ;;  %14921 = vmatprep.subr.bf16.mxu1 %v17012_v44 }
 0x604   :  { %v8280_v52 = vpack.c.bf16 %v17153_v47, %v17153_v47  ;;  %v17155_v16 = vpop.eup %17154 }
 0x605   :  { %8697 = vmatprep.mubr.bf16.mxu0 %v8278_v48  ;;  %v8267_v11 = vadd.f32 1.0, %v17155_v16 }
 0x606   :  { %8698 = vmatmul.mubr.bf16.vlgmr.msra.gmra.mrb[4].mxu0 %v8277_v50  ;;  %14922 = vmatpush3.bf16.msra.mxu1 %v17013_v30 }
 0x607   :  { %8707 = vmatpush1.bf16.msra.mxu0 %v16950_v49  ;;  %8738 = vmatprep.mubr.bf16.mxu0 %v8280_v52  ;;  %17156 = vrcp.f32 %v8267_v11 }
 0x608   :  { %8708 = vmatprep.subr.bf16.mxu0 %v16955_v51 }
 0x60b   :  { %8709 = vmatpush1.bf16.msra.mxu0 %v16953_v34 }
 0x60c   :  { %8710 = vmatprep.subr.bf16.mxu0 %v16958_v53 }
 0x60f   :  { %8711 = vmatpush1.bf16.msra.mxu0 %v16956_v54 }
 0x610   :  { %8712 = vmatprep.subr.bf16.mxu0 %v16961_v55 }
 0x611   :  { %v17157_v22 = vpop.eup %17156 }
 0x612   :  { %v8279_v32 = vpack.c.bf16 %v17157_v22, %v17157_v22 }
 0x613   :  { %8713 = vmatpush1.bf16.msra.mxu0 %v16959_v28 }
 0x614   :  { %8714 = vmatprep.subr.bf16.mxu0 %v16964_v56 }
 0x617   :  { %8715 = vmatpush1.bf16.msra.mxu0 %v16962_v57 }
 0x618   :  { %8716 = vmatprep.subr.bf16.mxu0 %v16967_v58 }
 0x61b   :  { %8717 = vmatpush1.bf16.msra.mxu0 %v16965_v31 }
 0x61c   :  { %8718 = vmatprep.subr.bf16.mxu0 %v16970_v60 }
 0x61f   :  { %8719 = vmatpush1.bf16.msra.mxu0 %v16968_v61 }
 0x620   :  { %8720 = vmatprep.subr.bf16.mxu0 %v16973_v62 }
 0x623   :  { %8721 = vmatpush1.bf16.msra.mxu0 %v16971_v63 }
 0x624   :  { %8722 = vmatprep.subr.bf16.mxu0 %v16976_v0 }
 0x627   :  { %8723 = vmatpush1.bf16.msra.mxu0 %v16974_v4 }
 0x628   :  { %8724 = vmatprep.subr.bf16.mxu0 %v16979_v7 }
 0x62b   :  { %8725 = vmatpush1.bf16.msra.mxu0 %v16977_v9 }
 0x62c   :  { %8726 = vmatprep.subr.bf16.mxu0 %v16982_v10 }
 0x62f   :  { %8727 = vmatpush1.bf16.msra.mxu0 %v16980_v12 }
 0x630   :  { %8728 = vmatprep.subr.bf16.mxu0 %v16985_v13 }
 0x633   :  { %8729 = vmatpush1.bf16.msra.mxu0 %v16983_v15 }
 0x634   :  { %8730 = vmatprep.subr.bf16.mxu0 %v16988_v18 }
 0x637   :  { %8731 = vmatpush1.bf16.msra.mxu0 %v16986_v20 }
 0x638   :  { %8732 = vmatprep.subr.bf16.mxu0 %v16991_v21 }
 0x63b   :  { %8733 = vmatpush1.bf16.msra.mxu0 %v16989_v14 }
 0x63c   :  { %8734 = vmatprep.subr.bf16.mxu0 %v16994_v23 }
 0x63f   :  { %8735 = vmatpush1.bf16.msra.mxu0 %v16992_v24 }
 0x640   :  { %8736 = vmatprep.subr.bf16.mxu0 %v16997_v17  ;;  %v8747_v17 = vld [vmem:[#allocation16 + $0x4] sm:$0x3] }
 0x641   :  { %v8791_v22 = vrot.slane %v8747_v17, %v17863_v3  ;;  %v8795_v27 = vrot.slane %v8747_v17, %v17869_v6 }
 0x643   :  { %8737 = vmatpush1.bf16.msra.mxu0 %v16995_v26  ;;  %v8748_v26 = vld [vmem:[#allocation17 + $0x4] sm:$0x3] }
 0x644   :  { %v8804_v35 = vrot.slane %v8748_v26, %v17863_v3  ;;  %v8808_v19 = vrot.slane %v8748_v26, %v17869_v6 }
 0x646   :  { %8739 = vmatmul.mubr.bf16.vlgmr.msra.gmra.mrb[4].mxu0 %v8279_v32 }
 0x719   :  { %v8740_v45 = vpop.f32.mrb[4].mxu0 }
 0x71a   :  { %v8749_v46 = vrot.slane %v8740_v45, 4  ;;  %v8742_v47 = vpop.f32.mrb[5].mxu0 }
 0x71b   :  { %v8755_v48 = vrot.slane %v8742_v47, 4  ;;  %v8744_v49 = vpop.f32.mrb[6].mxu0 }
 0x71c   :  { %v8750_v50 = vadd.f32 %v8749_v46, %v8740_v45  ;;  %v8745_v51 = vpop.f32.mrb[7].mxu0  ;;  %v17016_v49 = vld [vmem:[#allocation13 + $0x4] ss:$8 sps:$4 sm:$0xff]  }
 0x71d   :  { %v8756_v52 = vadd.f32 %v8755_v48, %v8742_v47  ;;  %9134 = vmatprep.subr.bf16.mxu1 %v17016_v49  ;;  %v17019_v51 = vld [vmem:[#allocation13 + $0x14] ss:$8 sps:$4 sm:$0xff]   ;;  %v17050_v49 = vld [vmem:[#allocation14 + $0x40] ss:$16 sps:$4 sm:$0xff]  }
 0x71e   :  { %v8751_v34 = vrot.slane %v8750_v50, 2 }
 0x71f   :  { %v8757_v53 = vrot.slane %v8756_v52, 2 }
 0x720   :  { %v8752_v54 = vadd.f32 %v8751_v34, %v8750_v50  ;;  %v17014_v50 = vld [vmem:[#allocation13] ss:$8 sps:$4 sm:$0xff]   ;;  %v17022_v34 = vld [vmem:[#allocation13 + $0x24] ss:$8 sps:$4 sm:$0xff]  }
 0x721   :  { %v8758_v55 = vadd.f32 %v8757_v53, %v8756_v52  ;;  %v17017_v52 = vld [vmem:[#allocation13 + $0x10] ss:$8 sps:$4 sm:$0xff]   ;;  %v17020_v53 = vld [vmem:[#allocation13 + $0x20] ss:$8 sps:$4 sm:$0xff]  }
 0x722   :  { %v8753_v28 = vrot.slane %v8752_v54, 1 }
 0x723   :  { %v8759_v56 = vrot.slane %v8758_v55, 1 }
 0x724   :  { %v8754_v57 = vadd.f32 %v8753_v28, %v8752_v54  ;;  %v17025_v54 = vld [vmem:[#allocation13 + $0x34] ss:$8 sps:$4 sm:$0xff]   ;;  %v17028_v28 = vld [vmem:[#allocation13 + $0x44] ss:$8 sps:$4 sm:$0xff]  }
 0x725   :  { %v8760_v58 = vadd.f32 %v8759_v56, %v8758_v55  ;;  %v17023_v55 = vld [vmem:[#allocation13 + $0x30] ss:$8 sps:$4 sm:$0xff]   ;;  %v17026_v56 = vld [vmem:[#allocation13 + $0x40] ss:$8 sps:$4 sm:$0xff]  }
 0x726   :  { %v8761_v31 = vmul.f32 0.125, %v8754_v57  ;;  %v17029_v57 = vld [vmem:[#allocation13 + $0x50] ss:$8 sps:$4 sm:$0xff]  }
 0x727   :  { %v8762_v60 = vmul.f32 0.125, %v8760_v58  ;;  %v17034_v58 = vld [vmem:[#allocation13 + $0x64] ss:$8 sps:$4 sm:$0xff]  }
 0x728   :  { %v8763_v61 = vsub.f32 %v8740_v45, %v8761_v31  ;;  %v17032_v31 = vld [vmem:[#allocation13 + $0x60] ss:$8 sps:$4 sm:$0xff]  }
 0x729   :  { %v8764_v62 = vsub.f32 %v8742_v47, %v8762_v60  ;;  %v17037_v60 = vld [vmem:[#allocation13 + $0x74] ss:$8 sps:$4 sm:$0xff]  }
 0x72a   :  { %v8765_v63 = vmul.f32 %v8763_v61, %v8763_v61 }
 0x72b   :  { %v8766_v0 = vmul.f32 %v8764_v62, %v8764_v62 }
 0x72c   :  { %v8767_v1 = vrot.slane %v8765_v63, 4 }
 0x72d   :  { %v8773_v4 = vrot.slane %v8766_v0, 4 }
 0x72e   :  { %v8768_v7 = vadd.f32 %v8767_v1, %v8765_v63  ;;  %v17041_v63 = vld [vmem:[#allocation14 + $0x8] ss:$16 sps:$4 sm:$0xff]   ;;  %v17049_v1 = vld [vmem:[#allocation14 + $0x2c] ss:$16 sps:$4 sm:$0xff]  }
 0x72f   :  { %v8774_v9 = vadd.f32 %v8773_v4, %v8766_v0  ;;  %v17043_v0 = vld [vmem:[#allocation14 + $0xc] ss:$16 sps:$4 sm:$0xff]   ;;  %v17047_v4 = vld [vmem:[#allocation14 + $0x28] ss:$16 sps:$4 sm:$0xff]  }
 0x730   :  { %v8769_v10 = vrot.slane %v8768_v7, 2  ;;  %9676 = vmatprep.subr.bf16.mxu0 %v17043_v0  ;;  %v17082_v0 = vld [vmem:[#allocation14 + $0xe4] ss:$16 sps:$4 sm:$0xff]  }
 0x731   :  { %v8775_v12 = vrot.slane %v8774_v9, 2  ;;  %9677 = vmatpush1.bf16.msra.mxu0 %v17041_v63  ;;  %v17077_v63 = vld [vmem:[#allocation14 + $0xc8] ss:$16 sps:$4 sm:$0xff]  }
 0x732   :  { %v8770_v13 = vadd.f32 %v8769_v10, %v8768_v7  ;;  %9678 = vmatprep.subr.bf16.mxu0 %v17049_v1  ;;  %v17085_v1 = vld [vmem:[#allocation14 + $0xec] ss:$16 sps:$4 sm:$0xff]  }
 0x733   :  { %v8776_v15 = vadd.f32 %v8775_v12, %v8774_v9 }
 0x734   :  { %v8771_v16 = vrot.slane %v8770_v13, 1 }
 0x735   :  { %v8777_v18 = vrot.slane %v8776_v15, 1  ;;  %9679 = vmatpush1.bf16.msra.mxu0 %v17047_v4  ;;  %v17080_v4 = vld [vmem:[#allocation14 + $0xe0] ss:$16 sps:$4 sm:$0xff]  }
 0x736   :  { %v8772_v20 = vadd.f32 %v8771_v16, %v8770_v13 }
 0x737   :  { %v8778_v11 = vadd.f32 %v8777_v18, %v8776_v15 }
 0x738   :  { %v8779_v21 = vmul.f32 0.125, %v8772_v20 }
 0x739   :  { %v8780_v14 = vmul.f32 0.125, %v8778_v11 }
 0x73a   :  { %v8781_v23 = vadd.f32 1e-05, %v8779_v21 }
 0x73b   :  { %v8782_v24 = vadd.f32 1e-05, %v8780_v14 }
 0x73c   :  { %17158 = vrsqrt.f32 %v8781_v23 }
 0x73d   :  { %17160 = vrsqrt.f32 %v8782_v24 }
 0x746   :  { %v17159_v32 = vpop.eup %17158 }
 0x747   :  { %v17161_v33 = vpop.eup %17160  ;;  %v8785_v25 = vmul.f32 %v17159_v32, %v8763_v61  ;;  %v17035_v61 = vld [vmem:[#allocation13 + $0x70] ss:$8 sps:$4 sm:$0xff]  }
 0x748   :  { %v8786_v36 = vmul.f32 %v17161_v33, %v8764_v62  ;;  %v17040_v62 = vld [vmem:[#allocation14 + $0x4] ss:$16 sps:$4 sm:$0xff]  }
 0x749   :  { %v8798_v37 = vmul.f32 %v8791_v22, %v8785_v25 }
 0x74a   :  { %v8799_v38 = vmul.f32 %v8795_v27, %v8786_v36 }
 0x74b   :  { %v8811_v39 = vadd.f32 %v8804_v35, %v8798_v37 }
 0x74c   :  { %v8812_v40 = vadd.f32 %v8808_v19, %v8799_v38  ;;  %v14817_v19 = vld [vmem:[#allocation16 + $0x6] ss:$0 sm:$0xff]  ;;  %v14818_v38 = vld [vmem:[#allocation17 + $0x6] ss:$0 sm:$0xff] }
 0x74d   :  { %v14799_v29 = vmul.f32 -1.442695, %v8811_v39 }
 0x74e   :  { %v14800_v41 = vmul.f32 -1.442695, %v8812_v40 }
 0x74f   :  { %17162 = vpow2.f32 %v14799_v29 }
 0x750   :  { %17164 = vpow2.f32 %v14800_v41 }
 0x759   :  { %v17163_v42 = vpop.eup %17162 }
 0x75a   :  { %v17165_v43 = vpop.eup %17164  ;;  %v8819_v44 = vadd.f32 1.0, %v17163_v42 }
 0x75b   :  { %v8820_v30 = vadd.f32 1.0, %v17165_v43 }
 0x75c   :  { %17166 = vrcp.f32 %v8819_v44  ;;  %v17038_v44 = vld [vmem:[#allocation14] ss:$16 sps:$4 sm:$0xff]  }
 0x75d   :  { %17168 = vrcp.f32 %v8820_v30 }
 0x766   :  { %v17167_v45 = vpop.eup %17166 }
 0x767   :  { %v17169_v46 = vpop.eup %17168  ;;  %v8825_v48 = vpack.c.bf16 %v17167_v45, %v17167_v45  ;;  %v17046_v45 = vld [vmem:[#allocation14 + $0x24] ss:$16 sps:$4 sm:$0xff]  }
 0x768   :  { %v8826_v47 = vpack.c.bf16 %v17169_v46, %v17169_v46  ;;  %v17044_v46 = vld [vmem:[#allocation14 + $0x20] ss:$16 sps:$4 sm:$0xff]  }
 0x76a   :  { %8987 = vmatprep.mubr.bf16.mxu1 %v8826_v47  ;;  %v17052_v47 = vld [vmem:[#allocation14 + $0x44] ss:$16 sps:$4 sm:$0xff]  }
 0x76b   :  { %8988 = vmatmul.mubr.bf16.vlgmr.msra.gmra.mrb[4].mxu1 %v8825_v48  ;;  %v17055_v48 = vld [vmem:[#allocation14 + $0x4c] ss:$16 sps:$4 sm:$0xff]  }
 0x76c   :  { %9166 = vmatprep.mubr.bf16.mxu1 %v17535_v59  ;;  %9135 = vmatpush1.bf16.msra.mxu1 %v17014_v50  ;;  %v17031_v59 = vld [vmem:[#allocation13 + $0x54] ss:$8 sps:$4 sm:$0xff]   ;;  %v17053_v50 = vld [vmem:[#allocation14 + $0x48] ss:$16 sps:$4 sm:$0xff]  }
 0x76d   :  { %9136 = vmatprep.subr.bf16.mxu1 %v17019_v51  ;;  %9680 = vmatprep.subr.bf16.mxu0 %v17055_v48  ;;  %v17058_v51 = vld [vmem:[#allocation14 + $0x64] ss:$16 sps:$4 sm:$0xff]  }
 0x76e   :  { %9681 = vmatpush1.bf16.msra.mxu0 %v17053_v50 }
 0x770   :  { %9137 = vmatpush1.bf16.msra.mxu1 %v17017_v52  ;;  %v17061_v52 = vld [vmem:[#allocation14 + $0x6c] ss:$16 sps:$4 sm:$0xff]  }
 0x771   :  { %9138 = vmatprep.subr.bf16.mxu1 %v17022_v34  ;;  %v17056_v34 = vld [vmem:[#allocation14 + $0x60] ss:$16 sps:$4 sm:$0xff]   ;;  %9682 = vmatprep.subr.bf16.mxu0 %v17061_v52 }
 0x774   :  { %9139 = vmatpush1.bf16.msra.mxu1 %v17020_v53  ;;  %v17059_v53 = vld [vmem:[#allocation14 + $0x68] ss:$16 sps:$4 sm:$0xff]  }
 0x775   :  { %9140 = vmatprep.subr.bf16.mxu1 %v17025_v54  ;;  %9683 = vmatpush1.bf16.msra.mxu0 %v17059_v53  ;;  %v17064_v54 = vld [vmem:[#allocation14 + $0x84] ss:$16 sps:$4 sm:$0xff]  }
 0x778   :  { %9141 = vmatpush1.bf16.msra.mxu1 %v17023_v55  ;;  %v17067_v55 = vld [vmem:[#allocation14 + $0x8c] ss:$16 sps:$4 sm:$0xff]  }
 0x779   :  { %9142 = vmatprep.subr.bf16.mxu1 %v17028_v28  ;;  %v17062_v28 = vld [vmem:[#allocation14 + $0x80] ss:$16 sps:$4 sm:$0xff]   ;;  %9684 = vmatprep.subr.bf16.mxu0 %v17067_v55 }
 0x77c   :  { %9143 = vmatpush1.bf16.msra.mxu1 %v17026_v56  ;;  %v17065_v56 = vld [vmem:[#allocation14 + $0x88] ss:$16 sps:$4 sm:$0xff]  }
 0x77d   :  { %9144 = vmatprep.subr.bf16.mxu1 %v17031_v59  ;;  %9685 = vmatpush1.bf16.msra.mxu0 %v17065_v56  ;;  %v17070_v59 = vld [vmem:[#allocation14 + $0xa4] ss:$16 sps:$4 sm:$0xff]  }
 0x780   :  { %9145 = vmatpush1.bf16.msra.mxu1 %v17029_v57  ;;  %v17073_v57 = vld [vmem:[#allocation14 + $0xac] ss:$16 sps:$4 sm:$0xff]  }
 0x781   :  { %9146 = vmatprep.subr.bf16.mxu1 %v17034_v58  ;;  %v17068_v58 = vld [vmem:[#allocation14 + $0xa0] ss:$16 sps:$4 sm:$0xff]   ;;  %9686 = vmatprep.subr.bf16.mxu0 %v17073_v57 }
 0x784   :  { %9147 = vmatpush1.bf16.msra.mxu1 %v17032_v31  ;;  %v17071_v31 = vld [vmem:[#allocation14 + $0xa8] ss:$16 sps:$4 sm:$0xff]  }
 0x785   :  { %9148 = vmatprep.subr.bf16.mxu1 %v17037_v60  ;;  %9687 = vmatpush1.bf16.msra.mxu0 %v17071_v31  ;;  %v17076_v60 = vld [vmem:[#allocation14 + $0xc4] ss:$16 sps:$4 sm:$0xff]  }
 0x788   :  { %9149 = vmatpush1.bf16.msra.mxu1 %v17035_v61  ;;  %v17079_v61 = vld [vmem:[#allocation14 + $0xcc] ss:$16 sps:$4 sm:$0xff]  }
 0x789   :  { %9635 = vmatprep.subr.bf16.mxu1 %v17040_v62  ;;  %v17074_v62 = vld [vmem:[#allocation14 + $0xc0] ss:$16 sps:$4 sm:$0xff]   ;;  %9688 = vmatprep.subr.bf16.mxu0 %v17079_v61 }
 0x78a   :  { %9689 = vmatpush1.bf16.msra.mxu0 %v17077_v63 }
 0x78b   :  { %9690 = vmatprep.subr.bf16.mxu0 %v17085_v1 }
 0x83e   :  { %v14923_v7 = vpop.f32.mrb[4].mxu1 }
 0x83f   :  { %v14924_v9 = vpop.f32.mrb[5].mxu1 }
 0x840   :  { %v14925_v10 = vadd.f32 %v14924_v9, %v14923_v7  ;;  %v14926_v12 = vpop.f32.mrb[6].mxu1  ;;  %v17083_v7 = vld [vmem:[#allocation14 + $0xe8] ss:$16 sps:$4 sm:$0xff]   ;;  %v17088_v9 = vld [vmem:[#allocation14 + $0x104] ss:$16 sps:$4 sm:$0xff]  }
 0x841   :  { %v14927_v13 = vpop.f32.mrb[7].mxu1  ;;  %9691 = vmatpush1.bf16.msra.mxu0 %v17083_v7  ;;  %v17086_v12 = vld [vmem:[#allocation14 + $0x100] ss:$16 sps:$4 sm:$0xff]  }
 0x842   :  { %v8997_v15 = vrot.slane %v14925_v10, 4  ;;  %v17089_v13 = vld [vmem:[#allocation14 + $0x108] ss:$16 sps:$4 sm:$0xff]  }
 0x844   :  { %v8998_v16 = vadd.f32 %v14925_v10, %v8997_v15  ;;  %v17094_v15 = vld [vmem:[#allocation14 + $0x124] ss:$16 sps:$4 sm:$0xff]  }
 0x846   :  { %v8999_v18 = vrot.slane %v8998_v16, 2 }
 0x848   :  { %v9000_v20 = vadd.f32 %v8999_v18, %v8998_v16  ;;  %v17097_v16 = vld [vmem:[#allocation14 + $0x12c] ss:$16 sps:$4 sm:$0xff]   ;;  %v17092_v18 = vld [vmem:[#allocation14 + $0x120] ss:$16 sps:$4 sm:$0xff]  }
 0x84a   :  { %v9001_v11 = vrot.slane %v9000_v20, 1 }
 0x84c   :  { %v9002_v21 = vadd.f32 %v9001_v11, %v9000_v20  ;;  %v17095_v20 = vld [vmem:[#allocation14 + $0x128] ss:$16 sps:$4 sm:$0xff]   ;;  %v17100_v11 = vld [vmem:[#allocation14 + $0x144] ss:$16 sps:$4 sm:$0xff]  }
 0x84e   :  { %v9003_v14 = vmul.f32 0.125, %v9002_v21  ;;  %v17103_v21 = vld [vmem:[#allocation14 + $0x14c] ss:$16 sps:$4 sm:$0xff]  }
 0x850   :  { %v9004_v23 = vsub.f32 %v14925_v10, %v9003_v14  ;;  %v17091_v10 = vld [vmem:[#allocation14 + $0x10c] ss:$16 sps:$4 sm:$0xff]   ;;  %v17098_v14 = vld [vmem:[#allocation14 + $0x140] ss:$16 sps:$4 sm:$0xff]  }
 0x851   :  { %9692 = vmatprep.subr.bf16.mxu0 %v17091_v10 }
 0x852   :  { %v9005_v24 = vmul.f32 %v9004_v23, %v9004_v23  ;;  %9693 = vmatpush1.bf16.msra.mxu0 %v17089_v13 }
 0x853   :  { %9694 = vmatprep.subr.bf16.mxu0 %v17097_v16 }
 0x854   :  { %v9006_v17 = vrot.slane %v9005_v24, 4 }
 0x856   :  { %v9007_v26 = vadd.f32 %v9006_v17, %v9005_v24  ;;  %9695 = vmatpush1.bf16.msra.mxu0 %v17095_v20  ;;  %v17106_v24 = vld [vmem:[#allocation14 + $0x164] ss:$16 sps:$4 sm:$0xff]   ;;  %v17109_v17 = vld [vmem:[#allocation14 + $0x16c] ss:$16 sps:$4 sm:$0xff]  }
 0x857   :  { %9696 = vmatprep.subr.bf16.mxu0 %v17103_v21 }
 0x858   :  { %v9008_v22 = vrot.slane %v9007_v26, 2 }
 0x85a   :  { %v9009_v32 = vadd.f32 %v9008_v22, %v9007_v26  ;;  %v17104_v26 = vld [vmem:[#allocation14 + $0x160] ss:$16 sps:$4 sm:$0xff]   ;;  %v17107_v22 = vld [vmem:[#allocation14 + $0x168] ss:$16 sps:$4 sm:$0xff]  }
 0x85c   :  { %v9010_v27 = vrot.slane %v9009_v32, 1 }
 0x85e   :  { %v9011_v33 = vadd.f32 %v9010_v27, %v9009_v32  ;;  %v17112_v32 = vld [vmem:[#allocation14 + $0x184] ss:$16 sps:$4 sm:$0xff]   ;;  %v17115_v27 = vld [vmem:[#allocation14 + $0x18c] ss:$16 sps:$4 sm:$0xff]  }
 0x860   :  { %v9012_v25 = vmul.f32 0.125, %v9011_v33  ;;  %v17110_v33 = vld [vmem:[#allocation14 + $0x180] ss:$16 sps:$4 sm:$0xff]  }
 0x862   :  { %v9013_v35 = vadd.f32 1e-05, %v9012_v25  ;;  %v17113_v25 = vld [vmem:[#allocation14 + $0x188] ss:$16 sps:$4 sm:$0xff]  }
 0x864   :  { %17170 = vrsqrt.f32 %v9013_v35  ;;  %v17118_v35 = vld [vmem:[#allocation14 + $0x1a4] ss:$16 sps:$4 sm:$0xff]  }
 0x86e   :  { %v17171_v36 = vpop.eup %17170 }
 0x86f   :  { %v9015_v37 = vmul.f32 %v17171_v36, %v9004_v23  ;;  %v17101_v23 = vld [vmem:[#allocation14 + $0x148] ss:$16 sps:$4 sm:$0xff]   ;;  %v17121_v36 = vld [vmem:[#allocation14 + $0x1ac] ss:$16 sps:$4 sm:$0xff]  }
 0x870   :  { %9697 = vmatpush1.bf16.msra.mxu0 %v17101_v23  ;;  %v9175_v23 = vld [vmem:[#allocation16 + $0x7] sm:$0x3] }
 0x871   :  { %v9022_v39 = vmul.f32 %v14817_v19, %v9015_v37  ;;  %9698 = vmatprep.subr.bf16.mxu0 %v17109_v17  ;;  %v17116_v19 = vld [vmem:[#allocation14 + $0x1a0] ss:$16 sps:$4 sm:$0xff]   ;;  %v17119_v37 = vld [vmem:[#allocation14 + $0x1a8] ss:$16 sps:$4 sm:$0xff]   ;;  %v9219_v17 = vrot.slane %v9175_v23, %v17863_v3 }
 0x873   :  { %v9029_v40 = vadd.f32 %v14818_v38, %v9022_v39  ;;  %v17124_v38 = vld [vmem:[#allocation14 + $0x1c4] ss:$16 sps:$4 sm:$0xff]   ;;  %v17127_v39 = vld [vmem:[#allocation14 + $0x1cc] ss:$16 sps:$4 sm:$0xff]  }
 0x874   :  { %9699 = vmatpush1.bf16.msra.mxu0 %v17107_v22  ;;  %v9223_v22 = vrot.slane %v9175_v23, %v17869_v6 }
 0x875   :  { %v14819_v29 = vmul.f32 -1.442695, %v9029_v40  ;;  %9700 = vmatprep.subr.bf16.mxu0 %v17115_v27  ;;  %v17122_v40 = vld [vmem:[#allocation14 + $0x1c0] ss:$16 sps:$4 sm:$0xff]  }
 0x877   :  { %17172 = vpow2.f32 %v14819_v29  ;;  %v17125_v29 = vld [vmem:[#allocation14 + $0x1c8] ss:$16 sps:$4 sm:$0xff]  }
 0x878   :  { %9701 = vmatpush1.bf16.msra.mxu0 %v17113_v25 }
 0x879   :  { %9702 = vmatprep.subr.bf16.mxu0 %v17121_v36 }
 0x87c   :  { %9703 = vmatpush1.bf16.msra.mxu0 %v17119_v37  ;;  %v9244_v37 = vstv %s9241_s6 }
 0x87d   :  { %9704 = vmatprep.subr.bf16.mxu0 %v17127_v39 }
 0x880   :  { %9705 = vmatpush1.bf16.msra.mxu0 %v17125_v29 }
 0x881   :  { %v17173_v41 = vpop.eup %17172 }
 0x882   :  { %v9033_v42 = vadd.f32 1.0, %v17173_v41  ;;  %v17130_v41 = vld [vmem:[#allocation14 + $0x1e4] ss:$16 sps:$4 sm:$0xff]  }
 0x884   :  { %17174 = vrcp.f32 %v9033_v42  ;;  %v17133_v42 = vld [vmem:[#allocation14 + $0x1ec] ss:$16 sps:$4 sm:$0xff]  }
 0x885   :  { %9706 = vmatprep.subr.bf16.mxu0 %v17133_v42 }
 0x88e   :  { %v17175_v43 = vpop.eup %17174 }
 0x88f   :  { %9036 = vst [vmem:[#allocation20] sm:$0xff] %v17175_v43  ;;  %v9037_v30 = vpack.c.bf16 %v17175_v43, %v17175_v43  ;;  %v17128_v43 = vld [vmem:[#allocation14 + $0x1e0] ss:$16 sps:$4 sm:$0xff]  }
 0x891   :  { %9167 = vmatmul.mubr.bf16.vlgmr.msra.gmra.mrb[8].mxu1 %v9037_v30 }
 0x892   :  { %9636 = vmatpush1.bf16.msra.mxu1 %v17038_v44  ;;  %v17131_v44 = vld [vmem:[#allocation14 + $0x1e8] ss:$16 sps:$4 sm:$0xff]  }
 0x893   :  { %9637 = vmatprep.subr.bf16.mxu1 %v17046_v45  ;;  %9707 = vmatpush1.bf16.msra.mxu0 %v17131_v44 }
 0x896   :  { %9638 = vmatpush1.bf16.msra.mxu1 %v17044_v46 }
 0x897   :  { %9639 = vmatprep.subr.bf16.mxu1 %v17052_v47 }
 0x89a   :  { %9640 = vmatpush1.bf16.msra.mxu1 %v17050_v49 }
 0x89b   :  { %9641 = vmatprep.subr.bf16.mxu1 %v17058_v51 }
 0x89e   :  { %9642 = vmatpush1.bf16.msra.mxu1 %v17056_v34 }
 0x89f   :  { %9643 = vmatprep.subr.bf16.mxu1 %v17064_v54 }
 0x8a2   :  { %9644 = vmatpush1.bf16.msra.mxu1 %v17062_v28 }
 0x8a3   :  { %9645 = vmatprep.subr.bf16.mxu1 %v17070_v59 }
 0x8a6   :  { %9646 = vmatpush1.bf16.msra.mxu1 %v17068_v58 }
 0x8a7   :  { %9647 = vmatprep.subr.bf16.mxu1 %v17076_v60 }
 0x8aa   :  { %9648 = vmatpush1.bf16.msra.mxu1 %v17074_v62 }
 0x8ab   :  { %9649 = vmatprep.subr.bf16.mxu1 %v17082_v0 }
 0x8ae   :  { %9650 = vmatpush1.bf16.msra.mxu1 %v17080_v4 }
 0x8af   :  { %9651 = vmatprep.subr.bf16.mxu1 %v17088_v9 }
 0x8b2   :  { %9652 = vmatpush1.bf16.msra.mxu1 %v17086_v12 }
 0x8b3   :  { %9653 = vmatprep.subr.bf16.mxu1 %v17094_v15 }
 0x8b6   :  { %9654 = vmatpush1.bf16.msra.mxu1 %v17092_v18 }
 0x8b7   :  { %9655 = vmatprep.subr.bf16.mxu1 %v17100_v11 }
 0x8ba   :  { %9656 = vmatpush1.bf16.msra.mxu1 %v17098_v14 }
 0x8bb   :  { %9657 = vmatprep.subr.bf16.mxu1 %v17106_v24  ;;  %v9176_v24 = vld [vmem:[#allocation17 + $0x7] sm:$0x3] }
 0x8be   :  { %9658 = vmatpush1.bf16.msra.mxu1 %v17104_v26 }
 0x8bf   :  { %9659 = vmatprep.subr.bf16.mxu1 %v17112_v32 }
 0x8c2   :  { %9660 = vmatpush1.bf16.msra.mxu1 %v17110_v33  ;;  %v9232_v33 = vrot.slane %v9176_v24, %v17863_v3 }
 0x8c3   :  { %9661 = vmatprep.subr.bf16.mxu1 %v17118_v35  ;;  %v9236_v35 = vrot.slane %v9176_v24, %v17869_v6 }
 0x8c6   :  { %9662 = vmatpush1.bf16.msra.mxu1 %v17116_v19 }
 0x8c7   :  { %9663 = vmatprep.subr.bf16.mxu1 %v17124_v38 }
 0x8ca   :  { %9664 = vmatpush1.bf16.msra.mxu1 %v17122_v40 }
 0x8cb   :  { %9665 = vmatprep.subr.bf16.mxu1 %v17130_v41 }
 0x8ce   :  { %9666 = vmatpush1.bf16.msra.mxu1 %v17128_v43 }
 0x964   :  { %v9168_v30 = vpop.f32.mrb[8].mxu1 }
 0x965   :  { %v9177_v45 = vrot.slane %v9168_v30, 4  ;;  %v9170_v46 = vpop.f32.mrb[9].mxu1 }
 0x966   :  { %v9183_v47 = vrot.slane %v9170_v46, 4  ;;  %v9172_v48 = vpop.f32.mrb[10].mxu1 }
 0x967   :  { %v9178_v49 = vadd.f32 %v9177_v45, %v9168_v30  ;;  %v9173_v50 = vpop.f32.mrb[11].mxu1 }
 0x968   :  { %v9184_v51 = vadd.f32 %v9183_v47, %v9170_v46 }
 0x969   :  { %v9179_v52 = vrot.slane %v9178_v49, 2 }
 0x96a   :  { %v9185_v34 = vrot.slane %v9184_v51, 2 }
 0x96b   :  { %v9180_v53 = vadd.f32 %v9179_v52, %v9178_v49 }
 0x96c   :  { %v9186_v54 = vadd.f32 %v9185_v34, %v9184_v51 }
 0x96d   :  { %v9181_v55 = vrot.slane %v9180_v53, 1 }
 0x96e   :  { %v9187_v28 = vrot.slane %v9186_v54, 1 }
 0x96f   :  { %v9182_v56 = vadd.f32 %v9181_v55, %v9180_v53 }
 0x970   :  { %v9188_v59 = vadd.f32 %v9187_v28, %v9186_v54 }
 0x971   :  { %v9189_v57 = vmul.f32 0.125, %v9182_v56 }
 0x972   :  { %v9190_v58 = vmul.f32 0.125, %v9188_v59 }
 0x973   :  { %v9191_v31 = vsub.f32 %v9168_v30, %v9189_v57 }
 0x974   :  { %v9192_v60 = vsub.f32 %v9170_v46, %v9190_v58 }
 0x975   :  { %v9193_v61 = vmul.f32 %v9191_v31, %v9191_v31 }
 0x976   :  { %v9194_v62 = vmul.f32 %v9192_v60, %v9192_v60 }
 0x977   :  { %v9195_v63 = vrot.slane %v9193_v61, 4 }
 0x978   :  { %v9201_v0 = vrot.slane %v9194_v62, 4 }
 0x979   :  { %v9196_v1 = vadd.f32 %v9195_v63, %v9193_v61 }
 0x97a   :  { %v9202_v4 = vadd.f32 %v9201_v0, %v9194_v62 }
 0x97b   :  { %v9197_v7 = vrot.slane %v9196_v1, 2 }
 0x97c   :  { %v9203_v9 = vrot.slane %v9202_v4, 2 }
 0x97d   :  { %v9198_v10 = vadd.f32 %v9197_v7, %v9196_v1 }
 0x97e   :  { %v9204_v12 = vadd.f32 %v9203_v9, %v9202_v4 }
 0x97f   :  { %v9199_v13 = vrot.slane %v9198_v10, 1 }
 0x980   :  { %v9205_v15 = vrot.slane %v9204_v12, 1 }
 0x981   :  { %v9200_v16 = vadd.f32 %v9199_v13, %v9198_v10 }
 0x982   :  { %v9206_v18 = vadd.f32 %v9205_v15, %v9204_v12 }
 0x983   :  { %v9207_v20 = vmul.f32 0.125, %v9200_v16 }
 0x984   :  { %v9208_v11 = vmul.f32 0.125, %v9206_v18 }
 0x985   :  { %v9209_v21 = vadd.f32 1e-05, %v9207_v20 }
 0x986   :  { %v9210_v14 = vadd.f32 1e-05, %v9208_v11 }
 0x987   :  { %17176 = vrsqrt.f32 %v9209_v21 }
 0x988   :  { %17178 = vrsqrt.f32 %v9210_v14 }
 0x991   :  { %v17177_v26 = vpop.eup %17176 }
 0x992   :  { %v17179_v32 = vpop.eup %17178  ;;  %v9213_v27 = vmul.f32 %v17177_v26, %v9191_v31 }
 0x993   :  { %v9214_v25 = vmul.f32 %v17179_v32, %v9192_v60 }
 0x994   :  { %v9226_v36 = vmul.f32 %v9219_v17, %v9213_v27 }
 0x995   :  { %v9227_v19 = vmul.f32 %v9223_v22, %v9214_v25 }
 0x996   :  { %v9239_v38 = vadd.f32 %v9232_v33, %v9226_v36 }
 0x997   :  { %v9240_v39 = vadd.f32 %v9236_v35, %v9227_v19 }
 0x998   :  { %v9245_v40 = vmul.f32 %v9244_v37, %v9239_v38  ;;  %vm9242_vm0 = vcmp.gt.f32.partialorder %v9239_v38, 0.0 }
 0x999   :  { %vm9243_vm1 = vcmp.gt.f32.partialorder %v9240_v39, 0.0  ;;  %v9246_v29 = vmul.f32 %v9244_v37, %v9240_v39 }
 0x99a   :  { %v9247_v41 = vsel %vm9242_vm0, %v9239_v38, %v9245_v40 }
 0x99b   :  { %v9248_v42 = vsel %vm9243_vm1, %v9240_v39, %v9246_v29  ;;  %v9249_v44 = vpack.c.bf16 %v9247_v41, %v9247_v41 }
 0x99c   :  { %v9250_v43 = vpack.c.bf16 %v9248_v42, %v9248_v42 }
 0x99e   :  { %9667 = vmatprep.mubr.bf16.mxu1 %v9250_v43  ;;  %9708 = vmatprep.mubr.bf16.mxu0 %v9250_v43 }
 0x99f   :  { %9668 = vmatmul.mubr.bf16.vlgmr.msra.gmra.mrb[12].mxu1 %v9249_v44  ;;  %9709 = vmatmul.mubr.bf16.vlgmr.msra.gmra.mrb[8].mxu0 %v9249_v44 }
 0xa72   :  { %v9669_v30 = vpop.f32.mrb[12].mxu1  ;;  %v9710_v45 = vpop.f32.mrb[8].mxu0 }
 0xa73   :  { %v9719_v46 = vrot.slane %v9669_v30, 4  ;;  %v9731_v47 = vrot.slane %v9710_v45, 4  ;;  %v9671_v48 = vpop.f32.mrb[13].mxu1  ;;  %v9712_v49 = vpop.f32.mrb[9].mxu0 }
 0xa74   :  { %v9725_v50 = vrot.slane %v9671_v48, 4  ;;  %v9737_v51 = vrot.slane %v9712_v49, 4  ;;  %v9673_v52 = vpop.f32.mrb[14].mxu1  ;;  %v9714_v34 = vpop.f32.mrb[10].mxu0 }
 0xa75   :  { %v9720_v53 = vadd.f32 %v9719_v46, %v9669_v30  ;;  %v9732_v54 = vadd.f32 %v9731_v47, %v9710_v45  ;;  %v9674_v55 = vpop.f32.mrb[15].mxu1  ;;  %v9715_v28 = vpop.f32.mrb[11].mxu0 }
 0xa76   :  { %v9726_v56 = vadd.f32 %v9725_v50, %v9671_v48  ;;  %v9738_v59 = vadd.f32 %v9737_v51, %v9712_v49 }
 0xa77   :  { %v9721_v57 = vrot.slane %v9720_v53, 2  ;;  %v9733_v58 = vrot.slane %v9732_v54, 2 }
 0xa78   :  { %v9727_v31 = vrot.slane %v9726_v56, 2  ;;  %v9739_v60 = vrot.slane %v9738_v59, 2 }
 0xa79   :  { %v9722_v61 = vadd.f32 %v9721_v57, %v9720_v53  ;;  %v9734_v62 = vadd.f32 %v9733_v58, %v9732_v54  ;;  %v9717_v58 = vld [vmem:[#allocation16 + $0x9] sm:$0xf] }
 0xa7a   :  { %v9728_v63 = vadd.f32 %v9727_v31, %v9726_v56  ;;  %v9740_v0 = vadd.f32 %v9739_v60, %v9738_v59  ;;  %v9718_v31 = vld [vmem:[#allocation17 + $0x9] sm:$0xf]  ;;  %v9799_v60 = vrot.slane %v9717_v58, %v17863_v3 }
 0xa7b   :  { %v9723_v1 = vrot.slane %v9722_v61, 1  ;;  %v9735_v4 = vrot.slane %v9734_v62, 1 }
 0xa7c   :  { %v9729_v7 = vrot.slane %v9728_v63, 1  ;;  %v9741_v9 = vrot.slane %v9740_v0, 1 }
 0xa7d   :  { %v9724_v10 = vadd.f32 %v9723_v1, %v9722_v61  ;;  %v9736_v12 = vadd.f32 %v9735_v4, %v9734_v62  ;;  %v9807_v62 = vrot.slane %v9717_v58, %v17866_v5  ;;  %v9824_v1 = vrot.slane %v9718_v31, %v17863_v3 }
 0xa7e   :  { %v9730_v13 = vadd.f32 %v9729_v7, %v9728_v63  ;;  %v9742_v15 = vadd.f32 %v9741_v9, %v9740_v0  ;;  %v9803_v4 = vrot.slane %v9717_v58, %v17869_v6 }
 0xa7f   :  { %v9743_v16 = vmul.f32 0.125, %v9724_v10  ;;  %v9745_v18 = vmul.f32 0.125, %v9736_v12  ;;  %v9832_v10 = vrot.slane %v9718_v31, %v17866_v5  ;;  %v9811_v12 = vrot.slane %v9717_v58, %v17872_v8 }
 0xa80   :  { %v9744_v20 = vmul.f32 0.125, %v9730_v13  ;;  %v9746_v11 = vmul.f32 0.125, %v9742_v15 }
 0xa81   :  { %v9747_v21 = vsub.f32 %v9669_v30, %v9743_v16  ;;  %v9749_v14 = vsub.f32 %v9710_v45, %v9745_v18  ;;  %v9828_v18 = vrot.slane %v9718_v31, %v17869_v6 }
 0xa82   :  { %v9748_v23 = vsub.f32 %v9671_v48, %v9744_v20  ;;  %v9750_v24 = vsub.f32 %v9712_v49, %v9746_v11  ;;  %v9850_v20 = vstv %s14900_s1 }
 0xa83   :  { %v9751_v17 = vmul.f32 %v9747_v21, %v9747_v21  ;;  %v9753_v26 = vmul.f32 %v9749_v14, %v9749_v14 }
 0xa84   :  { %v9752_v22 = vmul.f32 %v9748_v23, %v9748_v23  ;;  %v9754_v32 = vmul.f32 %v9750_v24, %v9750_v24 }
 0xa85   :  { %v9755_v27 = vrot.slane %v9751_v17, 4  ;;  %v9767_v33 = vrot.slane %v9753_v26, 4 }
 0xa86   :  { %v9761_v25 = vrot.slane %v9752_v22, 4  ;;  %v9773_v35 = vrot.slane %v9754_v32, 4 }
 0xa87   :  { %v9756_v36 = vadd.f32 %v9755_v27, %v9751_v17  ;;  %v9768_v19 = vadd.f32 %v9767_v33, %v9753_v26 }
 0xa88   :  { %v9762_v37 = vadd.f32 %v9761_v25, %v9752_v22  ;;  %v9774_v38 = vadd.f32 %v9773_v35, %v9754_v32 }
 0xa89   :  { %v9757_v39 = vrot.slane %v9756_v36, 2  ;;  %v9769_v40 = vrot.slane %v9768_v19, 2 }
 0xa8a   :  { %v9763_v29 = vrot.slane %v9762_v37, 2  ;;  %v9775_v41 = vrot.slane %v9774_v38, 2 }
 0xa8b   :  { %v9758_v42 = vadd.f32 %v9757_v39, %v9756_v36  ;;  %v9770_v43 = vadd.f32 %v9769_v40, %v9768_v19 }
 0xa8c   :  { %v9764_v44 = vadd.f32 %v9763_v29, %v9762_v37  ;;  %v9776_v30 = vadd.f32 %v9775_v41, %v9774_v38 }
 0xa8d   :  { %v9759_v45 = vrot.slane %v9758_v42, 1  ;;  %v9771_v46 = vrot.slane %v9770_v43, 1 }
 0xa8e   :  { %v9765_v47 = vrot.slane %v9764_v44, 1  ;;  %v9777_v48 = vrot.slane %v9776_v30, 1 }
 0xa8f   :  { %v9760_v49 = vadd.f32 %v9759_v45, %v9758_v42  ;;  %v9772_v50 = vadd.f32 %v9771_v46, %v9770_v43 }
 0xa90   :  { %v9766_v51 = vadd.f32 %v9765_v47, %v9764_v44  ;;  %v9778_v52 = vadd.f32 %v9777_v48, %v9776_v30 }
 0xa91   :  { %v9779_v34 = vmul.f32 0.125, %v9760_v49  ;;  %v9781_v53 = vmul.f32 0.125, %v9772_v50 }
 0xa92   :  { %v9780_v54 = vmul.f32 0.125, %v9766_v51  ;;  %v9782_v55 = vmul.f32 0.125, %v9778_v52 }
 0xa93   :  { %v9783_v28 = vadd.f32 1e-05, %v9779_v34  ;;  %v9785_v56 = vadd.f32 1e-05, %v9781_v53 }
 0xa94   :  { %v9784_v59 = vadd.f32 1e-05, %v9780_v54  ;;  %v9786_v57 = vadd.f32 1e-05, %v9782_v55 }
 0xa95   :  { %17180 = vrsqrt.f32 %v9783_v28 }
 0xa96   :  { %17182 = vrsqrt.f32 %v9785_v56 }
 0xa97   :  { %17184 = vrsqrt.f32 %v9784_v59 }
 0xa98   :  { %17186 = vrsqrt.f32 %v9786_v57 }
 0xa9f   :  { %v17181_v61 = vpop.eup %17180 }
 0xaa0   :  { %v17183_v63 = vpop.eup %17182  ;;  %v9791_v0 = vmul.f32 %v17181_v61, %v9747_v21  ;;  %v9836_v21 = vrot.slane %v9718_v31, %v17872_v8 }
 0xaa1   :  { %v17185_v7 = vpop.eup %17184  ;;  %v9793_v9 = vmul.f32 %v17183_v63, %v9749_v14 }
 0xaa2   :  { %v17187_v13 = vpop.eup %17186  ;;  %v9816_v15 = vmul.f32 %v9799_v60, %v9791_v0  ;;  %v9792_v16 = vmul.f32 %v17185_v7, %v9748_v23 }
 0xaa3   :  { %v9818_v11 = vmul.f32 %v9807_v62, %v9793_v9  ;;  %v9794_v17 = vmul.f32 %v17187_v13, %v9750_v24 }
 0xaa4   :  { %v9841_v26 = vadd.f32 %v9824_v1, %v9816_v15  ;;  %v9817_v22 = vmul.f32 %v9803_v4, %v9792_v16 }
 0xaa5   :  { %v9843_v32 = vadd.f32 %v9832_v10, %v9818_v11  ;;  %v9819_v27 = vmul.f32 %v9811_v12, %v9794_v17 }
 0xaa6   :  { %vm9846_vm2 = vcmp.gt.f32.partialorder %v9841_v26, 0.0  ;;  %v9851_v14 = vmul.f32 %v9850_v20, %v9841_v26  ;;  %v9842_v33 = vadd.f32 %v9828_v18, %v9817_v22 }
 0xaa7   :  { %vm9848_vm3 = vcmp.gt.f32.partialorder %v9843_v32, 0.0  ;;  %v9853_v25 = vmul.f32 %v9850_v20, %v9843_v32  ;;  %v9844_v35 = vadd.f32 %v9836_v21, %v9819_v27 }
 0xaa8   :  { %v9855_v36 = vsel %vm9846_vm2, %v9841_v26, %v9851_v14  ;;  %vm9847_vm4 = vcmp.gt.f32.partialorder %v9842_v33, 0.0  ;;  %v9852_v23 = vmul.f32 %v9850_v20, %v9842_v33 }
 0xaa9   :  { %v17901_v19 = vpack.c.bf16 %v9855_v36, %v9855_v36  ;;  %v9857_v37 = vsel %vm9848_vm3, %v9843_v32, %v9853_v25  ;;  %vm9849_vm5 = vcmp.gt.f32.partialorder %v9844_v35, 0.0  ;;  %v9854_v24 = vmul.f32 %v9850_v20, %v9844_v35 }
 0xaaa   :  { %v17903_v38 = vpack.c.bf16 %v9857_v37, %v9857_v37  ;;  %v9856_v39 = vsel %vm9847_vm4, %v9842_v33, %v9852_v23 }
 0xaab   :  { %v17905_v40 = vpack.c.bf16 %v9856_v39, %v9856_v39  ;;  %v9858_v29 = vsel %vm9849_vm5, %v9844_v35, %v9854_v24 }
 0xaac   :  { %v17907_v41 = vpack.c.bf16 %v9858_v29, %v9858_v29 }
 0xaad   :  { %17496 = dma.done.wait [#allocation3], 45056 }
 0xaae   :  { %17497 = vsyncadd [#allocation3], 4294922240  ;;  %10251 = vmatprep.mubr.bf16.mxu1 %v17905_v40  ;;  %10333 = vmatprep.mubr.bf16.mxu0 %v17905_v40  ;;  %v9868_v42 = vld [vmem:[#allocation2 + $0x8] sm:$0xff]  ;;  %v9870_v43 = vld [vmem:[#allocation2 + $0x18] sm:$0xff]  ;;  %s14901_s18 = sld [smem:[#allocation19 + $0x2]] }
 0xaaf   :  { %v9867_v44 = vld [vmem:[#allocation2] sm:$0xff]  ;;  %10219 = vmatprep.subr.bf16.mxu1 %v9868_v42  ;;  %10301 = vmatprep.subr.bf16.mxu0 %v9870_v43  ;;  %v9869_v30 = vld [vmem:[#allocation2 + $0x10] sm:$0xff]  ;;  %v9878_v47 = vld [vmem:[#allocation2 + $0x58] sm:$0xff] }
 0xab0   :  { %v9879_v45 = vld [vmem:[#allocation2 + $0x60] sm:$0xff]  ;;  %v9881_v46 = vld [vmem:[#allocation2 + $0x70] sm:$0xff]  ;;  %10220 = vmatpush1.bf16.msra.mxu1 %v9867_v44  ;;  %10302 = vmatpush1.bf16.msra.mxu0 %v9869_v30  ;;  %v9880_v48 = vld [vmem:[#allocation2 + $0x68] sm:$0xff] }
 0xab1   :  { %10221 = vmatprep.subr.bf16.mxu1 %v9879_v45  ;;  %10303 = vmatprep.subr.bf16.mxu0 %v9881_v46  ;;  %v9890_v49 = vld [vmem:[#allocation2 + $0xb8] sm:$0xff]  ;;  %v9892_v50 = vld [vmem:[#allocation2 + $0xc8] sm:$0xff]  ;;  %v9889_v51 = vld [vmem:[#allocation2 + $0xb0] sm:$0xff] }
 0xab2   :  { %v9891_v52 = vld [vmem:[#allocation2 + $0xc0] sm:$0xff]  ;;  %v9901_v34 = vld [vmem:[#allocation2 + $0x110] sm:$0xff]  ;;  %v9900_v54 = vld [vmem:[#allocation2 + $0x108] sm:$0xff] }
 0xab3   :  { %v9903_v53 = vld [vmem:[#allocation2 + $0x120] sm:$0xff]  ;;  %v9902_v55 = vld [vmem:[#allocation2 + $0x118] sm:$0xff]  ;;  %v9912_v28 = vld [vmem:[#allocation2 + $0x168] sm:$0xff] }
 0xab4   :  { %10222 = vmatpush1.bf16.msra.mxu1 %v9878_v47  ;;  %10304 = vmatpush1.bf16.msra.mxu0 %v9880_v48  ;;  %v9914_v56 = vld [vmem:[#allocation2 + $0x178] sm:$0xff]  ;;  %v9911_v59 = vld [vmem:[#allocation2 + $0x160] sm:$0xff]  ;;  %v9913_v57 = vld [vmem:[#allocation2 + $0x170] sm:$0xff] }
 0xab5   :  { %10223 = vmatprep.subr.bf16.mxu1 %v9890_v49  ;;  %10305 = vmatprep.subr.bf16.mxu0 %v9892_v50  ;;  %v9923_v58 = vld [vmem:[#allocation2 + $0x1c0] sm:$0xff]  ;;  %v9925_v31 = vld [vmem:[#allocation2 + $0x1d0] sm:$0xff]  ;;  %v9922_v60 = vld [vmem:[#allocation2 + $0x1b8] sm:$0xff] }
 0xab6   :  { %v9924_v61 = vld [vmem:[#allocation2 + $0x1c8] sm:$0xff]  ;;  %v9934_v62 = vld [vmem:[#allocation2 + $0x218] sm:$0xff]  ;;  %v9933_v0 = vld [vmem:[#allocation2 + $0x210] sm:$0xff] }
 0xab7   :  { %v9936_v63 = vld [vmem:[#allocation2 + $0x228] sm:$0xff]  ;;  %v9935_v1 = vld [vmem:[#allocation2 + $0x220] sm:$0xff]  ;;  %v9945_v4 = vld [vmem:[#allocation2 + $0x270] sm:$0xff] }
 0xab8   :  { %10224 = vmatpush1.bf16.msra.mxu1 %v9889_v51  ;;  %10306 = vmatpush1.bf16.msra.mxu0 %v9891_v52  ;;  %v9947_v7 = vld [vmem:[#allocation2 + $0x280] sm:$0xff]  ;;  %v9944_v9 = vld [vmem:[#allocation2 + $0x268] sm:$0xff]  ;;  %v9946_v10 = vld [vmem:[#allocation2 + $0x278] sm:$0xff] }
 0xab9   :  { %10225 = vmatprep.subr.bf16.mxu1 %v9901_v34  ;;  %10307 = vmatprep.subr.bf16.mxu0 %v9903_v53  ;;  %v9956_v12 = vld [vmem:[#allocation2 + $0x2c8] sm:$0xff]  ;;  %v9958_v13 = vld [vmem:[#allocation2 + $0x2d8] sm:$0xff]  ;;  %v9955_v15 = vld [vmem:[#allocation2 + $0x2c0] sm:$0xff] }
 0xaba   :  { %v9957_v16 = vld [vmem:[#allocation2 + $0x2d0] sm:$0xff]  ;;  %v9967_v18 = vld [vmem:[#allocation2 + $0x320] sm:$0xff]  ;;  %v9966_v11 = vld [vmem:[#allocation2 + $0x318] sm:$0xff] }
 0xabb   :  { %v9969_v20 = vld [vmem:[#allocation2 + $0x330] sm:$0xff]  ;;  %v9968_v17 = vld [vmem:[#allocation2 + $0x328] sm:$0xff]  ;;  %v9978_v21 = vld [vmem:[#allocation2 + $0x378] sm:$0xff] }
 0xabc   :  { %10226 = vmatpush1.bf16.msra.mxu1 %v9900_v54  ;;  %10308 = vmatpush1.bf16.msra.mxu0 %v9902_v55  ;;  %v9980_v26 = vld [vmem:[#allocation2 + $0x388] sm:$0xff]  ;;  %v9977_v22 = vld [vmem:[#allocation2 + $0x370] sm:$0xff]  ;;  %v9979_v32 = vld [vmem:[#allocation2 + $0x380] sm:$0xff] }
 0xabd   :  { %10227 = vmatprep.subr.bf16.mxu1 %v9912_v28  ;;  %10309 = vmatprep.subr.bf16.mxu0 %v9914_v56  ;;  %v9989_v27 = vld [vmem:[#allocation2 + $0x3d0] sm:$0xff]  ;;  %v9991_v14 = vld [vmem:[#allocation2 + $0x3e0] sm:$0xff]  ;;  %v9988_v33 = vld [vmem:[#allocation2 + $0x3c8] sm:$0xff] }
 0xabe   :  { %v9990_v25 = vld [vmem:[#allocation2 + $0x3d8] sm:$0xff]  ;;  %v10000_v35 = vld [vmem:[#allocation2 + $0x428] sm:$0xff]  ;;  %v9999_v23 = vld [vmem:[#allocation2 + $0x420] sm:$0xff] }
 0xabf   :  { %v10002_v36 = vld [vmem:[#allocation2 + $0x438] sm:$0xff]  ;;  %v10001_v37 = vld [vmem:[#allocation2 + $0x430] sm:$0xff]  ;;  %v10011_v24 = vld [vmem:[#allocation2 + $0x480] sm:$0xff] }
 0xac0   :  { %10228 = vmatpush1.bf16.msra.mxu1 %v9911_v59  ;;  %10310 = vmatpush1.bf16.msra.mxu0 %v9913_v57  ;;  %v10013_v39 = vld [vmem:[#allocation2 + $0x490] sm:$0xff]  ;;  %v10010_v29 = vld [vmem:[#allocation2 + $0x478] sm:$0xff]  ;;  %v10012_v42 = vld [vmem:[#allocation2 + $0x488] sm:$0xff] }
 0xac1   :  { %10229 = vmatprep.subr.bf16.mxu1 %v9923_v58  ;;  %10311 = vmatprep.subr.bf16.mxu0 %v9925_v31  ;;  %v10022_v43 = vld [vmem:[#allocation2 + $0x4d8] sm:$0xff]  ;;  %v10024_v44 = vld [vmem:[#allocation2 + $0x4e8] sm:$0xff]  ;;  %v10021_v30 = vld [vmem:[#allocation2 + $0x4d0] sm:$0xff] }
 0xac2   :  { %v10023_v45 = vld [vmem:[#allocation2 + $0x4e0] sm:$0xff]  ;;  %v10033_v46 = vld [vmem:[#allocation2 + $0x530] sm:$0xff]  ;;  %v10032_v48 = vld [vmem:[#allocation2 + $0x528] sm:$0xff] }
 0xac3   :  { %v10035_v47 = vld [vmem:[#allocation2 + $0x540] sm:$0xff]  ;;  %v10034_v49 = vld [vmem:[#allocation2 + $0x538] sm:$0xff]  ;;  %v10044_v50 = vld [vmem:[#allocation2 + $0x588] sm:$0xff] }
 0xac4   :  { %10230 = vmatpush1.bf16.msra.mxu1 %v9922_v60  ;;  %10312 = vmatpush1.bf16.msra.mxu0 %v9924_v61  ;;  %v10046_v51 = vld [vmem:[#allocation2 + $0x598] sm:$0xff]  ;;  %v10043_v52 = vld [vmem:[#allocation2 + $0x580] sm:$0xff]  ;;  %v10045_v34 = vld [vmem:[#allocation2 + $0x590] sm:$0xff] }
 0xac5   :  { %10231 = vmatprep.subr.bf16.mxu1 %v9934_v62  ;;  %10313 = vmatprep.subr.bf16.mxu0 %v9936_v63  ;;  %v10055_v53 = vld [vmem:[#allocation2 + $0x5e0] sm:$0xff]  ;;  %v10057_v54 = vld [vmem:[#allocation2 + $0x5f0] sm:$0xff]  ;;  %v10054_v55 = vld [vmem:[#allocation2 + $0x5d8] sm:$0xff] }
 0xac6   :  { %v10056_v28 = vld [vmem:[#allocation2 + $0x5e8] sm:$0xff]  ;;  %v10066_v56 = vld [vmem:[#allocation2 + $0x638] sm:$0xff]  ;;  %v10065_v57 = vld [vmem:[#allocation2 + $0x630] sm:$0xff] }
 0xac7   :  { %v10068_v59 = vld [vmem:[#allocation2 + $0x648] sm:$0xff]  ;;  %v10067_v58 = vld [vmem:[#allocation2 + $0x640] sm:$0xff]  ;;  %v10077_v31 = vld [vmem:[#allocation2 + $0x690] sm:$0xff] }
 0xac8   :  { %10232 = vmatpush1.bf16.msra.mxu1 %v9933_v0  ;;  %10314 = vmatpush1.bf16.msra.mxu0 %v9935_v1  ;;  %v10079_v60 = vld [vmem:[#allocation2 + $0x6a0] sm:$0xff]  ;;  %v10076_v61 = vld [vmem:[#allocation2 + $0x688] sm:$0xff]  ;;  %v10078_v62 = vld [vmem:[#allocation2 + $0x698] sm:$0xff] }
 0xac9   :  { %10233 = vmatprep.subr.bf16.mxu1 %v9945_v4  ;;  %10315 = vmatprep.subr.bf16.mxu0 %v9947_v7  ;;  %v10088_v63 = vld [vmem:[#allocation2 + $0x6e8] sm:$0xff]  ;;  %v10090_v0 = vld [vmem:[#allocation2 + $0x6f8] sm:$0xff]  ;;  %v10087_v1 = vld [vmem:[#allocation2 + $0x6e0] sm:$0xff] }
 0xaca   :  { %v10089_v4 = vld [vmem:[#allocation2 + $0x6f0] sm:$0xff]  ;;  %v10099_v7 = vld [vmem:[#allocation2 + $0x740] sm:$0xff] }
 0xacc   :  { %10234 = vmatpush1.bf16.msra.mxu1 %v9944_v9  ;;  %10316 = vmatpush1.bf16.msra.mxu0 %v9946_v10  ;;  %v10101_v9 = vld [vmem:[#allocation2 + $0x750] sm:$0xff]  ;;  %v10098_v10 = vld [vmem:[#allocation2 + $0x738] sm:$0xff] }
 0xacd   :  { %10235 = vmatprep.subr.bf16.mxu1 %v9956_v12  ;;  %10317 = vmatprep.subr.bf16.mxu0 %v9958_v13  ;;  %v10100_v12 = vld [vmem:[#allocation2 + $0x748] sm:$0xff]  ;;  %v10110_v13 = vld [vmem:[#allocation2 + $0x798] sm:$0xff] }
 0xad0   :  { %10236 = vmatpush1.bf16.msra.mxu1 %v9955_v15  ;;  %10318 = vmatpush1.bf16.msra.mxu0 %v9957_v16  ;;  %v10112_v15 = vld [vmem:[#allocation2 + $0x7a8] sm:$0xff]  ;;  %v10109_v16 = vld [vmem:[#allocation2 + $0x790] sm:$0xff] }
 0xad1   :  { %10237 = vmatprep.subr.bf16.mxu1 %v9967_v18  ;;  %10319 = vmatprep.subr.bf16.mxu0 %v9969_v20  ;;  %v10111_v18 = vld [vmem:[#allocation2 + $0x7a0] sm:$0xff]  ;;  %v10121_v20 = vld [vmem:[#allocation2 + $0x7f0] sm:$0xff] }
 0xad4   :  { %10238 = vmatpush1.bf16.msra.mxu1 %v9966_v11  ;;  %10320 = vmatpush1.bf16.msra.mxu0 %v9968_v17  ;;  %v10123_v11 = vld [vmem:[#allocation2 + $0x800] sm:$0xff]  ;;  %v10120_v17 = vld [vmem:[#allocation2 + $0x7e8] sm:$0xff] }
 0xad5   :  { %10239 = vmatprep.subr.bf16.mxu1 %v9978_v21  ;;  %10321 = vmatprep.subr.bf16.mxu0 %v9980_v26  ;;  %v10122_v21 = vld [vmem:[#allocation2 + $0x7f8] sm:$0xff]  ;;  %v10132_v26 = vld [vmem:[#allocation2 + $0x848] sm:$0xff] }
 0xad8   :  { %10240 = vmatpush1.bf16.msra.mxu1 %v9977_v22  ;;  %10322 = vmatpush1.bf16.msra.mxu0 %v9979_v32  ;;  %v10134_v22 = vld [vmem:[#allocation2 + $0x858] sm:$0xff]  ;;  %v10131_v32 = vld [vmem:[#allocation2 + $0x840] sm:$0xff] }
 0xad9   :  { %10241 = vmatprep.subr.bf16.mxu1 %v9989_v27  ;;  %10323 = vmatprep.subr.bf16.mxu0 %v9991_v14  ;;  %v10133_v27 = vld [vmem:[#allocation2 + $0x850] sm:$0xff]  ;;  %v10143_v14 = vld [vmem:[#allocation2 + $0x8a0] sm:$0xff] }
 0xadc   :  { %10242 = vmatpush1.bf16.msra.mxu1 %v9988_v33  ;;  %10324 = vmatpush1.bf16.msra.mxu0 %v9990_v25  ;;  %v10145_v33 = vld [vmem:[#allocation2 + $0x8b0] sm:$0xff]  ;;  %v10142_v25 = vld [vmem:[#allocation2 + $0x898] sm:$0xff] }
 0xadd   :  { %10243 = vmatprep.subr.bf16.mxu1 %v10000_v35  ;;  %10325 = vmatprep.subr.bf16.mxu0 %v10002_v36  ;;  %v10144_v35 = vld [vmem:[#allocation2 + $0x8a8] sm:$0xff]  ;;  %v10154_v36 = vld [vmem:[#allocation2 + $0x8f8] sm:$0xff] }
 0xae0   :  { %10244 = vmatpush1.bf16.msra.mxu1 %v9999_v23  ;;  %10326 = vmatpush1.bf16.msra.mxu0 %v10001_v37  ;;  %v10156_v23 = vld [vmem:[#allocation2 + $0x908] sm:$0xff]  ;;  %v10153_v37 = vld [vmem:[#allocation2 + $0x8f0] sm:$0xff] }
 0xae1   :  { %10245 = vmatprep.subr.bf16.mxu1 %v10011_v24  ;;  %10327 = vmatprep.subr.bf16.mxu0 %v10013_v39  ;;  %v10155_v24 = vld [vmem:[#allocation2 + $0x900] sm:$0xff]  ;;  %v10165_v39 = vld [vmem:[#allocation2 + $0x950] sm:$0xff] }
 0xae4   :  { %10246 = vmatpush1.bf16.msra.mxu1 %v10010_v29  ;;  %10328 = vmatpush1.bf16.msra.mxu0 %v10012_v42  ;;  %v10167_v29 = vld [vmem:[#allocation2 + $0x960] sm:$0xff]  ;;  %v10164_v42 = vld [vmem:[#allocation2 + $0x948] sm:$0xff] }
 0xae5   :  { %10247 = vmatprep.subr.bf16.mxu1 %v10022_v43  ;;  %10329 = vmatprep.subr.bf16.mxu0 %v10024_v44  ;;  %v10166_v43 = vld [vmem:[#allocation2 + $0x958] sm:$0xff]  ;;  %v10176_v44 = vld [vmem:[#allocation2 + $0x9a8] sm:$0xff] }
 0xae8   :  { %10248 = vmatpush1.bf16.msra.mxu1 %v10021_v30  ;;  %10330 = vmatpush1.bf16.msra.mxu0 %v10023_v45  ;;  %v10178_v30 = vld [vmem:[#allocation2 + $0x9b8] sm:$0xff]  ;;  %v10175_v45 = vld [vmem:[#allocation2 + $0x9a0] sm:$0xff] }
 0xae9   :  { %10249 = vmatprep.subr.bf16.mxu1 %v10033_v46  ;;  %10331 = vmatprep.subr.bf16.mxu0 %v10035_v47  ;;  %v10177_v46 = vld [vmem:[#allocation2 + $0x9b0] sm:$0xff]  ;;  %v10187_v47 = vld [vmem:[#allocation2 + $0xa00] sm:$0xff] }
 0xaec   :  { %10250 = vmatpush1.bf16.msra.mxu1 %v10032_v48  ;;  %10332 = vmatpush1.bf16.msra.mxu0 %v10034_v49  ;;  %v10189_v48 = vld [vmem:[#allocation2 + $0xa10] sm:$0xff]  ;;  %v10186_v49 = vld [vmem:[#allocation2 + $0x9f8] sm:$0xff] }
 0xaed   :  { %10260 = vmatprep.subr.bf16.mxu1 %v10044_v50  ;;  %10342 = vmatprep.subr.bf16.mxu0 %v10046_v51  ;;  %v10188_v50 = vld [vmem:[#allocation2 + $0xa08] sm:$0xff]  ;;  %v10198_v51 = vld [vmem:[#allocation2 + $0xa58] sm:$0xff] }
 0xaef   :  { %10252 = vmatmul.mubr.bf16.vlgmr.msra.gmra.mrb[16].mxu1 %v17901_v19  ;;  %10334 = vmatmul.mubr.bf16.vlgmr.msra.gmra.mrb[12].mxu0 %v17901_v19 }
 0xaf0   :  { %10261 = vmatpush1.bf16.msra.mxu1 %v10043_v52  ;;  %10343 = vmatpush1.bf16.msra.mxu0 %v10045_v34  ;;  %v10200_v52 = vld [vmem:[#allocation2 + $0xa68] sm:$0xff]  ;;  %v10197_v34 = vld [vmem:[#allocation2 + $0xa50] sm:$0xff] }
 0xaf1   :  { %10262 = vmatprep.subr.bf16.mxu1 %v10055_v53  ;;  %10344 = vmatprep.subr.bf16.mxu0 %v10057_v54  ;;  %v10199_v53 = vld [vmem:[#allocation2 + $0xa60] sm:$0xff]  ;;  %v10209_v54 = vld [vmem:[#allocation2 + $0xab0] sm:$0xff] }
 0xaf2   :  { %10292 = vmatprep.mubr.bf16.mxu1 %v17907_v41  ;;  %10374 = vmatprep.mubr.bf16.mxu0 %v17907_v41 }
 0xaf4   :  { %10263 = vmatpush1.bf16.msra.mxu1 %v10054_v55  ;;  %10345 = vmatpush1.bf16.msra.mxu0 %v10056_v28  ;;  %v10211_v55 = vld [vmem:[#allocation2 + $0xac0] sm:$0xff]  ;;  %v10208_v28 = vld [vmem:[#allocation2 + $0xaa8] sm:$0xff] }
 0xaf5   :  { %10264 = vmatprep.subr.bf16.mxu1 %v10066_v56  ;;  %10346 = vmatprep.subr.bf16.mxu0 %v10068_v59  ;;  %v10210_v56 = vld [vmem:[#allocation2 + $0xab8] sm:$0xff]  ;;  %v9872_v59 = vld [vmem:[#allocation2 + $0x28] sm:$0xff] }
 0xaf8   :  { %10265 = vmatpush1.bf16.msra.mxu1 %v10065_v57  ;;  %10347 = vmatpush1.bf16.msra.mxu0 %v10067_v58  ;;  %v9874_v57 = vld [vmem:[#allocation2 + $0x38] sm:$0xff]  ;;  %v9871_v58 = vld [vmem:[#allocation2 + $0x20] sm:$0xff] }
 0xaf9   :  { %10266 = vmatprep.subr.bf16.mxu1 %v10077_v31  ;;  %10348 = vmatprep.subr.bf16.mxu0 %v10079_v60  ;;  %v9873_v31 = vld [vmem:[#allocation2 + $0x30] sm:$0xff]  ;;  %v9883_v60 = vld [vmem:[#allocation2 + $0x80] sm:$0xff] }
 0xafc   :  { %10267 = vmatpush1.bf16.msra.mxu1 %v10076_v61  ;;  %10349 = vmatpush1.bf16.msra.mxu0 %v10078_v62  ;;  %v9885_v61 = vld [vmem:[#allocation2 + $0x90] sm:$0xff]  ;;  %v9882_v62 = vld [vmem:[#allocation2 + $0x78] sm:$0xff] }
 0xafd   :  { %10268 = vmatprep.subr.bf16.mxu1 %v10088_v63  ;;  %10350 = vmatprep.subr.bf16.mxu0 %v10090_v0  ;;  %v9884_v63 = vld [vmem:[#allocation2 + $0x88] sm:$0xff]  ;;  %v9894_v0 = vld [vmem:[#allocation2 + $0xd8] sm:$0xff] }
 0xb00   :  { %10269 = vmatpush1.bf16.msra.mxu1 %v10087_v1  ;;  %10351 = vmatpush1.bf16.msra.mxu0 %v10089_v4  ;;  %v9896_v1 = vld [vmem:[#allocation2 + $0xe8] sm:$0xff]  ;;  %v9893_v4 = vld [vmem:[#allocation2 + $0xd0] sm:$0xff] }
 0xb01   :  { %10270 = vmatprep.subr.bf16.mxu1 %v10099_v7  ;;  %10352 = vmatprep.subr.bf16.mxu0 %v10101_v9  ;;  %v9895_v7 = vld [vmem:[#allocation2 + $0xe0] sm:$0xff]  ;;  %v9905_v9 = vld [vmem:[#allocation2 + $0x130] sm:$0xff] }
 0xb04   :  { %10271 = vmatpush1.bf16.msra.mxu1 %v10098_v10  ;;  %10353 = vmatpush1.bf16.msra.mxu0 %v10100_v12  ;;  %v9907_v10 = vld [vmem:[#allocation2 + $0x140] sm:$0xff]  ;;  %v9904_v12 = vld [vmem:[#allocation2 + $0x128] sm:$0xff] }
 0xb05   :  { %10272 = vmatprep.subr.bf16.mxu1 %v10110_v13  ;;  %10354 = vmatprep.subr.bf16.mxu0 %v10112_v15  ;;  %v9906_v13 = vld [vmem:[#allocation2 + $0x138] sm:$0xff]  ;;  %v9916_v15 = vld [vmem:[#allocation2 + $0x188] sm:$0xff] }
 0xb08   :  { %10273 = vmatpush1.bf16.msra.mxu1 %v10109_v16  ;;  %10355 = vmatpush1.bf16.msra.mxu0 %v10111_v18  ;;  %v9918_v16 = vld [vmem:[#allocation2 + $0x198] sm:$0xff]  ;;  %v9915_v18 = vld [vmem:[#allocation2 + $0x180] sm:$0xff] }
 0xb09   :  { %10274 = vmatprep.subr.bf16.mxu1 %v10121_v20  ;;  %10356 = vmatprep.subr.bf16.mxu0 %v10123_v11  ;;  %v9917_v20 = vld [vmem:[#allocation2 + $0x190] sm:$0xff]  ;;  %v9927_v11 = vld [vmem:[#allocation2 + $0x1e0] sm:$0xff] }
 0xb0c   :  { %10275 = vmatpush1.bf16.msra.mxu1 %v10120_v17  ;;  %10357 = vmatpush1.bf16.msra.mxu0 %v10122_v21  ;;  %v9929_v17 = vld [vmem:[#allocation2 + $0x1f0] sm:$0xff]  ;;  %v9926_v21 = vld [vmem:[#allocation2 + $0x1d8] sm:$0xff] }
 0xb0d   :  { %10276 = vmatprep.subr.bf16.mxu1 %v10132_v26  ;;  %10358 = vmatprep.subr.bf16.mxu0 %v10134_v22  ;;  %v9928_v26 = vld [vmem:[#allocation2 + $0x1e8] sm:$0xff]  ;;  %v9938_v22 = vld [vmem:[#allocation2 + $0x238] sm:$0xff] }
 0xb10   :  { %10277 = vmatpush1.bf16.msra.mxu1 %v10131_v32  ;;  %10359 = vmatpush1.bf16.msra.mxu0 %v10133_v27  ;;  %v9940_v32 = vld [vmem:[#allocation2 + $0x248] sm:$0xff]  ;;  %v9937_v27 = vld [vmem:[#allocation2 + $0x230] sm:$0xff] }
 0xb11   :  { %10278 = vmatprep.subr.bf16.mxu1 %v10143_v14  ;;  %10360 = vmatprep.subr.bf16.mxu0 %v10145_v33  ;;  %v9939_v14 = vld [vmem:[#allocation2 + $0x240] sm:$0xff]  ;;  %v9949_v33 = vld [vmem:[#allocation2 + $0x290] sm:$0xff] }
 0xb14   :  { %10279 = vmatpush1.bf16.msra.mxu1 %v10142_v25  ;;  %10361 = vmatpush1.bf16.msra.mxu0 %v10144_v35  ;;  %v9951_v25 = vld [vmem:[#allocation2 + $0x2a0] sm:$0xff]  ;;  %v9948_v35 = vld [vmem:[#allocation2 + $0x288] sm:$0xff] }
 0xb15   :  { %10280 = vmatprep.subr.bf16.mxu1 %v10154_v36  ;;  %10362 = vmatprep.subr.bf16.mxu0 %v10156_v23  ;;  %v9950_v36 = vld [vmem:[#allocation2 + $0x298] sm:$0xff]  ;;  %v9960_v23 = vld [vmem:[#allocation2 + $0x2e8] sm:$0xff] }
 0xb18   :  { %10281 = vmatpush1.bf16.msra.mxu1 %v10153_v37  ;;  %10363 = vmatpush1.bf16.msra.mxu0 %v10155_v24  ;;  %v9962_v37 = vld [vmem:[#allocation2 + $0x2f8] sm:$0xff]  ;;  %v9959_v24 = vld [vmem:[#allocation2 + $0x2e0] sm:$0xff] }
 0xb19   :  { %10282 = vmatprep.subr.bf16.mxu1 %v10165_v39  ;;  %10364 = vmatprep.subr.bf16.mxu0 %v10167_v29  ;;  %v9961_v39 = vld [vmem:[#allocation2 + $0x2f0] sm:$0xff]  ;;  %v9971_v29 = vld [vmem:[#allocation2 + $0x340] sm:$0xff] }
 0xb1c   :  { %10283 = vmatpush1.bf16.msra.mxu1 %v10164_v42  ;;  %10365 = vmatpush1.bf16.msra.mxu0 %v10166_v43  ;;  %v9973_v42 = vld [vmem:[#allocation2 + $0x350] sm:$0xff]  ;;  %v9970_v43 = vld [vmem:[#allocation2 + $0x338] sm:$0xff] }
 0xb1d   :  { %10284 = vmatprep.subr.bf16.mxu1 %v10176_v44  ;;  %10366 = vmatprep.subr.bf16.mxu0 %v10178_v30  ;;  %v9972_v44 = vld [vmem:[#allocation2 + $0x348] sm:$0xff]  ;;  %v9982_v30 = vld [vmem:[#allocation2 + $0x398] sm:$0xff] }
 0xb20   :  { %10285 = vmatpush1.bf16.msra.mxu1 %v10175_v45  ;;  %10367 = vmatpush1.bf16.msra.mxu0 %v10177_v46  ;;  %v9984_v45 = vld [vmem:[#allocation2 + $0x3a8] sm:$0xff]  ;;  %v9981_v46 = vld [vmem:[#allocation2 + $0x390] sm:$0xff] }
 0xb21   :  { %10286 = vmatprep.subr.bf16.mxu1 %v10187_v47  ;;  %10368 = vmatprep.subr.bf16.mxu0 %v10189_v48  ;;  %v9983_v47 = vld [vmem:[#allocation2 + $0x3a0] sm:$0xff]  ;;  %v9993_v48 = vld [vmem:[#allocation2 + $0x3f0] sm:$0xff] }
 0xb24   :  { %10287 = vmatpush1.bf16.msra.mxu1 %v10186_v49  ;;  %10369 = vmatpush1.bf16.msra.mxu0 %v10188_v50  ;;  %v9995_v49 = vld [vmem:[#allocation2 + $0x400] sm:$0xff]  ;;  %v9992_v50 = vld [vmem:[#allocation2 + $0x3e8] sm:$0xff] }
 0xb25   :  { %10288 = vmatprep.subr.bf16.mxu1 %v10198_v51  ;;  %10370 = vmatprep.subr.bf16.mxu0 %v10200_v52  ;;  %v9994_v51 = vld [vmem:[#allocation2 + $0x3f8] sm:$0xff]  ;;  %v10004_v52 = vld [vmem:[#allocation2 + $0x448] sm:$0xff] }
 0xb28   :  { %10289 = vmatpush1.bf16.msra.mxu1 %v10197_v34  ;;  %10371 = vmatpush1.bf16.msra.mxu0 %v10199_v53  ;;  %v10006_v34 = vld [vmem:[#allocation2 + $0x458] sm:$0xff]  ;;  %v10003_v53 = vld [vmem:[#allocation2 + $0x440] sm:$0xff] }
 0xb29   :  { %10290 = vmatprep.subr.bf16.mxu1 %v10209_v54  ;;  %10372 = vmatprep.subr.bf16.mxu0 %v10211_v55  ;;  %v10005_v54 = vld [vmem:[#allocation2 + $0x450] sm:$0xff]  ;;  %v10015_v55 = vld [vmem:[#allocation2 + $0x4a0] sm:$0xff] }
 0xb2c   :  { %10291 = vmatpush1.bf16.msra.mxu1 %v10208_v28  ;;  %10373 = vmatpush1.bf16.msra.mxu0 %v10210_v56  ;;  %v10017_v28 = vld [vmem:[#allocation2 + $0x4b0] sm:$0xff]  ;;  %v10014_v56 = vld [vmem:[#allocation2 + $0x498] sm:$0xff] }
 0xb2d   :  { %10383 = vmatprep.subr.bf16.mxu1 %v9872_v59  ;;  %10465 = vmatprep.subr.bf16.mxu0 %v9874_v57  ;;  %v10016_v59 = vld [vmem:[#allocation2 + $0x4a8] sm:$0xff]  ;;  %v10026_v57 = vld [vmem:[#allocation2 + $0x4f8] sm:$0xff] }
 0xb2f   :  { %10293 = vmatmul.mubr.bf16.vlgmr.msra.gmra.mrb[16].mxu1 %v17903_v38  ;;  %10375 = vmatmul.mubr.bf16.vlgmr.msra.gmra.mrb[12].mxu0 %v17903_v38 }
 0xb30   :  { %10384 = vmatpush1.bf16.msra.mxu1 %v9871_v58  ;;  %10466 = vmatpush1.bf16.msra.mxu0 %v9873_v31  ;;  %v10028_v58 = vld [vmem:[#allocation2 + $0x508] sm:$0xff]  ;;  %v10025_v31 = vld [vmem:[#allocation2 + $0x4f0] sm:$0xff] }
 0xb31   :  { %10385 = vmatprep.subr.bf16.mxu1 %v9883_v60  ;;  %10467 = vmatprep.subr.bf16.mxu0 %v9885_v61  ;;  %v10027_v60 = vld [vmem:[#allocation2 + $0x500] sm:$0xff]  ;;  %v10037_v61 = vld [vmem:[#allocation2 + $0x550] sm:$0xff] }
 0xb32   :  { %10415 = vmatprep.mubr.bf16.mxu1 %v17905_v40  ;;  %10497 = vmatprep.mubr.bf16.mxu0 %v17905_v40 }
 0xb34   :  { %10386 = vmatpush1.bf16.msra.mxu1 %v9882_v62  ;;  %10468 = vmatpush1.bf16.msra.mxu0 %v9884_v63  ;;  %v10039_v62 = vld [vmem:[#allocation2 + $0x560] sm:$0xff]  ;;  %v10036_v63 = vld [vmem:[#allocation2 + $0x548] sm:$0xff] }
 0xb35   :  { %10387 = vmatprep.subr.bf16.mxu1 %v9894_v0  ;;  %10469 = vmatprep.subr.bf16.mxu0 %v9896_v1  ;;  %v10038_v0 = vld [vmem:[#allocation2 + $0x558] sm:$0xff]  ;;  %v10048_v1 = vld [vmem:[#allocation2 + $0x5a8] sm:$0xff] }
 0xb38   :  { %10388 = vmatpush1.bf16.msra.mxu1 %v9893_v4  ;;  %10470 = vmatpush1.bf16.msra.mxu0 %v9895_v7  ;;  %v10050_v4 = vld [vmem:[#allocation2 + $0x5b8] sm:$0xff]  ;;  %v10047_v7 = vld [vmem:[#allocation2 + $0x5a0] sm:$0xff] }
 0xb39   :  { %10389 = vmatprep.subr.bf16.mxu1 %v9905_v9  ;;  %10471 = vmatprep.subr.bf16.mxu0 %v9907_v10  ;;  %v10049_v9 = vld [vmem:[#allocation2 + $0x5b0] sm:$0xff]  ;;  %v10059_v10 = vld [vmem:[#allocation2 + $0x600] sm:$0xff] }
 0xb3c   :  { %10390 = vmatpush1.bf16.msra.mxu1 %v9904_v12  ;;  %10472 = vmatpush1.bf16.msra.mxu0 %v9906_v13  ;;  %v10061_v12 = vld [vmem:[#allocation2 + $0x610] sm:$0xff]  ;;  %v10058_v13 = vld [vmem:[#allocation2 + $0x5f8] sm:$0xff] }
 0xb3d   :  { %10391 = vmatprep.subr.bf16.mxu1 %v9916_v15  ;;  %10473 = vmatprep.subr.bf16.mxu0 %v9918_v16  ;;  %v10060_v15 = vld [vmem:[#allocation2 + $0x608] sm:$0xff]  ;;  %v10070_v16 = vld [vmem:[#allocation2 + $0x658] sm:$0xff] }
 0xb40   :  { %10392 = vmatpush1.bf16.msra.mxu1 %v9915_v18  ;;  %10474 = vmatpush1.bf16.msra.mxu0 %v9917_v20  ;;  %v10072_v18 = vld [vmem:[#allocation2 + $0x668] sm:$0xff]  ;;  %v10069_v20 = vld [vmem:[#allocation2 + $0x650] sm:$0xff] }
 0xb41   :  { %10393 = vmatprep.subr.bf16.mxu1 %v9927_v11  ;;  %10475 = vmatprep.subr.bf16.mxu0 %v9929_v17  ;;  %v10071_v11 = vld [vmem:[#allocation2 + $0x660] sm:$0xff]  ;;  %v10081_v17 = vld [vmem:[#allocation2 + $0x6b0] sm:$0xff] }
 0xb44   :  { %10394 = vmatpush1.bf16.msra.mxu1 %v9926_v21  ;;  %10476 = vmatpush1.bf16.msra.mxu0 %v9928_v26  ;;  %v10083_v21 = vld [vmem:[#allocation2 + $0x6c0] sm:$0xff]  ;;  %v10080_v26 = vld [vmem:[#allocation2 + $0x6a8] sm:$0xff] }
 0xb45   :  { %10395 = vmatprep.subr.bf16.mxu1 %v9938_v22  ;;  %10477 = vmatprep.subr.bf16.mxu0 %v9940_v32  ;;  %v10082_v22 = vld [vmem:[#allocation2 + $0x6b8] sm:$0xff]  ;;  %v10092_v32 = vld [vmem:[#allocation2 + $0x708] sm:$0xff] }
 0xb48   :  { %10396 = vmatpush1.bf16.msra.mxu1 %v9937_v27  ;;  %10478 = vmatpush1.bf16.msra.mxu0 %v9939_v14  ;;  %v10094_v27 = vld [vmem:[#allocation2 + $0x718] sm:$0xff]  ;;  %v10091_v14 = vld [vmem:[#allocation2 + $0x700] sm:$0xff] }
 0xb49   :  { %10397 = vmatprep.subr.bf16.mxu1 %v9949_v33  ;;  %10479 = vmatprep.subr.bf16.mxu0 %v9951_v25  ;;  %v10093_v33 = vld [vmem:[#allocation2 + $0x710] sm:$0xff]  ;;  %v10103_v25 = vld [vmem:[#allocation2 + $0x760] sm:$0xff] }
 0xb4c   :  { %10398 = vmatpush1.bf16.msra.mxu1 %v9948_v35  ;;  %10480 = vmatpush1.bf16.msra.mxu0 %v9950_v36  ;;  %v10105_v35 = vld [vmem:[#allocation2 + $0x770] sm:$0xff]  ;;  %v10102_v36 = vld [vmem:[#allocation2 + $0x758] sm:$0xff] }
 0xb4d   :  { %10399 = vmatprep.subr.bf16.mxu1 %v9960_v23  ;;  %10481 = vmatprep.subr.bf16.mxu0 %v9962_v37  ;;  %v10104_v23 = vld [vmem:[#allocation2 + $0x768] sm:$0xff]  ;;  %v10114_v37 = vld [vmem:[#allocation2 + $0x7b8] sm:$0xff] }
 0xb50   :  { %10400 = vmatpush1.bf16.msra.mxu1 %v9959_v24  ;;  %10482 = vmatpush1.bf16.msra.mxu0 %v9961_v39  ;;  %v10116_v24 = vld [vmem:[#allocation2 + $0x7c8] sm:$0xff]  ;;  %v10113_v39 = vld [vmem:[#allocation2 + $0x7b0] sm:$0xff] }
 0xb51   :  { %10401 = vmatprep.subr.bf16.mxu1 %v9971_v29  ;;  %10483 = vmatprep.subr.bf16.mxu0 %v9973_v42  ;;  %v10115_v29 = vld [vmem:[#allocation2 + $0x7c0] sm:$0xff]  ;;  %v10125_v42 = vld [vmem:[#allocation2 + $0x810] sm:$0xff] }
 0xb54   :  { %10402 = vmatpush1.bf16.msra.mxu1 %v9970_v43  ;;  %10484 = vmatpush1.bf16.msra.mxu0 %v9972_v44  ;;  %v10127_v43 = vld [vmem:[#allocation2 + $0x820] sm:$0xff]  ;;  %v10124_v44 = vld [vmem:[#allocation2 + $0x808] sm:$0xff] }
 0xb55   :  { %10403 = vmatprep.subr.bf16.mxu1 %v9982_v30  ;;  %10485 = vmatprep.subr.bf16.mxu0 %v9984_v45  ;;  %v10126_v30 = vld [vmem:[#allocation2 + $0x818] sm:$0xff]  ;;  %v10136_v45 = vld [vmem:[#allocation2 + $0x868] sm:$0xff] }
 0xb58   :  { %10404 = vmatpush1.bf16.msra.mxu1 %v9981_v46  ;;  %10486 = vmatpush1.bf16.msra.mxu0 %v9983_v47  ;;  %v10138_v46 = vld [vmem:[#allocation2 + $0x878] sm:$0xff]  ;;  %v10135_v47 = vld [vmem:[#allocation2 + $0x860] sm:$0xff] }
 0xb59   :  { %10405 = vmatprep.subr.bf16.mxu1 %v9993_v48  ;;  %10487 = vmatprep.subr.bf16.mxu0 %v9995_v49  ;;  %v10137_v48 = vld [vmem:[#allocation2 + $0x870] sm:$0xff]  ;;  %v10147_v49 = vld [vmem:[#allocation2 + $0x8c0] sm:$0xff] }
 0xb5c   :  { %10406 = vmatpush1.bf16.msra.mxu1 %v9992_v50  ;;  %10488 = vmatpush1.bf16.msra.mxu0 %v9994_v51  ;;  %v10149_v50 = vld [vmem:[#allocation2 + $0x8d0] sm:$0xff]  ;;  %v10146_v51 = vld [vmem:[#allocation2 + $0x8b8] sm:$0xff] }
 0xb5d   :  { %10407 = vmatprep.subr.bf16.mxu1 %v10004_v52  ;;  %10489 = vmatprep.subr.bf16.mxu0 %v10006_v34  ;;  %v10148_v52 = vld [vmem:[#allocation2 + $0x8c8] sm:$0xff]  ;;  %v10158_v34 = vld [vmem:[#allocation2 + $0x918] sm:$0xff] }
 0xb60   :  { %10408 = vmatpush1.bf16.msra.mxu1 %v10003_v53  ;;  %10490 = vmatpush1.bf16.msra.mxu0 %v10005_v54  ;;  %v10160_v53 = vld [vmem:[#allocation2 + $0x928] sm:$0xff]  ;;  %v10157_v54 = vld [vmem:[#allocation2 + $0x910] sm:$0xff] }
 0xb61   :  { %10409 = vmatprep.subr.bf16.mxu1 %v10015_v55  ;;  %10491 = vmatprep.subr.bf16.mxu0 %v10017_v28  ;;  %v10159_v55 = vld [vmem:[#allocation2 + $0x920] sm:$0xff]  ;;  %v10169_v28 = vld [vmem:[#allocation2 + $0x970] sm:$0xff] }
 0xb64   :  { %10410 = vmatpush1.bf16.msra.mxu1 %v10014_v56  ;;  %10492 = vmatpush1.bf16.msra.mxu0 %v10016_v59  ;;  %v10171_v56 = vld [vmem:[#allocation2 + $0x980] sm:$0xff]  ;;  %v10168_v59 = vld [vmem:[#allocation2 + $0x968] sm:$0xff] }
 0xb65   :  { %10411 = vmatprep.subr.bf16.mxu1 %v10026_v57  ;;  %10493 = vmatprep.subr.bf16.mxu0 %v10028_v58  ;;  %v10170_v57 = vld [vmem:[#allocation2 + $0x978] sm:$0xff]  ;;  %v10180_v58 = vld [vmem:[#allocation2 + $0x9c8] sm:$0xff] }
 0xb68   :  { %10412 = vmatpush1.bf16.msra.mxu1 %v10025_v31  ;;  %10494 = vmatpush1.bf16.msra.mxu0 %v10027_v60  ;;  %v10182_v31 = vld [vmem:[#allocation2 + $0x9d8] sm:$0xff]  ;;  %v10179_v60 = vld [vmem:[#allocation2 + $0x9c0] sm:$0xff] }
 0xb69   :  { %10413 = vmatprep.subr.bf16.mxu1 %v10037_v61  ;;  %10495 = vmatprep.subr.bf16.mxu0 %v10039_v62  ;;  %v10181_v61 = vld [vmem:[#allocation2 + $0x9d0] sm:$0xff]  ;;  %v10191_v62 = vld [vmem:[#allocation2 + $0xa20] sm:$0xff] }
 0xb6c   :  { %10414 = vmatpush1.bf16.msra.mxu1 %v10036_v63  ;;  %10496 = vmatpush1.bf16.msra.mxu0 %v10038_v0  ;;  %v10193_v63 = vld [vmem:[#allocation2 + $0xa30] sm:$0xff]  ;;  %v10190_v0 = vld [vmem:[#allocation2 + $0xa18] sm:$0xff] }
 0xb6d   :  { %10424 = vmatprep.subr.bf16.mxu1 %v10048_v1  ;;  %10506 = vmatprep.subr.bf16.mxu0 %v10050_v4  ;;  %v10192_v1 = vld [vmem:[#allocation2 + $0xa28] sm:$0xff]  ;;  %v10202_v4 = vld [vmem:[#allocation2 + $0xa78] sm:$0xff] }
 0xb6f   :  { %10416 = vmatmul.mubr.bf16.vlgmr.msra.gmra.mrb[20].mxu1 %v17901_v19  ;;  %10498 = vmatmul.mubr.bf16.vlgmr.msra.gmra.mrb[16].mxu0 %v17901_v19 }
 0xb70   :  { %10425 = vmatpush1.bf16.msra.mxu1 %v10047_v7  ;;  %10507 = vmatpush1.bf16.msra.mxu0 %v10049_v9  ;;  %v10204_v7 = vld [vmem:[#allocation2 + $0xa88] sm:$0xff]  ;;  %v10201_v9 = vld [vmem:[#allocation2 + $0xa70] sm:$0xff] }
 0xb71   :  { %10426 = vmatprep.subr.bf16.mxu1 %v10059_v10  ;;  %10508 = vmatprep.subr.bf16.mxu0 %v10061_v12  ;;  %v10203_v10 = vld [vmem:[#allocation2 + $0xa80] sm:$0xff]  ;;  %v10213_v12 = vld [vmem:[#allocation2 + $0xad0] sm:$0xff] }
 0xb72   :  { %10456 = vmatprep.mubr.bf16.mxu1 %v17907_v41  ;;  %10538 = vmatprep.mubr.bf16.mxu0 %v17907_v41 }
 0xb74   :  { %10427 = vmatpush1.bf16.msra.mxu1 %v10058_v13  ;;  %10509 = vmatpush1.bf16.msra.mxu0 %v10060_v15  ;;  %v10215_v13 = vld [vmem:[#allocation2 + $0xae0] sm:$0xff]  ;;  %v10212_v15 = vld [vmem:[#allocation2 + $0xac8] sm:$0xff] }
 0xb75   :  { %10428 = vmatprep.subr.bf16.mxu1 %v10070_v16  ;;  %10510 = vmatprep.subr.bf16.mxu0 %v10072_v18  ;;  %v10214_v16 = vld [vmem:[#allocation2 + $0xad8] sm:$0xff]  ;;  %v9876_v18 = vld [vmem:[#allocation2 + $0x48] sm:$0xff] }
 0xb78   :  { %10429 = vmatpush1.bf16.msra.mxu1 %v10069_v20  ;;  %10511 = vmatpush1.bf16.msra.mxu0 %v10071_v11  ;;  %v9965_v20 = vld [vmem:[#allocation2 + $0x310] sm:$0xff]  ;;  %v9875_v11 = vld [vmem:[#allocation2 + $0x40] sm:$0xff] }
 0xb79   :  { %10430 = vmatprep.subr.bf16.mxu1 %v10081_v17  ;;  %10512 = vmatprep.subr.bf16.mxu0 %v10083_v21  ;;  %v9877_v17 = vld [vmem:[#allocation2 + $0x50] sm:$0xff]  ;;  %v9887_v21 = vld [vmem:[#allocation2 + $0xa0] sm:$0xff] }
 0xb7c   :  { %10431 = vmatpush1.bf16.msra.mxu1 %v10080_v26  ;;  %10513 = vmatpush1.bf16.msra.mxu0 %v10082_v22  ;;  %v9976_v26 = vld [vmem:[#allocation2 + $0x368] sm:$0xff]  ;;  %v9886_v22 = vld [vmem:[#allocation2 + $0x98] sm:$0xff] }
 0xb7d   :  { %10432 = vmatprep.subr.bf16.mxu1 %v10092_v32  ;;  %10514 = vmatprep.subr.bf16.mxu0 %v10094_v27  ;;  %v9888_v32 = vld [vmem:[#allocation2 + $0xa8] sm:$0xff]  ;;  %v9898_v27 = vld [vmem:[#allocation2 + $0xf8] sm:$0xff] }
 0xb80   :  { %10433 = vmatpush1.bf16.msra.mxu1 %v10091_v14  ;;  %10515 = vmatpush1.bf16.msra.mxu0 %v10093_v33  ;;  %v9987_v14 = vld [vmem:[#allocation2 + $0x3c0] sm:$0xff]  ;;  %v9897_v33 = vld [vmem:[#allocation2 + $0xf0] sm:$0xff] }
 0xb81   :  { %10434 = vmatprep.subr.bf16.mxu1 %v10103_v25  ;;  %10516 = vmatprep.subr.bf16.mxu0 %v10105_v35  ;;  %v9899_v25 = vld [vmem:[#allocation2 + $0x100] sm:$0xff]  ;;  %v9909_v35 = vld [vmem:[#allocation2 + $0x150] sm:$0xff] }
 0xb84   :  { %10435 = vmatpush1.bf16.msra.mxu1 %v10102_v36  ;;  %10517 = vmatpush1.bf16.msra.mxu0 %v10104_v23  ;;  %v9998_v36 = vld [vmem:[#allocation2 + $0x418] sm:$0xff]  ;;  %v9908_v23 = vld [vmem:[#allocation2 + $0x148] sm:$0xff] }
 0xb85   :  { %10436 = vmatprep.subr.bf16.mxu1 %v10114_v37  ;;  %10518 = vmatprep.subr.bf16.mxu0 %v10116_v24  ;;  %v9910_v37 = vld [vmem:[#allocation2 + $0x158] sm:$0xff]  ;;  %v9920_v24 = vld [vmem:[#allocation2 + $0x1a8] sm:$0xff] }
 0xb88   :  { %10437 = vmatpush1.bf16.msra.mxu1 %v10113_v39  ;;  %10519 = vmatpush1.bf16.msra.mxu0 %v10115_v29  ;;  %v10009_v39 = vld [vmem:[#allocation2 + $0x470] sm:$0xff]  ;;  %v9919_v29 = vld [vmem:[#allocation2 + $0x1a0] sm:$0xff] }
 0xb89   :  { %10438 = vmatprep.subr.bf16.mxu1 %v10125_v42  ;;  %10520 = vmatprep.subr.bf16.mxu0 %v10127_v43  ;;  %v9921_v42 = vld [vmem:[#allocation2 + $0x1b0] sm:$0xff]  ;;  %v9931_v43 = vld [vmem:[#allocation2 + $0x200] sm:$0xff] }
 0xb8c   :  { %10439 = vmatpush1.bf16.msra.mxu1 %v10124_v44  ;;  %10521 = vmatpush1.bf16.msra.mxu0 %v10126_v30  ;;  %v10020_v44 = vld [vmem:[#allocation2 + $0x4c8] sm:$0xff]  ;;  %v9930_v30 = vld [vmem:[#allocation2 + $0x1f8] sm:$0xff] }
 0xb8d   :  { %10440 = vmatprep.subr.bf16.mxu1 %v10136_v45  ;;  %10522 = vmatprep.subr.bf16.mxu0 %v10138_v46  ;;  %v9932_v45 = vld [vmem:[#allocation2 + $0x208] sm:$0xff]  ;;  %v9942_v46 = vld [vmem:[#allocation2 + $0x258] sm:$0xff] }
 0xb90   :  { %10441 = vmatpush1.bf16.msra.mxu1 %v10135_v47  ;;  %10523 = vmatpush1.bf16.msra.mxu0 %v10137_v48  ;;  %v10031_v47 = vld [vmem:[#allocation2 + $0x520] sm:$0xff]  ;;  %v9941_v48 = vld [vmem:[#allocation2 + $0x250] sm:$0xff] }
 0xb91   :  { %10442 = vmatprep.subr.bf16.mxu1 %v10147_v49  ;;  %10524 = vmatprep.subr.bf16.mxu0 %v10149_v50  ;;  %v9943_v49 = vld [vmem:[#allocation2 + $0x260] sm:$0xff]  ;;  %v9953_v50 = vld [vmem:[#allocation2 + $0x2b0] sm:$0xff] }
 0xb94   :  { %10443 = vmatpush1.bf16.msra.mxu1 %v10146_v51  ;;  %10525 = vmatpush1.bf16.msra.mxu0 %v10148_v52  ;;  %v10042_v51 = vld [vmem:[#allocation2 + $0x578] sm:$0xff]  ;;  %v9952_v52 = vld [vmem:[#allocation2 + $0x2a8] sm:$0xff] }
 0xb95   :  { %10444 = vmatprep.subr.bf16.mxu1 %v10158_v34  ;;  %10526 = vmatprep.subr.bf16.mxu0 %v10160_v53  ;;  %v9954_v34 = vld [vmem:[#allocation2 + $0x2b8] sm:$0xff]  ;;  %v9964_v53 = vld [vmem:[#allocation2 + $0x308] sm:$0xff] }
 0xb98   :  { %10445 = vmatpush1.bf16.msra.mxu1 %v10157_v54  ;;  %10527 = vmatpush1.bf16.msra.mxu0 %v10159_v55  ;;  %v10141_v54 = vld [vmem:[#allocation2 + $0x890] sm:$0xff]  ;;  %v9963_v55 = vld [vmem:[#allocation2 + $0x300] sm:$0xff] }
 0xb99   :  { %10446 = vmatprep.subr.bf16.mxu1 %v10169_v28  ;;  %10528 = vmatprep.subr.bf16.mxu0 %v10171_v56  ;;  %v10053_v28 = vld [vmem:[#allocation2 + $0x5d0] sm:$0xff]  ;;  %v9975_v56 = vld [vmem:[#allocation2 + $0x360] sm:$0xff] }
 0xb9c   :  { %10447 = vmatpush1.bf16.msra.mxu1 %v10168_v59  ;;  %10529 = vmatpush1.bf16.msra.mxu0 %v10170_v57  ;;  %v10152_v59 = vld [vmem:[#allocation2 + $0x8e8] sm:$0xff]  ;;  %v9974_v57 = vld [vmem:[#allocation2 + $0x358] sm:$0xff] }
 0xb9d   :  { %10448 = vmatprep.subr.bf16.mxu1 %v10180_v58  ;;  %10530 = vmatprep.subr.bf16.mxu0 %v10182_v31  ;;  %v10064_v58 = vld [vmem:[#allocation2 + $0x628] sm:$0xff]  ;;  %v9986_v31 = vld [vmem:[#allocation2 + $0x3b8] sm:$0xff] }
 0xba0   :  { %10449 = vmatpush1.bf16.msra.mxu1 %v10179_v60  ;;  %10531 = vmatpush1.bf16.msra.mxu0 %v10181_v61  ;;  %v10163_v60 = vld [vmem:[#allocation2 + $0x940] sm:$0xff]  ;;  %v9985_v61 = vld [vmem:[#allocation2 + $0x3b0] sm:$0xff] }
 0xba1   :  { %10450 = vmatprep.subr.bf16.mxu1 %v10191_v62  ;;  %10532 = vmatprep.subr.bf16.mxu0 %v10193_v63  ;;  %v10075_v62 = vld [vmem:[#allocation2 + $0x680] sm:$0xff]  ;;  %v9997_v63 = vld [vmem:[#allocation2 + $0x410] sm:$0xff] }
 0xba4   :  { %10451 = vmatpush1.bf16.msra.mxu1 %v10190_v0  ;;  %10533 = vmatpush1.bf16.msra.mxu0 %v10192_v1  ;;  %v10174_v0 = vld [vmem:[#allocation2 + $0x998] sm:$0xff]  ;;  %v9996_v1 = vld [vmem:[#allocation2 + $0x408] sm:$0xff] }
 0xba5   :  { %10452 = vmatprep.subr.bf16.mxu1 %v10202_v4  ;;  %10534 = vmatprep.subr.bf16.mxu0 %v10204_v7  ;;  %v10086_v4 = vld [vmem:[#allocation2 + $0x6d8] sm:$0xff]  ;;  %v10008_v7 = vld [vmem:[#allocation2 + $0x468] sm:$0xff] }
 0xba8   :  { %10453 = vmatpush1.bf16.msra.mxu1 %v10201_v9  ;;  %10535 = vmatpush1.bf16.msra.mxu0 %v10203_v10  ;;  %v10185_v9 = vld [vmem:[#allocation2 + $0x9f0] sm:$0xff]  ;;  %v10007_v10 = vld [vmem:[#allocation2 + $0x460] sm:$0xff] }
 0xba9   :  { %10454 = vmatprep.subr.bf16.mxu1 %v10213_v12  ;;  %10536 = vmatprep.subr.bf16.mxu0 %v10215_v13  ;;  %v10097_v12 = vld [vmem:[#allocation2 + $0x730] sm:$0xff]  ;;  %v10019_v13 = vld [vmem:[#allocation2 + $0x4c0] sm:$0xff] }
 0xbac   :  { %10455 = vmatpush1.bf16.msra.mxu1 %v10212_v15  ;;  %10537 = vmatpush1.bf16.msra.mxu0 %v10214_v16  ;;  %v10196_v15 = vld [vmem:[#allocation2 + $0xa48] sm:$0xff]  ;;  %v10018_v16 = vld [vmem:[#allocation2 + $0x4b8] sm:$0xff] }
 0xbad   :  { %10547 = vmatprep.subr.bf16.mxu1 %v9876_v18  ;;  %14929 = vmatprep.subr.bf16.mxu0 %v9965_v20  ;;  %v10108_v18 = vld [vmem:[#allocation2 + $0x788] sm:$0xff]  ;;  %v10030_v20 = vld [vmem:[#allocation2 + $0x518] sm:$0xff] }
 0xbaf   :  { %10457 = vmatmul.mubr.bf16.vlgmr.msra.gmra.mrb[20].mxu1 %v17903_v38  ;;  %10539 = vmatmul.mubr.bf16.vlgmr.msra.gmra.mrb[16].mxu0 %v17903_v38 }
 0xbb0   :  { %10548 = vmatpush1.bf16.msra.mxu1 %v9875_v11  ;;  %14930 = vmatpush3.bf16.msra.mxu0 %v9877_v17  ;;  %v10207_v11 = vld [vmem:[#allocation2 + $0xaa0] sm:$0xff]  ;;  %v10029_v17 = vld [vmem:[#allocation2 + $0x510] sm:$0xff] }
 0xbb1   :  { %10549 = vmatprep.subr.bf16.mxu1 %v9887_v21  ;;  %14931 = vmatprep.subr.bf16.mxu0 %v9976_v26  ;;  %v10119_v21 = vld [vmem:[#allocation2 + $0x7e0] sm:$0xff]  ;;  %v10041_v26 = vld [vmem:[#allocation2 + $0x570] sm:$0xff] }
 0xbb2   :  { %10661 = vmatprep.mubr.bf16.mxu0 %v17905_v40  ;;  %10579 = vmatprep.mubr.bf16.mxu1 %v17905_v40 }
 0xbb4   :  { %10550 = vmatpush1.bf16.msra.mxu1 %v9886_v22  ;;  %14932 = vmatpush3.bf16.msra.mxu0 %v9888_v32  ;;  %v10218_v22 = vld [vmem:[#allocation2 + $0xaf8] sm:$0xff]  ;;  %v10040_v32 = vld [vmem:[#allocation2 + $0x568] sm:$0xff] }
 0xbb5   :  { %10551 = vmatprep.subr.bf16.mxu1 %v9898_v27  ;;  %14933 = vmatprep.subr.bf16.mxu0 %v9987_v14  ;;  %v10130_v27 = vld [vmem:[#allocation2 + $0x838] sm:$0xff]  ;;  %v10052_v14 = vld [vmem:[#allocation2 + $0x5c8] sm:$0xff] }
 0xbb8   :  { %10552 = vmatpush1.bf16.msra.mxu1 %v9897_v33  ;;  %14934 = vmatpush3.bf16.msra.mxu0 %v9899_v25  ;;  %v10051_v33 = vld [vmem:[#allocation2 + $0x5c0] sm:$0xff] }
 0xbb9   :  { %10553 = vmatprep.subr.bf16.mxu1 %v9909_v35  ;;  %14935 = vmatprep.subr.bf16.mxu0 %v9998_v36  ;;  %v10063_v25 = vld [vmem:[#allocation2 + $0x620] sm:$0xff]  ;;  %v10062_v35 = vld [vmem:[#allocation2 + $0x618] sm:$0xff] }
 0xbba   :  { %v10074_v36 = vld [vmem:[#allocation2 + $0x678] sm:$0xff] }
 0xbbc   :  { %10554 = vmatpush1.bf16.msra.mxu1 %v9908_v23  ;;  %14936 = vmatpush3.bf16.msra.mxu0 %v9910_v37  ;;  %v10073_v23 = vld [vmem:[#allocation2 + $0x670] sm:$0xff] }
 0xbbd   :  { %10555 = vmatprep.subr.bf16.mxu1 %v9920_v24  ;;  %14937 = vmatprep.subr.bf16.mxu0 %v10009_v39  ;;  %v10085_v37 = vld [vmem:[#allocation2 + $0x6d0] sm:$0xff]  ;;  %v10084_v24 = vld [vmem:[#allocation2 + $0x6c8] sm:$0xff] }
 0xbbe   :  { %v10096_v39 = vld [vmem:[#allocation2 + $0x728] sm:$0xff] }
 0xbc0   :  { %10556 = vmatpush1.bf16.msra.mxu1 %v9919_v29  ;;  %14938 = vmatpush3.bf16.msra.mxu0 %v9921_v42  ;;  %v10095_v29 = vld [vmem:[#allocation2 + $0x720] sm:$0xff] }
 0xbc1   :  { %10557 = vmatprep.subr.bf16.mxu1 %v9931_v43  ;;  %14939 = vmatprep.subr.bf16.mxu0 %v10020_v44  ;;  %v10107_v42 = vld [vmem:[#allocation2 + $0x780] sm:$0xff]  ;;  %v10106_v43 = vld [vmem:[#allocation2 + $0x778] sm:$0xff] }
 0xbc4   :  { %10558 = vmatpush1.bf16.msra.mxu1 %v9930_v30  ;;  %14940 = vmatpush3.bf16.msra.mxu0 %v9932_v45  ;;  %v10118_v45 = vld [vmem:[#allocation2 + $0x7d8] sm:$0xff] }
 0xbc5   :  { %10559 = vmatprep.subr.bf16.mxu1 %v9942_v46  ;;  %14941 = vmatprep.subr.bf16.mxu0 %v10031_v47 }
 0xbc8   :  { %10560 = vmatpush1.bf16.msra.mxu1 %v9941_v48  ;;  %14942 = vmatpush3.bf16.msra.mxu0 %v9943_v49 }
 0xbc9   :  { %10561 = vmatprep.subr.bf16.mxu1 %v9953_v50  ;;  %14943 = vmatprep.subr.bf16.mxu0 %v10042_v51 }
 0xbcc   :  { %10562 = vmatpush1.bf16.msra.mxu1 %v9952_v52  ;;  %14944 = vmatpush3.bf16.msra.mxu0 %v9954_v34 }
 0xbcd   :  { %10563 = vmatprep.subr.bf16.mxu1 %v9964_v53  ;;  %14951 = vmatprep.subr.bf16.mxu0 %v10141_v54 }
 0xbcf   :  { %10662 = vmatmul.mubr.bf16.vlgmr.msra.gmra.mrb[20].mxu0 %v17901_v19 }
 0xbd0   :  { %10564 = vmatpush1.bf16.msra.mxu1 %v9963_v55  ;;  %14952 = vmatpush3.bf16.msra.mxu0 %v10053_v28 }
 0xbd1   :  { %10565 = vmatprep.subr.bf16.mxu1 %v9975_v56  ;;  %14953 = vmatprep.subr.bf16.mxu0 %v10152_v59  ;;  %v10117_v56 = vld [vmem:[#allocation2 + $0x7d0] sm:$0xff] }
 0xbd2   :  { %10701 = vmatprep.mubr.bf16.mxu0 %v17907_v41 }
 0xbd4   :  { %10566 = vmatpush1.bf16.msra.mxu1 %v9974_v57  ;;  %14954 = vmatpush3.bf16.msra.mxu0 %v10064_v58  ;;  %v10129_v58 = vld [vmem:[#allocation2 + $0x830] sm:$0xff] }
 0xbd5   :  { %10567 = vmatprep.subr.bf16.mxu1 %v9986_v31  ;;  %14955 = vmatprep.subr.bf16.mxu0 %v10163_v60 }
 0xbd8   :  { %10568 = vmatpush1.bf16.msra.mxu1 %v9985_v61  ;;  %14956 = vmatpush3.bf16.msra.mxu0 %v10075_v62 }
 0xbd9   :  { %10569 = vmatprep.subr.bf16.mxu1 %v9997_v63  ;;  %14957 = vmatprep.subr.bf16.mxu0 %v10174_v0 }
 0xbdc   :  { %10570 = vmatpush1.bf16.msra.mxu1 %v9996_v1  ;;  %14958 = vmatpush3.bf16.msra.mxu0 %v10086_v4  ;;  %v10128_v1 = vld [vmem:[#allocation2 + $0x828] sm:$0xff] }
 0xbdd   :  { %10571 = vmatprep.subr.bf16.mxu1 %v10008_v7  ;;  %14959 = vmatprep.subr.bf16.mxu0 %v10185_v9  ;;  %v10140_v9 = vld [vmem:[#allocation2 + $0x888] sm:$0xff] }
 0xbe0   :  { %10572 = vmatpush1.bf16.msra.mxu1 %v10007_v10  ;;  %14960 = vmatpush3.bf16.msra.mxu0 %v10097_v12 }
 0xbe1   :  { %10573 = vmatprep.subr.bf16.mxu1 %v10019_v13  ;;  %14961 = vmatprep.subr.bf16.mxu0 %v10196_v15 }
 0xbe4   :  { %10574 = vmatpush1.bf16.msra.mxu1 %v10018_v16  ;;  %14962 = vmatpush3.bf16.msra.mxu0 %v10108_v18 }
 0xbe5   :  { %10575 = vmatprep.subr.bf16.mxu1 %v10030_v20  ;;  %14963 = vmatprep.subr.bf16.mxu0 %v10207_v11  ;;  %v10139_v20 = vld [vmem:[#allocation2 + $0x880] sm:$0xff] }
 0xbe8   :  { %10576 = vmatpush1.bf16.msra.mxu1 %v10029_v17  ;;  %14964 = vmatpush3.bf16.msra.mxu0 %v10119_v21  ;;  %v10151_v21 = vld [vmem:[#allocation2 + $0x8e0] sm:$0xff] }
 0xbe9   :  { %10577 = vmatprep.subr.bf16.mxu1 %v10041_v26  ;;  %14965 = vmatprep.subr.bf16.mxu0 %v10218_v22 }
 0xbec   :  { %10578 = vmatpush1.bf16.msra.mxu1 %v10040_v32  ;;  %14966 = vmatpush3.bf16.msra.mxu0 %v10130_v27 }
 0xbed   :  { %10588 = vmatprep.subr.bf16.mxu1 %v10052_v14 }
 0xbef   :  { %10702 = vmatmul.mubr.bf16.vlgmr.msra.gmra.mrb[24].mxu0 %v17903_v38  ;;  %10580 = vmatmul.mubr.bf16.vlgmr.msra.gmra.mrb[24].mxu1 %v17901_v19 }
 0xbf0   :  { %10589 = vmatpush1.bf16.msra.mxu1 %v10051_v33  ;;  %10620 = vmatprep.mubr.bf16.mxu1 %v17907_v41 }
 0xbf1   :  { %10590 = vmatprep.subr.bf16.mxu1 %v10063_v25  ;;  %v10150_v25 = vld [vmem:[#allocation2 + $0x8d8] sm:$0xff] }
 0xbf4   :  { %10591 = vmatpush1.bf16.msra.mxu1 %v10062_v35 }
 0xbf5   :  { %10592 = vmatprep.subr.bf16.mxu1 %v10074_v36 }
 0xbf8   :  { %10593 = vmatpush1.bf16.msra.mxu1 %v10073_v23  ;;  %v10162_v23 = vld [vmem:[#allocation2 + $0x938] sm:$0xff] }
 0xbf9   :  { %10594 = vmatprep.subr.bf16.mxu1 %v10085_v37 }
 0xbfc   :  { %10595 = vmatpush1.bf16.msra.mxu1 %v10084_v24 }
 0xbfd   :  { %10596 = vmatprep.subr.bf16.mxu1 %v10096_v39 }
 0xc00   :  { %10597 = vmatpush1.bf16.msra.mxu1 %v10095_v29 }
 0xc01   :  { %10598 = vmatprep.subr.bf16.mxu1 %v10107_v42 }
 0xc02   :  { %v10294_v44 = vpop.f32.mrb[16].mxu1  ;;  %v10376_v30 = vpop.f32.mrb[12].mxu0 }
 0xc03   :  { %v10713_v46 = vrot.slane %v10294_v44, 4  ;;  %v10725_v47 = vrot.slane %v10376_v30, 4  ;;  %v10296_v48 = vpop.f32.mrb[17].mxu1  ;;  %v10378_v49 = vpop.f32.mrb[13].mxu0 }
 0xc04   :  { %v10719_v50 = vrot.slane %v10296_v48, 4  ;;  %v10731_v51 = vrot.slane %v10378_v49, 4  ;;  %v10298_v52 = vpop.f32.mrb[18].mxu1  ;;  %v10380_v34 = vpop.f32.mrb[14].mxu0  ;;  %10599 = vmatpush1.bf16.msra.mxu1 %v10106_v43 }
 0xc05   :  { %v10714_v53 = vadd.f32 %v10713_v46, %v10294_v44  ;;  %v10726_v54 = vadd.f32 %v10725_v47, %v10376_v30  ;;  %v10299_v55 = vpop.f32.mrb[19].mxu1  ;;  %v10381_v28 = vpop.f32.mrb[15].mxu0  ;;  %10600 = vmatprep.subr.bf16.mxu1 %v10118_v45  ;;  %v10173_v46 = vld [vmem:[#allocation2 + $0x990] sm:$0xff]  ;;  %v10172_v34 = vld [vmem:[#allocation2 + $0x988] sm:$0xff] }
 0xc06   :  { %v10720_v59 = vadd.f32 %v10719_v50, %v10296_v48  ;;  %v10732_v57 = vadd.f32 %v10731_v51, %v10378_v49  ;;  %v10184_v55 = vld [vmem:[#allocation2 + $0x9e8] sm:$0xff] }
 0xc07   :  { %v10715_v31 = vrot.slane %v10714_v53, 2  ;;  %v10727_v60 = vrot.slane %v10726_v54, 2 }
 0xc08   :  { %v10721_v61 = vrot.slane %v10720_v59, 2  ;;  %v10733_v62 = vrot.slane %v10732_v57, 2  ;;  %10601 = vmatpush1.bf16.msra.mxu1 %v10117_v56 }
 0xc09   :  { %v10716_v63 = vadd.f32 %v10715_v31, %v10714_v53  ;;  %v10728_v0 = vadd.f32 %v10727_v60, %v10726_v54  ;;  %10602 = vmatprep.subr.bf16.mxu1 %v10129_v58  ;;  %v10183_v60 = vld [vmem:[#allocation2 + $0x9e0] sm:$0xff] }
 0xc0a   :  { %v10722_v4 = vadd.f32 %v10721_v61, %v10720_v59  ;;  %v10734_v7 = vadd.f32 %v10733_v62, %v10732_v57 }
 0xc0b   :  { %v10717_v10 = vrot.slane %v10716_v63, 1  ;;  %v10729_v12 = vrot.slane %v10728_v0, 1 }
 0xc0c   :  { %v10723_v13 = vrot.slane %v10722_v4, 1  ;;  %v10735_v15 = vrot.slane %v10734_v7, 1  ;;  %10603 = vmatpush1.bf16.msra.mxu1 %v10128_v1 }
 0xc0d   :  { %v10718_v16 = vadd.f32 %v10717_v10, %v10716_v63  ;;  %v10730_v18 = vadd.f32 %v10729_v12, %v10728_v0  ;;  %10604 = vmatprep.subr.bf16.mxu1 %v10140_v9  ;;  %v10195_v63 = vld [vmem:[#allocation2 + $0xa40] sm:$0xff]  ;;  %v10194_v12 = vld [vmem:[#allocation2 + $0xa38] sm:$0xff] }
 0xc0e   :  { %v10724_v11 = vadd.f32 %v10723_v13, %v10722_v4  ;;  %v10736_v17 = vadd.f32 %v10735_v15, %v10734_v7 }
 0xc0f   :  { %v10779_v26 = vmul.f32 0.125, %v10718_v16  ;;  %v10781_v22 = vmul.f32 0.125, %v10730_v18  ;;  %v10206_v16 = vld [vmem:[#allocation2 + $0xa98] sm:$0xff] }
 0xc10   :  { %v10780_v32 = vmul.f32 0.125, %v10724_v11  ;;  %v10782_v27 = vmul.f32 0.125, %v10736_v17  ;;  %10605 = vmatpush1.bf16.msra.mxu1 %v10139_v20 }
 0xc11   :  { %v17932_v14 = vsub.f32 %v10294_v44, %v10779_v26  ;;  %v17934_v33 = vsub.f32 %v10376_v30, %v10781_v22  ;;  %10606 = vmatprep.subr.bf16.mxu1 %v10151_v21  ;;  %v10161_v44 = vld [vmem:[#allocation2 + $0x930] sm:$0xff]  ;;  %v10216_v22 = vld [vmem:[#allocation2 + $0xae8] sm:$0xff] }
 0xc12   :  { %v17936_v35 = vsub.f32 %v10296_v48, %v10780_v32  ;;  %v17938_v36 = vsub.f32 %v10378_v49, %v10782_v27  ;;  %v10205_v21 = vld [vmem:[#allocation2 + $0xa90] sm:$0xff]  ;;  %v17950_v27 = vld [vmem:[#allocation17 + $0xd] sm:$0xff] }
 0xc13   :  { %v10801_v37 = vmul.f32 %v17932_v14, %v17932_v14  ;;  %v10803_v24 = vmul.f32 %v17934_v33, %v17934_v33  ;;  %v10217_v26 = vld [vmem:[#allocation2 + $0xaf0] sm:$0xff] }
 0xc14   :  { %v10802_v39 = vmul.f32 %v17936_v35, %v17936_v35  ;;  %v10804_v29 = vmul.f32 %v17938_v36, %v17938_v36  ;;  %10607 = vmatpush1.bf16.msra.mxu1 %v10150_v25  ;;  %v17948_v32 = vld [vmem:[#allocation16 + $0xd] sm:$0xff] }
 0xc15   :  { %v10812_v42 = vrot.slane %v10801_v37, 4  ;;  %v10824_v43 = vrot.slane %v10803_v24, 4  ;;  %10608 = vmatprep.subr.bf16.mxu1 %v10162_v23  ;;  %v10927_v25 = vrot.slane %v17948_v32, %v17863_v3 }
 0xc16   :  { %v10818_v30 = vrot.slane %v10802_v39, 4  ;;  %v10830_v45 = vrot.slane %v10804_v29, 4 }
 0xc17   :  { %v10813_v47 = vadd.f32 %v10812_v42, %v10801_v37  ;;  %v10825_v48 = vadd.f32 %v10824_v43, %v10803_v24  ;;  %v10935_v37 = vrot.slane %v17948_v32, %v17866_v5  ;;  %v10931_v42 = vrot.slane %v17948_v32, %v17869_v6 }
 0xc18   :  { %v10819_v49 = vadd.f32 %v10818_v30, %v10802_v39  ;;  %v10831_v50 = vadd.f32 %v10830_v45, %v10804_v29  ;;  %10609 = vmatpush1.bf16.msra.mxu1 %v10161_v44  ;;  %v10995_v29 = vrot.slane %v17950_v27, %v17863_v3  ;;  %v11003_v30 = vrot.slane %v17950_v27, %v17866_v5 }
 0xc19   :  { %v10814_v51 = vrot.slane %v10813_v47, 2  ;;  %v10826_v52 = vrot.slane %v10825_v48, 2  ;;  %10610 = vmatprep.subr.bf16.mxu1 %v10173_v46  ;;  %v10939_v45 = vrot.slane %v17948_v32, %v17872_v8 }
 0xc1a   :  { %v10820_v53 = vrot.slane %v10819_v49, 2  ;;  %v10832_v54 = vrot.slane %v10831_v50, 2 }
 0xc1b   :  { %v10815_v28 = vadd.f32 %v10814_v51, %v10813_v47  ;;  %v10827_v56 = vadd.f32 %v10826_v52, %v10825_v48 }
 0xc1c   :  { %v10821_v59 = vadd.f32 %v10820_v53, %v10819_v49  ;;  %v10833_v57 = vadd.f32 %v10832_v54, %v10831_v50  ;;  %10611 = vmatpush1.bf16.msra.mxu1 %v10172_v34  ;;  %v17970_v49 = vstv %s14901_s18 }
 0xc1d   :  { %v10816_v58 = vrot.slane %v10815_v28, 1  ;;  %v10828_v31 = vrot.slane %v10827_v56, 1  ;;  %10612 = vmatprep.subr.bf16.mxu1 %v10184_v55 }
 0xc1e   :  { %v10822_v61 = vrot.slane %v10821_v59, 1  ;;  %v10834_v62 = vrot.slane %v10833_v57, 1 }
 0xc1f   :  { %v10817_v0 = vadd.f32 %v10816_v58, %v10815_v28  ;;  %v10829_v1 = vadd.f32 %v10828_v31, %v10827_v56 }
 0xc20   :  { %v10823_v4 = vadd.f32 %v10822_v61, %v10821_v59  ;;  %v10835_v7 = vadd.f32 %v10834_v62, %v10833_v57  ;;  %10613 = vmatpush1.bf16.msra.mxu1 %v10183_v60 }
 0xc21   :  { %v10878_v9 = vmul.f32 0.125, %v10817_v0  ;;  %v10880_v10 = vmul.f32 0.125, %v10829_v1  ;;  %10614 = vmatprep.subr.bf16.mxu1 %v10195_v63 }
 0xc22   :  { %v10879_v13 = vmul.f32 0.125, %v10823_v4  ;;  %v10881_v15 = vmul.f32 0.125, %v10835_v7 }
 0xc23   :  { %v10889_v18 = vadd.f32 1e-05, %v10878_v9  ;;  %v10891_v20 = vadd.f32 1e-05, %v10880_v10 }
 0xc24   :  { %v10890_v11 = vadd.f32 1e-05, %v10879_v13  ;;  %v10892_v17 = vadd.f32 1e-05, %v10881_v15  ;;  %10615 = vmatpush1.bf16.msra.mxu1 %v10194_v12 }
 0xc25   :  { %17188 = vrsqrt.f32 %v10889_v18  ;;  %10616 = vmatprep.subr.bf16.mxu1 %v10206_v16 }
 0xc26   :  { %17190 = vrsqrt.f32 %v10891_v20 }
 0xc27   :  { %17192 = vrsqrt.f32 %v10890_v11 }
 0xc28   :  { %17194 = vrsqrt.f32 %v10892_v17  ;;  %10617 = vmatpush1.bf16.msra.mxu1 %v10205_v21 }
 0xc29   :  { %10618 = vmatprep.subr.bf16.mxu1 %v10217_v26 }
 0xc2c   :  { %10619 = vmatpush1.bf16.msra.mxu1 %v10216_v22 }
 0xc2f   :  { %v17189_v23 = vpop.eup %17188  ;;  %10621 = vmatmul.mubr.bf16.vlgmr.msra.gmra.mrb[24].mxu1 %v17903_v38 }
 0xc30   :  { %v17191_v24 = vpop.eup %17190  ;;  %v10911_v39 = vmul.f32 %v17189_v23, %v17932_v14  ;;  %v10999_v14 = vrot.slane %v17950_v27, %v17869_v6 }
 0xc31   :  { %v17193_v43 = vpop.eup %17192  ;;  %v10913_v44 = vmul.f32 %v17191_v24, %v17934_v33  ;;  %v11007_v33 = vrot.slane %v17950_v27, %v17872_v8 }
 0xc32   :  { %v17195_v46 = vpop.eup %17194  ;;  %v10979_v47 = vmul.f32 %v10927_v25, %v10911_v39  ;;  %v10912_v48 = vmul.f32 %v17193_v43, %v17936_v35 }
 0xc33   :  { %v10981_v50 = vmul.f32 %v10935_v37, %v10913_v44  ;;  %v10914_v51 = vmul.f32 %v17195_v46, %v17938_v36 }
 0xc34   :  { %v11047_v52 = vadd.f32 %v10995_v29, %v10979_v47  ;;  %v10980_v34 = vmul.f32 %v10931_v42, %v10912_v48 }
 0xc35   :  { %v11049_v53 = vadd.f32 %v11003_v30, %v10981_v50  ;;  %v10982_v54 = vmul.f32 %v10939_v45, %v10914_v51 }
 0xc36   :  { %vm11059_vm6 = vcmp.gt.f32.partialorder %v11047_v52, 0.0  ;;  %v11071_v55 = vmul.f32 %v17970_v49, %v11047_v52  ;;  %v11048_v28 = vadd.f32 %v10999_v14, %v10980_v34 }
 0xc37   :  { %vm11061_vm7 = vcmp.gt.f32.partialorder %v11049_v53, 0.0  ;;  %v11073_v35 = vmul.f32 %v17970_v49, %v11049_v53  ;;  %v11050_v56 = vadd.f32 %v11007_v33, %v10982_v54 }
 0xc38   :  { %v11082_v59 = vsel %vm11059_vm6, %v11047_v52, %v11071_v55  ;;  %vm11060_vm8 = vcmp.gt.f32.partialorder %v11048_v28, 0.0  ;;  %v11072_v57 = vmul.f32 %v17970_v49, %v11048_v28 }
 0xc39   :  { %11093 = vst [vmem:[#allocation21] sm:$0xff] %v11082_v59  ;;  %v11084_v36 = vsel %vm11061_vm7, %v11049_v53, %v11073_v35  ;;  %vm11062_vm9 = vcmp.gt.f32.partialorder %v11050_v56, 0.0  ;;  %v11074_v58 = vmul.f32 %v17970_v49, %v11050_v56 }
 0xc3a   :  { %11095 = vst [vmem:[#allocation21 + $0x10] sm:$0xff] %v11084_v36  ;;  %v11083_v31 = vsel %vm11060_vm8, %v11048_v28, %v11072_v57 }
 0xc3b   :  { %11094 = vst [vmem:[#allocation21 + $0x8] sm:$0xff] %v11083_v31  ;;  %v11085_v60 = vsel %vm11062_vm9, %v11050_v56, %v11074_v58 }
 0xc3c   :  { %11096 = vst [vmem:[#allocation21 + $0x18] sm:$0xff] %v11085_v60 }
 0xc82   :  { %v10458_v61 = vpop.f32.mrb[20].mxu1  ;;  %v10540_v62 = vpop.f32.mrb[16].mxu0 }
 0xc83   :  { %v10737_v63 = vrot.slane %v10458_v61, 4  ;;  %v10749_v0 = vrot.slane %v10540_v62, 4  ;;  %v10460_v1 = vpop.f32.mrb[21].mxu1  ;;  %v10542_v4 = vpop.f32.mrb[17].mxu0 }
 0xc84   :  { %v10743_v7 = vrot.slane %v10460_v1, 4  ;;  %v10755_v9 = vrot.slane %v10542_v4, 4  ;;  %v10462_v10 = vpop.f32.mrb[22].mxu1  ;;  %v10544_v12 = vpop.f32.mrb[18].mxu0 }
 0xc85   :  { %v10738_v13 = vadd.f32 %v10737_v63, %v10458_v61  ;;  %v10750_v15 = vadd.f32 %v10749_v0, %v10540_v62  ;;  %v10463_v16 = vpop.f32.mrb[23].mxu1  ;;  %v10545_v18 = vpop.f32.mrb[19].mxu0 }
 0xc86   :  { %v10744_v20 = vadd.f32 %v10743_v7, %v10460_v1  ;;  %v10756_v11 = vadd.f32 %v10755_v9, %v10542_v4 }
 0xc87   :  { %v10739_v17 = vrot.slane %v10738_v13, 2  ;;  %v10751_v21 = vrot.slane %v10750_v15, 2 }
 0xc88   :  { %v10745_v26 = vrot.slane %v10744_v20, 2  ;;  %v10757_v22 = vrot.slane %v10756_v11, 2 }
 0xc89   :  { %v10740_v25 = vadd.f32 %v10739_v17, %v10738_v13  ;;  %v10752_v23 = vadd.f32 %v10751_v21, %v10750_v15 }
 0xc8a   :  { %v10746_v37 = vadd.f32 %v10745_v26, %v10744_v20  ;;  %v10758_v24 = vadd.f32 %v10757_v22, %v10756_v11 }
 0xc8b   :  { %v10741_v39 = vrot.slane %v10740_v25, 1  ;;  %v10753_v29 = vrot.slane %v10752_v23, 1 }
 0xc8c   :  { %v10747_v42 = vrot.slane %v10746_v37, 1  ;;  %v10759_v43 = vrot.slane %v10758_v24, 1 }
 0xc8d   :  { %v10742_v44 = vadd.f32 %v10741_v39, %v10740_v25  ;;  %v10754_v30 = vadd.f32 %v10753_v29, %v10752_v23 }
 0xc8e   :  { %v10748_v45 = vadd.f32 %v10747_v42, %v10746_v37  ;;  %v10760_v46 = vadd.f32 %v10759_v43, %v10758_v24 }
 0xc8f   :  { %v10783_v47 = vmul.f32 0.125, %v10742_v44  ;;  %v10785_v48 = vmul.f32 0.125, %v10754_v30  ;;  %v17988_v30 = vsub.s32 4, %v17860_v2 }
 0xc90   :  { %v10784_v14 = vmul.f32 0.125, %v10748_v45  ;;  %v10786_v50 = vmul.f32 0.125, %v10760_v46  ;;  %v17991_v45 = vsub.s32 6, %v17860_v2  ;;  %v17994_v46 = vsub.s32 5, %v17860_v2 }
 0xc91   :  { %v10794_v51 = vsub.f32 %v10458_v61, %v10783_v47  ;;  %v10796_v33 = vsub.f32 %v10540_v62, %v10785_v48  ;;  %v17997_v47 = vsub.s32 7, %v17860_v2  ;;  %v10943_v48 = vrot.slane %v17948_v32, %v17988_v30 }
 0xc92   :  { %v17979_v52 = vsub.f32 %v10460_v1, %v10784_v14  ;;  %v17981_v34 = vsub.f32 %v10542_v4, %v10786_v50  ;;  %v10951_v50 = vrot.slane %v17948_v32, %v17991_v45  ;;  %v11019_v2 = vrot.slane %v17950_v27, %v17991_v45 }
 0xc93   :  { %v10805_v53 = vmul.f32 %v10794_v51, %v10794_v51  ;;  %v10807_v54 = vmul.f32 %v10796_v33, %v10796_v33 }
 0xc94   :  { %v10806_v55 = vmul.f32 %v17979_v52, %v17979_v52  ;;  %v10808_v28 = vmul.f32 %v17981_v34, %v17981_v34 }
 0xc95   :  { %v10836_v35 = vrot.slane %v10805_v53, 4  ;;  %v10848_v56 = vrot.slane %v10807_v54, 4 }
 0xc96   :  { %v10842_v59 = vrot.slane %v10806_v55, 4  ;;  %v10854_v57 = vrot.slane %v10808_v28, 4 }
 0xc97   :  { %v10837_v36 = vadd.f32 %v10836_v35, %v10805_v53  ;;  %v10849_v58 = vadd.f32 %v10848_v56, %v10807_v54 }
 0xc98   :  { %v10843_v31 = vadd.f32 %v10842_v59, %v10806_v55  ;;  %v10855_v60 = vadd.f32 %v10854_v57, %v10808_v28  ;;  %v11011_v55 = vrot.slane %v17950_v27, %v17988_v30  ;;  %v10947_v28 = vrot.slane %v17948_v32, %v17994_v46 }
 0xc99   :  { %v10838_v61 = vrot.slane %v10837_v36, 2  ;;  %v10850_v62 = vrot.slane %v10849_v58, 2  ;;  %v10955_v59 = vrot.slane %v17948_v32, %v17997_v47 }
 0xc9a   :  { %v10844_v63 = vrot.slane %v10843_v31, 2  ;;  %v10856_v0 = vrot.slane %v10855_v60, 2 }
 0xc9b   :  { %v10839_v1 = vadd.f32 %v10838_v61, %v10837_v36  ;;  %v10851_v4 = vadd.f32 %v10850_v62, %v10849_v58  ;;  %v11023_v61 = vrot.slane %v17950_v27, %v17997_v47 }
 0xc9c   :  { %v10845_v7 = vadd.f32 %v10844_v63, %v10843_v31  ;;  %v10857_v9 = vadd.f32 %v10856_v0, %v10855_v60 }
 0xc9d   :  { %v10840_v10 = vrot.slane %v10839_v1, 1  ;;  %v10852_v12 = vrot.slane %v10851_v4, 1 }
 0xc9e   :  { %v10846_v13 = vrot.slane %v10845_v7, 1  ;;  %v10858_v15 = vrot.slane %v10857_v9, 1 }
 0xc9f   :  { %v10841_v16 = vadd.f32 %v10840_v10, %v10839_v1  ;;  %v10853_v18 = vadd.f32 %v10852_v12, %v10851_v4 }
 0xca0   :  { %v10847_v20 = vadd.f32 %v10846_v13, %v10845_v7  ;;  %v10859_v11 = vadd.f32 %v10858_v15, %v10857_v9 }
 0xca1   :  { %v10882_v17 = vmul.f32 0.125, %v10841_v16  ;;  %v10884_v21 = vmul.f32 0.125, %v10853_v18 }
 0xca2   :  { %v10883_v26 = vmul.f32 0.125, %v10847_v20  ;;  %v10885_v22 = vmul.f32 0.125, %v10859_v11  ;;  %v14945_v25 = vpop.f32.mrb[20].mxu0 }
 0xca3   :  { %v10893_v23 = vadd.f32 1e-05, %v10882_v17  ;;  %v10895_v37 = vadd.f32 1e-05, %v10884_v21  ;;  %v14946_v24 = vpop.f32.mrb[21].mxu0 }
 0xca4   :  { %v10894_v39 = vadd.f32 1e-05, %v10883_v26  ;;  %v10896_v29 = vadd.f32 1e-05, %v10885_v22  ;;  %v14947_v42 = vadd.f32 %v14946_v24, %v14945_v25  ;;  %v14948_v43 = vpop.f32.mrb[22].mxu0 }
 0xca5   :  { %17196 = vrsqrt.f32 %v10893_v23  ;;  %v14949_v44 = vpop.f32.mrb[23].mxu0 }
 0xca6   :  { %17198 = vrsqrt.f32 %v10895_v37 }
 0xca7   :  { %17200 = vrsqrt.f32 %v10894_v39 }
 0xca8   :  { %17202 = vrsqrt.f32 %v10896_v29 }
 0xcaf   :  { %v17197_v14 = vpop.eup %17196 }
 0xcb0   :  { %v17199_v53 = vpop.eup %17198  ;;  %v10915_v54 = vmul.f32 %v17197_v14, %v10794_v51  ;;  %v11015_v51 = vrot.slane %v17950_v27, %v17994_v46 }
 0xcb1   :  { %v17201_v35 = vpop.eup %17200  ;;  %v10917_v56 = vmul.f32 %v17199_v53, %v10796_v33 }
 0xcb2   :  { %v17203_v57 = vpop.eup %17202  ;;  %v10983_v36 = vmul.f32 %v10943_v48, %v10915_v54  ;;  %v10916_v58 = vmul.f32 %v17201_v35, %v17979_v52 }
 0xcb3   :  { %v10985_v31 = vmul.f32 %v10951_v50, %v10917_v56  ;;  %v10918_v60 = vmul.f32 %v17203_v57, %v17981_v34 }
 0xcb4   :  { %v11051_v33 = vadd.f32 %v11011_v55, %v10983_v36  ;;  %v10984_v62 = vmul.f32 %v10947_v28, %v10916_v58  ;;  %v10710_v55 = vld [vmem:[#allocation16 + $0x15] sm:$0x7] }
 0xcb5   :  { %v11053_v63 = vadd.f32 %v11019_v2, %v10985_v31  ;;  %v10986_v0 = vmul.f32 %v10955_v59, %v10918_v60  ;;  %v10967_v28 = vrot.slane %v10710_v55, %v17866_v5 }
 0xcb6   :  { %vm11063_vm10 = vcmp.gt.f32.partialorder %v11051_v33, 0.0  ;;  %v11075_v32 = vmul.f32 %v17970_v49, %v11051_v33  ;;  %v11052_v1 = vadd.f32 %v11015_v51, %v10984_v62 }
 0xcb7   :  { %vm11065_vm11 = vcmp.gt.f32.partialorder %v11053_v63, 0.0  ;;  %v11077_v52 = vmul.f32 %v17970_v49, %v11053_v63  ;;  %v11054_v4 = vadd.f32 %v11023_v61, %v10986_v0 }
 0xcb8   :  { %v11086_v7 = vsel %vm11063_vm10, %v11051_v33, %v11075_v32  ;;  %vm11064_vm12 = vcmp.gt.f32.partialorder %v11052_v1, 0.0  ;;  %v11076_v9 = vmul.f32 %v17970_v49, %v11052_v1 }
 0xcb9   :  { %11097 = vst [vmem:[#allocation21 + $0x20] sm:$0xff] %v11086_v7  ;;  %v11088_v34 = vsel %vm11065_vm11, %v11053_v63, %v11077_v52  ;;  %vm11066_vm13 = vcmp.gt.f32.partialorder %v11054_v4, 0.0  ;;  %v11078_v27 = vmul.f32 %v17970_v49, %v11054_v4 }
 0xcba   :  { %11099 = vst [vmem:[#allocation21 + $0x30] sm:$0xff] %v11088_v34  ;;  %v11087_v10 = vsel %vm11064_vm12, %v11052_v1, %v11076_v9 }
 0xcbb   :  { %11098 = vst [vmem:[#allocation21 + $0x28] sm:$0xff] %v11087_v10  ;;  %v11089_v12 = vsel %vm11066_vm13, %v11054_v4, %v11078_v27 }
 0xcbc   :  { %11100 = vst [vmem:[#allocation21 + $0x38] sm:$0xff] %v11089_v12 }
 0xcc2   :  { %v14967_v13 = vpop.f32.mrb[24].mxu0 }
 0xcc3   :  { %v14968_v15 = vpop.f32.mrb[25].mxu0 }
 0xcc4   :  { %v14969_v16 = vadd.f32 %v14968_v15, %v14967_v13  ;;  %v14970_v18 = vpop.f32.mrb[26].mxu0 }
 0xcc5   :  { %v14971_v20 = vpop.f32.mrb[27].mxu0 }
 0xcc6   :  { %v10704_v11 = vadd.f32 %v14969_v16, %v14947_v42  ;;  %v18021_v42 = vld [vmem:[#allocation17 + $0x15] sm:$0x7] }
 0xcc7   :  { %v11035_v2 = vrot.slane %v18021_v42, %v17866_v5 }
 0xcc8   :  { %v10773_v17 = vrot.slane %v10704_v11, 4 }
 0xcca   :  { %v10774_v21 = vadd.f32 %v10773_v17, %v10704_v11 }
 0xccc   :  { %v10775_v26 = vrot.slane %v10774_v21, 2 }
 0xcce   :  { %v10776_v22 = vadd.f32 %v10775_v26, %v10774_v21 }
 0xcd0   :  { %v10777_v25 = vrot.slane %v10776_v22, 1 }
 0xcd2   :  { %v10778_v23 = vadd.f32 %v10777_v25, %v10776_v22 }
 0xcd4   :  { %v10789_v37 = vmul.f32 0.125, %v10778_v23 }
 0xcd6   :  { %v10800_v24 = vsub.f32 %v10704_v11, %v10789_v37 }
 0xcd8   :  { %v10811_v39 = vmul.f32 %v10800_v24, %v10800_v24 }
 0xcda   :  { %v10872_v29 = vrot.slane %v10811_v39, 4 }
 0xcdc   :  { %v10873_v43 = vadd.f32 %v10872_v29, %v10811_v39 }
 0xcde   :  { %v10874_v44 = vrot.slane %v10873_v43, 2 }
 0xce0   :  { %v10875_v48 = vadd.f32 %v10874_v44, %v10873_v43 }
 0xce2   :  { %v10876_v14 = vrot.slane %v10875_v48, 1 }
 0xce4   :  { %v10877_v50 = vadd.f32 %v10876_v14, %v10875_v48 }
 0xce6   :  { %v10888_v53 = vmul.f32 0.125, %v10877_v50  ;;  %v10959_v50 = vrot.slane %v10710_v55, %v17863_v3 }
 0xce8   :  { %v10899_v54 = vadd.f32 1e-05, %v10888_v53 }
 0xcea   :  { %17204 = vrsqrt.f32 %v10899_v54  ;;  %v10963_v54 = vrot.slane %v10710_v55, %v17869_v6 }
 0xcf4   :  { %v17205_v35 = vpop.eup %17204 }
 0xcf5   :  { %v10921_v56 = vmul.f32 %v17205_v35, %v10800_v24 }
 0xcf7   :  { %v10989_v59 = vmul.f32 %v10967_v28, %v10921_v56  ;;  %v11027_v56 = vrot.slane %v18021_v42, %v17863_v3 }
 0xcf9   :  { %v11057_v57 = vadd.f32 %v11035_v2, %v10989_v59  ;;  %v11031_v59 = vrot.slane %v18021_v42, %v17869_v6 }
 0xcfb   :  { %vm11069_vm14 = vcmp.gt.f32.partialorder %v11057_v57, 0.0  ;;  %v11081_v36 = vmul.f32 %v17970_v49, %v11057_v57 }
 0xcfd   :  { %v11092_v58 = vsel %vm11069_vm14, %v11057_v57, %v11081_v36 }
 0xcfe   :  { %11103 = vst [vmem:[#allocation21 + $0x50] sm:$0xff] %v11092_v58 }
 0xd02   :  { %v10622_v51 = vpop.f32.mrb[24].mxu1 }
 0xd03   :  { %v10761_v31 = vrot.slane %v10622_v51, 4  ;;  %v10624_v60 = vpop.f32.mrb[25].mxu1 }
 0xd04   :  { %v10767_v61 = vrot.slane %v10624_v60, 4  ;;  %v10626_v33 = vpop.f32.mrb[26].mxu1 }
 0xd05   :  { %v10762_v62 = vadd.f32 %v10761_v31, %v10622_v51  ;;  %v10627_v63 = vpop.f32.mrb[27].mxu1 }
 0xd06   :  { %v10768_v0 = vadd.f32 %v10767_v61, %v10624_v60 }
 0xd07   :  { %v10763_v32 = vrot.slane %v10762_v62, 2 }
 0xd08   :  { %v10769_v1 = vrot.slane %v10768_v0, 2 }
 0xd09   :  { %v10764_v52 = vadd.f32 %v10763_v32, %v10762_v62 }
 0xd0a   :  { %v10770_v4 = vadd.f32 %v10769_v1, %v10768_v0 }
 0xd0b   :  { %v10765_v7 = vrot.slane %v10764_v52, 1 }
 0xd0c   :  { %v10771_v9 = vrot.slane %v10770_v4, 1 }
 0xd0d   :  { %v10766_v34 = vadd.f32 %v10765_v7, %v10764_v52 }
 0xd0e   :  { %v10772_v27 = vadd.f32 %v10771_v9, %v10770_v4 }
 0xd0f   :  { %v10787_v10 = vmul.f32 0.125, %v10766_v34 }
 0xd10   :  { %v10788_v12 = vmul.f32 0.125, %v10772_v27 }
 0xd11   :  { %v10798_v13 = vsub.f32 %v10622_v51, %v10787_v10 }
 0xd12   :  { %v10799_v15 = vsub.f32 %v10624_v60, %v10788_v12 }
 0xd13   :  { %v10809_v16 = vmul.f32 %v10798_v13, %v10798_v13 }
 0xd14   :  { %v10810_v18 = vmul.f32 %v10799_v15, %v10799_v15 }
 0xd15   :  { %v10860_v20 = vrot.slane %v10809_v16, 4 }
 0xd16   :  { %v10866_v11 = vrot.slane %v10810_v18, 4 }
 0xd17   :  { %v10861_v17 = vadd.f32 %v10860_v20, %v10809_v16 }
 0xd18   :  { %v10867_v21 = vadd.f32 %v10866_v11, %v10810_v18 }
 0xd19   :  { %v10862_v26 = vrot.slane %v10861_v17, 2 }
 0xd1a   :  { %v10868_v22 = vrot.slane %v10867_v21, 2 }
 0xd1b   :  { %v10863_v25 = vadd.f32 %v10862_v26, %v10861_v17 }
 0xd1c   :  { %v10869_v23 = vadd.f32 %v10868_v22, %v10867_v21 }
 0xd1d   :  { %v10864_v37 = vrot.slane %v10863_v25, 1 }
 0xd1e   :  { %v10870_v24 = vrot.slane %v10869_v23, 1 }
 0xd1f   :  { %v10865_v39 = vadd.f32 %v10864_v37, %v10863_v25 }
 0xd20   :  { %v10871_v29 = vadd.f32 %v10870_v24, %v10869_v23 }
 0xd21   :  { %v10886_v43 = vmul.f32 0.125, %v10865_v39 }
 0xd22   :  { %v10887_v44 = vmul.f32 0.125, %v10871_v29 }
 0xd23   :  { %v10897_v48 = vadd.f32 1e-05, %v10886_v43 }
 0xd24   :  { %v10898_v14 = vadd.f32 1e-05, %v10887_v44 }
 0xd25   :  { %17206 = vrsqrt.f32 %v10897_v48 }
 0xd26   :  { %17208 = vrsqrt.f32 %v10898_v14 }
 0xd2f   :  { %v17207_v53 = vpop.eup %17206 }
 0xd30   :  { %v17209_v28 = vpop.eup %17208  ;;  %v10919_v35 = vmul.f32 %v17207_v53, %v10798_v13 }
 0xd31   :  { %v10920_v2 = vmul.f32 %v17209_v28, %v10799_v15 }
 0xd32   :  { %v10987_v57 = vmul.f32 %v10959_v50, %v10919_v35 }
 0xd33   :  { %v10988_v36 = vmul.f32 %v10963_v54, %v10920_v2 }
 0xd34   :  { %v11055_v58 = vadd.f32 %v11027_v56, %v10987_v57 }
 0xd35   :  { %v11056_v51 = vadd.f32 %v11031_v59, %v10988_v36 }
 0xd36   :  { %vm11067_vm15 = vcmp.gt.f32.partialorder %v11055_v58, 0.0  ;;  %v11079_v31 = vmul.f32 %v17970_v49, %v11055_v58 }
 0xd37   :  { %vm11068_vm0 = vcmp.gt.f32.partialorder %v11056_v51, 0.0  ;;  %v11080_v60 = vmul.f32 %v17970_v49, %v11056_v51 }
 0xd38   :  { %v11090_v55 = vsel %vm11067_vm15, %v11055_v58, %v11079_v31 }
 0xd39   :  { %11101 = vst [vmem:[#allocation21 + $0x40] sm:$0xff] %v11090_v55  ;;  %v11091_v61 = vsel %vm11068_vm0, %v11056_v51, %v11080_v60 }
 0xd3a   :  { %11102 = vst [vmem:[#allocation21 + $0x48] sm:$0xff] %v11091_v61 }
 0xd3b   :  { %17498 = dma.done.wait [#allocation3 + $0x1], 45056 }
 0xd3c   :  { %17499 = vsyncadd [#allocation3 + $0x1], 4294922240  ;;  %11490 = vmatprep.mubr.bf16.mxu0 %v17905_v40  ;;  %11572 = vmatprep.mubr.bf16.mxu1 %v17905_v40  ;;  %v11107_v42 = vld [vmem:[#allocation2 + $0xb08] sm:$0xff]  ;;  %v11109_v33 = vld [vmem:[#allocation2 + $0xb18] sm:$0xff]  ;;  %s14902_s0 = sld [smem:[#allocation19 + $0x2]] }
 0xd3d   :  { %v11106_v62 = vld [vmem:[#allocation2 + $0xb00] sm:$0xff]  ;;  %11458 = vmatprep.subr.bf16.mxu0 %v11107_v42  ;;  %11540 = vmatprep.subr.bf16.mxu1 %v11109_v33  ;;  %v11108_v63 = vld [vmem:[#allocation2 + $0xb10] sm:$0xff]  ;;  %v11117_v49 = vld [vmem:[#allocation2 + $0xb58] sm:$0xff] }
 0xd3e   :  { %v11118_v0 = vld [vmem:[#allocation2 + $0xb60] sm:$0xff]  ;;  %v11120_v32 = vld [vmem:[#allocation2 + $0xb70] sm:$0xff]  ;;  %11459 = vmatpush1.bf16.msra.mxu0 %v11106_v62  ;;  %11541 = vmatpush1.bf16.msra.mxu1 %v11108_v63  ;;  %v11119_v1 = vld [vmem:[#allocation2 + $0xb68] sm:$0xff] }
 0xd3f   :  { %11460 = vmatprep.subr.bf16.mxu0 %v11118_v0  ;;  %11542 = vmatprep.subr.bf16.mxu1 %v11120_v32  ;;  %v11129_v52 = vld [vmem:[#allocation2 + $0xbb8] sm:$0xff]  ;;  %v11131_v4 = vld [vmem:[#allocation2 + $0xbc8] sm:$0xff]  ;;  %v11128_v7 = vld [vmem:[#allocation2 + $0xbb0] sm:$0xff] }
 0xd40   :  { %v11130_v9 = vld [vmem:[#allocation2 + $0xbc0] sm:$0xff]  ;;  %v11140_v34 = vld [vmem:[#allocation2 + $0xc10] sm:$0xff]  ;;  %v11139_v10 = vld [vmem:[#allocation2 + $0xc08] sm:$0xff] }
 0xd41   :  { %v11142_v27 = vld [vmem:[#allocation2 + $0xc20] sm:$0xff]  ;;  %v11141_v12 = vld [vmem:[#allocation2 + $0xc18] sm:$0xff]  ;;  %v11151_v13 = vld [vmem:[#allocation2 + $0xc68] sm:$0xff] }
 0xd42   :  { %11461 = vmatpush1.bf16.msra.mxu0 %v11117_v49  ;;  %11543 = vmatpush1.bf16.msra.mxu1 %v11119_v1  ;;  %v11153_v15 = vld [vmem:[#allocation2 + $0xc78] sm:$0xff]  ;;  %v11150_v16 = vld [vmem:[#allocation2 + $0xc60] sm:$0xff]  ;;  %v11152_v18 = vld [vmem:[#allocation2 + $0xc70] sm:$0xff] }
 0xd43   :  { %11462 = vmatprep.subr.bf16.mxu0 %v11129_v52  ;;  %11544 = vmatprep.subr.bf16.mxu1 %v11131_v4  ;;  %v11162_v20 = vld [vmem:[#allocation2 + $0xcc0] sm:$0xff]  ;;  %v11164_v11 = vld [vmem:[#allocation2 + $0xcd0] sm:$0xff]  ;;  %v11161_v17 = vld [vmem:[#allocation2 + $0xcb8] sm:$0xff] }
 0xd44   :  { %v11163_v21 = vld [vmem:[#allocation2 + $0xcc8] sm:$0xff]  ;;  %v11173_v26 = vld [vmem:[#allocation2 + $0xd18] sm:$0xff]  ;;  %v11172_v25 = vld [vmem:[#allocation2 + $0xd10] sm:$0xff] }
 0xd45   :  { %v11175_v22 = vld [vmem:[#allocation2 + $0xd28] sm:$0xff]  ;;  %v11174_v23 = vld [vmem:[#allocation2 + $0xd20] sm:$0xff]  ;;  %v11184_v37 = vld [vmem:[#allocation2 + $0xd70] sm:$0xff] }
 0xd46   :  { %11463 = vmatpush1.bf16.msra.mxu0 %v11128_v7  ;;  %11545 = vmatpush1.bf16.msra.mxu1 %v11130_v9  ;;  %v11186_v24 = vld [vmem:[#allocation2 + $0xd80] sm:$0xff]  ;;  %v11183_v39 = vld [vmem:[#allocation2 + $0xd68] sm:$0xff]  ;;  %v11185_v29 = vld [vmem:[#allocation2 + $0xd78] sm:$0xff] }
 0xd47   :  { %11464 = vmatprep.subr.bf16.mxu0 %v11140_v34  ;;  %11546 = vmatprep.subr.bf16.mxu1 %v11142_v27  ;;  %v11195_v43 = vld [vmem:[#allocation2 + $0xdc8] sm:$0xff]  ;;  %v11197_v44 = vld [vmem:[#allocation2 + $0xdd8] sm:$0xff]  ;;  %v11194_v48 = vld [vmem:[#allocation2 + $0xdc0] sm:$0xff] }
 0xd48   :  { %v11196_v14 = vld [vmem:[#allocation2 + $0xdd0] sm:$0xff]  ;;  %v11206_v50 = vld [vmem:[#allocation2 + $0xe20] sm:$0xff]  ;;  %v11205_v54 = vld [vmem:[#allocation2 + $0xe18] sm:$0xff] }
 0xd49   :  { %v11208_v53 = vld [vmem:[#allocation2 + $0xe30] sm:$0xff]  ;;  %v11207_v28 = vld [vmem:[#allocation2 + $0xe28] sm:$0xff]  ;;  %v11217_v35 = vld [vmem:[#allocation2 + $0xe78] sm:$0xff] }
 0xd4a   :  { %11465 = vmatpush1.bf16.msra.mxu0 %v11139_v10  ;;  %11547 = vmatpush1.bf16.msra.mxu1 %v11141_v12  ;;  %v11219_v56 = vld [vmem:[#allocation2 + $0xe88] sm:$0xff]  ;;  %v11216_v2 = vld [vmem:[#allocation2 + $0xe70] sm:$0xff]  ;;  %v11218_v59 = vld [vmem:[#allocation2 + $0xe80] sm:$0xff] }
 0xd4b   :  { %11466 = vmatprep.subr.bf16.mxu0 %v11151_v13  ;;  %11548 = vmatprep.subr.bf16.mxu1 %v11153_v15  ;;  %v11228_v57 = vld [vmem:[#allocation2 + $0xed0] sm:$0xff]  ;;  %v11230_v36 = vld [vmem:[#allocation2 + $0xee0] sm:$0xff]  ;;  %v11227_v58 = vld [vmem:[#allocation2 + $0xec8] sm:$0xff] }
 0xd4c   :  { %v11229_v51 = vld [vmem:[#allocation2 + $0xed8] sm:$0xff]  ;;  %v11239_v31 = vld [vmem:[#allocation2 + $0xf28] sm:$0xff]  ;;  %v11238_v55 = vld [vmem:[#allocation2 + $0xf20] sm:$0xff] }
 0xd4d   :  { %v11241_v60 = vld [vmem:[#allocation2 + $0xf38] sm:$0xff]  ;;  %v11240_v61 = vld [vmem:[#allocation2 + $0xf30] sm:$0xff]  ;;  %v11250_v42 = vld [vmem:[#allocation2 + $0xf80] sm:$0xff] }
 0xd4e   :  { %11467 = vmatpush1.bf16.msra.mxu0 %v11150_v16  ;;  %11549 = vmatpush1.bf16.msra.mxu1 %v11152_v18  ;;  %v11252_v33 = vld [vmem:[#allocation2 + $0xf90] sm:$0xff]  ;;  %v11249_v62 = vld [vmem:[#allocation2 + $0xf78] sm:$0xff]  ;;  %v11251_v63 = vld [vmem:[#allocation2 + $0xf88] sm:$0xff] }
 0xd4f   :  { %11468 = vmatprep.subr.bf16.mxu0 %v11162_v20  ;;  %11550 = vmatprep.subr.bf16.mxu1 %v11164_v11  ;;  %v11261_v0 = vld [vmem:[#allocation2 + $0xfd8] sm:$0xff]  ;;  %v11263_v32 = vld [vmem:[#allocation2 + $0xfe8] sm:$0xff]  ;;  %v11260_v49 = vld [vmem:[#allocation2 + $0xfd0] sm:$0xff] }
 0xd50   :  { %v11262_v1 = vld [vmem:[#allocation2 + $0xfe0] sm:$0xff]  ;;  %v11272_v52 = vld [vmem:[#allocation2 + $0x1030] sm:$0xff]  ;;  %v11271_v7 = vld [vmem:[#allocation2 + $0x1028] sm:$0xff] }
 0xd51   :  { %v11274_v4 = vld [vmem:[#allocation2 + $0x1040] sm:$0xff]  ;;  %v11273_v9 = vld [vmem:[#allocation2 + $0x1038] sm:$0xff]  ;;  %v11283_v34 = vld [vmem:[#allocation2 + $0x1088] sm:$0xff] }
 0xd52   :  { %11469 = vmatpush1.bf16.msra.mxu0 %v11161_v17  ;;  %11551 = vmatpush1.bf16.msra.mxu1 %v11163_v21  ;;  %v11285_v27 = vld [vmem:[#allocation2 + $0x1098] sm:$0xff]  ;;  %v11282_v10 = vld [vmem:[#allocation2 + $0x1080] sm:$0xff]  ;;  %v11284_v12 = vld [vmem:[#allocation2 + $0x1090] sm:$0xff] }
 0xd53   :  { %11470 = vmatprep.subr.bf16.mxu0 %v11173_v26  ;;  %11552 = vmatprep.subr.bf16.mxu1 %v11175_v22  ;;  %v11294_v13 = vld [vmem:[#allocation2 + $0x10e0] sm:$0xff]  ;;  %v11296_v15 = vld [vmem:[#allocation2 + $0x10f0] sm:$0xff]  ;;  %v11293_v16 = vld [vmem:[#allocation2 + $0x10d8] sm:$0xff] }
 0xd54   :  { %v11295_v18 = vld [vmem:[#allocation2 + $0x10e8] sm:$0xff]  ;;  %v11305_v20 = vld [vmem:[#allocation2 + $0x1138] sm:$0xff]  ;;  %v11304_v17 = vld [vmem:[#allocation2 + $0x1130] sm:$0xff] }
 0xd55   :  { %v11307_v11 = vld [vmem:[#allocation2 + $0x1148] sm:$0xff]  ;;  %v11306_v21 = vld [vmem:[#allocation2 + $0x1140] sm:$0xff]  ;;  %v11316_v26 = vld [vmem:[#allocation2 + $0x1190] sm:$0xff] }
 0xd56   :  { %11471 = vmatpush1.bf16.msra.mxu0 %v11172_v25  ;;  %11553 = vmatpush1.bf16.msra.mxu1 %v11174_v23  ;;  %v11318_v22 = vld [vmem:[#allocation2 + $0x11a0] sm:$0xff]  ;;  %v11315_v25 = vld [vmem:[#allocation2 + $0x1188] sm:$0xff]  ;;  %v11317_v23 = vld [vmem:[#allocation2 + $0x1198] sm:$0xff] }
 0xd57   :  { %11472 = vmatprep.subr.bf16.mxu0 %v11184_v37  ;;  %11554 = vmatprep.subr.bf16.mxu1 %v11186_v24  ;;  %v11327_v37 = vld [vmem:[#allocation2 + $0x11e8] sm:$0xff]  ;;  %v11329_v24 = vld [vmem:[#allocation2 + $0x11f8] sm:$0xff] }
 0xd5a   :  { %11473 = vmatpush1.bf16.msra.mxu0 %v11183_v39  ;;  %11555 = vmatpush1.bf16.msra.mxu1 %v11185_v29  ;;  %v11326_v39 = vld [vmem:[#allocation2 + $0x11e0] sm:$0xff]  ;;  %v11328_v29 = vld [vmem:[#allocation2 + $0x11f0] sm:$0xff] }
 0xd5b   :  { %11474 = vmatprep.subr.bf16.mxu0 %v11195_v43  ;;  %11556 = vmatprep.subr.bf16.mxu1 %v11197_v44  ;;  %v11338_v43 = vld [vmem:[#allocation2 + $0x1240] sm:$0xff]  ;;  %v11340_v44 = vld [vmem:[#allocation2 + $0x1250] sm:$0xff] }
 0xd5e   :  { %11475 = vmatpush1.bf16.msra.mxu0 %v11194_v48  ;;  %11557 = vmatpush1.bf16.msra.mxu1 %v11196_v14  ;;  %v11337_v48 = vld [vmem:[#allocation2 + $0x1238] sm:$0xff]  ;;  %v11339_v14 = vld [vmem:[#allocation2 + $0x1248] sm:$0xff] }
 0xd5f   :  { %11476 = vmatprep.subr.bf16.mxu0 %v11206_v50  ;;  %11558 = vmatprep.subr.bf16.mxu1 %v11208_v53  ;;  %v11349_v50 = vld [vmem:[#allocation2 + $0x1298] sm:$0xff]  ;;  %v11351_v53 = vld [vmem:[#allocation2 + $0x12a8] sm:$0xff] }
 0xd62   :  { %11477 = vmatpush1.bf16.msra.mxu0 %v11205_v54  ;;  %11559 = vmatpush1.bf16.msra.mxu1 %v11207_v28  ;;  %v11348_v54 = vld [vmem:[#allocation2 + $0x1290] sm:$0xff]  ;;  %v11350_v28 = vld [vmem:[#allocation2 + $0x12a0] sm:$0xff] }
 0xd63   :  { %11478 = vmatprep.subr.bf16.mxu0 %v11217_v35  ;;  %11560 = vmatprep.subr.bf16.mxu1 %v11219_v56  ;;  %v11360_v35 = vld [vmem:[#allocation2 + $0x12f0] sm:$0xff]  ;;  %v11362_v56 = vld [vmem:[#allocation2 + $0x1300] sm:$0xff] }
 0xd66   :  { %11479 = vmatpush1.bf16.msra.mxu0 %v11216_v2  ;;  %11561 = vmatpush1.bf16.msra.mxu1 %v11218_v59  ;;  %v11359_v2 = vld [vmem:[#allocation2 + $0x12e8] sm:$0xff]  ;;  %v11361_v59 = vld [vmem:[#allocation2 + $0x12f8] sm:$0xff] }
 0xd67   :  { %11480 = vmatprep.subr.bf16.mxu0 %v11228_v57  ;;  %11562 = vmatprep.subr.bf16.mxu1 %v11230_v36  ;;  %v11371_v57 = vld [vmem:[#allocation2 + $0x1348] sm:$0xff]  ;;  %v11373_v36 = vld [vmem:[#allocation2 + $0x1358] sm:$0xff] }
 0xd6a   :  { %11481 = vmatpush1.bf16.msra.mxu0 %v11227_v58  ;;  %11563 = vmatpush1.bf16.msra.mxu1 %v11229_v51  ;;  %v11370_v58 = vld [vmem:[#allocation2 + $0x1340] sm:$0xff]  ;;  %v11372_v51 = vld [vmem:[#allocation2 + $0x1350] sm:$0xff] }
 0xd6b   :  { %11482 = vmatprep.subr.bf16.mxu0 %v11239_v31  ;;  %11564 = vmatprep.subr.bf16.mxu1 %v11241_v60  ;;  %v11382_v31 = vld [vmem:[#allocation2 + $0x13a0] sm:$0xff]  ;;  %v11384_v60 = vld [vmem:[#allocation2 + $0x13b0] sm:$0xff] }
 0xd6e   :  { %11483 = vmatpush1.bf16.msra.mxu0 %v11238_v55  ;;  %11565 = vmatpush1.bf16.msra.mxu1 %v11240_v61  ;;  %v11381_v55 = vld [vmem:[#allocation2 + $0x1398] sm:$0xff]  ;;  %v11383_v61 = vld [vmem:[#allocation2 + $0x13a8] sm:$0xff] }
 0xd6f   :  { %11484 = vmatprep.subr.bf16.mxu0 %v11250_v42  ;;  %11566 = vmatprep.subr.bf16.mxu1 %v11252_v33  ;;  %v11393_v42 = vld [vmem:[#allocation2 + $0x13f8] sm:$0xff]  ;;  %v11395_v33 = vld [vmem:[#allocation2 + $0x1408] sm:$0xff] }
 0xd72   :  { %11485 = vmatpush1.bf16.msra.mxu0 %v11249_v62  ;;  %11567 = vmatpush1.bf16.msra.mxu1 %v11251_v63  ;;  %v11392_v62 = vld [vmem:[#allocation2 + $0x13f0] sm:$0xff]  ;;  %v11394_v63 = vld [vmem:[#allocation2 + $0x1400] sm:$0xff] }
 0xd73   :  { %11486 = vmatprep.subr.bf16.mxu0 %v11261_v0  ;;  %11568 = vmatprep.subr.bf16.mxu1 %v11263_v32  ;;  %v11404_v0 = vld [vmem:[#allocation2 + $0x1450] sm:$0xff]  ;;  %v11406_v32 = vld [vmem:[#allocation2 + $0x1460] sm:$0xff] }
 0xd76   :  { %11487 = vmatpush1.bf16.msra.mxu0 %v11260_v49  ;;  %11569 = vmatpush1.bf16.msra.mxu1 %v11262_v1  ;;  %v11403_v49 = vld [vmem:[#allocation2 + $0x1448] sm:$0xff]  ;;  %v11405_v1 = vld [vmem:[#allocation2 + $0x1458] sm:$0xff] }
 0xd77   :  { %11488 = vmatprep.subr.bf16.mxu0 %v11272_v52  ;;  %11570 = vmatprep.subr.bf16.mxu1 %v11274_v4  ;;  %v11415_v52 = vld [vmem:[#allocation2 + $0x14a8] sm:$0xff]  ;;  %v11417_v4 = vld [vmem:[#allocation2 + $0x14b8] sm:$0xff] }
 0xd7a   :  { %11489 = vmatpush1.bf16.msra.mxu0 %v11271_v7  ;;  %11571 = vmatpush1.bf16.msra.mxu1 %v11273_v9  ;;  %v11414_v7 = vld [vmem:[#allocation2 + $0x14a0] sm:$0xff]  ;;  %v11416_v9 = vld [vmem:[#allocation2 + $0x14b0] sm:$0xff] }
 0xd7b   :  { %11499 = vmatprep.subr.bf16.mxu0 %v11283_v34  ;;  %11581 = vmatprep.subr.bf16.mxu1 %v11285_v27  ;;  %v11426_v34 = vld [vmem:[#allocation2 + $0x1500] sm:$0xff]  ;;  %v11428_v27 = vld [vmem:[#allocation2 + $0x1510] sm:$0xff] }
 0xd7d   :  { %11491 = vmatmul.mubr.bf16.vlgmr.msra.gmra.mrb[28].mxu0 %v17901_v19  ;;  %11573 = vmatmul.mubr.bf16.vlgmr.msra.gmra.mrb[28].mxu1 %v17901_v19 }
 0xd7e   :  { %11500 = vmatpush1.bf16.msra.mxu0 %v11282_v10  ;;  %11582 = vmatpush1.bf16.msra.mxu1 %v11284_v12  ;;  %v11425_v10 = vld [vmem:[#allocation2 + $0x14f8] sm:$0xff]  ;;  %v11427_v12 = vld [vmem:[#allocation2 + $0x1508] sm:$0xff] }
 0xd7f   :  { %11501 = vmatprep.subr.bf16.mxu0 %v11294_v13  ;;  %11583 = vmatprep.subr.bf16.mxu1 %v11296_v15  ;;  %v11437_v13 = vld [vmem:[#allocation2 + $0x1558] sm:$0xff]  ;;  %v11439_v15 = vld [vmem:[#allocation2 + $0x1568] sm:$0xff] }
 0xd80   :  { %11531 = vmatprep.mubr.bf16.mxu0 %v17907_v41  ;;  %11613 = vmatprep.mubr.bf16.mxu1 %v17907_v41 }
 0xd82   :  { %11502 = vmatpush1.bf16.msra.mxu0 %v11293_v16  ;;  %11584 = vmatpush1.bf16.msra.mxu1 %v11295_v18  ;;  %v11436_v16 = vld [vmem:[#allocation2 + $0x1550] sm:$0xff]  ;;  %v11438_v18 = vld [vmem:[#allocation2 + $0x1560] sm:$0xff] }
 0xd83   :  { %11503 = vmatprep.subr.bf16.mxu0 %v11305_v20  ;;  %11585 = vmatprep.subr.bf16.mxu1 %v11307_v11  ;;  %v11448_v20 = vld [vmem:[#allocation2 + $0x15b0] sm:$0xff]  ;;  %v11450_v11 = vld [vmem:[#allocation2 + $0x15c0] sm:$0xff] }
 0xd86   :  { %11504 = vmatpush1.bf16.msra.mxu0 %v11304_v17  ;;  %11586 = vmatpush1.bf16.msra.mxu1 %v11306_v21  ;;  %v11447_v17 = vld [vmem:[#allocation2 + $0x15a8] sm:$0xff]  ;;  %v11449_v21 = vld [vmem:[#allocation2 + $0x15b8] sm:$0xff] }
 0xd87   :  { %11505 = vmatprep.subr.bf16.mxu0 %v11316_v26  ;;  %11587 = vmatprep.subr.bf16.mxu1 %v11318_v22  ;;  %v11111_v26 = vld [vmem:[#allocation2 + $0xb28] sm:$0xff]  ;;  %v11113_v22 = vld [vmem:[#allocation2 + $0xb38] sm:$0xff] }
 0xd8a   :  { %11506 = vmatpush1.bf16.msra.mxu0 %v11315_v25  ;;  %11588 = vmatpush1.bf16.msra.mxu1 %v11317_v23  ;;  %v11110_v25 = vld [vmem:[#allocation2 + $0xb20] sm:$0xff]  ;;  %v11112_v23 = vld [vmem:[#allocation2 + $0xb30] sm:$0xff] }
 0xd8b   :  { %11507 = vmatprep.subr.bf16.mxu0 %v11327_v37  ;;  %11589 = vmatprep.subr.bf16.mxu1 %v11329_v24  ;;  %v11122_v37 = vld [vmem:[#allocation2 + $0xb80] sm:$0xff]  ;;  %v11124_v24 = vld [vmem:[#allocation2 + $0xb90] sm:$0xff] }
 0xd8e   :  { %11508 = vmatpush1.bf16.msra.mxu0 %v11326_v39  ;;  %11590 = vmatpush1.bf16.msra.mxu1 %v11328_v29  ;;  %v11121_v39 = vld [vmem:[#allocation2 + $0xb78] sm:$0xff]  ;;  %v11123_v29 = vld [vmem:[#allocation2 + $0xb88] sm:$0xff] }
 0xd8f   :  { %11509 = vmatprep.subr.bf16.mxu0 %v11338_v43  ;;  %11591 = vmatprep.subr.bf16.mxu1 %v11340_v44  ;;  %v11133_v43 = vld [vmem:[#allocation2 + $0xbd8] sm:$0xff]  ;;  %v11135_v44 = vld [vmem:[#allocation2 + $0xbe8] sm:$0xff] }
 0xd92   :  { %11510 = vmatpush1.bf16.msra.mxu0 %v11337_v48  ;;  %11592 = vmatpush1.bf16.msra.mxu1 %v11339_v14  ;;  %v11132_v48 = vld [vmem:[#allocation2 + $0xbd0] sm:$0xff]  ;;  %v11134_v14 = vld [vmem:[#allocation2 + $0xbe0] sm:$0xff] }
 0xd93   :  { %11511 = vmatprep.subr.bf16.mxu0 %v11349_v50  ;;  %11593 = vmatprep.subr.bf16.mxu1 %v11351_v53  ;;  %v11144_v50 = vld [vmem:[#allocation2 + $0xc30] sm:$0xff]  ;;  %v11146_v53 = vld [vmem:[#allocation2 + $0xc40] sm:$0xff] }
 0xd96   :  { %11512 = vmatpush1.bf16.msra.mxu0 %v11348_v54  ;;  %11594 = vmatpush1.bf16.msra.mxu1 %v11350_v28  ;;  %v11143_v54 = vld [vmem:[#allocation2 + $0xc28] sm:$0xff]  ;;  %v11145_v28 = vld [vmem:[#allocation2 + $0xc38] sm:$0xff] }
 0xd97   :  { %11513 = vmatprep.subr.bf16.mxu0 %v11360_v35  ;;  %11595 = vmatprep.subr.bf16.mxu1 %v11362_v56  ;;  %v11155_v35 = vld [vmem:[#allocation2 + $0xc88] sm:$0xff]  ;;  %v11157_v56 = vld [vmem:[#allocation2 + $0xc98] sm:$0xff] }
 0xd9a   :  { %11514 = vmatpush1.bf16.msra.mxu0 %v11359_v2  ;;  %11596 = vmatpush1.bf16.msra.mxu1 %v11361_v59  ;;  %v11154_v2 = vld [vmem:[#allocation2 + $0xc80] sm:$0xff]  ;;  %v11156_v59 = vld [vmem:[#allocation2 + $0xc90] sm:$0xff] }
 0xd9b   :  { %11515 = vmatprep.subr.bf16.mxu0 %v11371_v57  ;;  %11597 = vmatprep.subr.bf16.mxu1 %v11373_v36  ;;  %v11166_v57 = vld [vmem:[#allocation2 + $0xce0] sm:$0xff]  ;;  %v11168_v36 = vld [vmem:[#allocation2 + $0xcf0] sm:$0xff] }
 0xd9e   :  { %11516 = vmatpush1.bf16.msra.mxu0 %v11370_v58  ;;  %11598 = vmatpush1.bf16.msra.mxu1 %v11372_v51  ;;  %v11165_v58 = vld [vmem:[#allocation2 + $0xcd8] sm:$0xff]  ;;  %v11167_v51 = vld [vmem:[#allocation2 + $0xce8] sm:$0xff] }
 0xd9f   :  { %11517 = vmatprep.subr.bf16.mxu0 %v11382_v31  ;;  %11599 = vmatprep.subr.bf16.mxu1 %v11384_v60  ;;  %v11177_v31 = vld [vmem:[#allocation2 + $0xd38] sm:$0xff]  ;;  %v11179_v60 = vld [vmem:[#allocation2 + $0xd48] sm:$0xff] }
 0xda2   :  { %11518 = vmatpush1.bf16.msra.mxu0 %v11381_v55  ;;  %11600 = vmatpush1.bf16.msra.mxu1 %v11383_v61  ;;  %v11176_v55 = vld [vmem:[#allocation2 + $0xd30] sm:$0xff]  ;;  %v11178_v61 = vld [vmem:[#allocation2 + $0xd40] sm:$0xff] }
 0xda3   :  { %11519 = vmatprep.subr.bf16.mxu0 %v11393_v42  ;;  %11601 = vmatprep.subr.bf16.mxu1 %v11395_v33  ;;  %v11188_v42 = vld [vmem:[#allocation2 + $0xd90] sm:$0xff]  ;;  %v11190_v33 = vld [vmem:[#allocation2 + $0xda0] sm:$0xff] }
 0xda6   :  { %11520 = vmatpush1.bf16.msra.mxu0 %v11392_v62  ;;  %11602 = vmatpush1.bf16.msra.mxu1 %v11394_v63  ;;  %v11187_v62 = vld [vmem:[#allocation2 + $0xd88] sm:$0xff]  ;;  %v11189_v63 = vld [vmem:[#allocation2 + $0xd98] sm:$0xff] }
 0xda7   :  { %11521 = vmatprep.subr.bf16.mxu0 %v11404_v0  ;;  %11603 = vmatprep.subr.bf16.mxu1 %v11406_v32  ;;  %v11199_v0 = vld [vmem:[#allocation2 + $0xde8] sm:$0xff]  ;;  %v11201_v32 = vld [vmem:[#allocation2 + $0xdf8] sm:$0xff] }
 0xdaa   :  { %11522 = vmatpush1.bf16.msra.mxu0 %v11403_v49  ;;  %11604 = vmatpush1.bf16.msra.mxu1 %v11405_v1  ;;  %v11198_v49 = vld [vmem:[#allocation2 + $0xde0] sm:$0xff]  ;;  %v11200_v1 = vld [vmem:[#allocation2 + $0xdf0] sm:$0xff] }
 0xdab   :  { %11523 = vmatprep.subr.bf16.mxu0 %v11415_v52  ;;  %11605 = vmatprep.subr.bf16.mxu1 %v11417_v4  ;;  %v11210_v52 = vld [vmem:[#allocation2 + $0xe40] sm:$0xff]  ;;  %v11212_v4 = vld [vmem:[#allocation2 + $0xe50] sm:$0xff] }
 0xdae   :  { %11524 = vmatpush1.bf16.msra.mxu0 %v11414_v7  ;;  %11606 = vmatpush1.bf16.msra.mxu1 %v11416_v9  ;;  %v11209_v7 = vld [vmem:[#allocation2 + $0xe38] sm:$0xff]  ;;  %v11211_v9 = vld [vmem:[#allocation2 + $0xe48] sm:$0xff] }
 0xdaf   :  { %11525 = vmatprep.subr.bf16.mxu0 %v11426_v34  ;;  %11607 = vmatprep.subr.bf16.mxu1 %v11428_v27  ;;  %v11221_v34 = vld [vmem:[#allocation2 + $0xe98] sm:$0xff]  ;;  %v11223_v27 = vld [vmem:[#allocation2 + $0xea8] sm:$0xff] }
 0xdb2   :  { %11526 = vmatpush1.bf16.msra.mxu0 %v11425_v10  ;;  %11608 = vmatpush1.bf16.msra.mxu1 %v11427_v12  ;;  %v11220_v10 = vld [vmem:[#allocation2 + $0xe90] sm:$0xff]  ;;  %v11222_v12 = vld [vmem:[#allocation2 + $0xea0] sm:$0xff] }
 0xdb3   :  { %11527 = vmatprep.subr.bf16.mxu0 %v11437_v13  ;;  %11609 = vmatprep.subr.bf16.mxu1 %v11439_v15  ;;  %v11232_v13 = vld [vmem:[#allocation2 + $0xef0] sm:$0xff]  ;;  %v11234_v15 = vld [vmem:[#allocation2 + $0xf00] sm:$0xff] }
 0xdb6   :  { %11528 = vmatpush1.bf16.msra.mxu0 %v11436_v16  ;;  %11610 = vmatpush1.bf16.msra.mxu1 %v11438_v18  ;;  %v11231_v16 = vld [vmem:[#allocation2 + $0xee8] sm:$0xff]  ;;  %v11233_v18 = vld [vmem:[#allocation2 + $0xef8] sm:$0xff] }
 0xdb7   :  { %11529 = vmatprep.subr.bf16.mxu0 %v11448_v20  ;;  %11611 = vmatprep.subr.bf16.mxu1 %v11450_v11  ;;  %v11243_v20 = vld [vmem:[#allocation2 + $0xf48] sm:$0xff]  ;;  %v11245_v11 = vld [vmem:[#allocation2 + $0xf58] sm:$0xff] }
 0xdba   :  { %11530 = vmatpush1.bf16.msra.mxu0 %v11447_v17  ;;  %11612 = vmatpush1.bf16.msra.mxu1 %v11449_v21  ;;  %v11242_v17 = vld [vmem:[#allocation2 + $0xf40] sm:$0xff]  ;;  %v11244_v21 = vld [vmem:[#allocation2 + $0xf50] sm:$0xff] }
 0xdbb   :  { %11622 = vmatprep.subr.bf16.mxu0 %v11111_v26  ;;  %11704 = vmatprep.subr.bf16.mxu1 %v11113_v22  ;;  %v11254_v26 = vld [vmem:[#allocation2 + $0xfa0] sm:$0xff]  ;;  %v11256_v22 = vld [vmem:[#allocation2 + $0xfb0] sm:$0xff] }
 0xdbd   :  { %11532 = vmatmul.mubr.bf16.vlgmr.msra.gmra.mrb[28].mxu0 %v17903_v38  ;;  %11614 = vmatmul.mubr.bf16.vlgmr.msra.gmra.mrb[28].mxu1 %v17903_v38 }
 0xdbe   :  { %11623 = vmatpush1.bf16.msra.mxu0 %v11110_v25  ;;  %11705 = vmatpush1.bf16.msra.mxu1 %v11112_v23  ;;  %v11253_v25 = vld [vmem:[#allocation2 + $0xf98] sm:$0xff]  ;;  %v11255_v23 = vld [vmem:[#allocation2 + $0xfa8] sm:$0xff] }
 0xdbf   :  { %11624 = vmatprep.subr.bf16.mxu0 %v11122_v37  ;;  %11706 = vmatprep.subr.bf16.mxu1 %v11124_v24  ;;  %v11265_v37 = vld [vmem:[#allocation2 + $0xff8] sm:$0xff]  ;;  %v11267_v24 = vld [vmem:[#allocation2 + $0x1008] sm:$0xff] }
 0xdc0   :  { %11654 = vmatprep.mubr.bf16.mxu0 %v17905_v40  ;;  %11736 = vmatprep.mubr.bf16.mxu1 %v17905_v40 }
 0xdc2   :  { %11625 = vmatpush1.bf16.msra.mxu0 %v11121_v39  ;;  %11707 = vmatpush1.bf16.msra.mxu1 %v11123_v29  ;;  %v11264_v39 = vld [vmem:[#allocation2 + $0xff0] sm:$0xff]  ;;  %v11266_v29 = vld [vmem:[#allocation2 + $0x1000] sm:$0xff] }
 0xdc3   :  { %11626 = vmatprep.subr.bf16.mxu0 %v11133_v43  ;;  %11708 = vmatprep.subr.bf16.mxu1 %v11135_v44  ;;  %v11276_v43 = vld [vmem:[#allocation2 + $0x1050] sm:$0xff]  ;;  %v11278_v44 = vld [vmem:[#allocation2 + $0x1060] sm:$0xff] }
 0xdc6   :  { %11627 = vmatpush1.bf16.msra.mxu0 %v11132_v48  ;;  %11709 = vmatpush1.bf16.msra.mxu1 %v11134_v14  ;;  %v11275_v48 = vld [vmem:[#allocation2 + $0x1048] sm:$0xff]  ;;  %v11277_v14 = vld [vmem:[#allocation2 + $0x1058] sm:$0xff] }
 0xdc7   :  { %11628 = vmatprep.subr.bf16.mxu0 %v11144_v50  ;;  %11710 = vmatprep.subr.bf16.mxu1 %v11146_v53  ;;  %v11287_v50 = vld [vmem:[#allocation2 + $0x10a8] sm:$0xff]  ;;  %v11289_v53 = vld [vmem:[#allocation2 + $0x10b8] sm:$0xff] }
 0xdca   :  { %11629 = vmatpush1.bf16.msra.mxu0 %v11143_v54  ;;  %11711 = vmatpush1.bf16.msra.mxu1 %v11145_v28  ;;  %v11286_v54 = vld [vmem:[#allocation2 + $0x10a0] sm:$0xff]  ;;  %v11288_v28 = vld [vmem:[#allocation2 + $0x10b0] sm:$0xff] }
 0xdcb   :  { %11630 = vmatprep.subr.bf16.mxu0 %v11155_v35  ;;  %11712 = vmatprep.subr.bf16.mxu1 %v11157_v56  ;;  %v11298_v35 = vld [vmem:[#allocation2 + $0x1100] sm:$0xff]  ;;  %v11300_v56 = vld [vmem:[#allocation2 + $0x1110] sm:$0xff] }
 0xdce   :  { %11631 = vmatpush1.bf16.msra.mxu0 %v11154_v2  ;;  %11713 = vmatpush1.bf16.msra.mxu1 %v11156_v59  ;;  %v11297_v2 = vld [vmem:[#allocation2 + $0x10f8] sm:$0xff]  ;;  %v11299_v59 = vld [vmem:[#allocation2 + $0x1108] sm:$0xff] }
 0xdcf   :  { %11632 = vmatprep.subr.bf16.mxu0 %v11166_v57  ;;  %11714 = vmatprep.subr.bf16.mxu1 %v11168_v36  ;;  %v11309_v57 = vld [vmem:[#allocation2 + $0x1158] sm:$0xff]  ;;  %v11311_v36 = vld [vmem:[#allocation2 + $0x1168] sm:$0xff] }
 0xdd2   :  { %11633 = vmatpush1.bf16.msra.mxu0 %v11165_v58  ;;  %11715 = vmatpush1.bf16.msra.mxu1 %v11167_v51  ;;  %v11308_v58 = vld [vmem:[#allocation2 + $0x1150] sm:$0xff]  ;;  %v11310_v51 = vld [vmem:[#allocation2 + $0x1160] sm:$0xff] }
 0xdd3   :  { %11634 = vmatprep.subr.bf16.mxu0 %v11177_v31  ;;  %11716 = vmatprep.subr.bf16.mxu1 %v11179_v60  ;;  %v11320_v31 = vld [vmem:[#allocation2 + $0x11b0] sm:$0xff]  ;;  %v11322_v60 = vld [vmem:[#allocation2 + $0x11c0] sm:$0xff] }
 0xdd6   :  { %11635 = vmatpush1.bf16.msra.mxu0 %v11176_v55  ;;  %11717 = vmatpush1.bf16.msra.mxu1 %v11178_v61  ;;  %v11319_v55 = vld [vmem:[#allocation2 + $0x11a8] sm:$0xff]  ;;  %v11321_v61 = vld [vmem:[#allocation2 + $0x11b8] sm:$0xff] }
 0xdd7   :  { %11636 = vmatprep.subr.bf16.mxu0 %v11188_v42  ;;  %11718 = vmatprep.subr.bf16.mxu1 %v11190_v33  ;;  %v11331_v42 = vld [vmem:[#allocation2 + $0x1208] sm:$0xff]  ;;  %v11333_v33 = vld [vmem:[#allocation2 + $0x1218] sm:$0xff] }
 0xdda   :  { %11637 = vmatpush1.bf16.msra.mxu0 %v11187_v62  ;;  %11719 = vmatpush1.bf16.msra.mxu1 %v11189_v63  ;;  %v11330_v62 = vld [vmem:[#allocation2 + $0x1200] sm:$0xff]  ;;  %v11332_v63 = vld [vmem:[#allocation2 + $0x1210] sm:$0xff] }
 0xddb   :  { %11638 = vmatprep.subr.bf16.mxu0 %v11199_v0  ;;  %11720 = vmatprep.subr.bf16.mxu1 %v11201_v32  ;;  %v11342_v0 = vld [vmem:[#allocation2 + $0x1260] sm:$0xff]  ;;  %v11344_v32 = vld [vmem:[#allocation2 + $0x1270] sm:$0xff] }
 0xdde   :  { %11639 = vmatpush1.bf16.msra.mxu0 %v11198_v49  ;;  %11721 = vmatpush1.bf16.msra.mxu1 %v11200_v1  ;;  %v11341_v49 = vld [vmem:[#allocation2 + $0x1258] sm:$0xff]  ;;  %v11343_v1 = vld [vmem:[#allocation2 + $0x1268] sm:$0xff] }
 0xddf   :  { %11640 = vmatprep.subr.bf16.mxu0 %v11210_v52  ;;  %11722 = vmatprep.subr.bf16.mxu1 %v11212_v4  ;;  %v11353_v52 = vld [vmem:[#allocation2 + $0x12b8] sm:$0xff]  ;;  %v11355_v4 = vld [vmem:[#allocation2 + $0x12c8] sm:$0xff] }
 0xde2   :  { %11641 = vmatpush1.bf16.msra.mxu0 %v11209_v7  ;;  %11723 = vmatpush1.bf16.msra.mxu1 %v11211_v9  ;;  %v11352_v7 = vld [vmem:[#allocation2 + $0x12b0] sm:$0xff]  ;;  %v11354_v9 = vld [vmem:[#allocation2 + $0x12c0] sm:$0xff] }
 0xde3   :  { %11642 = vmatprep.subr.bf16.mxu0 %v11221_v34  ;;  %11724 = vmatprep.subr.bf16.mxu1 %v11223_v27  ;;  %v11364_v34 = vld [vmem:[#allocation2 + $0x1310] sm:$0xff]  ;;  %v11366_v27 = vld [vmem:[#allocation2 + $0x1320] sm:$0xff] }
 0xde6   :  { %11643 = vmatpush1.bf16.msra.mxu0 %v11220_v10  ;;  %11725 = vmatpush1.bf16.msra.mxu1 %v11222_v12  ;;  %v11363_v10 = vld [vmem:[#allocation2 + $0x1308] sm:$0xff]  ;;  %v11365_v12 = vld [vmem:[#allocation2 + $0x1318] sm:$0xff] }
 0xde7   :  { %11644 = vmatprep.subr.bf16.mxu0 %v11232_v13  ;;  %11726 = vmatprep.subr.bf16.mxu1 %v11234_v15  ;;  %v11375_v13 = vld [vmem:[#allocation2 + $0x1368] sm:$0xff]  ;;  %v11377_v15 = vld [vmem:[#allocation2 + $0x1378] sm:$0xff] }
 0xdea   :  { %11645 = vmatpush1.bf16.msra.mxu0 %v11231_v16  ;;  %11727 = vmatpush1.bf16.msra.mxu1 %v11233_v18  ;;  %v11374_v16 = vld [vmem:[#allocation2 + $0x1360] sm:$0xff]  ;;  %v11376_v18 = vld [vmem:[#allocation2 + $0x1370] sm:$0xff] }
 0xdeb   :  { %11646 = vmatprep.subr.bf16.mxu0 %v11243_v20  ;;  %11728 = vmatprep.subr.bf16.mxu1 %v11245_v11  ;;  %v11386_v20 = vld [vmem:[#allocation2 + $0x13c0] sm:$0xff]  ;;  %v11388_v11 = vld [vmem:[#allocation2 + $0x13d0] sm:$0xff] }
 0xdee   :  { %11647 = vmatpush1.bf16.msra.mxu0 %v11242_v17  ;;  %11729 = vmatpush1.bf16.msra.mxu1 %v11244_v21  ;;  %v11385_v17 = vld [vmem:[#allocation2 + $0x13b8] sm:$0xff]  ;;  %v11387_v21 = vld [vmem:[#allocation2 + $0x13c8] sm:$0xff] }
 0xdef   :  { %11648 = vmatprep.subr.bf16.mxu0 %v11254_v26  ;;  %11730 = vmatprep.subr.bf16.mxu1 %v11256_v22  ;;  %v11397_v26 = vld [vmem:[#allocation2 + $0x1418] sm:$0xff]  ;;  %v11399_v22 = vld [vmem:[#allocation2 + $0x1428] sm:$0xff] }
 0xdf2   :  { %11649 = vmatpush1.bf16.msra.mxu0 %v11253_v25  ;;  %11731 = vmatpush1.bf16.msra.mxu1 %v11255_v23  ;;  %v11396_v25 = vld [vmem:[#allocation2 + $0x1410] sm:$0xff]  ;;  %v11398_v23 = vld [vmem:[#allocation2 + $0x1420] sm:$0xff] }
 0xdf3   :  { %11650 = vmatprep.subr.bf16.mxu0 %v11265_v37  ;;  %11732 = vmatprep.subr.bf16.mxu1 %v11267_v24  ;;  %v11408_v37 = vld [vmem:[#allocation2 + $0x1470] sm:$0xff]  ;;  %v11410_v24 = vld [vmem:[#allocation2 + $0x1480] sm:$0xff] }
 0xdf6   :  { %11651 = vmatpush1.bf16.msra.mxu0 %v11264_v39  ;;  %11733 = vmatpush1.bf16.msra.mxu1 %v11266_v29  ;;  %v11407_v39 = vld [vmem:[#allocation2 + $0x1468] sm:$0xff]  ;;  %v11409_v29 = vld [vmem:[#allocation2 + $0x1478] sm:$0xff] }
 0xdf7   :  { %11652 = vmatprep.subr.bf16.mxu0 %v11276_v43  ;;  %11734 = vmatprep.subr.bf16.mxu1 %v11278_v44  ;;  %v11419_v43 = vld [vmem:[#allocation2 + $0x14c8] sm:$0xff]  ;;  %v11421_v44 = vld [vmem:[#allocation2 + $0x14d8] sm:$0xff] }
 0xdfa   :  { %11653 = vmatpush1.bf16.msra.mxu0 %v11275_v48  ;;  %11735 = vmatpush1.bf16.msra.mxu1 %v11277_v14  ;;  %v11418_v48 = vld [vmem:[#allocation2 + $0x14c0] sm:$0xff]  ;;  %v11420_v14 = vld [vmem:[#allocation2 + $0x14d0] sm:$0xff] }
 0xdfb   :  { %11663 = vmatprep.subr.bf16.mxu0 %v11287_v50  ;;  %11745 = vmatprep.subr.bf16.mxu1 %v11289_v53  ;;  %v11430_v50 = vld [vmem:[#allocation2 + $0x1520] sm:$0xff]  ;;  %v11432_v53 = vld [vmem:[#allocation2 + $0x1530] sm:$0xff] }
 0xdfd   :  { %11655 = vmatmul.mubr.bf16.vlgmr.msra.gmra.mrb[32].mxu0 %v17901_v19  ;;  %11737 = vmatmul.mubr.bf16.vlgmr.msra.gmra.mrb[32].mxu1 %v17901_v19 }
 0xdfe   :  { %11664 = vmatpush1.bf16.msra.mxu0 %v11286_v54  ;;  %11746 = vmatpush1.bf16.msra.mxu1 %v11288_v28  ;;  %v11429_v54 = vld [vmem:[#allocation2 + $0x1518] sm:$0xff]  ;;  %v11431_v28 = vld [vmem:[#allocation2 + $0x1528] sm:$0xff] }
 0xdff   :  { %11665 = vmatprep.subr.bf16.mxu0 %v11298_v35  ;;  %11747 = vmatprep.subr.bf16.mxu1 %v11300_v56  ;;  %v11441_v35 = vld [vmem:[#allocation2 + $0x1578] sm:$0xff]  ;;  %v11443_v56 = vld [vmem:[#allocation2 + $0x1588] sm:$0xff] }
 0xe00   :  { %11695 = vmatprep.mubr.bf16.mxu0 %v17907_v41  ;;  %11777 = vmatprep.mubr.bf16.mxu1 %v17907_v41 }
 0xe02   :  { %11666 = vmatpush1.bf16.msra.mxu0 %v11297_v2  ;;  %11748 = vmatpush1.bf16.msra.mxu1 %v11299_v59  ;;  %v11440_v2 = vld [vmem:[#allocation2 + $0x1570] sm:$0xff]  ;;  %v11442_v59 = vld [vmem:[#allocation2 + $0x1580] sm:$0xff] }
 0xe03   :  { %11667 = vmatprep.subr.bf16.mxu0 %v11309_v57  ;;  %11749 = vmatprep.subr.bf16.mxu1 %v11311_v36  ;;  %v11452_v57 = vld [vmem:[#allocation2 + $0x15d0] sm:$0xff]  ;;  %v11454_v36 = vld [vmem:[#allocation2 + $0x15e0] sm:$0xff] }
 0xe06   :  { %11668 = vmatpush1.bf16.msra.mxu0 %v11308_v58  ;;  %11750 = vmatpush1.bf16.msra.mxu1 %v11310_v51  ;;  %v11451_v58 = vld [vmem:[#allocation2 + $0x15c8] sm:$0xff]  ;;  %v11453_v51 = vld [vmem:[#allocation2 + $0x15d8] sm:$0xff] }
 0xe07   :  { %11669 = vmatprep.subr.bf16.mxu0 %v11320_v31  ;;  %11751 = vmatprep.subr.bf16.mxu1 %v11322_v60  ;;  %v11115_v31 = vld [vmem:[#allocation2 + $0xb48] sm:$0xff]  ;;  %v11204_v60 = vld [vmem:[#allocation2 + $0xe10] sm:$0xff] }
 0xe0a   :  { %11670 = vmatpush1.bf16.msra.mxu0 %v11319_v55  ;;  %11752 = vmatpush1.bf16.msra.mxu1 %v11321_v61  ;;  %v11114_v55 = vld [vmem:[#allocation2 + $0xb40] sm:$0xff]  ;;  %v11116_v61 = vld [vmem:[#allocation2 + $0xb50] sm:$0xff] }
 0xe0b   :  { %11671 = vmatprep.subr.bf16.mxu0 %v11331_v42  ;;  %11753 = vmatprep.subr.bf16.mxu1 %v11333_v33  ;;  %v11126_v42 = vld [vmem:[#allocation2 + $0xba0] sm:$0xff]  ;;  %v11215_v33 = vld [vmem:[#allocation2 + $0xe68] sm:$0xff] }
 0xe0e   :  { %11672 = vmatpush1.bf16.msra.mxu0 %v11330_v62  ;;  %11754 = vmatpush1.bf16.msra.mxu1 %v11332_v63  ;;  %v11125_v62 = vld [vmem:[#allocation2 + $0xb98] sm:$0xff]  ;;  %v11127_v63 = vld [vmem:[#allocation2 + $0xba8] sm:$0xff] }
 0xe0f   :  { %11673 = vmatprep.subr.bf16.mxu0 %v11342_v0  ;;  %11755 = vmatprep.subr.bf16.mxu1 %v11344_v32  ;;  %v11137_v0 = vld [vmem:[#allocation2 + $0xbf8] sm:$0xff]  ;;  %v11226_v32 = vld [vmem:[#allocation2 + $0xec0] sm:$0xff] }
 0xe12   :  { %11674 = vmatpush1.bf16.msra.mxu0 %v11341_v49  ;;  %11756 = vmatpush1.bf16.msra.mxu1 %v11343_v1  ;;  %v11136_v49 = vld [vmem:[#allocation2 + $0xbf0] sm:$0xff]  ;;  %v11138_v1 = vld [vmem:[#allocation2 + $0xc00] sm:$0xff] }
 0xe13   :  { %11675 = vmatprep.subr.bf16.mxu0 %v11353_v52  ;;  %11757 = vmatprep.subr.bf16.mxu1 %v11355_v4  ;;  %v11148_v52 = vld [vmem:[#allocation2 + $0xc50] sm:$0xff]  ;;  %v11237_v4 = vld [vmem:[#allocation2 + $0xf18] sm:$0xff] }
 0xe16   :  { %11676 = vmatpush1.bf16.msra.mxu0 %v11352_v7  ;;  %11758 = vmatpush1.bf16.msra.mxu1 %v11354_v9  ;;  %v11147_v7 = vld [vmem:[#allocation2 + $0xc48] sm:$0xff]  ;;  %v11149_v9 = vld [vmem:[#allocation2 + $0xc58] sm:$0xff] }
 0xe17   :  { %11677 = vmatprep.subr.bf16.mxu0 %v11364_v34  ;;  %11759 = vmatprep.subr.bf16.mxu1 %v11366_v27  ;;  %v11159_v34 = vld [vmem:[#allocation2 + $0xca8] sm:$0xff]  ;;  %v11248_v27 = vld [vmem:[#allocation2 + $0xf70] sm:$0xff] }
 0xe1a   :  { %11678 = vmatpush1.bf16.msra.mxu0 %v11363_v10  ;;  %11760 = vmatpush1.bf16.msra.mxu1 %v11365_v12  ;;  %v11158_v10 = vld [vmem:[#allocation2 + $0xca0] sm:$0xff]  ;;  %v11160_v12 = vld [vmem:[#allocation2 + $0xcb0] sm:$0xff] }
 0xe1b   :  { %11679 = vmatprep.subr.bf16.mxu0 %v11375_v13  ;;  %11761 = vmatprep.subr.bf16.mxu1 %v11377_v15  ;;  %v11170_v13 = vld [vmem:[#allocation2 + $0xd00] sm:$0xff]  ;;  %v11259_v15 = vld [vmem:[#allocation2 + $0xfc8] sm:$0xff] }
 0xe1e   :  { %11680 = vmatpush1.bf16.msra.mxu0 %v11374_v16  ;;  %11762 = vmatpush1.bf16.msra.mxu1 %v11376_v18  ;;  %v11169_v16 = vld [vmem:[#allocation2 + $0xcf8] sm:$0xff]  ;;  %v11171_v18 = vld [vmem:[#allocation2 + $0xd08] sm:$0xff] }
 0xe1f   :  { %11681 = vmatprep.subr.bf16.mxu0 %v11386_v20  ;;  %11763 = vmatprep.subr.bf16.mxu1 %v11388_v11  ;;  %v11181_v20 = vld [vmem:[#allocation2 + $0xd58] sm:$0xff]  ;;  %v11270_v11 = vld [vmem:[#allocation2 + $0x1020] sm:$0xff] }
 0xe22   :  { %11682 = vmatpush1.bf16.msra.mxu0 %v11385_v17  ;;  %11764 = vmatpush1.bf16.msra.mxu1 %v11387_v21  ;;  %v11180_v17 = vld [vmem:[#allocation2 + $0xd50] sm:$0xff]  ;;  %v11182_v21 = vld [vmem:[#allocation2 + $0xd60] sm:$0xff] }
 0xe23   :  { %11683 = vmatprep.subr.bf16.mxu0 %v11397_v26  ;;  %11765 = vmatprep.subr.bf16.mxu1 %v11399_v22  ;;  %v11192_v26 = vld [vmem:[#allocation2 + $0xdb0] sm:$0xff]  ;;  %v11281_v22 = vld [vmem:[#allocation2 + $0x1078] sm:$0xff] }
 0xe26   :  { %11684 = vmatpush1.bf16.msra.mxu0 %v11396_v25  ;;  %11766 = vmatpush1.bf16.msra.mxu1 %v11398_v23  ;;  %v11191_v25 = vld [vmem:[#allocation2 + $0xda8] sm:$0xff]  ;;  %v11193_v23 = vld [vmem:[#allocation2 + $0xdb8] sm:$0xff] }
 0xe27   :  { %11685 = vmatprep.subr.bf16.mxu0 %v11408_v37  ;;  %11767 = vmatprep.subr.bf16.mxu1 %v11410_v24  ;;  %v11203_v37 = vld [vmem:[#allocation2 + $0xe08] sm:$0xff]  ;;  %v11380_v24 = vld [vmem:[#allocation2 + $0x1390] sm:$0xff] }
 0xe2a   :  { %11686 = vmatpush1.bf16.msra.mxu0 %v11407_v39  ;;  %11768 = vmatpush1.bf16.msra.mxu1 %v11409_v29  ;;  %v11202_v39 = vld [vmem:[#allocation2 + $0xe00] sm:$0xff]  ;;  %v11292_v29 = vld [vmem:[#allocation2 + $0x10d0] sm:$0xff] }
 0xe2b   :  { %11687 = vmatprep.subr.bf16.mxu0 %v11419_v43  ;;  %11769 = vmatprep.subr.bf16.mxu1 %v11421_v44  ;;  %v11214_v43 = vld [vmem:[#allocation2 + $0xe60] sm:$0xff]  ;;  %v11391_v44 = vld [vmem:[#allocation2 + $0x13e8] sm:$0xff] }
 0xe2e   :  { %11688 = vmatpush1.bf16.msra.mxu0 %v11418_v48  ;;  %11770 = vmatpush1.bf16.msra.mxu1 %v11420_v14  ;;  %v11213_v48 = vld [vmem:[#allocation2 + $0xe58] sm:$0xff]  ;;  %v11303_v14 = vld [vmem:[#allocation2 + $0x1128] sm:$0xff] }
 0xe2f   :  { %11689 = vmatprep.subr.bf16.mxu0 %v11430_v50  ;;  %11771 = vmatprep.subr.bf16.mxu1 %v11432_v53  ;;  %v11225_v50 = vld [vmem:[#allocation2 + $0xeb8] sm:$0xff]  ;;  %v11402_v53 = vld [vmem:[#allocation2 + $0x1440] sm:$0xff] }
 0xe32   :  { %11690 = vmatpush1.bf16.msra.mxu0 %v11429_v54  ;;  %11772 = vmatpush1.bf16.msra.mxu1 %v11431_v28  ;;  %v11224_v54 = vld [vmem:[#allocation2 + $0xeb0] sm:$0xff]  ;;  %v11314_v28 = vld [vmem:[#allocation2 + $0x1180] sm:$0xff] }
 0xe33   :  { %11691 = vmatprep.subr.bf16.mxu0 %v11441_v35  ;;  %11773 = vmatprep.subr.bf16.mxu1 %v11443_v56  ;;  %v11236_v35 = vld [vmem:[#allocation2 + $0xf10] sm:$0xff]  ;;  %v11413_v56 = vld [vmem:[#allocation2 + $0x1498] sm:$0xff] }
 0xe36   :  { %11692 = vmatpush1.bf16.msra.mxu0 %v11440_v2  ;;  %11774 = vmatpush1.bf16.msra.mxu1 %v11442_v59  ;;  %v11235_v2 = vld [vmem:[#allocation2 + $0xf08] sm:$0xff]  ;;  %v11325_v59 = vld [vmem:[#allocation2 + $0x11d8] sm:$0xff] }
 0xe37   :  { %11693 = vmatprep.subr.bf16.mxu0 %v11452_v57  ;;  %11775 = vmatprep.subr.bf16.mxu1 %v11454_v36  ;;  %v11247_v57 = vld [vmem:[#allocation2 + $0xf68] sm:$0xff]  ;;  %v11424_v36 = vld [vmem:[#allocation2 + $0x14f0] sm:$0xff] }
 0xe3a   :  { %11694 = vmatpush1.bf16.msra.mxu0 %v11451_v58  ;;  %11776 = vmatpush1.bf16.msra.mxu1 %v11453_v51  ;;  %v11246_v58 = vld [vmem:[#allocation2 + $0xf60] sm:$0xff]  ;;  %v11336_v51 = vld [vmem:[#allocation2 + $0x1230] sm:$0xff] }
 0xe3b   :  { %11786 = vmatprep.subr.bf16.mxu0 %v11115_v31  ;;  %14973 = vmatprep.subr.bf16.mxu1 %v11204_v60  ;;  %v11258_v31 = vld [vmem:[#allocation2 + $0xfc0] sm:$0xff]  ;;  %v11435_v60 = vld [vmem:[#allocation2 + $0x1548] sm:$0xff] }
 0xe3d   :  { %11696 = vmatmul.mubr.bf16.vlgmr.msra.gmra.mrb[32].mxu0 %v17903_v38  ;;  %11778 = vmatmul.mubr.bf16.vlgmr.msra.gmra.mrb[32].mxu1 %v17903_v38 }
 0xe3e   :  { %11787 = vmatpush1.bf16.msra.mxu0 %v11114_v55  ;;  %14974 = vmatpush3.bf16.msra.mxu1 %v11116_v61  ;;  %v11257_v55 = vld [vmem:[#allocation2 + $0xfb8] sm:$0xff]  ;;  %v11347_v61 = vld [vmem:[#allocation2 + $0x1288] sm:$0xff] }
 0xe3f   :  { %11788 = vmatprep.subr.bf16.mxu0 %v11126_v42  ;;  %14975 = vmatprep.subr.bf16.mxu1 %v11215_v33  ;;  %v11269_v42 = vld [vmem:[#allocation2 + $0x1018] sm:$0xff]  ;;  %v11446_v33 = vld [vmem:[#allocation2 + $0x15a0] sm:$0xff] }
 0xe40   :  { %11900 = vmatprep.mubr.bf16.mxu1 %v17905_v40  ;;  %11818 = vmatprep.mubr.bf16.mxu0 %v17905_v40 }
 0xe42   :  { %11789 = vmatpush1.bf16.msra.mxu0 %v11125_v62  ;;  %14976 = vmatpush3.bf16.msra.mxu1 %v11127_v63  ;;  %v11268_v62 = vld [vmem:[#allocation2 + $0x1010] sm:$0xff]  ;;  %v11358_v63 = vld [vmem:[#allocation2 + $0x12e0] sm:$0xff] }
 0xe43   :  { %11790 = vmatprep.subr.bf16.mxu0 %v11137_v0  ;;  %14977 = vmatprep.subr.bf16.mxu1 %v11226_v32  ;;  %v11280_v0 = vld [vmem:[#allocation2 + $0x1070] sm:$0xff]  ;;  %v11457_v32 = vld [vmem:[#allocation2 + $0x15f8] sm:$0xff] }
 0xe46   :  { %11791 = vmatpush1.bf16.msra.mxu0 %v11136_v49  ;;  %14978 = vmatpush3.bf16.msra.mxu1 %v11138_v1  ;;  %v11279_v49 = vld [vmem:[#allocation2 + $0x1068] sm:$0xff]  ;;  %v11369_v1 = vld [vmem:[#allocation2 + $0x1338] sm:$0xff] }
 0xe47   :  { %11792 = vmatprep.subr.bf16.mxu0 %v11148_v52  ;;  %14979 = vmatprep.subr.bf16.mxu1 %v11237_v4  ;;  %v11291_v52 = vld [vmem:[#allocation2 + $0x10c8] sm:$0xff]  ;;  %v11290_v4 = vld [vmem:[#allocation2 + $0x10c0] sm:$0xff] }
 0xe4a   :  { %11793 = vmatpush1.bf16.msra.mxu0 %v11147_v7  ;;  %14980 = vmatpush3.bf16.msra.mxu1 %v11149_v9  ;;  %v11302_v7 = vld [vmem:[#allocation2 + $0x1120] sm:$0xff]  ;;  %v11301_v9 = vld [vmem:[#allocation2 + $0x1118] sm:$0xff] }
 0xe4b   :  { %11794 = vmatprep.subr.bf16.mxu0 %v11159_v34  ;;  %14981 = vmatprep.subr.bf16.mxu1 %v11248_v27  ;;  %v11313_v34 = vld [vmem:[#allocation2 + $0x1178] sm:$0xff]  ;;  %v11312_v27 = vld [vmem:[#allocation2 + $0x1170] sm:$0xff] }
 0xe4e   :  { %11795 = vmatpush1.bf16.msra.mxu0 %v11158_v10  ;;  %14982 = vmatpush3.bf16.msra.mxu1 %v11160_v12  ;;  %v11324_v10 = vld [vmem:[#allocation2 + $0x11d0] sm:$0xff]  ;;  %v11323_v12 = vld [vmem:[#allocation2 + $0x11c8] sm:$0xff] }
 0xe4f   :  { %11796 = vmatprep.subr.bf16.mxu0 %v11170_v13  ;;  %14983 = vmatprep.subr.bf16.mxu1 %v11259_v15  ;;  %v11335_v13 = vld [vmem:[#allocation2 + $0x1228] sm:$0xff]  ;;  %v11334_v15 = vld [vmem:[#allocation2 + $0x1220] sm:$0xff] }
 0xe52   :  { %11797 = vmatpush1.bf16.msra.mxu0 %v11169_v16  ;;  %14984 = vmatpush3.bf16.msra.mxu1 %v11171_v18  ;;  %v11346_v16 = vld [vmem:[#allocation2 + $0x1280] sm:$0xff]  ;;  %v11345_v18 = vld [vmem:[#allocation2 + $0x1278] sm:$0xff] }
 0xe53   :  { %11798 = vmatprep.subr.bf16.mxu0 %v11181_v20  ;;  %14985 = vmatprep.subr.bf16.mxu1 %v11270_v11 }
 0xe56   :  { %11799 = vmatpush1.bf16.msra.mxu0 %v11180_v17  ;;  %14986 = vmatpush3.bf16.msra.mxu1 %v11182_v21  ;;  %v11357_v17 = vld [vmem:[#allocation2 + $0x12d8] sm:$0xff] }
 0xe57   :  { %11800 = vmatprep.subr.bf16.mxu0 %v11192_v26  ;;  %14987 = vmatprep.subr.bf16.mxu1 %v11281_v22 }
 0xe5a   :  { %11801 = vmatpush1.bf16.msra.mxu0 %v11191_v25  ;;  %14988 = vmatpush3.bf16.msra.mxu1 %v11193_v23 }
 0xe5b   :  { %11802 = vmatprep.subr.bf16.mxu0 %v11203_v37  ;;  %14995 = vmatprep.subr.bf16.mxu1 %v11380_v24 }
 0xe5d   :  { %11901 = vmatmul.mubr.bf16.vlgmr.msra.gmra.mrb[36].mxu1 %v17901_v19 }
 0xe5e   :  { %11803 = vmatpush1.bf16.msra.mxu0 %v11202_v39  ;;  %14996 = vmatpush3.bf16.msra.mxu1 %v11292_v29 }
 0xe5f   :  { %11804 = vmatprep.subr.bf16.mxu0 %v11214_v43  ;;  %14997 = vmatprep.subr.bf16.mxu1 %v11391_v44 }
 0xe60   :  { %11940 = vmatprep.mubr.bf16.mxu1 %v17907_v41 }
 0xe62   :  { %11805 = vmatpush1.bf16.msra.mxu0 %v11213_v48  ;;  %14998 = vmatpush3.bf16.msra.mxu1 %v11303_v14  ;;  %v11356_v14 = vld [vmem:[#allocation2 + $0x12d0] sm:$0xff] }
 0xe63   :  { %11806 = vmatprep.subr.bf16.mxu0 %v11225_v50  ;;  %14999 = vmatprep.subr.bf16.mxu1 %v11402_v53 }
 0xe66   :  { %11807 = vmatpush1.bf16.msra.mxu0 %v11224_v54  ;;  %15000 = vmatpush3.bf16.msra.mxu1 %v11314_v28  ;;  %v11368_v54 = vld [vmem:[#allocation2 + $0x1330] sm:$0xff] }
 0xe67   :  { %11808 = vmatprep.subr.bf16.mxu0 %v11236_v35  ;;  %15001 = vmatprep.subr.bf16.mxu1 %v11413_v56 }
 0xe6a   :  { %11809 = vmatpush1.bf16.msra.mxu0 %v11235_v2  ;;  %15002 = vmatpush3.bf16.msra.mxu1 %v11325_v59 }
 0xe6b   :  { %11810 = vmatprep.subr.bf16.mxu0 %v11247_v57  ;;  %15003 = vmatprep.subr.bf16.mxu1 %v11424_v36  ;;  %v11367_v36 = vld [vmem:[#allocation2 + $0x1328] sm:$0xff] }
 0xe6e   :  { %11811 = vmatpush1.bf16.msra.mxu0 %v11246_v58  ;;  %15004 = vmatpush3.bf16.msra.mxu1 %v11336_v51 }
 0xe6f   :  { %11812 = vmatprep.subr.bf16.mxu0 %v11258_v31  ;;  %15005 = vmatprep.subr.bf16.mxu1 %v11435_v60  ;;  %v11379_v31 = vld [vmem:[#allocation2 + $0x1388] sm:$0xff] }
 0xe72   :  { %11813 = vmatpush1.bf16.msra.mxu0 %v11257_v55  ;;  %15006 = vmatpush3.bf16.msra.mxu1 %v11347_v61 }
 0xe73   :  { %11814 = vmatprep.subr.bf16.mxu0 %v11269_v42  ;;  %15007 = vmatprep.subr.bf16.mxu1 %v11446_v33 }
 0xe76   :  { %11815 = vmatpush1.bf16.msra.mxu0 %v11268_v62  ;;  %15008 = vmatpush3.bf16.msra.mxu1 %v11358_v63  ;;  %v11378_v63 = vld [vmem:[#allocation2 + $0x1380] sm:$0xff] }
 0xe77   :  { %11816 = vmatprep.subr.bf16.mxu0 %v11280_v0  ;;  %15009 = vmatprep.subr.bf16.mxu1 %v11457_v32 }
 0xe7a   :  { %11817 = vmatpush1.bf16.msra.mxu0 %v11279_v49  ;;  %15010 = vmatpush3.bf16.msra.mxu1 %v11369_v1  ;;  %v11390_v49 = vld [vmem:[#allocation2 + $0x13e0] sm:$0xff] }
 0xe7b   :  { %11827 = vmatprep.subr.bf16.mxu0 %v11291_v52 }
 0xe7d   :  { %11941 = vmatmul.mubr.bf16.vlgmr.msra.gmra.mrb[40].mxu1 %v17903_v38  ;;  %11819 = vmatmul.mubr.bf16.vlgmr.msra.gmra.mrb[36].mxu0 %v17901_v19 }
 0xe7e   :  { %11828 = vmatpush1.bf16.msra.mxu0 %v11290_v4  ;;  %11859 = vmatprep.mubr.bf16.mxu0 %v17907_v41 }
 0xe7f   :  { %11829 = vmatprep.subr.bf16.mxu0 %v11302_v7 }
 0xe82   :  { %11830 = vmatpush1.bf16.msra.mxu0 %v11301_v9 }
 0xe83   :  { %11831 = vmatprep.subr.bf16.mxu0 %v11313_v34 }
 0xe86   :  { %11832 = vmatpush1.bf16.msra.mxu0 %v11312_v27  ;;  %v11389_v27 = vld [vmem:[#allocation2 + $0x13d8] sm:$0xff] }
 0xe87   :  { %11833 = vmatprep.subr.bf16.mxu0 %v11324_v10 }
 0xe8a   :  { %11834 = vmatpush1.bf16.msra.mxu0 %v11323_v12 }
 0xe8b   :  { %11835 = vmatprep.subr.bf16.mxu0 %v11335_v13  ;;  %v11401_v13 = vld [vmem:[#allocation2 + $0x1438] sm:$0xff] }
 0xe8e   :  { %11836 = vmatpush1.bf16.msra.mxu0 %v11334_v15 }
 0xe8f   :  { %11837 = vmatprep.subr.bf16.mxu0 %v11346_v16 }
 0xe90   :  { %v11533_v20 = vpop.f32.mrb[28].mxu0  ;;  %v11615_v11 = vpop.f32.mrb[28].mxu1 }
 0xe91   :  { %v11952_v21 = vrot.slane %v11533_v20, 4  ;;  %v11964_v26 = vrot.slane %v11615_v11, 4  ;;  %v11535_v22 = vpop.f32.mrb[29].mxu0  ;;  %v11617_v25 = vpop.f32.mrb[29].mxu1 }
 0xe92   :  { %v11958_v23 = vrot.slane %v11535_v22, 4  ;;  %v11970_v37 = vrot.slane %v11617_v25, 4  ;;  %v11537_v24 = vpop.f32.mrb[30].mxu0  ;;  %v11619_v39 = vpop.f32.mrb[30].mxu1  ;;  %11838 = vmatpush1.bf16.msra.mxu0 %v11345_v18 }
 0xe93   :  { %v11953_v29 = vadd.f32 %v11952_v21, %v11533_v20  ;;  %v11965_v43 = vadd.f32 %v11964_v26, %v11615_v11  ;;  %v11538_v44 = vpop.f32.mrb[31].mxu0  ;;  %v11620_v48 = vpop.f32.mrb[31].mxu1  ;;  %11839 = vmatprep.subr.bf16.mxu0 %v11357_v17  ;;  %v11400_v21 = vld [vmem:[#allocation2 + $0x1430] sm:$0xff] }
 0xe94   :  { %v11959_v50 = vadd.f32 %v11958_v23, %v11535_v22  ;;  %v11971_v53 = vadd.f32 %v11970_v37, %v11617_v25  ;;  %v11411_v44 = vld [vmem:[#allocation2 + $0x1488] sm:$0xff] }
 0xe95   :  { %v11954_v28 = vrot.slane %v11953_v29, 2  ;;  %v11966_v35 = vrot.slane %v11965_v43, 2 }
 0xe96   :  { %v11960_v56 = vrot.slane %v11959_v50, 2  ;;  %v11972_v2 = vrot.slane %v11971_v53, 2  ;;  %11840 = vmatpush1.bf16.msra.mxu0 %v11356_v14 }
 0xe97   :  { %v11955_v59 = vadd.f32 %v11954_v28, %v11953_v29  ;;  %v11967_v57 = vadd.f32 %v11966_v35, %v11965_v43  ;;  %11841 = vmatprep.subr.bf16.mxu0 %v11368_v54 }
 0xe98   :  { %v11961_v58 = vadd.f32 %v11960_v56, %v11959_v50  ;;  %v11973_v51 = vadd.f32 %v11972_v2, %v11971_v53  ;;  %v11423_v50 = vld [vmem:[#allocation2 + $0x14e8] sm:$0xff] }
 0xe99   :  { %v11956_v60 = vrot.slane %v11955_v59, 1  ;;  %v11968_v55 = vrot.slane %v11967_v57, 1 }
 0xe9a   :  { %v11962_v61 = vrot.slane %v11961_v58, 1  ;;  %v11974_v42 = vrot.slane %v11973_v51, 1  ;;  %11842 = vmatpush1.bf16.msra.mxu0 %v11367_v36 }
 0xe9b   :  { %v11957_v33 = vadd.f32 %v11956_v60, %v11955_v59  ;;  %v11969_v62 = vadd.f32 %v11968_v55, %v11967_v57  ;;  %11843 = vmatprep.subr.bf16.mxu0 %v11379_v31  ;;  %v11422_v59 = vld [vmem:[#allocation2 + $0x14e0] sm:$0xff] }
 0xe9c   :  { %v11963_v0 = vadd.f32 %v11962_v61, %v11961_v58  ;;  %v11975_v32 = vadd.f32 %v11974_v42, %v11973_v51  ;;  %v11434_v58 = vld [vmem:[#allocation2 + $0x1540] sm:$0xff] }
 0xe9d   :  { %v12018_v1 = vmul.f32 0.125, %v11957_v33  ;;  %v12020_v52 = vmul.f32 0.125, %v11969_v62  ;;  %v11433_v33 = vld [vmem:[#allocation2 + $0x1538] sm:$0xff] }
 0xe9e   :  { %v12019_v4 = vmul.f32 0.125, %v11963_v0  ;;  %v12021_v7 = vmul.f32 0.125, %v11975_v32  ;;  %11844 = vmatpush1.bf16.msra.mxu0 %v11378_v63  ;;  %v11445_v0 = vld [vmem:[#allocation2 + $0x1598] sm:$0xff] }
 0xe9f   :  { %v18058_v9 = vsub.f32 %v11533_v20, %v12018_v1  ;;  %v18060_v34 = vsub.f32 %v11615_v11, %v12020_v52  ;;  %11845 = vmatprep.subr.bf16.mxu0 %v11390_v49 }
 0xea0   :  { %v18062_v10 = vsub.f32 %v11535_v22, %v12019_v4  ;;  %v18064_v12 = vsub.f32 %v11617_v25, %v12021_v7  ;;  %v11412_v25 = vld [vmem:[#allocation2 + $0x1490] sm:$0xff] }
 0xea1   :  { %v12040_v15 = vmul.f32 %v18058_v9, %v18058_v9  ;;  %v12042_v16 = vmul.f32 %v18060_v34, %v18060_v34  ;;  %v11444_v4 = vld [vmem:[#allocation2 + $0x1590] sm:$0xff] }
 0xea2   :  { %v12041_v18 = vmul.f32 %v18062_v10, %v18062_v10  ;;  %v12043_v20 = vmul.f32 %v18064_v12, %v18064_v12  ;;  %11846 = vmatpush1.bf16.msra.mxu0 %v11389_v27  ;;  %v11456_v7 = vld [vmem:[#allocation2 + $0x15f0] sm:$0xff]  ;;  %v11455_v27 = vld [vmem:[#allocation2 + $0x15e8] sm:$0xff] }
 0xea3   :  { %v12051_v11 = vrot.slane %v12040_v15, 4  ;;  %v12063_v17 = vrot.slane %v12042_v16, 4  ;;  %11847 = vmatprep.subr.bf16.mxu0 %v11401_v13  ;;  %v18074_v13 = vld [vmem:[#allocation16 + $0x18] sm:$0xff] }
 0xea4   :  { %v12057_v26 = vrot.slane %v12041_v18, 4  ;;  %v12069_v22 = vrot.slane %v12043_v20, 4 }
 0xea5   :  { %v12052_v23 = vadd.f32 %v12051_v11, %v12040_v15  ;;  %v12064_v37 = vadd.f32 %v12063_v17, %v12042_v16  ;;  %v18076_v15 = vld [vmem:[#allocation17 + $0x18] sm:$0xff]  ;;  %v12166_v16 = vrot.slane %v18074_v13, %v17863_v3 }
 0xea6   :  { %v12058_v24 = vadd.f32 %v12057_v26, %v12041_v18  ;;  %v12070_v39 = vadd.f32 %v12069_v22, %v12043_v20  ;;  %11848 = vmatpush1.bf16.msra.mxu0 %v11400_v21  ;;  %v12174_v20 = vrot.slane %v18074_v13, %v17866_v5  ;;  %v12234_v21 = vrot.slane %v18076_v15, %v17863_v3 }
 0xea7   :  { %v12053_v29 = vrot.slane %v12052_v23, 2  ;;  %v12065_v43 = vrot.slane %v12064_v37, 2  ;;  %11849 = vmatprep.subr.bf16.mxu0 %v11412_v25  ;;  %v12170_v26 = vrot.slane %v18074_v13, %v17869_v6 }
 0xea8   :  { %v12059_v48 = vrot.slane %v12058_v24, 2  ;;  %v12071_v14 = vrot.slane %v12070_v39, 2 }
 0xea9   :  { %v12054_v53 = vadd.f32 %v12053_v29, %v12052_v23  ;;  %v12066_v54 = vadd.f32 %v12065_v43, %v12064_v37  ;;  %v12242_v23 = vrot.slane %v18076_v15, %v17866_v5  ;;  %v12178_v37 = vrot.slane %v18074_v13, %v17872_v8 }
 0xeaa   :  { %v12060_v28 = vadd.f32 %v12059_v48, %v12058_v24  ;;  %v12072_v35 = vadd.f32 %v12071_v14, %v12070_v39  ;;  %11850 = vmatpush1.bf16.msra.mxu0 %v11411_v44  ;;  %v18096_v43 = vstv %s14902_s0 }
 0xeab   :  { %v12055_v56 = vrot.slane %v12054_v53, 1  ;;  %v12067_v2 = vrot.slane %v12066_v54, 1  ;;  %11851 = vmatprep.subr.bf16.mxu0 %v11423_v50 }
 0xeac   :  { %v12061_v57 = vrot.slane %v12060_v28, 1  ;;  %v12073_v36 = vrot.slane %v12072_v35, 1 }
 0xead   :  { %v12056_v51 = vadd.f32 %v12055_v56, %v12054_v53  ;;  %v12068_v31 = vadd.f32 %v12067_v2, %v12066_v54 }
 0xeae   :  { %v12062_v60 = vadd.f32 %v12061_v57, %v12060_v28  ;;  %v12074_v55 = vadd.f32 %v12073_v36, %v12072_v35  ;;  %11852 = vmatpush1.bf16.msra.mxu0 %v11422_v59 }
 0xeaf   :  { %v12117_v61 = vmul.f32 0.125, %v12056_v51  ;;  %v12119_v42 = vmul.f32 0.125, %v12068_v31  ;;  %11853 = vmatprep.subr.bf16.mxu0 %v11434_v58 }
 0xeb0   :  { %v12118_v62 = vmul.f32 0.125, %v12062_v60  ;;  %v12120_v63 = vmul.f32 0.125, %v12074_v55 }
 0xeb1   :  { %v12128_v32 = vadd.f32 1e-05, %v12117_v61  ;;  %v12130_v49 = vadd.f32 1e-05, %v12119_v42 }
 0xeb2   :  { %v12129_v1 = vadd.f32 1e-05, %v12118_v62  ;;  %v12131_v52 = vadd.f32 1e-05, %v12120_v63  ;;  %11854 = vmatpush1.bf16.msra.mxu0 %v11433_v33 }
 0xeb3   :  { %17210 = vrsqrt.f32 %v12128_v32  ;;  %11855 = vmatprep.subr.bf16.mxu0 %v11445_v0 }
 0xeb4   :  { %17212 = vrsqrt.f32 %v12130_v49 }
 0xeb5   :  { %17214 = vrsqrt.f32 %v12129_v1 }
 0xeb6   :  { %17216 = vrsqrt.f32 %v12131_v52  ;;  %11856 = vmatpush1.bf16.msra.mxu0 %v11444_v4 }
 0xeb7   :  { %11857 = vmatprep.subr.bf16.mxu0 %v11456_v7 }
 0xeba   :  { %11858 = vmatpush1.bf16.msra.mxu0 %v11455_v27 }
 0xebd   :  { %v17211_v18 = vpop.eup %17210  ;;  %11860 = vmatmul.mubr.bf16.vlgmr.msra.gmra.mrb[36].mxu0 %v17903_v38 }
 0xebe   :  { %v17213_v11 = vpop.eup %17212  ;;  %v12150_v17 = vmul.f32 %v17211_v18, %v18058_v9  ;;  %v12238_v9 = vrot.slane %v18076_v15, %v17869_v6 }
 0xebf   :  { %v17215_v22 = vpop.eup %17214  ;;  %v12152_v25 = vmul.f32 %v17213_v11, %v18060_v34  ;;  %v12246_v34 = vrot.slane %v18076_v15, %v17872_v8 }
 0xec0   :  { %v17217_v24 = vpop.eup %17216  ;;  %v12218_v39 = vmul.f32 %v12166_v16, %v12150_v17  ;;  %v12151_v29 = vmul.f32 %v17215_v22, %v18062_v10 }
 0xec1   :  { %v12220_v44 = vmul.f32 %v12174_v20, %v12152_v25  ;;  %v12153_v48 = vmul.f32 %v17217_v24, %v18064_v12 }
 0xec2   :  { %v12286_v14 = vadd.f32 %v12234_v21, %v12218_v39  ;;  %v12219_v50 = vmul.f32 %v12170_v26, %v12151_v29 }
 0xec3   :  { %v12288_v53 = vadd.f32 %v12242_v23, %v12220_v44  ;;  %v12221_v54 = vmul.f32 %v12178_v37, %v12153_v48 }
 0xec4   :  { %vm12298_vm1 = vcmp.gt.f32.partialorder %v12286_v14, 0.0  ;;  %v12310_v28 = vmul.f32 %v18096_v43, %v12286_v14  ;;  %v12287_v35 = vadd.f32 %v12238_v9, %v12219_v50 }
 0xec5   :  { %vm12300_vm2 = vcmp.gt.f32.partialorder %v12288_v53, 0.0  ;;  %v12312_v10 = vmul.f32 %v18096_v43, %v12288_v53  ;;  %v12289_v56 = vadd.f32 %v12246_v34, %v12221_v54 }
 0xec6   :  { %v12321_v2 = vsel %vm12298_vm1, %v12286_v14, %v12310_v28  ;;  %vm12299_vm3 = vcmp.gt.f32.partialorder %v12287_v35, 0.0  ;;  %v12311_v59 = vmul.f32 %v18096_v43, %v12287_v35 }
 0xec7   :  { %12332 = vst [vmem:[#allocation21 + $0x58] sm:$0xff] %v12321_v2  ;;  %v12323_v12 = vsel %vm12300_vm2, %v12288_v53, %v12312_v10  ;;  %vm12301_vm4 = vcmp.gt.f32.partialorder %v12289_v56, 0.0  ;;  %v12313_v57 = vmul.f32 %v18096_v43, %v12289_v56 }
 0xec8   :  { %12334 = vst [vmem:[#allocation21 + $0x68] sm:$0xff] %v12323_v12  ;;  %v12322_v36 = vsel %vm12299_vm3, %v12287_v35, %v12311_v59 }
 0xec9   :  { %12333 = vst [vmem:[#allocation21 + $0x60] sm:$0xff] %v12322_v36  ;;  %v12324_v58 = vsel %vm12301_vm4, %v12289_v56, %v12313_v57 }
 0xeca   :  { %12335 = vst [vmem:[#allocation21 + $0x70] sm:$0xff] %v12324_v58 }
 0xf10   :  { %v11697_v51 = vpop.f32.mrb[32].mxu0  ;;  %v11779_v31 = vpop.f32.mrb[32].mxu1 }
 0xf11   :  { %v11976_v60 = vrot.slane %v11697_v51, 4  ;;  %v11988_v55 = vrot.slane %v11779_v31, 4  ;;  %v11699_v61 = vpop.f32.mrb[33].mxu0  ;;  %v11781_v42 = vpop.f32.mrb[33].mxu1 }
 0xf12   :  { %v11982_v33 = vrot.slane %v11699_v61, 4  ;;  %v11994_v62 = vrot.slane %v11781_v42, 4  ;;  %v11701_v63 = vpop.f32.mrb[34].mxu0  ;;  %v11783_v0 = vpop.f32.mrb[34].mxu1 }
 0xf13   :  { %v11977_v32 = vadd.f32 %v11976_v60, %v11697_v51  ;;  %v11989_v49 = vadd.f32 %v11988_v55, %v11779_v31  ;;  %v11702_v1 = vpop.f32.mrb[35].mxu0  ;;  %v11784_v52 = vpop.f32.mrb[35].mxu1 }
 0xf14   :  { %v11983_v4 = vadd.f32 %v11982_v33, %v11699_v61  ;;  %v11995_v7 = vadd.f32 %v11994_v62, %v11781_v42 }
 0xf15   :  { %v11978_v27 = vrot.slane %v11977_v32, 2  ;;  %v11990_v16 = vrot.slane %v11989_v49, 2 }
 0xf16   :  { %v11984_v18 = vrot.slane %v11983_v4, 2  ;;  %v11996_v20 = vrot.slane %v11995_v7, 2 }
 0xf17   :  { %v11979_v11 = vadd.f32 %v11978_v27, %v11977_v32  ;;  %v11991_v17 = vadd.f32 %v11990_v16, %v11989_v49 }
 0xf18   :  { %v11985_v21 = vadd.f32 %v11984_v18, %v11983_v4  ;;  %v11997_v26 = vadd.f32 %v11996_v20, %v11995_v7 }
 0xf19   :  { %v11980_v22 = vrot.slane %v11979_v11, 1  ;;  %v11992_v25 = vrot.slane %v11991_v17, 1 }
 0xf1a   :  { %v11986_v23 = vrot.slane %v11985_v21, 1  ;;  %v11998_v37 = vrot.slane %v11997_v26, 1 }
 0xf1b   :  { %v11981_v24 = vadd.f32 %v11980_v22, %v11979_v11  ;;  %v11993_v39 = vadd.f32 %v11992_v25, %v11991_v17 }
 0xf1c   :  { %v11987_v29 = vadd.f32 %v11986_v23, %v11985_v21  ;;  %v11999_v9 = vadd.f32 %v11998_v37, %v11997_v26 }
 0xf1d   :  { %v12022_v44 = vmul.f32 0.125, %v11981_v24  ;;  %v12024_v48 = vmul.f32 0.125, %v11993_v39 }
 0xf1e   :  { %v12023_v34 = vmul.f32 0.125, %v11987_v29  ;;  %v12025_v14 = vmul.f32 0.125, %v11999_v9 }
 0xf1f   :  { %v12033_v50 = vsub.f32 %v11697_v51, %v12022_v44  ;;  %v12035_v53 = vsub.f32 %v11779_v31, %v12024_v48  ;;  %v12182_v44 = vrot.slane %v18074_v13, %v17988_v30 }
 0xf20   :  { %v12034_v54 = vsub.f32 %v11699_v61, %v12023_v34  ;;  %v12036_v28 = vsub.f32 %v11781_v42, %v12025_v14  ;;  %v12190_v34 = vrot.slane %v18074_v13, %v17991_v45 }
 0xf21   :  { %v12044_v35 = vmul.f32 %v12033_v50, %v12033_v50  ;;  %v12046_v10 = vmul.f32 %v12035_v53, %v12035_v53 }
 0xf22   :  { %v12045_v56 = vmul.f32 %v12034_v54, %v12034_v54  ;;  %v12047_v2 = vmul.f32 %v12036_v28, %v12036_v28 }
 0xf23   :  { %v12075_v59 = vrot.slane %v12044_v35, 4  ;;  %v12087_v12 = vrot.slane %v12046_v10, 4 }
 0xf24   :  { %v12081_v57 = vrot.slane %v12045_v56, 4  ;;  %v12093_v36 = vrot.slane %v12047_v2, 4 }
 0xf25   :  { %v12076_v58 = vadd.f32 %v12075_v59, %v12044_v35  ;;  %v12088_v60 = vadd.f32 %v12087_v12, %v12046_v10  ;;  %v12250_v10 = vrot.slane %v18076_v15, %v17988_v30  ;;  %v12258_v12 = vrot.slane %v18076_v15, %v17991_v45 }
 0xf26   :  { %v12082_v55 = vadd.f32 %v12081_v57, %v12045_v56  ;;  %v12094_v33 = vadd.f32 %v12093_v36, %v12047_v2  ;;  %v12186_v56 = vrot.slane %v18074_v13, %v17994_v46  ;;  %v12194_v57 = vrot.slane %v18074_v13, %v17997_v47 }
 0xf27   :  { %v12077_v62 = vrot.slane %v12076_v58, 2  ;;  %v12089_v63 = vrot.slane %v12088_v60, 2 }
 0xf28   :  { %v12083_v0 = vrot.slane %v12082_v55, 2  ;;  %v12095_v32 = vrot.slane %v12094_v33, 2 }
 0xf29   :  { %v12078_v51 = vadd.f32 %v12077_v62, %v12076_v58  ;;  %v12090_v31 = vadd.f32 %v12089_v63, %v12088_v60  ;;  %v12262_v62 = vrot.slane %v18076_v15, %v17997_v47 }
 0xf2a   :  { %v12084_v61 = vadd.f32 %v12083_v0, %v12082_v55  ;;  %v12096_v42 = vadd.f32 %v12095_v32, %v12094_v33 }
 0xf2b   :  { %v12079_v49 = vrot.slane %v12078_v51, 1  ;;  %v12091_v1 = vrot.slane %v12090_v31, 1 }
 0xf2c   :  { %v12085_v52 = vrot.slane %v12084_v61, 1  ;;  %v12097_v4 = vrot.slane %v12096_v42, 1 }
 0xf2d   :  { %v12080_v7 = vadd.f32 %v12079_v49, %v12078_v51  ;;  %v12092_v27 = vadd.f32 %v12091_v1, %v12090_v31 }
 0xf2e   :  { %v12086_v16 = vadd.f32 %v12085_v52, %v12084_v61  ;;  %v12098_v18 = vadd.f32 %v12097_v4, %v12096_v42 }
 0xf2f   :  { %v12121_v20 = vmul.f32 0.125, %v12080_v7  ;;  %v12123_v11 = vmul.f32 0.125, %v12092_v27 }
 0xf30   :  { %v12122_v17 = vmul.f32 0.125, %v12086_v16  ;;  %v12124_v21 = vmul.f32 0.125, %v12098_v18  ;;  %v14989_v26 = vpop.f32.mrb[36].mxu1 }
 0xf31   :  { %v12132_v22 = vadd.f32 1e-05, %v12121_v20  ;;  %v12134_v25 = vadd.f32 1e-05, %v12123_v11  ;;  %v14990_v23 = vpop.f32.mrb[37].mxu1 }
 0xf32   :  { %v12133_v37 = vadd.f32 1e-05, %v12122_v17  ;;  %v12135_v24 = vadd.f32 1e-05, %v12124_v21  ;;  %v14991_v39 = vadd.f32 %v14990_v23, %v14989_v26  ;;  %v14992_v29 = vpop.f32.mrb[38].mxu1 }
 0xf33   :  { %17218 = vrsqrt.f32 %v12132_v22  ;;  %v14993_v9 = vpop.f32.mrb[39].mxu1 }
 0xf34   :  { %17220 = vrsqrt.f32 %v12134_v25 }
 0xf35   :  { %17222 = vrsqrt.f32 %v12133_v37 }
 0xf36   :  { %17224 = vrsqrt.f32 %v12135_v24 }
 0xf3d   :  { %v17219_v48 = vpop.eup %17218 }
 0xf3e   :  { %v17221_v14 = vpop.eup %17220  ;;  %v12154_v35 = vmul.f32 %v17219_v48, %v12033_v50  ;;  %v12254_v50 = vrot.slane %v18076_v15, %v17994_v46 }
 0xf3f   :  { %v17223_v2 = vpop.eup %17222  ;;  %v12156_v59 = vmul.f32 %v17221_v14, %v12035_v53 }
 0xf40   :  { %v17225_v36 = vpop.eup %17224  ;;  %v12222_v58 = vmul.f32 %v12182_v44, %v12154_v35  ;;  %v12155_v60 = vmul.f32 %v17223_v2, %v12034_v54 }
 0xf41   :  { %v12224_v55 = vmul.f32 %v12190_v34, %v12156_v59  ;;  %v12157_v33 = vmul.f32 %v17225_v36, %v12036_v28 }
 0xf42   :  { %v12290_v63 = vadd.f32 %v12250_v10, %v12222_v58  ;;  %v12223_v0 = vmul.f32 %v12186_v56, %v12155_v60  ;;  %v11949_v10 = vld [vmem:[#allocation16 + $0x20] sm:$0x7] }
 0xf43   :  { %v12292_v53 = vadd.f32 %v12258_v12, %v12224_v55  ;;  %v12225_v32 = vmul.f32 %v12194_v57, %v12157_v33  ;;  %v12206_v56 = vrot.slane %v11949_v10, %v17866_v5 }
 0xf44   :  { %vm12302_vm5 = vcmp.gt.f32.partialorder %v12290_v63, 0.0  ;;  %v12314_v51 = vmul.f32 %v18096_v43, %v12290_v63  ;;  %v12291_v31 = vadd.f32 %v12254_v50, %v12223_v0 }
 0xf45   :  { %vm12304_vm6 = vcmp.gt.f32.partialorder %v12292_v53, 0.0  ;;  %v12316_v13 = vmul.f32 %v18096_v43, %v12292_v53  ;;  %v12293_v54 = vadd.f32 %v12262_v62, %v12225_v32 }
 0xf46   :  { %v12325_v61 = vsel %vm12302_vm5, %v12290_v63, %v12314_v51  ;;  %vm12303_vm7 = vcmp.gt.f32.partialorder %v12291_v31, 0.0  ;;  %v12315_v42 = vmul.f32 %v18096_v43, %v12291_v31 }
 0xf47   :  { %12336 = vst [vmem:[#allocation21 + $0x78] sm:$0xff] %v12325_v61  ;;  %v12327_v28 = vsel %vm12304_vm6, %v12292_v53, %v12316_v13  ;;  %vm12305_vm8 = vcmp.gt.f32.partialorder %v12293_v54, 0.0  ;;  %v12317_v15 = vmul.f32 %v18096_v43, %v12293_v54 }
 0xf48   :  { %12338 = vst [vmem:[#allocation21 + $0x88] sm:$0xff] %v12327_v28  ;;  %v12326_v49 = vsel %vm12303_vm7, %v12291_v31, %v12315_v42 }
 0xf49   :  { %12337 = vst [vmem:[#allocation21 + $0x80] sm:$0xff] %v12326_v49  ;;  %v12328_v1 = vsel %vm12305_vm8, %v12293_v54, %v12317_v15 }
 0xf4a   :  { %12339 = vst [vmem:[#allocation21 + $0x90] sm:$0xff] %v12328_v1 }
 0xf50   :  { %v15011_v52 = vpop.f32.mrb[40].mxu1 }
 0xf51   :  { %v15012_v4 = vpop.f32.mrb[41].mxu1 }
 0xf52   :  { %v15013_v7 = vadd.f32 %v15012_v4, %v15011_v52  ;;  %v15014_v27 = vpop.f32.mrb[42].mxu1 }
 0xf53   :  { %v15015_v16 = vpop.f32.mrb[43].mxu1 }
 0xf54   :  { %v11943_v18 = vadd.f32 %v15013_v7, %v14991_v39  ;;  %v18125_v39 = vld [vmem:[#allocation17 + $0x20] sm:$0x7] }
 0xf55   :  { %v12274_v12 = vrot.slane %v18125_v39, %v17866_v5 }
 0xf56   :  { %v12012_v20 = vrot.slane %v11943_v18, 4 }
 0xf58   :  { %v12013_v11 = vadd.f32 %v12012_v20, %v11943_v18 }
 0xf5a   :  { %v12014_v17 = vrot.slane %v12013_v11, 2 }
 0xf5c   :  { %v12015_v21 = vadd.f32 %v12014_v17, %v12013_v11 }
 0xf5e   :  { %v12016_v26 = vrot.slane %v12015_v21, 1 }
 0xf60   :  { %v12017_v22 = vadd.f32 %v12016_v26, %v12015_v21 }
 0xf62   :  { %v12028_v25 = vmul.f32 0.125, %v12017_v22 }
 0xf64   :  { %v12039_v23 = vsub.f32 %v11943_v18, %v12028_v25 }
 0xf66   :  { %v12050_v37 = vmul.f32 %v12039_v23, %v12039_v23 }
 0xf68   :  { %v12111_v24 = vrot.slane %v12050_v37, 4 }
 0xf6a   :  { %v12112_v29 = vadd.f32 %v12111_v24, %v12050_v37 }
 0xf6c   :  { %v12113_v9 = vrot.slane %v12112_v29, 2 }
 0xf6e   :  { %v12114_v44 = vadd.f32 %v12113_v9, %v12112_v29 }
 0xf70   :  { %v12115_v48 = vrot.slane %v12114_v44, 1 }
 0xf72   :  { %v12116_v34 = vadd.f32 %v12115_v48, %v12114_v44 }
 0xf74   :  { %v12127_v14 = vmul.f32 0.125, %v12116_v34  ;;  %v12198_v34 = vrot.slane %v11949_v10, %v17863_v3 }
 0xf76   :  { %v12138_v35 = vadd.f32 1e-05, %v12127_v14 }
 0xf78   :  { %17226 = vrsqrt.f32 %v12138_v35  ;;  %v12202_v35 = vrot.slane %v11949_v10, %v17869_v6 }
 0xf82   :  { %v17227_v2 = vpop.eup %17226 }
 0xf83   :  { %v12160_v59 = vmul.f32 %v17227_v2, %v12039_v23 }
 0xf85   :  { %v12228_v57 = vmul.f32 %v12206_v56, %v12160_v59  ;;  %v12266_v59 = vrot.slane %v18125_v39, %v17863_v3 }
 0xf87   :  { %v12296_v36 = vadd.f32 %v12274_v12, %v12228_v57  ;;  %v12270_v57 = vrot.slane %v18125_v39, %v17869_v6 }
 0xf89   :  { %vm12308_vm9 = vcmp.gt.f32.partialorder %v12296_v36, 0.0  ;;  %v12320_v58 = vmul.f32 %v18096_v43, %v12296_v36 }
 0xf8b   :  { %v12331_v60 = vsel %vm12308_vm9, %v12296_v36, %v12320_v58 }
 0xf8c   :  { %12342 = vst [vmem:[#allocation21 + $0xa8] sm:$0xff] %v12331_v60 }
 0xf90   :  { %v11861_v50 = vpop.f32.mrb[36].mxu0 }
 0xf91   :  { %v12000_v55 = vrot.slane %v11861_v50, 4  ;;  %v11863_v33 = vpop.f32.mrb[37].mxu0 }
 0xf92   :  { %v12006_v62 = vrot.slane %v11863_v33, 4  ;;  %v11865_v63 = vpop.f32.mrb[38].mxu0 }
 0xf93   :  { %v12001_v0 = vadd.f32 %v12000_v55, %v11861_v50  ;;  %v11866_v53 = vpop.f32.mrb[39].mxu0 }
 0xf94   :  { %v12007_v32 = vadd.f32 %v12006_v62, %v11863_v33 }
 0xf95   :  { %v12002_v51 = vrot.slane %v12001_v0, 2 }
 0xf96   :  { %v12008_v31 = vrot.slane %v12007_v32, 2 }
 0xf97   :  { %v12003_v13 = vadd.f32 %v12002_v51, %v12001_v0 }
 0xf98   :  { %v12009_v54 = vadd.f32 %v12008_v31, %v12007_v32 }
 0xf99   :  { %v12004_v61 = vrot.slane %v12003_v13, 1 }
 0xf9a   :  { %v12010_v42 = vrot.slane %v12009_v54, 1 }
 0xf9b   :  { %v12005_v28 = vadd.f32 %v12004_v61, %v12003_v13 }
 0xf9c   :  { %v12011_v15 = vadd.f32 %v12010_v42, %v12009_v54 }
 0xf9d   :  { %v12026_v49 = vmul.f32 0.125, %v12005_v28 }
 0xf9e   :  { %v12027_v1 = vmul.f32 0.125, %v12011_v15 }
 0xf9f   :  { %v12037_v52 = vsub.f32 %v11861_v50, %v12026_v49 }
 0xfa0   :  { %v12038_v4 = vsub.f32 %v11863_v33, %v12027_v1 }
 0xfa1   :  { %v12048_v7 = vmul.f32 %v12037_v52, %v12037_v52 }
 0xfa2   :  { %v12049_v27 = vmul.f32 %v12038_v4, %v12038_v4 }
 0xfa3   :  { %v12099_v16 = vrot.slane %v12048_v7, 4 }
 0xfa4   :  { %v12105_v18 = vrot.slane %v12049_v27, 4 }
 0xfa5   :  { %v12100_v20 = vadd.f32 %v12099_v16, %v12048_v7 }
 0xfa6   :  { %v12106_v11 = vadd.f32 %v12105_v18, %v12049_v27 }
 0xfa7   :  { %v12101_v17 = vrot.slane %v12100_v20, 2 }
 0xfa8   :  { %v12107_v21 = vrot.slane %v12106_v11, 2 }
 0xfa9   :  { %v12102_v26 = vadd.f32 %v12101_v17, %v12100_v20 }
 0xfaa   :  { %v12108_v22 = vadd.f32 %v12107_v21, %v12106_v11 }
 0xfab   :  { %v12103_v25 = vrot.slane %v12102_v26, 1 }
 0xfac   :  { %v12109_v23 = vrot.slane %v12108_v22, 1 }
 0xfad   :  { %v12104_v37 = vadd.f32 %v12103_v25, %v12102_v26 }
 0xfae   :  { %v12110_v24 = vadd.f32 %v12109_v23, %v12108_v22 }
 0xfaf   :  { %v12125_v29 = vmul.f32 0.125, %v12104_v37 }
 0xfb0   :  { %v12126_v9 = vmul.f32 0.125, %v12110_v24 }
 0xfb1   :  { %v12136_v44 = vadd.f32 1e-05, %v12125_v29 }
 0xfb2   :  { %v12137_v48 = vadd.f32 1e-05, %v12126_v9 }
 0xfb3   :  { %17228 = vrsqrt.f32 %v12136_v44 }
 0xfb4   :  { %17230 = vrsqrt.f32 %v12137_v48 }
 0xfbd   :  { %v17229_v14 = vpop.eup %17228 }
 0xfbe   :  { %v17231_v56 = vpop.eup %17230  ;;  %v12158_v2 = vmul.f32 %v17229_v14, %v12037_v52 }
 0xfbf   :  { %v12159_v12 = vmul.f32 %v17231_v56, %v12038_v4 }
 0xfc0   :  { %v12226_v36 = vmul.f32 %v12198_v34, %v12158_v2 }
 0xfc1   :  { %v12227_v58 = vmul.f32 %v12202_v35, %v12159_v12 }
 0xfc2   :  { %v12294_v60 = vadd.f32 %v12266_v59, %v12226_v36 }
 0xfc3   :  { %v12295_v50 = vadd.f32 %v12270_v57, %v12227_v58 }
 0xfc4   :  { %vm12306_vm10 = vcmp.gt.f32.partialorder %v12294_v60, 0.0  ;;  %v12318_v55 = vmul.f32 %v18096_v43, %v12294_v60 }
 0xfc5   :  { %vm12307_vm11 = vcmp.gt.f32.partialorder %v12295_v50, 0.0  ;;  %v12319_v33 = vmul.f32 %v18096_v43, %v12295_v50 }
 0xfc6   :  { %v12329_v10 = vsel %vm12306_vm10, %v12294_v60, %v12318_v55 }
 0xfc7   :  { %12340 = vst [vmem:[#allocation21 + $0x98] sm:$0xff] %v12329_v10  ;;  %v12330_v62 = vsel %vm12307_vm11, %v12295_v50, %v12319_v33 }
 0xfc8   :  { %12341 = vst [vmem:[#allocation21 + $0xa0] sm:$0xff] %v12330_v62 }
 0xfc9   :  { %17500 = dma.done.wait [#allocation3 + $0x2], 45056 }
 0xfca   :  { %17501 = vsyncadd [#allocation3 + $0x2], 4294922240  ;;  %12729 = vmatprep.mubr.bf16.mxu1 %v17905_v40  ;;  %12811 = vmatprep.mubr.bf16.mxu0 %v17905_v40  ;;  %v12346_v39 = vld [vmem:[#allocation2 + $0x1608] sm:$0xff]  ;;  %v12348_v63 = vld [vmem:[#allocation2 + $0x1618] sm:$0xff]  ;;  %s14903_s15 = sld [smem:[#allocation19 + $0x2]]  ;;  %s17536_s9 = smov [#allocation20]  }
 0xfcb   :  { %v12345_v0 = vld [vmem:[#allocation2 + $0x1600] sm:$0xff]  ;;  %12697 = vmatprep.subr.bf16.mxu1 %v12346_v39  ;;  %12779 = vmatprep.subr.bf16.mxu0 %v12348_v63  ;;  %v12347_v53 = vld [vmem:[#allocation2 + $0x1610] sm:$0xff]  ;;  %v12356_v43 = vld [vmem:[#allocation2 + $0x1658] sm:$0xff]  ;;  %s13588_s5 = sshll.u32 %s17536_s9, 4  ;;  %s13589_s5 = int_to_ptr.vmem [resolvable:$true] %s13588_s5 }
 0xfcc   :  { %v12357_v32 = vld [vmem:[#allocation2 + $0x1660] sm:$0xff]  ;;  %v12359_v51 = vld [vmem:[#allocation2 + $0x1670] sm:$0xff]  ;;  %12698 = vmatpush1.bf16.msra.mxu1 %v12345_v0  ;;  %12780 = vmatpush1.bf16.msra.mxu0 %v12347_v53  ;;  %v12358_v31 = vld [vmem:[#allocation2 + $0x1668] sm:$0xff]  ;;  %s17440_s27 = scalar_lea.vmem %s13589_s5, 128  ;;  %p17445_p12 = scmp.lt.s32.totalorder %s13589_s5, %s13589_s5 }
 0xfcd   :  { %12699 = vmatprep.subr.bf16.mxu1 %v12357_v32  ;;  %12781 = vmatprep.subr.bf16.mxu0 %v12359_v51  ;;  %v12368_v13 = vld [vmem:[#allocation2 + $0x16b8] sm:$0xff]  ;;  %v12370_v54 = vld [vmem:[#allocation2 + $0x16c8] sm:$0xff]  ;;  %v12367_v61 = vld [vmem:[#allocation2 + $0x16b0] sm:$0xff]  ;;  %p17441_p11 = scmp.ne.s32.totalorder %s13589_s5, %s17440_s27  ;;  %p17446_p13 = scmp.lt.s32.totalorder %s17440_s27, %s17440_s27 }
 0xfce   :  { %v12369_v42 = vld [vmem:[#allocation2 + $0x16c0] sm:$0xff]  ;;  %v12379_v28 = vld [vmem:[#allocation2 + $0x1710] sm:$0xff]  ;;  %v12378_v49 = vld [vmem:[#allocation2 + $0x1708] sm:$0xff] }
 0xfcf   :  { %v12381_v15 = vld [vmem:[#allocation2 + $0x1720] sm:$0xff]  ;;  %v12380_v1 = vld [vmem:[#allocation2 + $0x1718] sm:$0xff]  ;;  %v12390_v52 = vld [vmem:[#allocation2 + $0x1768] sm:$0xff]  ;;  %p17447_p0 = por %p17446_p13, %p17445_p12 }
 0xfd0   :  { %12700 = vmatpush1.bf16.msra.mxu1 %v12356_v43  ;;  %12782 = vmatpush1.bf16.msra.mxu0 %v12358_v31  ;;  %v12392_v4 = vld [vmem:[#allocation2 + $0x1778] sm:$0xff]  ;;  %v12389_v7 = vld [vmem:[#allocation2 + $0x1760] sm:$0xff]  ;;  %v12391_v27 = vld [vmem:[#allocation2 + $0x1770] sm:$0xff] }
 0xfd1   :  { %12701 = vmatprep.subr.bf16.mxu1 %v12368_v13  ;;  %12783 = vmatprep.subr.bf16.mxu0 %v12370_v54  ;;  %v12401_v16 = vld [vmem:[#allocation2 + $0x17c0] sm:$0xff]  ;;  %v12403_v18 = vld [vmem:[#allocation2 + $0x17d0] sm:$0xff]  ;;  %v12400_v20 = vld [vmem:[#allocation2 + $0x17b8] sm:$0xff]  ;;  %p17448_p1 = pnand %p17447_p0, %p17441_p11 }
 0xfd2   :  { %v12402_v11 = vld [vmem:[#allocation2 + $0x17c8] sm:$0xff]  ;;  %v12412_v17 = vld [vmem:[#allocation2 + $0x1818] sm:$0xff]  ;;  %v12411_v26 = vld [vmem:[#allocation2 + $0x1810] sm:$0xff] }
 0xfd3   :  { %v12414_v21 = vld [vmem:[#allocation2 + $0x1828] sm:$0xff]  ;;  %v12413_v22 = vld [vmem:[#allocation2 + $0x1820] sm:$0xff]  ;;  %v12423_v25 = vld [vmem:[#allocation2 + $0x1870] sm:$0xff] }
 0xfd4   :  { %12702 = vmatpush1.bf16.msra.mxu1 %v12367_v61  ;;  %12784 = vmatpush1.bf16.msra.mxu0 %v12369_v42  ;;  %v12425_v23 = vld [vmem:[#allocation2 + $0x1880] sm:$0xff]  ;;  %v12422_v37 = vld [vmem:[#allocation2 + $0x1868] sm:$0xff]  ;;  %v12424_v24 = vld [vmem:[#allocation2 + $0x1878] sm:$0xff] }
 0xfd5   :  { %12703 = vmatprep.subr.bf16.mxu1 %v12379_v28  ;;  %12785 = vmatprep.subr.bf16.mxu0 %v12381_v15  ;;  %v12434_v29 = vld [vmem:[#allocation2 + $0x18c8] sm:$0xff]  ;;  %v12436_v9 = vld [vmem:[#allocation2 + $0x18d8] sm:$0xff]  ;;  %v12433_v44 = vld [vmem:[#allocation2 + $0x18c0] sm:$0xff] }
 0xfd6   :  { %v12435_v48 = vld [vmem:[#allocation2 + $0x18d0] sm:$0xff]  ;;  %v12445_v34 = vld [vmem:[#allocation2 + $0x1920] sm:$0xff]  ;;  %v12444_v35 = vld [vmem:[#allocation2 + $0x1918] sm:$0xff] }
 0xfd7   :  { %v12447_v14 = vld [vmem:[#allocation2 + $0x1930] sm:$0xff]  ;;  %v12446_v56 = vld [vmem:[#allocation2 + $0x1928] sm:$0xff]  ;;  %v12456_v2 = vld [vmem:[#allocation2 + $0x1978] sm:$0xff] }
 0xfd8   :  { %12704 = vmatpush1.bf16.msra.mxu1 %v12378_v49  ;;  %12786 = vmatpush1.bf16.msra.mxu0 %v12380_v1  ;;  %v12458_v59 = vld [vmem:[#allocation2 + $0x1988] sm:$0xff]  ;;  %v12455_v12 = vld [vmem:[#allocation2 + $0x1970] sm:$0xff]  ;;  %v12457_v57 = vld [vmem:[#allocation2 + $0x1980] sm:$0xff] }
 0xfd9   :  { %12705 = vmatprep.subr.bf16.mxu1 %v12390_v52  ;;  %12787 = vmatprep.subr.bf16.mxu0 %v12392_v4  ;;  %v12467_v36 = vld [vmem:[#allocation2 + $0x19d0] sm:$0xff]  ;;  %v12469_v58 = vld [vmem:[#allocation2 + $0x19e0] sm:$0xff]  ;;  %v12466_v60 = vld [vmem:[#allocation2 + $0x19c8] sm:$0xff] }
 0xfda   :  { %v12468_v50 = vld [vmem:[#allocation2 + $0x19d8] sm:$0xff]  ;;  %v12478_v55 = vld [vmem:[#allocation2 + $0x1a28] sm:$0xff]  ;;  %v12477_v10 = vld [vmem:[#allocation2 + $0x1a20] sm:$0xff] }
 0xfdb   :  { %v12480_v33 = vld [vmem:[#allocation2 + $0x1a38] sm:$0xff]  ;;  %v12479_v62 = vld [vmem:[#allocation2 + $0x1a30] sm:$0xff]  ;;  %v12489_v39 = vld [vmem:[#allocation2 + $0x1a80] sm:$0xff] }
 0xfdc   :  { %12706 = vmatpush1.bf16.msra.mxu1 %v12389_v7  ;;  %12788 = vmatpush1.bf16.msra.mxu0 %v12391_v27  ;;  %v12491_v63 = vld [vmem:[#allocation2 + $0x1a90] sm:$0xff]  ;;  %v12488_v0 = vld [vmem:[#allocation2 + $0x1a78] sm:$0xff]  ;;  %v12490_v53 = vld [vmem:[#allocation2 + $0x1a88] sm:$0xff] }
 0xfdd   :  { %12707 = vmatprep.subr.bf16.mxu1 %v12401_v16  ;;  %12789 = vmatprep.subr.bf16.mxu0 %v12403_v18  ;;  %v12500_v32 = vld [vmem:[#allocation2 + $0x1ad8] sm:$0xff]  ;;  %v12502_v51 = vld [vmem:[#allocation2 + $0x1ae8] sm:$0xff]  ;;  %v12499_v43 = vld [vmem:[#allocation2 + $0x1ad0] sm:$0xff] }
 0xfde   :  { %v12501_v31 = vld [vmem:[#allocation2 + $0x1ae0] sm:$0xff]  ;;  %v12511_v13 = vld [vmem:[#allocation2 + $0x1b30] sm:$0xff]  ;;  %v12510_v61 = vld [vmem:[#allocation2 + $0x1b28] sm:$0xff] }
 0xfdf   :  { %v12513_v54 = vld [vmem:[#allocation2 + $0x1b40] sm:$0xff]  ;;  %v12512_v42 = vld [vmem:[#allocation2 + $0x1b38] sm:$0xff]  ;;  %v12522_v28 = vld [vmem:[#allocation2 + $0x1b88] sm:$0xff] }
 0xfe0   :  { %12708 = vmatpush1.bf16.msra.mxu1 %v12400_v20  ;;  %12790 = vmatpush1.bf16.msra.mxu0 %v12402_v11  ;;  %v12524_v15 = vld [vmem:[#allocation2 + $0x1b98] sm:$0xff]  ;;  %v12521_v49 = vld [vmem:[#allocation2 + $0x1b80] sm:$0xff]  ;;  %v12523_v1 = vld [vmem:[#allocation2 + $0x1b90] sm:$0xff] }
 0xfe1   :  { %12709 = vmatprep.subr.bf16.mxu1 %v12412_v17  ;;  %12791 = vmatprep.subr.bf16.mxu0 %v12414_v21  ;;  %v12533_v52 = vld [vmem:[#allocation2 + $0x1be0] sm:$0xff]  ;;  %v12535_v4 = vld [vmem:[#allocation2 + $0x1bf0] sm:$0xff]  ;;  %v12532_v7 = vld [vmem:[#allocation2 + $0x1bd8] sm:$0xff] }
 0xfe2   :  { %v12534_v27 = vld [vmem:[#allocation2 + $0x1be8] sm:$0xff]  ;;  %v12544_v16 = vld [vmem:[#allocation2 + $0x1c38] sm:$0xff]  ;;  %v12543_v20 = vld [vmem:[#allocation2 + $0x1c30] sm:$0xff] }
 0xfe3   :  { %v12546_v18 = vld [vmem:[#allocation2 + $0x1c48] sm:$0xff]  ;;  %v12545_v11 = vld [vmem:[#allocation2 + $0x1c40] sm:$0xff]  ;;  %v12555_v17 = vld [vmem:[#allocation2 + $0x1c90] sm:$0xff] }
 0xfe4   :  { %12710 = vmatpush1.bf16.msra.mxu1 %v12411_v26  ;;  %12792 = vmatpush1.bf16.msra.mxu0 %v12413_v22  ;;  %v12557_v21 = vld [vmem:[#allocation2 + $0x1ca0] sm:$0xff]  ;;  %v12554_v26 = vld [vmem:[#allocation2 + $0x1c88] sm:$0xff]  ;;  %v12556_v22 = vld [vmem:[#allocation2 + $0x1c98] sm:$0xff] }
 0xfe5   :  { %12711 = vmatprep.subr.bf16.mxu1 %v12423_v25  ;;  %12793 = vmatprep.subr.bf16.mxu0 %v12425_v23  ;;  %v12566_v25 = vld [vmem:[#allocation2 + $0x1ce8] sm:$0xff]  ;;  %v12568_v23 = vld [vmem:[#allocation2 + $0x1cf8] sm:$0xff] }
 0xfe8   :  { %12712 = vmatpush1.bf16.msra.mxu1 %v12422_v37  ;;  %12794 = vmatpush1.bf16.msra.mxu0 %v12424_v24  ;;  %v12565_v37 = vld [vmem:[#allocation2 + $0x1ce0] sm:$0xff]  ;;  %v12567_v24 = vld [vmem:[#allocation2 + $0x1cf0] sm:$0xff] }
 0xfe9   :  { %12713 = vmatprep.subr.bf16.mxu1 %v12434_v29  ;;  %12795 = vmatprep.subr.bf16.mxu0 %v12436_v9  ;;  %v12577_v29 = vld [vmem:[#allocation2 + $0x1d40] sm:$0xff]  ;;  %v12579_v9 = vld [vmem:[#allocation2 + $0x1d50] sm:$0xff] }
 0xfec   :  { %12714 = vmatpush1.bf16.msra.mxu1 %v12433_v44  ;;  %12796 = vmatpush1.bf16.msra.mxu0 %v12435_v48  ;;  %v12576_v44 = vld [vmem:[#allocation2 + $0x1d38] sm:$0xff]  ;;  %v12578_v48 = vld [vmem:[#allocation2 + $0x1d48] sm:$0xff] }
 0xfed   :  { %12715 = vmatprep.subr.bf16.mxu1 %v12445_v34  ;;  %12797 = vmatprep.subr.bf16.mxu0 %v12447_v14  ;;  %v12588_v34 = vld [vmem:[#allocation2 + $0x1d98] sm:$0xff]  ;;  %v12590_v14 = vld [vmem:[#allocation2 + $0x1da8] sm:$0xff] }
 0xff0   :  { %12716 = vmatpush1.bf16.msra.mxu1 %v12444_v35  ;;  %12798 = vmatpush1.bf16.msra.mxu0 %v12446_v56  ;;  %v12587_v35 = vld [vmem:[#allocation2 + $0x1d90] sm:$0xff]  ;;  %v12589_v56 = vld [vmem:[#allocation2 + $0x1da0] sm:$0xff] }
 0xff1   :  { %12717 = vmatprep.subr.bf16.mxu1 %v12456_v2  ;;  %12799 = vmatprep.subr.bf16.mxu0 %v12458_v59  ;;  %v12599_v2 = vld [vmem:[#allocation2 + $0x1df0] sm:$0xff]  ;;  %v12601_v59 = vld [vmem:[#allocation2 + $0x1e00] sm:$0xff] }
 0xff4   :  { %12718 = vmatpush1.bf16.msra.mxu1 %v12455_v12  ;;  %12800 = vmatpush1.bf16.msra.mxu0 %v12457_v57  ;;  %v12598_v12 = vld [vmem:[#allocation2 + $0x1de8] sm:$0xff]  ;;  %v12600_v57 = vld [vmem:[#allocation2 + $0x1df8] sm:$0xff] }
 0xff5   :  { %12719 = vmatprep.subr.bf16.mxu1 %v12467_v36  ;;  %12801 = vmatprep.subr.bf16.mxu0 %v12469_v58  ;;  %v12610_v36 = vld [vmem:[#allocation2 + $0x1e48] sm:$0xff]  ;;  %v12612_v58 = vld [vmem:[#allocation2 + $0x1e58] sm:$0xff] }
 0xff8   :  { %12720 = vmatpush1.bf16.msra.mxu1 %v12466_v60  ;;  %12802 = vmatpush1.bf16.msra.mxu0 %v12468_v50  ;;  %v12609_v60 = vld [vmem:[#allocation2 + $0x1e40] sm:$0xff]  ;;  %v12611_v50 = vld [vmem:[#allocation2 + $0x1e50] sm:$0xff] }
 0xff9   :  { %12721 = vmatprep.subr.bf16.mxu1 %v12478_v55  ;;  %12803 = vmatprep.subr.bf16.mxu0 %v12480_v33  ;;  %v12621_v55 = vld [vmem:[#allocation2 + $0x1ea0] sm:$0xff]  ;;  %v12623_v33 = vld [vmem:[#allocation2 + $0x1eb0] sm:$0xff] }
 0xffc   :  { %12722 = vmatpush1.bf16.msra.mxu1 %v12477_v10  ;;  %12804 = vmatpush1.bf16.msra.mxu0 %v12479_v62  ;;  %v12620_v10 = vld [vmem:[#allocation2 + $0x1e98] sm:$0xff]  ;;  %v12622_v62 = vld [vmem:[#allocation2 + $0x1ea8] sm:$0xff] }
 0xffd   :  { %12723 = vmatprep.subr.bf16.mxu1 %v12489_v39  ;;  %12805 = vmatprep.subr.bf16.mxu0 %v12491_v63  ;;  %v12632_v39 = vld [vmem:[#allocation2 + $0x1ef8] sm:$0xff]  ;;  %v12634_v63 = vld [vmem:[#allocation2 + $0x1f08] sm:$0xff] }
0x1000   :  { %12724 = vmatpush1.bf16.msra.mxu1 %v12488_v0  ;;  %12806 = vmatpush1.bf16.msra.mxu0 %v12490_v53  ;;  %v12631_v0 = vld [vmem:[#allocation2 + $0x1ef0] sm:$0xff]  ;;  %v12633_v53 = vld [vmem:[#allocation2 + $0x1f00] sm:$0xff] }
0x1001   :  { %12725 = vmatprep.subr.bf16.mxu1 %v12500_v32  ;;  %12807 = vmatprep.subr.bf16.mxu0 %v12502_v51  ;;  %v12643_v32 = vld [vmem:[#allocation2 + $0x1f50] sm:$0xff]  ;;  %v12645_v51 = vld [vmem:[#allocation2 + $0x1f60] sm:$0xff] }
0x1004   :  { %12726 = vmatpush1.bf16.msra.mxu1 %v12499_v43  ;;  %12808 = vmatpush1.bf16.msra.mxu0 %v12501_v31  ;;  %v12642_v43 = vld [vmem:[#allocation2 + $0x1f48] sm:$0xff]  ;;  %v12644_v31 = vld [vmem:[#allocation2 + $0x1f58] sm:$0xff] }
0x1005   :  { %12727 = vmatprep.subr.bf16.mxu1 %v12511_v13  ;;  %12809 = vmatprep.subr.bf16.mxu0 %v12513_v54  ;;  %v12654_v13 = vld [vmem:[#allocation2 + $0x1fa8] sm:$0xff]  ;;  %v12656_v54 = vld [vmem:[#allocation2 + $0x1fb8] sm:$0xff] }
0x1008   :  { %12728 = vmatpush1.bf16.msra.mxu1 %v12510_v61  ;;  %12810 = vmatpush1.bf16.msra.mxu0 %v12512_v42  ;;  %v12653_v61 = vld [vmem:[#allocation2 + $0x1fa0] sm:$0xff]  ;;  %v12655_v42 = vld [vmem:[#allocation2 + $0x1fb0] sm:$0xff] }
0x1009   :  { %12738 = vmatprep.subr.bf16.mxu1 %v12522_v28  ;;  %12820 = vmatprep.subr.bf16.mxu0 %v12524_v15  ;;  %v12665_v28 = vld [vmem:[#allocation2 + $0x2000] sm:$0xff]  ;;  %v12667_v15 = vld [vmem:[#allocation2 + $0x2010] sm:$0xff] }
0x100b   :  { %12730 = vmatmul.mubr.bf16.vlgmr.msra.gmra.mrb[44].mxu1 %v17901_v19  ;;  %12812 = vmatmul.mubr.bf16.vlgmr.msra.gmra.mrb[40].mxu0 %v17901_v19 }
0x100c   :  { %12739 = vmatpush1.bf16.msra.mxu1 %v12521_v49  ;;  %12821 = vmatpush1.bf16.msra.mxu0 %v12523_v1  ;;  %v12664_v49 = vld [vmem:[#allocation2 + $0x1ff8] sm:$0xff]  ;;  %v12666_v1 = vld [vmem:[#allocation2 + $0x2008] sm:$0xff] }
0x100d   :  { %12740 = vmatprep.subr.bf16.mxu1 %v12533_v52  ;;  %12822 = vmatprep.subr.bf16.mxu0 %v12535_v4  ;;  %v12676_v52 = vld [vmem:[#allocation2 + $0x2058] sm:$0xff]  ;;  %v12678_v4 = vld [vmem:[#allocation2 + $0x2068] sm:$0xff] }
0x100e   :  { %12770 = vmatprep.mubr.bf16.mxu1 %v17907_v41  ;;  %12852 = vmatprep.mubr.bf16.mxu0 %v17907_v41 }
0x1010   :  { %12741 = vmatpush1.bf16.msra.mxu1 %v12532_v7  ;;  %12823 = vmatpush1.bf16.msra.mxu0 %v12534_v27  ;;  %v12675_v7 = vld [vmem:[#allocation2 + $0x2050] sm:$0xff]  ;;  %v12677_v27 = vld [vmem:[#allocation2 + $0x2060] sm:$0xff] }
0x1011   :  { %12742 = vmatprep.subr.bf16.mxu1 %v12544_v16  ;;  %12824 = vmatprep.subr.bf16.mxu0 %v12546_v18  ;;  %v12687_v16 = vld [vmem:[#allocation2 + $0x20b0] sm:$0xff]  ;;  %v12689_v18 = vld [vmem:[#allocation2 + $0x20c0] sm:$0xff] }
0x1014   :  { %12743 = vmatpush1.bf16.msra.mxu1 %v12543_v20  ;;  %12825 = vmatpush1.bf16.msra.mxu0 %v12545_v11  ;;  %v12686_v20 = vld [vmem:[#allocation2 + $0x20a8] sm:$0xff]  ;;  %v12688_v11 = vld [vmem:[#allocation2 + $0x20b8] sm:$0xff] }
0x1015   :  { %12744 = vmatprep.subr.bf16.mxu1 %v12555_v17  ;;  %12826 = vmatprep.subr.bf16.mxu0 %v12557_v21  ;;  %v12350_v17 = vld [vmem:[#allocation2 + $0x1628] sm:$0xff]  ;;  %v12352_v21 = vld [vmem:[#allocation2 + $0x1638] sm:$0xff] }
0x1018   :  { %12745 = vmatpush1.bf16.msra.mxu1 %v12554_v26  ;;  %12827 = vmatpush1.bf16.msra.mxu0 %v12556_v22  ;;  %v12349_v26 = vld [vmem:[#allocation2 + $0x1620] sm:$0xff]  ;;  %v12351_v22 = vld [vmem:[#allocation2 + $0x1630] sm:$0xff] }
0x1019   :  { %12746 = vmatprep.subr.bf16.mxu1 %v12566_v25  ;;  %12828 = vmatprep.subr.bf16.mxu0 %v12568_v23  ;;  %v12361_v25 = vld [vmem:[#allocation2 + $0x1680] sm:$0xff]  ;;  %v12363_v23 = vld [vmem:[#allocation2 + $0x1690] sm:$0xff] }
0x101c   :  { %12747 = vmatpush1.bf16.msra.mxu1 %v12565_v37  ;;  %12829 = vmatpush1.bf16.msra.mxu0 %v12567_v24  ;;  %v12360_v37 = vld [vmem:[#allocation2 + $0x1678] sm:$0xff]  ;;  %v12362_v24 = vld [vmem:[#allocation2 + $0x1688] sm:$0xff] }
0x101d   :  { %12748 = vmatprep.subr.bf16.mxu1 %v12577_v29  ;;  %12830 = vmatprep.subr.bf16.mxu0 %v12579_v9  ;;  %v12372_v29 = vld [vmem:[#allocation2 + $0x16d8] sm:$0xff]  ;;  %v12374_v9 = vld [vmem:[#allocation2 + $0x16e8] sm:$0xff] }
0x1020   :  { %12749 = vmatpush1.bf16.msra.mxu1 %v12576_v44  ;;  %12831 = vmatpush1.bf16.msra.mxu0 %v12578_v48  ;;  %v12371_v44 = vld [vmem:[#allocation2 + $0x16d0] sm:$0xff]  ;;  %v12373_v48 = vld [vmem:[#allocation2 + $0x16e0] sm:$0xff] }
0x1021   :  { %12750 = vmatprep.subr.bf16.mxu1 %v12588_v34  ;;  %12832 = vmatprep.subr.bf16.mxu0 %v12590_v14  ;;  %v12383_v34 = vld [vmem:[#allocation2 + $0x1730] sm:$0xff]  ;;  %v12385_v14 = vld [vmem:[#allocation2 + $0x1740] sm:$0xff] }
0x1024   :  { %12751 = vmatpush1.bf16.msra.mxu1 %v12587_v35  ;;  %12833 = vmatpush1.bf16.msra.mxu0 %v12589_v56  ;;  %v12382_v35 = vld [vmem:[#allocation2 + $0x1728] sm:$0xff]  ;;  %v12384_v56 = vld [vmem:[#allocation2 + $0x1738] sm:$0xff] }
0x1025   :  { %12752 = vmatprep.subr.bf16.mxu1 %v12599_v2  ;;  %12834 = vmatprep.subr.bf16.mxu0 %v12601_v59  ;;  %v12394_v2 = vld [vmem:[#allocation2 + $0x1788] sm:$0xff]  ;;  %v12396_v59 = vld [vmem:[#allocation2 + $0x1798] sm:$0xff] }
0x1028   :  { %12753 = vmatpush1.bf16.msra.mxu1 %v12598_v12  ;;  %12835 = vmatpush1.bf16.msra.mxu0 %v12600_v57  ;;  %v12393_v12 = vld [vmem:[#allocation2 + $0x1780] sm:$0xff]  ;;  %v12395_v57 = vld [vmem:[#allocation2 + $0x1790] sm:$0xff] }
0x1029   :  { %12754 = vmatprep.subr.bf16.mxu1 %v12610_v36  ;;  %12836 = vmatprep.subr.bf16.mxu0 %v12612_v58  ;;  %v12405_v36 = vld [vmem:[#allocation2 + $0x17e0] sm:$0xff]  ;;  %v12407_v58 = vld [vmem:[#allocation2 + $0x17f0] sm:$0xff] }
0x102c   :  { %12755 = vmatpush1.bf16.msra.mxu1 %v12609_v60  ;;  %12837 = vmatpush1.bf16.msra.mxu0 %v12611_v50  ;;  %v12404_v60 = vld [vmem:[#allocation2 + $0x17d8] sm:$0xff]  ;;  %v12406_v50 = vld [vmem:[#allocation2 + $0x17e8] sm:$0xff] }
0x102d   :  { %12756 = vmatprep.subr.bf16.mxu1 %v12621_v55  ;;  %12838 = vmatprep.subr.bf16.mxu0 %v12623_v33  ;;  %v12416_v55 = vld [vmem:[#allocation2 + $0x1838] sm:$0xff]  ;;  %v12418_v33 = vld [vmem:[#allocation2 + $0x1848] sm:$0xff] }
0x1030   :  { %12757 = vmatpush1.bf16.msra.mxu1 %v12620_v10  ;;  %12839 = vmatpush1.bf16.msra.mxu0 %v12622_v62  ;;  %v12415_v10 = vld [vmem:[#allocation2 + $0x1830] sm:$0xff]  ;;  %v12417_v62 = vld [vmem:[#allocation2 + $0x1840] sm:$0xff] }
0x1031   :  { %12758 = vmatprep.subr.bf16.mxu1 %v12632_v39  ;;  %12840 = vmatprep.subr.bf16.mxu0 %v12634_v63  ;;  %v12427_v39 = vld [vmem:[#allocation2 + $0x1890] sm:$0xff]  ;;  %v12429_v63 = vld [vmem:[#allocation2 + $0x18a0] sm:$0xff] }
0x1034   :  { %12759 = vmatpush1.bf16.msra.mxu1 %v12631_v0  ;;  %12841 = vmatpush1.bf16.msra.mxu0 %v12633_v53  ;;  %v12426_v0 = vld [vmem:[#allocation2 + $0x1888] sm:$0xff]  ;;  %v12428_v53 = vld [vmem:[#allocation2 + $0x1898] sm:$0xff] }
0x1035   :  { %12760 = vmatprep.subr.bf16.mxu1 %v12643_v32  ;;  %12842 = vmatprep.subr.bf16.mxu0 %v12645_v51  ;;  %v12438_v32 = vld [vmem:[#allocation2 + $0x18e8] sm:$0xff]  ;;  %v12440_v51 = vld [vmem:[#allocation2 + $0x18f8] sm:$0xff] }
0x1038   :  { %12761 = vmatpush1.bf16.msra.mxu1 %v12642_v43  ;;  %12843 = vmatpush1.bf16.msra.mxu0 %v12644_v31  ;;  %v12437_v43 = vld [vmem:[#allocation2 + $0x18e0] sm:$0xff]  ;;  %v12439_v31 = vld [vmem:[#allocation2 + $0x18f0] sm:$0xff] }
0x1039   :  { %12762 = vmatprep.subr.bf16.mxu1 %v12654_v13  ;;  %12844 = vmatprep.subr.bf16.mxu0 %v12656_v54  ;;  %v12449_v13 = vld [vmem:[#allocation2 + $0x1940] sm:$0xff]  ;;  %v12451_v54 = vld [vmem:[#allocation2 + $0x1950] sm:$0xff] }
0x103c   :  { %12763 = vmatpush1.bf16.msra.mxu1 %v12653_v61  ;;  %12845 = vmatpush1.bf16.msra.mxu0 %v12655_v42  ;;  %v12448_v61 = vld [vmem:[#allocation2 + $0x1938] sm:$0xff]  ;;  %v12450_v42 = vld [vmem:[#allocation2 + $0x1948] sm:$0xff] }
0x103d   :  { %12764 = vmatprep.subr.bf16.mxu1 %v12665_v28  ;;  %12846 = vmatprep.subr.bf16.mxu0 %v12667_v15  ;;  %v12460_v28 = vld [vmem:[#allocation2 + $0x1998] sm:$0xff]  ;;  %v12462_v15 = vld [vmem:[#allocation2 + $0x19a8] sm:$0xff] }
0x1040   :  { %12765 = vmatpush1.bf16.msra.mxu1 %v12664_v49  ;;  %12847 = vmatpush1.bf16.msra.mxu0 %v12666_v1  ;;  %v12459_v49 = vld [vmem:[#allocation2 + $0x1990] sm:$0xff]  ;;  %v12461_v1 = vld [vmem:[#allocation2 + $0x19a0] sm:$0xff] }
0x1041   :  { %12766 = vmatprep.subr.bf16.mxu1 %v12676_v52  ;;  %12848 = vmatprep.subr.bf16.mxu0 %v12678_v4  ;;  %v12471_v52 = vld [vmem:[#allocation2 + $0x19f0] sm:$0xff]  ;;  %v12473_v4 = vld [vmem:[#allocation2 + $0x1a00] sm:$0xff] }
0x1044   :  { %12767 = vmatpush1.bf16.msra.mxu1 %v12675_v7  ;;  %12849 = vmatpush1.bf16.msra.mxu0 %v12677_v27  ;;  %v12470_v7 = vld [vmem:[#allocation2 + $0x19e8] sm:$0xff]  ;;  %v12472_v27 = vld [vmem:[#allocation2 + $0x19f8] sm:$0xff] }
0x1045   :  { %12768 = vmatprep.subr.bf16.mxu1 %v12687_v16  ;;  %12850 = vmatprep.subr.bf16.mxu0 %v12689_v18  ;;  %v12482_v16 = vld [vmem:[#allocation2 + $0x1a48] sm:$0xff]  ;;  %v12484_v18 = vld [vmem:[#allocation2 + $0x1a58] sm:$0xff] }
0x1048   :  { %12769 = vmatpush1.bf16.msra.mxu1 %v12686_v20  ;;  %12851 = vmatpush1.bf16.msra.mxu0 %v12688_v11  ;;  %v12481_v20 = vld [vmem:[#allocation2 + $0x1a40] sm:$0xff]  ;;  %v12483_v11 = vld [vmem:[#allocation2 + $0x1a50] sm:$0xff] }
0x1049   :  { %12861 = vmatprep.subr.bf16.mxu1 %v12350_v17  ;;  %12943 = vmatprep.subr.bf16.mxu0 %v12352_v21  ;;  %v12493_v17 = vld [vmem:[#allocation2 + $0x1aa0] sm:$0xff]  ;;  %v12495_v21 = vld [vmem:[#allocation2 + $0x1ab0] sm:$0xff] }
0x104b   :  { %12771 = vmatmul.mubr.bf16.vlgmr.msra.gmra.mrb[44].mxu1 %v17903_v38  ;;  %12853 = vmatmul.mubr.bf16.vlgmr.msra.gmra.mrb[40].mxu0 %v17903_v38 }
0x104c   :  { %12862 = vmatpush1.bf16.msra.mxu1 %v12349_v26  ;;  %12944 = vmatpush1.bf16.msra.mxu0 %v12351_v22  ;;  %v12492_v26 = vld [vmem:[#allocation2 + $0x1a98] sm:$0xff]  ;;  %v12494_v22 = vld [vmem:[#allocation2 + $0x1aa8] sm:$0xff] }
0x104d   :  { %12863 = vmatprep.subr.bf16.mxu1 %v12361_v25  ;;  %12945 = vmatprep.subr.bf16.mxu0 %v12363_v23  ;;  %v12504_v25 = vld [vmem:[#allocation2 + $0x1af8] sm:$0xff]  ;;  %v12506_v23 = vld [vmem:[#allocation2 + $0x1b08] sm:$0xff] }
0x104e   :  { %12893 = vmatprep.mubr.bf16.mxu1 %v17905_v40  ;;  %12975 = vmatprep.mubr.bf16.mxu0 %v17905_v40 }
0x1050   :  { %12864 = vmatpush1.bf16.msra.mxu1 %v12360_v37  ;;  %12946 = vmatpush1.bf16.msra.mxu0 %v12362_v24  ;;  %v12503_v37 = vld [vmem:[#allocation2 + $0x1af0] sm:$0xff]  ;;  %v12505_v24 = vld [vmem:[#allocation2 + $0x1b00] sm:$0xff] }
0x1051   :  { %12865 = vmatprep.subr.bf16.mxu1 %v12372_v29  ;;  %12947 = vmatprep.subr.bf16.mxu0 %v12374_v9  ;;  %v12515_v29 = vld [vmem:[#allocation2 + $0x1b50] sm:$0xff]  ;;  %v12517_v9 = vld [vmem:[#allocation2 + $0x1b60] sm:$0xff] }
0x1054   :  { %12866 = vmatpush1.bf16.msra.mxu1 %v12371_v44  ;;  %12948 = vmatpush1.bf16.msra.mxu0 %v12373_v48  ;;  %v12514_v44 = vld [vmem:[#allocation2 + $0x1b48] sm:$0xff]  ;;  %v12516_v48 = vld [vmem:[#allocation2 + $0x1b58] sm:$0xff] }
0x1055   :  { %12867 = vmatprep.subr.bf16.mxu1 %v12383_v34  ;;  %12949 = vmatprep.subr.bf16.mxu0 %v12385_v14  ;;  %v12526_v34 = vld [vmem:[#allocation2 + $0x1ba8] sm:$0xff]  ;;  %v12528_v14 = vld [vmem:[#allocation2 + $0x1bb8] sm:$0xff] }
0x1058   :  { %12868 = vmatpush1.bf16.msra.mxu1 %v12382_v35  ;;  %12950 = vmatpush1.bf16.msra.mxu0 %v12384_v56  ;;  %v12525_v35 = vld [vmem:[#allocation2 + $0x1ba0] sm:$0xff]  ;;  %v12527_v56 = vld [vmem:[#allocation2 + $0x1bb0] sm:$0xff] }
0x1059   :  { %12869 = vmatprep.subr.bf16.mxu1 %v12394_v2  ;;  %12951 = vmatprep.subr.bf16.mxu0 %v12396_v59  ;;  %v12537_v2 = vld [vmem:[#allocation2 + $0x1c00] sm:$0xff]  ;;  %v12539_v59 = vld [vmem:[#allocation2 + $0x1c10] sm:$0xff] }
0x105c   :  { %12870 = vmatpush1.bf16.msra.mxu1 %v12393_v12  ;;  %12952 = vmatpush1.bf16.msra.mxu0 %v12395_v57  ;;  %v12536_v12 = vld [vmem:[#allocation2 + $0x1bf8] sm:$0xff]  ;;  %v12538_v57 = vld [vmem:[#allocation2 + $0x1c08] sm:$0xff] }
0x105d   :  { %12871 = vmatprep.subr.bf16.mxu1 %v12405_v36  ;;  %12953 = vmatprep.subr.bf16.mxu0 %v12407_v58  ;;  %v12548_v36 = vld [vmem:[#allocation2 + $0x1c58] sm:$0xff]  ;;  %v12550_v58 = vld [vmem:[#allocation2 + $0x1c68] sm:$0xff] }
0x1060   :  { %12872 = vmatpush1.bf16.msra.mxu1 %v12404_v60  ;;  %12954 = vmatpush1.bf16.msra.mxu0 %v12406_v50  ;;  %v12547_v60 = vld [vmem:[#allocation2 + $0x1c50] sm:$0xff]  ;;  %v12549_v50 = vld [vmem:[#allocation2 + $0x1c60] sm:$0xff] }
0x1061   :  { %12873 = vmatprep.subr.bf16.mxu1 %v12416_v55  ;;  %12955 = vmatprep.subr.bf16.mxu0 %v12418_v33  ;;  %v12559_v55 = vld [vmem:[#allocation2 + $0x1cb0] sm:$0xff]  ;;  %v12561_v33 = vld [vmem:[#allocation2 + $0x1cc0] sm:$0xff] }
0x1064   :  { %12874 = vmatpush1.bf16.msra.mxu1 %v12415_v10  ;;  %12956 = vmatpush1.bf16.msra.mxu0 %v12417_v62  ;;  %v12558_v10 = vld [vmem:[#allocation2 + $0x1ca8] sm:$0xff]  ;;  %v12560_v62 = vld [vmem:[#allocation2 + $0x1cb8] sm:$0xff] }
0x1065   :  { %12875 = vmatprep.subr.bf16.mxu1 %v12427_v39  ;;  %12957 = vmatprep.subr.bf16.mxu0 %v12429_v63  ;;  %v12570_v39 = vld [vmem:[#allocation2 + $0x1d08] sm:$0xff]  ;;  %v12572_v63 = vld [vmem:[#allocation2 + $0x1d18] sm:$0xff] }
0x1068   :  { %12876 = vmatpush1.bf16.msra.mxu1 %v12426_v0  ;;  %12958 = vmatpush1.bf16.msra.mxu0 %v12428_v53  ;;  %v12569_v0 = vld [vmem:[#allocation2 + $0x1d00] sm:$0xff]  ;;  %v12571_v53 = vld [vmem:[#allocation2 + $0x1d10] sm:$0xff] }
0x1069   :  { %12877 = vmatprep.subr.bf16.mxu1 %v12438_v32  ;;  %12959 = vmatprep.subr.bf16.mxu0 %v12440_v51  ;;  %v12581_v32 = vld [vmem:[#allocation2 + $0x1d60] sm:$0xff]  ;;  %v12583_v51 = vld [vmem:[#allocation2 + $0x1d70] sm:$0xff] }
0x106c   :  { %12878 = vmatpush1.bf16.msra.mxu1 %v12437_v43  ;;  %12960 = vmatpush1.bf16.msra.mxu0 %v12439_v31  ;;  %v12580_v43 = vld [vmem:[#allocation2 + $0x1d58] sm:$0xff]  ;;  %v12582_v31 = vld [vmem:[#allocation2 + $0x1d68] sm:$0xff] }
0x106d   :  { %12879 = vmatprep.subr.bf16.mxu1 %v12449_v13  ;;  %12961 = vmatprep.subr.bf16.mxu0 %v12451_v54  ;;  %v12592_v13 = vld [vmem:[#allocation2 + $0x1db8] sm:$0xff]  ;;  %v12594_v54 = vld [vmem:[#allocation2 + $0x1dc8] sm:$0xff] }
0x1070   :  { %12880 = vmatpush1.bf16.msra.mxu1 %v12448_v61  ;;  %12962 = vmatpush1.bf16.msra.mxu0 %v12450_v42  ;;  %v12591_v61 = vld [vmem:[#allocation2 + $0x1db0] sm:$0xff]  ;;  %v12593_v42 = vld [vmem:[#allocation2 + $0x1dc0] sm:$0xff] }
0x1071   :  { %12881 = vmatprep.subr.bf16.mxu1 %v12460_v28  ;;  %12963 = vmatprep.subr.bf16.mxu0 %v12462_v15  ;;  %v12603_v28 = vld [vmem:[#allocation2 + $0x1e10] sm:$0xff]  ;;  %v12605_v15 = vld [vmem:[#allocation2 + $0x1e20] sm:$0xff] }
0x1074   :  { %12882 = vmatpush1.bf16.msra.mxu1 %v12459_v49  ;;  %12964 = vmatpush1.bf16.msra.mxu0 %v12461_v1  ;;  %v12602_v49 = vld [vmem:[#allocation2 + $0x1e08] sm:$0xff]  ;;  %v12604_v1 = vld [vmem:[#allocation2 + $0x1e18] sm:$0xff] }
0x1075   :  { %12883 = vmatprep.subr.bf16.mxu1 %v12471_v52  ;;  %12965 = vmatprep.subr.bf16.mxu0 %v12473_v4  ;;  %v12614_v52 = vld [vmem:[#allocation2 + $0x1e68] sm:$0xff]  ;;  %v12616_v4 = vld [vmem:[#allocation2 + $0x1e78] sm:$0xff] }
0x1078   :  { %12884 = vmatpush1.bf16.msra.mxu1 %v12470_v7  ;;  %12966 = vmatpush1.bf16.msra.mxu0 %v12472_v27  ;;  %v12613_v7 = vld [vmem:[#allocation2 + $0x1e60] sm:$0xff]  ;;  %v12615_v27 = vld [vmem:[#allocation2 + $0x1e70] sm:$0xff] }
0x1079   :  { %12885 = vmatprep.subr.bf16.mxu1 %v12482_v16  ;;  %12967 = vmatprep.subr.bf16.mxu0 %v12484_v18  ;;  %v12625_v16 = vld [vmem:[#allocation2 + $0x1ec0] sm:$0xff]  ;;  %v12627_v18 = vld [vmem:[#allocation2 + $0x1ed0] sm:$0xff] }
0x107c   :  { %12886 = vmatpush1.bf16.msra.mxu1 %v12481_v20  ;;  %12968 = vmatpush1.bf16.msra.mxu0 %v12483_v11  ;;  %v12624_v20 = vld [vmem:[#allocation2 + $0x1eb8] sm:$0xff]  ;;  %v12626_v11 = vld [vmem:[#allocation2 + $0x1ec8] sm:$0xff] }
0x107d   :  { %12887 = vmatprep.subr.bf16.mxu1 %v12493_v17  ;;  %12969 = vmatprep.subr.bf16.mxu0 %v12495_v21  ;;  %v12636_v17 = vld [vmem:[#allocation2 + $0x1f18] sm:$0xff]  ;;  %v12638_v21 = vld [vmem:[#allocation2 + $0x1f28] sm:$0xff] }
0x1080   :  { %12888 = vmatpush1.bf16.msra.mxu1 %v12492_v26  ;;  %12970 = vmatpush1.bf16.msra.mxu0 %v12494_v22  ;;  %v12635_v26 = vld [vmem:[#allocation2 + $0x1f10] sm:$0xff]  ;;  %v12637_v22 = vld [vmem:[#allocation2 + $0x1f20] sm:$0xff] }
0x1081   :  { %12889 = vmatprep.subr.bf16.mxu1 %v12504_v25  ;;  %12971 = vmatprep.subr.bf16.mxu0 %v12506_v23  ;;  %v12647_v25 = vld [vmem:[#allocation2 + $0x1f70] sm:$0xff]  ;;  %v12649_v23 = vld [vmem:[#allocation2 + $0x1f80] sm:$0xff] }
0x1084   :  { %12890 = vmatpush1.bf16.msra.mxu1 %v12503_v37  ;;  %12972 = vmatpush1.bf16.msra.mxu0 %v12505_v24  ;;  %v12646_v37 = vld [vmem:[#allocation2 + $0x1f68] sm:$0xff]  ;;  %v12648_v24 = vld [vmem:[#allocation2 + $0x1f78] sm:$0xff] }
0x1085   :  { %12891 = vmatprep.subr.bf16.mxu1 %v12515_v29  ;;  %12973 = vmatprep.subr.bf16.mxu0 %v12517_v9  ;;  %v12658_v29 = vld [vmem:[#allocation2 + $0x1fc8] sm:$0xff]  ;;  %v12660_v9 = vld [vmem:[#allocation2 + $0x1fd8] sm:$0xff] }
0x1088   :  { %12892 = vmatpush1.bf16.msra.mxu1 %v12514_v44  ;;  %12974 = vmatpush1.bf16.msra.mxu0 %v12516_v48  ;;  %v12657_v44 = vld [vmem:[#allocation2 + $0x1fc0] sm:$0xff]  ;;  %v12659_v48 = vld [vmem:[#allocation2 + $0x1fd0] sm:$0xff] }
0x1089   :  { %12902 = vmatprep.subr.bf16.mxu1 %v12526_v34  ;;  %12984 = vmatprep.subr.bf16.mxu0 %v12528_v14  ;;  %v12669_v34 = vld [vmem:[#allocation2 + $0x2020] sm:$0xff]  ;;  %v12671_v14 = vld [vmem:[#allocation2 + $0x2030] sm:$0xff] }
0x108b   :  { %12894 = vmatmul.mubr.bf16.vlgmr.msra.gmra.mrb[48].mxu1 %v17901_v19  ;;  %12976 = vmatmul.mubr.bf16.vlgmr.msra.gmra.mrb[44].mxu0 %v17901_v19 }
0x108c   :  { %12903 = vmatpush1.bf16.msra.mxu1 %v12525_v35  ;;  %12985 = vmatpush1.bf16.msra.mxu0 %v12527_v56  ;;  %v12668_v35 = vld [vmem:[#allocation2 + $0x2018] sm:$0xff]  ;;  %v12670_v56 = vld [vmem:[#allocation2 + $0x2028] sm:$0xff] }
0x108d   :  { %12904 = vmatprep.subr.bf16.mxu1 %v12537_v2  ;;  %12986 = vmatprep.subr.bf16.mxu0 %v12539_v59  ;;  %v12680_v2 = vld [vmem:[#allocation2 + $0x2078] sm:$0xff]  ;;  %v12682_v59 = vld [vmem:[#allocation2 + $0x2088] sm:$0xff] }
0x108e   :  { %12934 = vmatprep.mubr.bf16.mxu1 %v17907_v41  ;;  %13016 = vmatprep.mubr.bf16.mxu0 %v17907_v41 }
0x1090   :  { %12905 = vmatpush1.bf16.msra.mxu1 %v12536_v12  ;;  %12987 = vmatpush1.bf16.msra.mxu0 %v12538_v57  ;;  %v12679_v12 = vld [vmem:[#allocation2 + $0x2070] sm:$0xff]  ;;  %v12681_v57 = vld [vmem:[#allocation2 + $0x2080] sm:$0xff] }
0x1091   :  { %12906 = vmatprep.subr.bf16.mxu1 %v12548_v36  ;;  %12988 = vmatprep.subr.bf16.mxu0 %v12550_v58  ;;  %v12691_v36 = vld [vmem:[#allocation2 + $0x20d0] sm:$0xff]  ;;  %v12693_v58 = vld [vmem:[#allocation2 + $0x20e0] sm:$0xff] }
0x1094   :  { %12907 = vmatpush1.bf16.msra.mxu1 %v12547_v60  ;;  %12989 = vmatpush1.bf16.msra.mxu0 %v12549_v50  ;;  %v12690_v60 = vld [vmem:[#allocation2 + $0x20c8] sm:$0xff]  ;;  %v12692_v50 = vld [vmem:[#allocation2 + $0x20d8] sm:$0xff] }
0x1095   :  { %12908 = vmatprep.subr.bf16.mxu1 %v12559_v55  ;;  %12990 = vmatprep.subr.bf16.mxu0 %v12561_v33  ;;  %v12354_v55 = vld [vmem:[#allocation2 + $0x1648] sm:$0xff]  ;;  %v12443_v33 = vld [vmem:[#allocation2 + $0x1910] sm:$0xff] }
0x1098   :  { %12909 = vmatpush1.bf16.msra.mxu1 %v12558_v10  ;;  %12991 = vmatpush1.bf16.msra.mxu0 %v12560_v62  ;;  %v12353_v10 = vld [vmem:[#allocation2 + $0x1640] sm:$0xff]  ;;  %v12355_v62 = vld [vmem:[#allocation2 + $0x1650] sm:$0xff] }
0x1099   :  { %12910 = vmatprep.subr.bf16.mxu1 %v12570_v39  ;;  %12992 = vmatprep.subr.bf16.mxu0 %v12572_v63  ;;  %v12365_v39 = vld [vmem:[#allocation2 + $0x16a0] sm:$0xff]  ;;  %v12454_v63 = vld [vmem:[#allocation2 + $0x1968] sm:$0xff] }
0x109c   :  { %12911 = vmatpush1.bf16.msra.mxu1 %v12569_v0  ;;  %12993 = vmatpush1.bf16.msra.mxu0 %v12571_v53  ;;  %v12364_v0 = vld [vmem:[#allocation2 + $0x1698] sm:$0xff]  ;;  %v12366_v53 = vld [vmem:[#allocation2 + $0x16a8] sm:$0xff] }
0x109d   :  { %12912 = vmatprep.subr.bf16.mxu1 %v12581_v32  ;;  %12994 = vmatprep.subr.bf16.mxu0 %v12583_v51  ;;  %v12376_v32 = vld [vmem:[#allocation2 + $0x16f8] sm:$0xff]  ;;  %v12465_v51 = vld [vmem:[#allocation2 + $0x19c0] sm:$0xff] }
0x10a0   :  { %12913 = vmatpush1.bf16.msra.mxu1 %v12580_v43  ;;  %12995 = vmatpush1.bf16.msra.mxu0 %v12582_v31  ;;  %v12375_v43 = vld [vmem:[#allocation2 + $0x16f0] sm:$0xff]  ;;  %v12377_v31 = vld [vmem:[#allocation2 + $0x1700] sm:$0xff] }
0x10a1   :  { %12914 = vmatprep.subr.bf16.mxu1 %v12592_v13  ;;  %12996 = vmatprep.subr.bf16.mxu0 %v12594_v54  ;;  %v12387_v13 = vld [vmem:[#allocation2 + $0x1750] sm:$0xff]  ;;  %v12476_v54 = vld [vmem:[#allocation2 + $0x1a18] sm:$0xff] }
0x10a4   :  { %12915 = vmatpush1.bf16.msra.mxu1 %v12591_v61  ;;  %12997 = vmatpush1.bf16.msra.mxu0 %v12593_v42  ;;  %v12386_v61 = vld [vmem:[#allocation2 + $0x1748] sm:$0xff]  ;;  %v12388_v42 = vld [vmem:[#allocation2 + $0x1758] sm:$0xff] }
0x10a5   :  { %12916 = vmatprep.subr.bf16.mxu1 %v12603_v28  ;;  %12998 = vmatprep.subr.bf16.mxu0 %v12605_v15  ;;  %v12398_v28 = vld [vmem:[#allocation2 + $0x17a8] sm:$0xff]  ;;  %v12487_v15 = vld [vmem:[#allocation2 + $0x1a70] sm:$0xff] }
0x10a8   :  { %12917 = vmatpush1.bf16.msra.mxu1 %v12602_v49  ;;  %12999 = vmatpush1.bf16.msra.mxu0 %v12604_v1  ;;  %v12399_v49 = vld [vmem:[#allocation2 + $0x17b0] sm:$0xff]  ;;  %v12409_v1 = vld [vmem:[#allocation2 + $0x1800] sm:$0xff] }
0x10a9   :  { %12918 = vmatprep.subr.bf16.mxu1 %v12614_v52  ;;  %13000 = vmatprep.subr.bf16.mxu0 %v12616_v4  ;;  %v12498_v52 = vld [vmem:[#allocation2 + $0x1ac8] sm:$0xff]  ;;  %v12408_v4 = vld [vmem:[#allocation2 + $0x17f8] sm:$0xff] }
0x10ac   :  { %12919 = vmatpush1.bf16.msra.mxu1 %v12613_v7  ;;  %13001 = vmatpush1.bf16.msra.mxu0 %v12615_v27  ;;  %v12410_v7 = vld [vmem:[#allocation2 + $0x1808] sm:$0xff]  ;;  %v12420_v27 = vld [vmem:[#allocation2 + $0x1858] sm:$0xff] }
0x10ad   :  { %12920 = vmatprep.subr.bf16.mxu1 %v12625_v16  ;;  %13002 = vmatprep.subr.bf16.mxu0 %v12627_v18  ;;  %v12509_v16 = vld [vmem:[#allocation2 + $0x1b20] sm:$0xff]  ;;  %v12419_v18 = vld [vmem:[#allocation2 + $0x1850] sm:$0xff] }
0x10b0   :  { %12921 = vmatpush1.bf16.msra.mxu1 %v12624_v20  ;;  %13003 = vmatpush1.bf16.msra.mxu0 %v12626_v11  ;;  %v12421_v20 = vld [vmem:[#allocation2 + $0x1860] sm:$0xff]  ;;  %v12431_v11 = vld [vmem:[#allocation2 + $0x18b0] sm:$0xff] }
0x10b1   :  { %12922 = vmatprep.subr.bf16.mxu1 %v12636_v17  ;;  %13004 = vmatprep.subr.bf16.mxu0 %v12638_v21  ;;  %v12520_v17 = vld [vmem:[#allocation2 + $0x1b78] sm:$0xff]  ;;  %v12430_v21 = vld [vmem:[#allocation2 + $0x18a8] sm:$0xff] }
0x10b4   :  { %12923 = vmatpush1.bf16.msra.mxu1 %v12635_v26  ;;  %13005 = vmatpush1.bf16.msra.mxu0 %v12637_v22  ;;  %v12432_v26 = vld [vmem:[#allocation2 + $0x18b8] sm:$0xff]  ;;  %v12442_v22 = vld [vmem:[#allocation2 + $0x1908] sm:$0xff] }
0x10b5   :  { %12924 = vmatprep.subr.bf16.mxu1 %v12647_v25  ;;  %13006 = vmatprep.subr.bf16.mxu0 %v12649_v23  ;;  %v12619_v25 = vld [vmem:[#allocation2 + $0x1e90] sm:$0xff]  ;;  %v12441_v23 = vld [vmem:[#allocation2 + $0x1900] sm:$0xff] }
0x10b8   :  { %12925 = vmatpush1.bf16.msra.mxu1 %v12646_v37  ;;  %13007 = vmatpush1.bf16.msra.mxu0 %v12648_v24  ;;  %v12531_v37 = vld [vmem:[#allocation2 + $0x1bd0] sm:$0xff]  ;;  %v12453_v24 = vld [vmem:[#allocation2 + $0x1960] sm:$0xff] }
0x10b9   :  { %12926 = vmatprep.subr.bf16.mxu1 %v12658_v29  ;;  %13008 = vmatprep.subr.bf16.mxu0 %v12660_v9  ;;  %v12630_v29 = vld [vmem:[#allocation2 + $0x1ee8] sm:$0xff]  ;;  %v12452_v9 = vld [vmem:[#allocation2 + $0x1958] sm:$0xff] }
0x10bc   :  { %12927 = vmatpush1.bf16.msra.mxu1 %v12657_v44  ;;  %13009 = vmatpush1.bf16.msra.mxu0 %v12659_v48  ;;  %v12542_v44 = vld [vmem:[#allocation2 + $0x1c28] sm:$0xff]  ;;  %v12464_v48 = vld [vmem:[#allocation2 + $0x19b8] sm:$0xff] }
0x10bd   :  { %12928 = vmatprep.subr.bf16.mxu1 %v12669_v34  ;;  %13010 = vmatprep.subr.bf16.mxu0 %v12671_v14  ;;  %v12641_v34 = vld [vmem:[#allocation2 + $0x1f40] sm:$0xff]  ;;  %v12463_v14 = vld [vmem:[#allocation2 + $0x19b0] sm:$0xff] }
0x10c0   :  { %12929 = vmatpush1.bf16.msra.mxu1 %v12668_v35  ;;  %13011 = vmatpush1.bf16.msra.mxu0 %v12670_v56  ;;  %v12553_v35 = vld [vmem:[#allocation2 + $0x1c80] sm:$0xff]  ;;  %v12475_v56 = vld [vmem:[#allocation2 + $0x1a10] sm:$0xff] }
0x10c1   :  { %12930 = vmatprep.subr.bf16.mxu1 %v12680_v2  ;;  %13012 = vmatprep.subr.bf16.mxu0 %v12682_v59  ;;  %v12652_v2 = vld [vmem:[#allocation2 + $0x1f98] sm:$0xff]  ;;  %v12474_v59 = vld [vmem:[#allocation2 + $0x1a08] sm:$0xff] }
0x10c4   :  { %12931 = vmatpush1.bf16.msra.mxu1 %v12679_v12  ;;  %13013 = vmatpush1.bf16.msra.mxu0 %v12681_v57  ;;  %v12564_v12 = vld [vmem:[#allocation2 + $0x1cd8] sm:$0xff]  ;;  %v12486_v57 = vld [vmem:[#allocation2 + $0x1a68] sm:$0xff] }
0x10c5   :  { %12932 = vmatprep.subr.bf16.mxu1 %v12691_v36  ;;  %13014 = vmatprep.subr.bf16.mxu0 %v12693_v58  ;;  %v12663_v36 = vld [vmem:[#allocation2 + $0x1ff0] sm:$0xff]  ;;  %v12485_v58 = vld [vmem:[#allocation2 + $0x1a60] sm:$0xff] }
0x10c8   :  { %12933 = vmatpush1.bf16.msra.mxu1 %v12690_v60  ;;  %13015 = vmatpush1.bf16.msra.mxu0 %v12692_v50  ;;  %v12575_v60 = vld [vmem:[#allocation2 + $0x1d30] sm:$0xff]  ;;  %v12497_v50 = vld [vmem:[#allocation2 + $0x1ac0] sm:$0xff] }
0x10c9   :  { %13025 = vmatprep.subr.bf16.mxu1 %v12354_v55  ;;  %15017 = vmatprep.subr.bf16.mxu0 %v12443_v33  ;;  %v12674_v55 = vld [vmem:[#allocation2 + $0x2048] sm:$0xff]  ;;  %v12496_v33 = vld [vmem:[#allocation2 + $0x1ab8] sm:$0xff] }
0x10cb   :  { %12935 = vmatmul.mubr.bf16.vlgmr.msra.gmra.mrb[48].mxu1 %v17903_v38  ;;  %13017 = vmatmul.mubr.bf16.vlgmr.msra.gmra.mrb[44].mxu0 %v17903_v38 }
0x10cc   :  { %13026 = vmatpush1.bf16.msra.mxu1 %v12353_v10  ;;  %15018 = vmatpush3.bf16.msra.mxu0 %v12355_v62  ;;  %v12586_v10 = vld [vmem:[#allocation2 + $0x1d88] sm:$0xff]  ;;  %v12508_v62 = vld [vmem:[#allocation2 + $0x1b18] sm:$0xff] }
0x10cd   :  { %13027 = vmatprep.subr.bf16.mxu1 %v12365_v39  ;;  %15019 = vmatprep.subr.bf16.mxu0 %v12454_v63  ;;  %v12685_v39 = vld [vmem:[#allocation2 + $0x20a0] sm:$0xff]  ;;  %v12507_v63 = vld [vmem:[#allocation2 + $0x1b10] sm:$0xff] }
0x10ce   :  { %13139 = vmatprep.mubr.bf16.mxu0 %v17905_v40  ;;  %13057 = vmatprep.mubr.bf16.mxu1 %v17905_v40  ;;  %v12397_v40 = vld [vmem:[#allocation2 + $0x17a0] sm:$0xff] }
0x10d0   :  { %13028 = vmatpush1.bf16.msra.mxu1 %v12364_v0  ;;  %15020 = vmatpush3.bf16.msra.mxu0 %v12366_v53  ;;  %v12597_v0 = vld [vmem:[#allocation2 + $0x1de0] sm:$0xff]  ;;  %v12519_v53 = vld [vmem:[#allocation2 + $0x1b70] sm:$0xff] }
0x10d1   :  { %13029 = vmatprep.subr.bf16.mxu1 %v12376_v32  ;;  %15021 = vmatprep.subr.bf16.mxu0 %v12465_v51  ;;  %v12696_v32 = vld [vmem:[#allocation2 + $0x20f8] sm:$0xff]  ;;  %v12518_v51 = vld [vmem:[#allocation2 + $0x1b68] sm:$0xff] }
0x10d4   :  { %13030 = vmatpush1.bf16.msra.mxu1 %v12375_v43  ;;  %15022 = vmatpush3.bf16.msra.mxu0 %v12377_v31  ;;  %v12608_v43 = vld [vmem:[#allocation2 + $0x1e38] sm:$0xff]  ;;  %v12530_v31 = vld [vmem:[#allocation2 + $0x1bc8] sm:$0xff] }
0x10d5   :  { %13031 = vmatprep.subr.bf16.mxu1 %v12387_v13  ;;  %15023 = vmatprep.subr.bf16.mxu0 %v12476_v54  ;;  %v12529_v13 = vld [vmem:[#allocation2 + $0x1bc0] sm:$0xff] }
0x10d6   :  { %v12541_v54 = vld [vmem:[#allocation2 + $0x1c20] sm:$0xff] }
0x10d8   :  { %13032 = vmatpush1.bf16.msra.mxu1 %v12386_v61  ;;  %15024 = vmatpush3.bf16.msra.mxu0 %v12388_v42  ;;  %v12540_v61 = vld [vmem:[#allocation2 + $0x1c18] sm:$0xff] }
0x10d9   :  { %13033 = vmatprep.subr.bf16.mxu1 %v12398_v28  ;;  %15025 = vmatprep.subr.bf16.mxu0 %v12487_v15  ;;  %v12552_v42 = vld [vmem:[#allocation2 + $0x1c78] sm:$0xff]  ;;  %v12551_v28 = vld [vmem:[#allocation2 + $0x1c70] sm:$0xff] }
0x10da   :  { %v12563_v15 = vld [vmem:[#allocation2 + $0x1cd0] sm:$0xff] }
0x10dc   :  { %13034 = vmatpush1.bf16.msra.mxu1 %v12397_v40  ;;  %15026 = vmatpush3.bf16.msra.mxu0 %v12399_v49  ;;  %v12562_v40 = vld [vmem:[#allocation2 + $0x1cc8] sm:$0xff] }
0x10dd   :  { %13035 = vmatprep.subr.bf16.mxu1 %v12409_v1  ;;  %15027 = vmatprep.subr.bf16.mxu0 %v12498_v52  ;;  %v12574_v49 = vld [vmem:[#allocation2 + $0x1d28] sm:$0xff]  ;;  %v12573_v1 = vld [vmem:[#allocation2 + $0x1d20] sm:$0xff] }
0x10de   :  { %v12585_v52 = vld [vmem:[#allocation2 + $0x1d80] sm:$0xff] }
0x10e0   :  { %13036 = vmatpush1.bf16.msra.mxu1 %v12408_v4  ;;  %15028 = vmatpush3.bf16.msra.mxu0 %v12410_v7  ;;  %v12596_v7 = vld [vmem:[#allocation2 + $0x1dd8] sm:$0xff] }
0x10e1   :  { %13037 = vmatprep.subr.bf16.mxu1 %v12420_v27  ;;  %15029 = vmatprep.subr.bf16.mxu0 %v12509_v16 }
0x10e4   :  { %13038 = vmatpush1.bf16.msra.mxu1 %v12419_v18  ;;  %15030 = vmatpush3.bf16.msra.mxu0 %v12421_v20 }
0x10e5   :  { %13039 = vmatprep.subr.bf16.mxu1 %v12431_v11  ;;  %15031 = vmatprep.subr.bf16.mxu0 %v12520_v17 }
0x10e8   :  { %13040 = vmatpush1.bf16.msra.mxu1 %v12430_v21  ;;  %15032 = vmatpush3.bf16.msra.mxu0 %v12432_v26 }
0x10e9   :  { %13041 = vmatprep.subr.bf16.mxu1 %v12442_v22  ;;  %15039 = vmatprep.subr.bf16.mxu0 %v12619_v25 }
0x10eb   :  { %13140 = vmatmul.mubr.bf16.vlgmr.msra.gmra.mrb[48].mxu0 %v17901_v19 }
0x10ec   :  { %13042 = vmatpush1.bf16.msra.mxu1 %v12441_v23  ;;  %15040 = vmatpush3.bf16.msra.mxu0 %v12531_v37 }
0x10ed   :  { %13043 = vmatprep.subr.bf16.mxu1 %v12453_v24  ;;  %15041 = vmatprep.subr.bf16.mxu0 %v12630_v29  ;;  %v12595_v24 = vld [vmem:[#allocation2 + $0x1dd0] sm:$0xff] }
0x10ee   :  { %13179 = vmatprep.mubr.bf16.mxu0 %v17907_v41 }
0x10f0   :  { %13044 = vmatpush1.bf16.msra.mxu1 %v12452_v9  ;;  %15042 = vmatpush3.bf16.msra.mxu0 %v12542_v44  ;;  %v12607_v44 = vld [vmem:[#allocation2 + $0x1e30] sm:$0xff] }
0x10f1   :  { %13045 = vmatprep.subr.bf16.mxu1 %v12464_v48  ;;  %15043 = vmatprep.subr.bf16.mxu0 %v12641_v34 }
0x10f4   :  { %13046 = vmatpush1.bf16.msra.mxu1 %v12463_v14  ;;  %15044 = vmatpush3.bf16.msra.mxu0 %v12553_v35 }
0x10f5   :  { %13047 = vmatprep.subr.bf16.mxu1 %v12475_v56  ;;  %15045 = vmatprep.subr.bf16.mxu0 %v12652_v2 }
0x10f8   :  { %13048 = vmatpush1.bf16.msra.mxu1 %v12474_v59  ;;  %15046 = vmatpush3.bf16.msra.mxu0 %v12564_v12  ;;  %v12606_v59 = vld [vmem:[#allocation2 + $0x1e28] sm:$0xff] }
0x10f9   :  { %13049 = vmatprep.subr.bf16.mxu1 %v12486_v57  ;;  %15047 = vmatprep.subr.bf16.mxu0 %v12663_v36  ;;  %v12618_v36 = vld [vmem:[#allocation2 + $0x1e88] sm:$0xff] }
0x10fc   :  { %13050 = vmatpush1.bf16.msra.mxu1 %v12485_v58  ;;  %15048 = vmatpush3.bf16.msra.mxu0 %v12575_v60 }
0x10fd   :  { %13051 = vmatprep.subr.bf16.mxu1 %v12497_v50  ;;  %15049 = vmatprep.subr.bf16.mxu0 %v12674_v55 }
0x1100   :  { %13052 = vmatpush1.bf16.msra.mxu1 %v12496_v33  ;;  %15050 = vmatpush3.bf16.msra.mxu0 %v12586_v10 }
0x1101   :  { %13053 = vmatprep.subr.bf16.mxu1 %v12508_v62  ;;  %15051 = vmatprep.subr.bf16.mxu0 %v12685_v39  ;;  %v12617_v62 = vld [vmem:[#allocation2 + $0x1e80] sm:$0xff] }
0x1104   :  { %13054 = vmatpush1.bf16.msra.mxu1 %v12507_v63  ;;  %15052 = vmatpush3.bf16.msra.mxu0 %v12597_v0  ;;  %v12629_v0 = vld [vmem:[#allocation2 + $0x1ee0] sm:$0xff] }
0x1105   :  { %13055 = vmatprep.subr.bf16.mxu1 %v12519_v53  ;;  %15053 = vmatprep.subr.bf16.mxu0 %v12696_v32 }
0x1108   :  { %13056 = vmatpush1.bf16.msra.mxu1 %v12518_v51  ;;  %15054 = vmatpush3.bf16.msra.mxu0 %v12608_v43 }
0x1109   :  { %13066 = vmatprep.subr.bf16.mxu1 %v12530_v31 }
0x110b   :  { %13180 = vmatmul.mubr.bf16.vlgmr.msra.gmra.mrb[52].mxu0 %v17903_v38  ;;  %13058 = vmatmul.mubr.bf16.vlgmr.msra.gmra.mrb[52].mxu1 %v17901_v19  ;;  %v12584_v19 = vld [vmem:[#allocation2 + $0x1d78] sm:$0xff] }
0x110c   :  { %13067 = vmatpush1.bf16.msra.mxu1 %v12529_v13  ;;  %13098 = vmatprep.mubr.bf16.mxu1 %v17907_v41 }
0x110d   :  { %13068 = vmatprep.subr.bf16.mxu1 %v12541_v54  ;;  %v12628_v54 = vld [vmem:[#allocation2 + $0x1ed8] sm:$0xff] }
0x1110   :  { %13069 = vmatpush1.bf16.msra.mxu1 %v12540_v61 }
0x1111   :  { %13070 = vmatprep.subr.bf16.mxu1 %v12552_v42 }
0x1114   :  { %13071 = vmatpush1.bf16.msra.mxu1 %v12551_v28  ;;  %v12640_v28 = vld [vmem:[#allocation2 + $0x1f38] sm:$0xff] }
0x1115   :  { %13072 = vmatprep.subr.bf16.mxu1 %v12563_v15 }
0x1118   :  { %13073 = vmatpush1.bf16.msra.mxu1 %v12562_v40 }
0x1119   :  { %13074 = vmatprep.subr.bf16.mxu1 %v12574_v49 }
0x111c   :  { %13075 = vmatpush1.bf16.msra.mxu1 %v12573_v1 }
0x111d   :  { %13076 = vmatprep.subr.bf16.mxu1 %v12585_v52 }
0x111e   :  { %v12772_v4 = vpop.f32.mrb[44].mxu1  ;;  %v12854_v41 = vpop.f32.mrb[40].mxu0 }
0x111f   :  { %v13191_v27 = vrot.slane %v12772_v4, 4  ;;  %v13203_v16 = vrot.slane %v12854_v41, 4  ;;  %v12774_v18 = vpop.f32.mrb[45].mxu1  ;;  %v12856_v20 = vpop.f32.mrb[41].mxu0 }
0x1120   :  { %v13197_v11 = vrot.slane %v12774_v18, 4  ;;  %v13209_v17 = vrot.slane %v12856_v20, 4  ;;  %v12776_v21 = vpop.f32.mrb[46].mxu1  ;;  %v12858_v26 = vpop.f32.mrb[42].mxu0  ;;  %13077 = vmatpush1.bf16.msra.mxu1 %v12584_v19 }
0x1121   :  { %v13192_v22 = vadd.f32 %v13191_v27, %v12772_v4  ;;  %v13204_v25 = vadd.f32 %v13203_v16, %v12854_v41  ;;  %v12777_v23 = vpop.f32.mrb[47].mxu1  ;;  %v12859_v37 = vpop.f32.mrb[43].mxu0  ;;  %13078 = vmatprep.subr.bf16.mxu1 %v12596_v7  ;;  %v12651_v27 = vld [vmem:[#allocation2 + $0x1f90] sm:$0xff]  ;;  %v12650_v26 = vld [vmem:[#allocation2 + $0x1f88] sm:$0xff] }
0x1122   :  { %v13198_v29 = vadd.f32 %v13197_v11, %v12774_v18  ;;  %v13210_v9 = vadd.f32 %v13209_v17, %v12856_v20  ;;  %v12662_v23 = vld [vmem:[#allocation2 + $0x1fe8] sm:$0xff] }
0x1123   :  { %v13193_v48 = vrot.slane %v13192_v22, 2  ;;  %v13205_v34 = vrot.slane %v13204_v25, 2 }
0x1124   :  { %v13199_v14 = vrot.slane %v13198_v29, 2  ;;  %v13211_v35 = vrot.slane %v13210_v9, 2  ;;  %13079 = vmatpush1.bf16.msra.mxu1 %v12595_v24 }
0x1125   :  { %v13194_v56 = vadd.f32 %v13193_v48, %v13192_v22  ;;  %v13206_v2 = vadd.f32 %v13205_v34, %v13204_v25  ;;  %13080 = vmatprep.subr.bf16.mxu1 %v12607_v44  ;;  %v12661_v34 = vld [vmem:[#allocation2 + $0x1fe0] sm:$0xff] }
0x1126   :  { %v13200_v12 = vadd.f32 %v13199_v14, %v13198_v29  ;;  %v13212_v57 = vadd.f32 %v13211_v35, %v13210_v9 }
0x1127   :  { %v13195_v58 = vrot.slane %v13194_v56, 1  ;;  %v13207_v60 = vrot.slane %v13206_v2, 1 }
0x1128   :  { %v13201_v50 = vrot.slane %v13200_v12, 1  ;;  %v13213_v55 = vrot.slane %v13212_v57, 1  ;;  %13081 = vmatpush1.bf16.msra.mxu1 %v12606_v59 }
0x1129   :  { %v13196_v33 = vadd.f32 %v13195_v58, %v13194_v56  ;;  %v13208_v10 = vadd.f32 %v13207_v60, %v13206_v2  ;;  %13082 = vmatprep.subr.bf16.mxu1 %v12618_v36  ;;  %v12673_v56 = vld [vmem:[#allocation2 + $0x2040] sm:$0xff]  ;;  %v12672_v60 = vld [vmem:[#allocation2 + $0x2038] sm:$0xff] }
0x112a   :  { %v13202_v39 = vadd.f32 %v13201_v50, %v13200_v12  ;;  %v13214_v63 = vadd.f32 %v13213_v55, %v13212_v57 }
0x112b   :  { %v13257_v53 = vmul.f32 0.125, %v13196_v33  ;;  %v13259_v32 = vmul.f32 0.125, %v13208_v10  ;;  %v12684_v33 = vld [vmem:[#allocation2 + $0x2098] sm:$0xff] }
0x112c   :  { %v13258_v51 = vmul.f32 0.125, %v13202_v39  ;;  %v13260_v43 = vmul.f32 0.125, %v13214_v63  ;;  %13083 = vmatpush1.bf16.msra.mxu1 %v12617_v62 }
0x112d   :  { %v18162_v31 = vsub.f32 %v12772_v4, %v13257_v53  ;;  %v18164_v13 = vsub.f32 %v12854_v41, %v13259_v32  ;;  %13084 = vmatprep.subr.bf16.mxu1 %v12629_v0  ;;  %v12639_v4 = vld [vmem:[#allocation2 + $0x1f30] sm:$0xff]  ;;  %v12694_v32 = vld [vmem:[#allocation2 + $0x20e8] sm:$0xff] }
0x112e   :  { %v18166_v61 = vsub.f32 %v12774_v18, %v13258_v51  ;;  %v18168_v42 = vsub.f32 %v12856_v20, %v13260_v43  ;;  %v12683_v0 = vld [vmem:[#allocation2 + $0x2090] sm:$0xff]  ;;  %v18178_v51 = vld [vmem:[#allocation16 + $0x23] sm:$0xff] }
0x112f   :  { %v13279_v15 = vmul.f32 %v18162_v31, %v18162_v31  ;;  %v13281_v40 = vmul.f32 %v18164_v13, %v18164_v13  ;;  %v12695_v53 = vld [vmem:[#allocation2 + $0x20f0] sm:$0xff] }
0x1130   :  { %v13280_v49 = vmul.f32 %v18166_v61, %v18166_v61  ;;  %v13282_v1 = vmul.f32 %v18168_v42, %v18168_v42  ;;  %13085 = vmatpush1.bf16.msra.mxu1 %v12628_v54  ;;  %v18180_v43 = vld [vmem:[#allocation17 + $0x23] sm:$0xff]  ;;  %v13405_v54 = vrot.slane %v18178_v51, %v17863_v3 }
0x1131   :  { %v13290_v52 = vrot.slane %v13279_v15, 4  ;;  %v13302_v19 = vrot.slane %v13281_v40, 4  ;;  %13086 = vmatprep.subr.bf16.mxu1 %v12640_v28 }
0x1132   :  { %v13296_v41 = vrot.slane %v13280_v49, 4  ;;  %v13308_v7 = vrot.slane %v13282_v1, 4 }
0x1133   :  { %v13291_v16 = vadd.f32 %v13290_v52, %v13279_v15  ;;  %v13303_v18 = vadd.f32 %v13302_v19, %v13281_v40  ;;  %v13413_v15 = vrot.slane %v18178_v51, %v17866_v5  ;;  %v13409_v52 = vrot.slane %v18178_v51, %v17869_v6 }
0x1134   :  { %v13297_v20 = vadd.f32 %v13296_v41, %v13280_v49  ;;  %v13309_v11 = vadd.f32 %v13308_v7, %v13282_v1  ;;  %13087 = vmatpush1.bf16.msra.mxu1 %v12639_v4  ;;  %v13473_v1 = vrot.slane %v18180_v43, %v17863_v3  ;;  %v13481_v41 = vrot.slane %v18180_v43, %v17866_v5 }
0x1135   :  { %v13292_v17 = vrot.slane %v13291_v16, 2  ;;  %v13304_v21 = vrot.slane %v13303_v18, 2  ;;  %13088 = vmatprep.subr.bf16.mxu1 %v12651_v27  ;;  %v13417_v7 = vrot.slane %v18178_v51, %v17872_v8 }
0x1136   :  { %v13298_v22 = vrot.slane %v13297_v20, 2  ;;  %v13310_v25 = vrot.slane %v13309_v11, 2 }
0x1137   :  { %v13293_v37 = vadd.f32 %v13292_v17, %v13291_v16  ;;  %v13305_v24 = vadd.f32 %v13304_v21, %v13303_v18  ;;  %v18200_v18 = vstv %s14903_s15 }
0x1138   :  { %v13299_v29 = vadd.f32 %v13298_v22, %v13297_v20  ;;  %v13311_v9 = vadd.f32 %v13310_v25, %v13309_v11  ;;  %13089 = vmatpush1.bf16.msra.mxu1 %v12650_v26 }
0x1139   :  { %v13294_v44 = vrot.slane %v13293_v37, 1  ;;  %v13306_v48 = vrot.slane %v13305_v24, 1  ;;  %13090 = vmatprep.subr.bf16.mxu1 %v12662_v23 }
0x113a   :  { %v13300_v14 = vrot.slane %v13299_v29, 1  ;;  %v13312_v35 = vrot.slane %v13311_v9, 1 }
0x113b   :  { %v13295_v2 = vadd.f32 %v13294_v44, %v13293_v37  ;;  %v13307_v59 = vadd.f32 %v13306_v48, %v13305_v24 }
0x113c   :  { %v13301_v12 = vadd.f32 %v13300_v14, %v13299_v29  ;;  %v13313_v57 = vadd.f32 %v13312_v35, %v13311_v9  ;;  %13091 = vmatpush1.bf16.msra.mxu1 %v12661_v34 }
0x113d   :  { %v13356_v36 = vmul.f32 0.125, %v13295_v2  ;;  %v13358_v58 = vmul.f32 0.125, %v13307_v59  ;;  %13092 = vmatprep.subr.bf16.mxu1 %v12673_v56 }
0x113e   :  { %v13357_v50 = vmul.f32 0.125, %v13301_v12  ;;  %v13359_v55 = vmul.f32 0.125, %v13313_v57 }
0x113f   :  { %v13367_v10 = vadd.f32 1e-05, %v13356_v36  ;;  %v13369_v62 = vadd.f32 1e-05, %v13358_v58 }
0x1140   :  { %v13368_v39 = vadd.f32 1e-05, %v13357_v50  ;;  %v13370_v63 = vadd.f32 1e-05, %v13359_v55  ;;  %13093 = vmatpush1.bf16.msra.mxu1 %v12672_v60 }
0x1141   :  { %17232 = vrsqrt.f32 %v13367_v10  ;;  %13094 = vmatprep.subr.bf16.mxu1 %v12684_v33 }
0x1142   :  { %17234 = vrsqrt.f32 %v13369_v62 }
0x1143   :  { %17236 = vrsqrt.f32 %v13368_v39 }
0x1144   :  { %17238 = vrsqrt.f32 %v13370_v63  ;;  %13095 = vmatpush1.bf16.msra.mxu1 %v12683_v0 }
0x1145   :  { %13096 = vmatprep.subr.bf16.mxu1 %v12695_v53 }
0x1148   :  { %13097 = vmatpush1.bf16.msra.mxu1 %v12694_v32 }
0x114b   :  { %v17233_v28 = vpop.eup %17232  ;;  %13099 = vmatmul.mubr.bf16.vlgmr.msra.gmra.mrb[52].mxu1 %v17903_v38 }
0x114c   :  { %v17235_v40 = vpop.eup %17234  ;;  %v13389_v49 = vmul.f32 %v17233_v28, %v18162_v31  ;;  %v13477_v31 = vrot.slane %v18180_v43, %v17869_v6 }
0x114d   :  { %v17237_v19 = vpop.eup %17236  ;;  %v13391_v4 = vmul.f32 %v17235_v40, %v18164_v13  ;;  %v13485_v13 = vrot.slane %v18180_v43, %v17872_v8 }
0x114e   :  { %v17239_v27 = vpop.eup %17238  ;;  %v13457_v38 = vmul.f32 %v13405_v54, %v13389_v49  ;;  %v13390_v16 = vmul.f32 %v17237_v19, %v18166_v61 }
0x114f   :  { %v13459_v20 = vmul.f32 %v13413_v15, %v13391_v4  ;;  %v13392_v11 = vmul.f32 %v17239_v27, %v18168_v42 }
0x1150   :  { %v13525_v17 = vadd.f32 %v13473_v1, %v13457_v38  ;;  %v13458_v21 = vmul.f32 %v13409_v52, %v13390_v16 }
0x1151   :  { %v13527_v26 = vadd.f32 %v13481_v41, %v13459_v20  ;;  %v13460_v22 = vmul.f32 %v13417_v7, %v13392_v11 }
0x1152   :  { %vm13537_vm12 = vcmp.gt.f32.partialorder %v13525_v17, 0.0  ;;  %v13549_v25 = vmul.f32 %v18200_v18, %v13525_v17  ;;  %v13526_v23 = vadd.f32 %v13477_v31, %v13458_v21 }
0x1153   :  { %vm13539_vm13 = vcmp.gt.f32.partialorder %v13527_v26, 0.0  ;;  %v13551_v61 = vmul.f32 %v18200_v18, %v13527_v26  ;;  %v13528_v37 = vadd.f32 %v13485_v13, %v13460_v22 }
0x1154   :  { %v13560_v24 = vsel %vm13537_vm12, %v13525_v17, %v13549_v25  ;;  %vm13538_vm14 = vcmp.gt.f32.partialorder %v13526_v23, 0.0  ;;  %v13550_v29 = vmul.f32 %v18200_v18, %v13526_v23 }
0x1155   :  { %13571 = vst [vmem:[#allocation21 + $0xb0] sm:$0xff] %v13560_v24  ;;  %v13562_v42 = vsel %vm13539_vm13, %v13527_v26, %v13551_v61  ;;  %vm13540_vm15 = vcmp.gt.f32.partialorder %v13528_v37, 0.0  ;;  %v13552_v8 = vmul.f32 %v18200_v18, %v13528_v37 }
0x1156   :  { %13573 = vst [vmem:[#allocation21 + $0xc0] sm:$0xff] %v13562_v42  ;;  %v13561_v9 = vsel %vm13538_vm14, %v13526_v23, %v13550_v29 }
0x1157   :  { %13572 = vst [vmem:[#allocation21 + $0xb8] sm:$0xff] %v13561_v9  ;;  %v13563_v44 = vsel %vm13540_vm15, %v13528_v37, %v13552_v8 }
0x1158   :  { %13574 = vst [vmem:[#allocation21 + $0xc8] sm:$0xff] %v13563_v44 }
0x119e   :  { %v12936_v48 = vpop.f32.mrb[48].mxu1  ;;  %v13018_v34 = vpop.f32.mrb[44].mxu0 }
0x119f   :  { %v13215_v14 = vrot.slane %v12936_v48, 4  ;;  %v13227_v35 = vrot.slane %v13018_v34, 4  ;;  %v12938_v56 = vpop.f32.mrb[49].mxu1  ;;  %v13020_v2 = vpop.f32.mrb[45].mxu0 }
0x11a0   :  { %v13221_v59 = vrot.slane %v12938_v56, 4  ;;  %v13233_v12 = vrot.slane %v13020_v2, 4  ;;  %v12940_v57 = vpop.f32.mrb[50].mxu1  ;;  %v13022_v36 = vpop.f32.mrb[46].mxu0 }
0x11a1   :  { %v13216_v58 = vadd.f32 %v13215_v14, %v12936_v48  ;;  %v13228_v60 = vadd.f32 %v13227_v35, %v13018_v34  ;;  %v12941_v50 = vpop.f32.mrb[51].mxu1  ;;  %v13023_v55 = vpop.f32.mrb[47].mxu0 }
0x11a2   :  { %v13222_v33 = vadd.f32 %v13221_v59, %v12938_v56  ;;  %v13234_v10 = vadd.f32 %v13233_v12, %v13020_v2 }
0x11a3   :  { %v13217_v62 = vrot.slane %v13216_v58, 2  ;;  %v13229_v39 = vrot.slane %v13228_v60, 2 }
0x11a4   :  { %v13223_v63 = vrot.slane %v13222_v33, 2  ;;  %v13235_v0 = vrot.slane %v13234_v10, 2 }
0x11a5   :  { %v13218_v53 = vadd.f32 %v13217_v62, %v13216_v58  ;;  %v13230_v32 = vadd.f32 %v13229_v39, %v13228_v60 }
0x11a6   :  { %v13224_v54 = vadd.f32 %v13223_v63, %v13222_v33  ;;  %v13236_v28 = vadd.f32 %v13235_v0, %v13234_v10 }
0x11a7   :  { %v13219_v15 = vrot.slane %v13218_v53, 1  ;;  %v13231_v40 = vrot.slane %v13230_v32, 1 }
0x11a8   :  { %v13225_v49 = vrot.slane %v13224_v54, 1  ;;  %v13237_v1 = vrot.slane %v13236_v28, 1 }
0x11a9   :  { %v13220_v52 = vadd.f32 %v13219_v15, %v13218_v53  ;;  %v13232_v19 = vadd.f32 %v13231_v40, %v13230_v32 }
0x11aa   :  { %v13226_v4 = vadd.f32 %v13225_v49, %v13224_v54  ;;  %v13238_v41 = vadd.f32 %v13237_v1, %v13236_v28  ;;  %v13421_v1 = vrot.slane %v18178_v51, %v17988_v30 }
0x11ab   :  { %v13261_v7 = vmul.f32 0.125, %v13220_v52  ;;  %v13263_v27 = vmul.f32 0.125, %v13232_v19  ;;  %v13429_v19 = vrot.slane %v18178_v51, %v17991_v45 }
0x11ac   :  { %v13262_v38 = vmul.f32 0.125, %v13226_v4  ;;  %v13264_v16 = vmul.f32 0.125, %v13238_v41 }
0x11ad   :  { %v13272_v31 = vsub.f32 %v12936_v48, %v13261_v7  ;;  %v13274_v20 = vsub.f32 %v13018_v34, %v13263_v27  ;;  %v13489_v7 = vrot.slane %v18180_v43, %v17988_v30  ;;  %v13425_v27 = vrot.slane %v18178_v51, %v17994_v46 }
0x11ae   :  { %v13273_v11 = vsub.f32 %v12938_v56, %v13262_v38  ;;  %v13275_v13 = vsub.f32 %v13020_v2, %v13264_v16  ;;  %v13501_v30 = vrot.slane %v18180_v43, %v17997_v47 }
0x11af   :  { %v13283_v17 = vmul.f32 %v13272_v31, %v13272_v31  ;;  %v13285_v21 = vmul.f32 %v13274_v20, %v13274_v20 }
0x11b0   :  { %v13284_v26 = vmul.f32 %v13273_v11, %v13273_v11  ;;  %v13286_v22 = vmul.f32 %v13275_v13, %v13275_v13 }
0x11b1   :  { %v13314_v25 = vrot.slane %v13283_v17, 4  ;;  %v13326_v23 = vrot.slane %v13285_v21, 4 }
0x11b2   :  { %v13320_v61 = vrot.slane %v13284_v26, 4  ;;  %v13332_v37 = vrot.slane %v13286_v22, 4 }
0x11b3   :  { %v13315_v24 = vadd.f32 %v13314_v25, %v13283_v17  ;;  %v13327_v29 = vadd.f32 %v13326_v23, %v13285_v21  ;;  %v13497_v17 = vrot.slane %v18180_v43, %v17991_v45  ;;  %v13433_v21 = vrot.slane %v18178_v51, %v17997_v47 }
0x11b4   :  { %v13321_v42 = vadd.f32 %v13320_v61, %v13284_v26  ;;  %v13333_v8 = vadd.f32 %v13332_v37, %v13286_v22 }
0x11b5   :  { %v13316_v9 = vrot.slane %v13315_v24, 2  ;;  %v13328_v44 = vrot.slane %v13327_v29, 2 }
0x11b6   :  { %v13322_v14 = vrot.slane %v13321_v42, 2  ;;  %v13334_v35 = vrot.slane %v13333_v8, 2 }
0x11b7   :  { %v13317_v48 = vadd.f32 %v13316_v9, %v13315_v24  ;;  %v13329_v34 = vadd.f32 %v13328_v44, %v13327_v29 }
0x11b8   :  { %v13323_v56 = vadd.f32 %v13322_v14, %v13321_v42  ;;  %v13335_v2 = vadd.f32 %v13334_v35, %v13333_v8 }
0x11b9   :  { %v13318_v59 = vrot.slane %v13317_v48, 1  ;;  %v13330_v12 = vrot.slane %v13329_v34, 1 }
0x11ba   :  { %v13324_v57 = vrot.slane %v13323_v56, 1  ;;  %v13336_v36 = vrot.slane %v13335_v2, 1 }
0x11bb   :  { %v13319_v58 = vadd.f32 %v13318_v59, %v13317_v48  ;;  %v13331_v60 = vadd.f32 %v13330_v12, %v13329_v34 }
0x11bc   :  { %v13325_v50 = vadd.f32 %v13324_v57, %v13323_v56  ;;  %v13337_v55 = vadd.f32 %v13336_v36, %v13335_v2 }
0x11bd   :  { %v13360_v33 = vmul.f32 0.125, %v13319_v58  ;;  %v13362_v10 = vmul.f32 0.125, %v13331_v60 }
0x11be   :  { %v13361_v62 = vmul.f32 0.125, %v13325_v50  ;;  %v13363_v39 = vmul.f32 0.125, %v13337_v55  ;;  %v15033_v63 = vpop.f32.mrb[48].mxu0 }
0x11bf   :  { %v13371_v0 = vadd.f32 1e-05, %v13360_v33  ;;  %v13373_v53 = vadd.f32 1e-05, %v13362_v10  ;;  %v15034_v32 = vpop.f32.mrb[49].mxu0 }
0x11c0   :  { %v13372_v54 = vadd.f32 1e-05, %v13361_v62  ;;  %v13374_v28 = vadd.f32 1e-05, %v13363_v39  ;;  %v18209_v15 = vadd.f32 %v15034_v32, %v15033_v63  ;;  %v15036_v40 = vpop.f32.mrb[50].mxu0 }
0x11c1   :  { %17240 = vrsqrt.f32 %v13371_v0  ;;  %v15037_v49 = vpop.f32.mrb[51].mxu0 }
0x11c2   :  { %17242 = vrsqrt.f32 %v13373_v53 }
0x11c3   :  { %17244 = vrsqrt.f32 %v13372_v54 }
0x11c4   :  { %17246 = vrsqrt.f32 %v13374_v28 }
0x11cb   :  { %v17241_v52 = vpop.eup %17240 }
0x11cc   :  { %v17243_v4 = vpop.eup %17242  ;;  %v13393_v41 = vmul.f32 %v17241_v52, %v13272_v31  ;;  %v13493_v31 = vrot.slane %v18180_v43, %v17994_v46 }
0x11cd   :  { %v17245_v38 = vpop.eup %17244  ;;  %v13395_v16 = vmul.f32 %v17243_v4, %v13274_v20 }
0x11ce   :  { %v17247_v26 = vpop.eup %17246  ;;  %v13461_v22 = vmul.f32 %v13421_v1, %v13393_v41  ;;  %v13394_v25 = vmul.f32 %v17245_v38, %v13273_v11 }
0x11cf   :  { %v13463_v23 = vmul.f32 %v13429_v19, %v13395_v16  ;;  %v13396_v61 = vmul.f32 %v17247_v26, %v13275_v13 }
0x11d0   :  { %v13529_v37 = vadd.f32 %v13489_v7, %v13461_v22  ;;  %v13462_v24 = vmul.f32 %v13425_v27, %v13394_v25 }
0x11d1   :  { %v13531_v20 = vadd.f32 %v13497_v17, %v13463_v23  ;;  %v13464_v29 = vmul.f32 %v13433_v21, %v13396_v61 }
0x11d2   :  { %vm13541_vm0 = vcmp.gt.f32.partialorder %v13529_v37, 0.0  ;;  %v13553_v45 = vmul.f32 %v18200_v18, %v13529_v37  ;;  %v13530_v42 = vadd.f32 %v13493_v31, %v13462_v24 }
0x11d3   :  { %vm13543_vm1 = vcmp.gt.f32.partialorder %v13531_v20, 0.0  ;;  %v13555_v51 = vmul.f32 %v18200_v18, %v13531_v20  ;;  %v13532_v11 = vadd.f32 %v13501_v30, %v13464_v29 }
0x11d4   :  { %v13564_v8 = vsel %vm13541_vm0, %v13529_v37, %v13553_v45  ;;  %vm13542_vm2 = vcmp.gt.f32.partialorder %v13530_v42, 0.0  ;;  %v13554_v46 = vmul.f32 %v18200_v18, %v13530_v42 }
0x11d5   :  { %13575 = vst [vmem:[#allocation21 + $0xd0] sm:$0xff] %v13564_v8  ;;  %v13566_v13 = vsel %vm13543_vm1, %v13531_v20, %v13555_v51  ;;  %vm13544_vm3 = vcmp.gt.f32.partialorder %v13532_v11, 0.0  ;;  %v13556_v47 = vmul.f32 %v18200_v18, %v13532_v11 }
0x11d6   :  { %13577 = vst [vmem:[#allocation21 + $0xe0] sm:$0xff] %v13566_v13  ;;  %v13565_v43 = vsel %vm13542_vm2, %v13530_v42, %v13554_v46 }
0x11d7   :  { %13576 = vst [vmem:[#allocation21 + $0xd8] sm:$0xff] %v13565_v43  ;;  %v13567_v9 = vsel %vm13544_vm3, %v13532_v11, %v13556_v47 }
0x11d8   :  { %13578 = vst [vmem:[#allocation21 + $0xe8] sm:$0xff] %v13567_v9 }
0x11d9   :  { %17451 = shalt.err (!%p17448_p1)
}
0x11da   :  { %s17452_s17 = scalar_lea.hbm %s18280_s10, 128 }
0x11db   :  { %p17453_p2 = scmp.ne.s32.totalorder %s18280_s10, %s17452_s17  ;;  %p17456_p3 = scmp.lt.u32.totalorder %s17452_s17, %s18280_s10 }
0x11dd   :  { %p17458_p4 = pnand %p17456_p3, %p17453_p2 }
0x11df   :  { %17461 = shalt.err (!%p17458_p4)
}
0x11e0   :  { %13591 = dma.vmem_to_hbm [thread:$0]  %s13589_s5, 128, %s18280_s10, [#allocation6]   ;;  %v15055_v44 = vpop.f32.mrb[52].mxu0  ;;  %v13188_v54 = vld [vmem:[#allocation16 + $0x2b] sm:$0x7] }
0x11e1   :  { %v15056_v14 = vpop.f32.mrb[53].mxu0  ;;  %v18244_v28 = vld [vmem:[#allocation17 + $0x2b] sm:$0x7]  ;;  %s17537_s10 = smov [#allocation21]  }
0x11e2   :  { %v15057_v35 = vadd.f32 %v15056_v14, %v15055_v44  ;;  %v15058_v48 = vpop.f32.mrb[54].mxu0  ;;  %v13513_v1 = vrot.slane %v18244_v28, %v17866_v5  ;;  %s13598_s3 = sshll.u32 %s17537_s10, 4  ;;  %s13599_s3 = int_to_ptr.vmem [resolvable:$true] %s13598_s3 }
0x11e3   :  { %v15059_v34 = vpop.f32.mrb[55].mxu0  ;;  %s17462_s13 = scalar_lea.vmem %s13599_s3, 4224  ;;  %p17467_p6 = scmp.lt.s32.totalorder %s13599_s3, %s13599_s3 }
0x11e4   :  { %v13182_v56 = vadd.f32 %v15057_v35, %v18209_v15  ;;  %v13445_v15 = vrot.slane %v13188_v54, %v17866_v5  ;;  %p17463_p5 = scmp.ne.s32.totalorder %s13599_s3, %s17462_s13  ;;  %p17468_p7 = scmp.lt.s32.totalorder %s17462_s13, %s17462_s13 }
0x11e6   :  { %v13251_v2 = vrot.slane %v13182_v56, 4  ;;  %p17469_p8 = por %p17468_p7, %p17467_p6 }
0x11e8   :  { %v13252_v59 = vadd.f32 %v13251_v2, %v13182_v56  ;;  %p17470_p9 = pnand %p17469_p8, %p17463_p5 }
0x11ea   :  { %v13253_v12 = vrot.slane %v13252_v59, 2 }
0x11ec   :  { %v13254_v57 = vadd.f32 %v13253_v12, %v13252_v59 }
0x11ee   :  { %v13255_v36 = vrot.slane %v13254_v57, 1 }
0x11f0   :  { %v13256_v58 = vadd.f32 %v13255_v36, %v13254_v57  ;;  %v13437_v36 = vrot.slane %v13188_v54, %v17863_v3 }
0x11f2   :  { %v13267_v60 = vmul.f32 0.125, %v13256_v58 }
0x11f4   :  { %v13278_v50 = vsub.f32 %v13182_v56, %v13267_v60  ;;  %v13441_v60 = vrot.slane %v13188_v54, %v17869_v6 }
0x11f6   :  { %v13289_v55 = vmul.f32 %v13278_v50, %v13278_v50 }
0x11f8   :  { %v13350_v33 = vrot.slane %v13289_v55, 4 }
0x11fa   :  { %v13351_v10 = vadd.f32 %v13350_v33, %v13289_v55  ;;  %v13505_v33 = vrot.slane %v18244_v28, %v17863_v3 }
0x11fc   :  { %v13352_v62 = vrot.slane %v13351_v10, 2 }
0x11fe   :  { %v13353_v39 = vadd.f32 %v13352_v62, %v13351_v10  ;;  %v13509_v62 = vrot.slane %v18244_v28, %v17869_v6 }
0x1200   :  { %v13354_v63 = vrot.slane %v13353_v39, 1 }
0x1202   :  { %v13355_v0 = vadd.f32 %v13354_v63, %v13353_v39 }
0x1204   :  { %v13366_v53 = vmul.f32 0.125, %v13355_v0 }
0x1206   :  { %v13377_v32 = vadd.f32 1e-05, %v13366_v53 }
0x1208   :  { %17248 = vrsqrt.f32 %v13377_v32 }
0x1212   :  { %v17249_v40 = vpop.eup %17248 }
0x1213   :  { %v13399_v49 = vmul.f32 %v17249_v40, %v13278_v50 }
0x1215   :  { %v13467_v52 = vmul.f32 %v13445_v15, %v13399_v49 }
0x1217   :  { %v13535_v19 = vadd.f32 %v13513_v1, %v13467_v52 }
0x1219   :  { %vm13547_vm4 = vcmp.gt.f32.partialorder %v13535_v19, 0.0  ;;  %v13559_v4 = vmul.f32 %v18200_v18, %v13535_v19 }
0x121b   :  { %v13570_v41 = vsel %vm13547_vm4, %v13535_v19, %v13559_v4 }
0x121c   :  { %13581 = vst [vmem:[#allocation21 + $0x100] sm:$0xff] %v13570_v41 }
0x121e   :  { %v13100_v7 = vpop.f32.mrb[52].mxu1 }
0x121f   :  { %v13239_v27 = vrot.slane %v13100_v7, 4  ;;  %v13102_v38 = vpop.f32.mrb[53].mxu1 }
0x1220   :  { %v13245_v16 = vrot.slane %v13102_v38, 4  ;;  %v13104_v17 = vpop.f32.mrb[54].mxu1 }
0x1221   :  { %v13240_v21 = vadd.f32 %v13239_v27, %v13100_v7  ;;  %v13105_v26 = vpop.f32.mrb[55].mxu1 }
0x1222   :  { %v13246_v22 = vadd.f32 %v13245_v16, %v13102_v38 }
0x1223   :  { %v13241_v25 = vrot.slane %v13240_v21, 2 }
0x1224   :  { %v13247_v31 = vrot.slane %v13246_v22, 2 }
0x1225   :  { %v13242_v23 = vadd.f32 %v13241_v25, %v13240_v21 }
0x1226   :  { %v13248_v61 = vadd.f32 %v13247_v31, %v13246_v22 }
0x1227   :  { %v13243_v5 = vrot.slane %v13242_v23, 1 }
0x1228   :  { %v13249_v30 = vrot.slane %v13248_v61, 1 }
0x1229   :  { %v13244_v37 = vadd.f32 %v13243_v5, %v13242_v23 }
0x122a   :  { %v13250_v24 = vadd.f32 %v13249_v30, %v13248_v61 }
0x122b   :  { %v13265_v20 = vmul.f32 0.125, %v13244_v37 }
0x122c   :  { %v13266_v29 = vmul.f32 0.125, %v13250_v24 }
0x122d   :  { %v13276_v45 = vsub.f32 %v13100_v7, %v13265_v20 }
0x122e   :  { %v13277_v42 = vsub.f32 %v13102_v38, %v13266_v29 }
0x122f   :  { %v13287_v51 = vmul.f32 %v13276_v45, %v13276_v45 }
0x1230   :  { %v13288_v11 = vmul.f32 %v13277_v42, %v13277_v42 }
0x1231   :  { %v13338_v8 = vrot.slane %v13287_v51, 4 }
0x1232   :  { %v13344_v46 = vrot.slane %v13288_v11, 4 }
0x1233   :  { %v13339_v13 = vadd.f32 %v13338_v8, %v13287_v51 }
0x1234   :  { %v13345_v47 = vadd.f32 %v13344_v46, %v13288_v11 }
0x1235   :  { %v13340_v43 = vrot.slane %v13339_v13, 2 }
0x1236   :  { %v13346_v9 = vrot.slane %v13345_v47, 2 }
0x1237   :  { %v13341_v44 = vadd.f32 %v13340_v43, %v13339_v13 }
0x1238   :  { %v13347_v14 = vadd.f32 %v13346_v9, %v13345_v47 }
0x1239   :  { %v13342_v35 = vrot.slane %v13341_v44, 1 }
0x123a   :  { %v13348_v48 = vrot.slane %v13347_v14, 1 }
0x123b   :  { %v13343_v34 = vadd.f32 %v13342_v35, %v13341_v44 }
0x123c   :  { %v13349_v56 = vadd.f32 %v13348_v48, %v13347_v14 }
0x123d   :  { %v13364_v2 = vmul.f32 0.125, %v13343_v34 }
0x123e   :  { %v13365_v59 = vmul.f32 0.125, %v13349_v56 }
0x123f   :  { %v13375_v12 = vadd.f32 1e-05, %v13364_v2 }
0x1240   :  { %v13376_v57 = vadd.f32 1e-05, %v13365_v59 }
0x1241   :  { %17250 = vrsqrt.f32 %v13375_v12 }
0x1242   :  { %17252 = vrsqrt.f32 %v13376_v57 }
0x124b   :  { %v17251_v58 = vpop.eup %17250 }
0x124c   :  { %v17253_v50 = vpop.eup %17252  ;;  %v13397_v55 = vmul.f32 %v17251_v58, %v13276_v45 }
0x124d   :  { %v13398_v10 = vmul.f32 %v17253_v50, %v13277_v42 }
0x124e   :  { %v13465_v39 = vmul.f32 %v13437_v36, %v13397_v55 }
0x124f   :  { %v13466_v63 = vmul.f32 %v13441_v60, %v13398_v10 }
0x1250   :  { %v13533_v0 = vadd.f32 %v13505_v33, %v13465_v39 }
0x1251   :  { %v13534_v53 = vadd.f32 %v13509_v62, %v13466_v63 }
0x1252   :  { %vm13545_vm5 = vcmp.gt.f32.partialorder %v13533_v0, 0.0  ;;  %v13557_v32 = vmul.f32 %v18200_v18, %v13533_v0 }
0x1253   :  { %vm13546_vm6 = vcmp.gt.f32.partialorder %v13534_v53, 0.0  ;;  %v13558_v54 = vmul.f32 %v18200_v18, %v13534_v53 }
0x1254   :  { %v13568_v15 = vsel %vm13545_vm5, %v13533_v0, %v13557_v32 }
0x1255   :  { %13579 = vst [vmem:[#allocation21 + $0xf0] sm:$0xff] %v13568_v15  ;;  %v13569_v3 = vsel %vm13546_vm6, %v13534_v53, %v13558_v54 }
0x1256   :  { %13580 = vst [vmem:[#allocation21 + $0xf8] sm:$0xff] %v13569_v3 }
0x1257   :  { %17473 = shalt.err (!%p17470_p9)
}
0x1258   :  { %s17474_s23 = scalar_lea.hbm %s18281_s11, 4224 }
0x1259   :  { %p17475_p10 = scmp.ne.s32.totalorder %s18281_s11, %s17474_s23  ;;  %p17478_p11 = scmp.lt.u32.totalorder %s17474_s23, %s18281_s11 }
0x125b   :  { %p17480_p12 = pnand %p17478_p11, %p17475_p10 }
0x125d   :  { %17483 = shalt.err (!%p17480_p12)
}
0x125e   :  { %13601 = dma.vmem_to_hbm [thread:$0]  %s13599_s3, 4224, %s18281_s11, [#allocation22]  }
0x125f   :  { %17502 = dma.done.wait [#allocation6], 128  }
0x1260   :  { %17503 = vsyncadd [#allocation6], 4294967168 }
0x1261   :  { %17504 = dma.done.wait [#allocation22], 4224  }
0x1262   :  { %17505 = vsyncadd [#allocation22], 4294963072 }
0x1263   :  { %13608 = vsyncpa [#allocation5], 1 }
0x1264   :  { %13609 = vsyncpa [#allocation9], 1 }
0x1265   :  { %13610 = vsyncpa [#allocation12], 1 }
0x1266   :  { %13611 = vsyncpa [#allocation15], 1 }
0x1267   :  { %13612 = vsyncpa [#allocation18], 1 }
0x1268   :  { %13613 = vsyncpa [#allocation6], 1 }
0x1269   :  { %13614 = vsyncpa [#allocation22], 1 }
0x126a   :  { %13615 = vsyncpa [#allocation7], 1 }
0x126b   :  { %13616 = vsyncmov [#allocation3] }
0x126e   :  { %s13617_s29 = vpop.sfrf %13616 }
0x126f   :  { %p14904_p13 = scmp.ne.s32.totalorder %s13617_s29, 0 }
0x1271   :  { %13621 = shalt.err (%p14904_p13)  }
0x1272   :  { %13623 = vsyncmov [#allocation3 + $0x1] }
0x1275   :  { %s13624_s6 = vpop.sfrf %13623 }
0x1276   :  { %p14905_p0 = scmp.ne.s32.totalorder %s13624_s6, 0 }
0x1278   :  { %13628 = shalt.err (%p14905_p0)  }
0x1279   :  { %13630 = vsyncmov [#allocation3 + $0x2] }
0x127c   :  { %s13631_s11 = vpop.sfrf %13630 }
0x127d   :  { %p14906_p1 = scmp.ne.s32.totalorder %s13631_s11, 0 }
0x127f   :  { %13635 = shalt.err (%p14906_p1)  }

</bundles_post_ra>
